<compile_context>
chip_gen: v7x
topology: tpu7x:2x2x1
jax: 0.10.0
libtpu: 0.0.40
codegen_flags: <defaults>
</compile_context>

<pallas_src>
import functools
import math

import jax
import jax.numpy as jnp
from jax import lax
from jax.experimental import pallas as pl
from jax.experimental.pallas import tpu as pltpu


_COMPUTE_DTYPE = jnp.bfloat16      # MXU compute dtype (f32 accumulation)
_TM_CAP, _TN_CAP, _TK_CAP = 256, 256, 512


# ---------------------------------------------------------------------------
# Fused dequant + GEMM kernel
# ---------------------------------------------------------------------------
def _fused_kernel(ogs, csz,
                  x_ref, codes_ref, cbt_ref, scale_ref, bias_ref,
                  o_ref, acc_ref, wt_ref):
    """One grid step (i, j, k).

    x_ref:     (tm, tk)                 bf16 activations tile
    codes_ref: (tk//igs, ncb, tn)       int8 codes, expanded per out-feature
    cbt_ref:   (igs, ncb*csz*ogs)       bf16 flattened codebooks (VMEM resident)
    scale_ref: (1, tn)                  f32 per-out-feature scale
    bias_ref:  (1, tn)                  f32 bias
    o_ref:     (tm, tn)                 f32 output tile
    acc_ref:   (tm, tn) f32 scratch     K-axis accumulator
    wt_ref:    (tk, tn) bf16 scratch    dequantized W^T tile
    """
    nb_k, ncb, tn = codes_ref.shape
    igs, q_total = cbt_ref.shape
    k2 = q_total // ncb                      # csz * ogs rows per codebook
    cdt = cbt_ref.dtype

    k_id = pl.program_id(2)

    @pl.when(k_id == 0)
    def _():
        acc_ref[...] = jnp.zeros_like(acc_ref)

    # ---- dequantize the (tk, tn) tile of W^T into wt_ref ----
    cbt = cbt_ref[...]                                                   # (igs, Q)
    q_iota = lax.broadcasted_iota(jnp.int32, (q_total, tn), 0)
    if ogs > 1:
        col = lax.broadcasted_iota(jnp.int32, (q_total, tn), 1) + pl.program_id(1) * tn
        oo = col % ogs                                                   # o % ogs (global)
    else:
        oo = 0

    def dequant_in_group(kb):
        # codes for this in-group, already repeated per out-feature: (ncb, tn)
        codes_kb = codes_ref[kb].astype(jnp.int32) & (csz - 1)
        onehot = None
        for c in range(ncb):                                             # ncb is tiny; static unroll
            target = codes_kb[c:c + 1, :] * ogs + oo + c * k2
            eq = (q_iota == target).astype(cdt)
            onehot = eq if onehot is None else onehot + eq
        # one MXU op covers all codebooks; output is lane-dense (tn wide)
        slab = jnp.dot(cbt, onehot, preferred_element_type=jnp.float32)  # (igs, tn)
        row0 = kb * igs
        if not isinstance(row0, int):
            row0 = pl.multiple_of(row0, igs)
        wt_ref[pl.ds(row0, igs), :] = slab.astype(wt_ref.dtype)

    if nb_k <= 8:                       # short fixed loop: static unroll
        for kb in range(nb_k):
            dequant_in_group(kb)
    else:
        def body(kb, carry):
            dequant_in_group(kb)
            return carry
        lax.fori_loop(0, nb_k, body, None)

    # ---- GEMM: acc += x_tile @ Wt_tile  (bf16 x bf16 -> f32 accumulate) ----
    acc_ref[...] += jnp.dot(x_ref[...], wt_ref[...],
                            preferred_element_type=jnp.float32)

    # ---- epilogue only on the last K step ----
    @pl.when(k_id == pl.num_programs(2) - 1)
    def _():
        o_ref[...] = (acc_ref[...] * scale_ref[...] + bias_ref[...]).astype(o_ref.dtype)


# ---------------------------------------------------------------------------
# Wrapper
# ---------------------------------------------------------------------------
def _pick_tile(dim, cap, unit):
    """Largest tile <= cap that is a multiple of `unit` and divides `dim`, else full dim."""
    if dim <= cap:
        return dim
    t = (cap // unit) * unit
    while t >= unit:
        if dim % t == 0:
            return t
        t -= unit
    return dim  # TODO(synk): pad instead of whole-dim fallback for awkward huge dims.


@jax.jit
def quantized_linear_forward(x, codes, codebooks, scales, bias):
    """AQLM QuantizedLinear forward.

    x:         (..., in_features)                    f32
    codes:     (num_out_groups, num_in_groups, ncb)  int8 (signed storage, used mod 2^nbits)
    codebooks: (ncb, codebook_size, ogs, igs)        f32
    scales:    (num_out_groups, 1, 1, 1)             f32
    bias:      (out_features,) or None               f32
    """
    ncb, csz, ogs, igs = codebooks.shape
    nog, nig, _ = codes.shape
    K = nig * igs
    N = nog * ogs
    assert csz & (csz - 1) == 0, "codebook_size must be 2**nbits (bitmask == modulo)"

    lead = x.shape[:-1]
    x2 = x.reshape(-1, K)
    B = x2.shape[0]

    # --- parameter-side layout prep (tiny one-time transforms, stays int8 / bf16) ---
    # codes_prep[ig, c, o] = codes[o // ogs, ig, c]
    codes_prep = jnp.repeat(jnp.transpose(codes, (1, 2, 0)), ogs, axis=2)
    # cbt[ii, c*csz*ogs + code*ogs + oo] = codebooks[c, code, oo, ii]   (W^T layout)
    cbt = jnp.transpose(codebooks, (3, 0, 1, 2)).reshape(igs, ncb * csz * ogs)
    cbt = cbt.astype(_COMPUTE_DTYPE)
    scale_row = jnp.repeat(scales.reshape(nog), ogs).reshape(1, N).astype(jnp.float32)
    if bias is None:
        bias_row = jnp.zeros((1, N), jnp.float32)
    else:
        bias_row = bias.reshape(1, N).astype(jnp.float32)

    # --- tiling (full-dim blocks for small shapes; 128-multiples when tiled) ---
    if B > _TM_CAP:
        tm = _TM_CAP
        pad = (-B) % tm
        if pad:
            x2 = jnp.pad(x2, ((0, pad), (0, 0)))
    else:
        tm, pad = B, 0
    bp = B + pad
    xb = x2.astype(_COMPUTE_DTYPE)

    unit_k = 128 * igs // math.gcd(128, igs)          # K tiles must keep whole in-groups
    tk = _pick_tile(K, _TK_CAP, unit_k)
    tn = _pick_tile(N, _TN_CAP, 128)
    gm, gn, gk = bp // tm, N // tn, K // tk

    grid_spec = pltpu.PrefetchScalarGridSpec(
        num_scalar_prefetch=0,
        grid=(gm, gn, gk),
        in_specs=[
            pl.BlockSpec((tm, tk), lambda i, j, k: (i, k)),                 # x
            pl.BlockSpec((tk // igs, ncb, tn), lambda i, j, k: (k, 0, j)),  # codes (int8)
            pl.BlockSpec((igs, ncb * csz * ogs), lambda i, j, k: (0, 0)),   # codebooks (resident)
            pl.BlockSpec((1, tn), lambda i, j, k: (0, j)),                  # scale
            pl.BlockSpec((1, tn), lambda i, j, k: (0, j)),                  # bias
        ],
        out_specs=pl.BlockSpec((tm, tn), lambda i, j, k: (i, j)),
        scratch_shapes=[
            pltpu.VMEM((tm, tn), jnp.float32),       # K accumulator
            pltpu.VMEM((tk, tn), _COMPUTE_DTYPE),    # dequantized W^T tile
        ],
    )

    y = pl.pallas_call(
        functools.partial(_fused_kernel, ogs, csz),
        out_shape=jax.ShapeDtypeStruct((bp, N), jnp.float32),
        grid_spec=grid_spec,
        compiler_params=pltpu.CompilerParams(
            dimension_semantics=("parallel", "parallel", "arbitrary"),
            vmem_limit_bytes=48 * 1024 * 1024,       # explicit budget, safe on v7x's 64 MiB
        ),
    )(xb, codes_prep, cbt, scale_row, bias_row)

    if pad:
        y = y[:B]
    return y.reshape(*lead, N).astype(x.dtype)


# ---------------------------------------------------------------------------
# Pure-JAX reference (mirrors the PyTorch module, f32)
# ---------------------------------------------------------------------------
def reference_forward(x, codes, codebooks, scales, bias):
    ncb, csz, ogs, igs = codebooks.shape
    nog, nig, _ = codes.shape
    out_features, in_features = nog * ogs, nig * igs

    codes_u = codes.astype(jnp.int32) % csz
    blocks = jnp.zeros((nog, nig, ogs, igs), jnp.float32)
    for c in range(ncb):
        blocks = blocks + codebooks[c][codes_u[:, :, c]]
    blocks = blocks * scales.reshape(nog, 1, 1, 1)
    w = blocks.transpose(0, 2, 1, 3).reshape(out_features, in_features)
    y = x.reshape(-1, in_features) @ w.T
    if bias is not None:
        y = y + bias[None, :]
    return y.reshape(*x.shape[:-1], out_features)


# ---------------------------------------------------------------------------
if __name__ == "__main__":
    # Small config consistent with QuantizedLinear.__init__
    in_features = 32
    out_features = 16
    in_group_size = 8
    out_group_size = 2
    num_codebooks = 2
    nbits_per_codebook = 8
    codebook_size = 2 ** nbits_per_codebook
    nog = out_features // out_group_size
    nig = in_features // in_group_size

    key = jax.random.PRNGKey(0)
    k_cb, k_codes, k_scales, k_bias, k_x = jax.random.split(key, 5)

    codebooks = 0.1 * jax.random.normal(
        k_cb, (num_codebooks, codebook_size, out_group_size, in_group_size), jnp.float32)
    # codes stored signed (int8 for 8 bits), interpreted mod 2^nbits
    codes = jax.random.randint(
        k_codes, (nog, nig, num_codebooks), 0, codebook_size, jnp.int32).astype(jnp.int8)
    scales = 0.5 + jax.random.uniform(k_scales, (nog, 1, 1, 1), jnp.float32)
    bias = 0.1 * jax.random.normal(k_bias, (out_features,), jnp.float32)

    # input: (batch=2, seq=8, in_features=32)
    x = jax.random.normal(k_x, (2, 8, in_features), jnp.float32)

    out = quantized_linear_forward(x, codes, codebooks, scales, bias)
    out = jax.block_until_ready(out)

    ref = reference_forward(x, codes, codebooks, scales, bias)
    assert out.shape == (2, 8, out_features), out.shape
    # Kernel runs the GEMM/dequant in bf16 on the MXU (f32 accumulation) per perf review,
    # so compare against the f32 module-semantics reference with a bf16-level tolerance.
    assert jnp.allclose(out, ref, rtol=2e-2, atol=2e-2), float(jnp.max(jnp.abs(out - ref)))

    print("KERNEL_OK")
</pallas_src>

<mosaic_0001>
module attributes {stable_mosaic.version = 11 : i64} {
  func.func @_fused_kernel(%arg0: i32, %arg1: i32, %arg2: i32, %arg3: memref<16x32xbf16, #tpu.memory_space<vmem>>, %arg4: memref<4x2x16xi8, #tpu.memory_space<vmem>>, %arg5: memref<8x1024xbf16, #tpu.memory_space<vmem>>, %arg6: memref<1x16xf32, #tpu.memory_space<vmem>>, %arg7: memref<1x16xf32, #tpu.memory_space<vmem>>, %arg8: memref<16x16xf32, #tpu.memory_space<vmem>>, %arg9: memref<16x16xf32, #tpu.memory_space<vmem>>, %arg10: memref<32x16xbf16, #tpu.memory_space<vmem>>) attributes {dimension_semantics = [#tpu.dimension_semantics<parallel>, #tpu.dimension_semantics<parallel>, #tpu.dimension_semantics<arbitrary>], iteration_bounds = array<i64: 1, 1, 1>, scalar_prefetch = 0 : i64, scratch_operands = 2 : i64, tpu.core_type = #tpu.core_type<tc>, window_params = [{transform_indices = @transform_0, window_bounds = array<i64: 16, 32>}, {transform_indices = @transform_1, window_bounds = array<i64: 4, 2, 16>}, {pipeline_mode = #tpu.pipeline_mode<synchronous>, transform_indices = @transform_2, window_bounds = array<i64: 8, 1024>}, {transform_indices = @transform_3, window_bounds = array<i64: 1, 16>}, {transform_indices = @transform_4, window_bounds = array<i64: 1, 16>}, {transform_indices = @transform_5, window_bounds = array<i64: 16, 16>}]} {
    %c0_i32 = arith.constant 0 : i32
    %0 = arith.cmpi eq, %arg2, %c0_i32 : i32
    %1 = arith.extui %0 : i1 to i32
    %c0_i32_0 = arith.constant 0 : i32
    %2 = arith.cmpi ne, %1, %c0_i32_0 : i32
    scf.if %2 {
      %cst_52 = arith.constant 0.000000e+00 : f32
      %158 = vector.broadcast %cst_52 : f32 to vector<16x16xf32>
      %c0_53 = arith.constant 0 : index
      %c0_54 = arith.constant 0 : index
      %159 = vector.load %arg9[%c0_53, %c0_54] : memref<16x16xf32, #tpu.memory_space<vmem>>, vector<16x16xf32>
      tpu.vector_store %arg9[%c0_53, %c0_54], %158 {strides = array<i32>} : memref<16x16xf32, #tpu.memory_space<vmem>>, vector<16x16xf32>,
    } else {
    }
    %c0 = arith.constant 0 : index
    %c0_1 = arith.constant 0 : index
    %3 = vector.load %arg5[%c0, %c0_1] : memref<8x1024xbf16, #tpu.memory_space<vmem>>, vector<8x1024xbf16>
    %4 = tpu.iota {dimensions = array<i32: 0>} : vector<1024x16xi32>
    %5 = tpu.iota {dimensions = array<i32: 1>} : vector<1024x16xi32>
    %c16_i32 = arith.constant 16 : i32
    %6 = arith.muli %arg1, %c16_i32 : i32
    %7 = vector.broadcast %6 : i32 to vector<1024x16xi32>
    %8 = arith.addi %5, %7 : vector<1024x16xi32>
    %c2_i32 = arith.constant 2 : i32
    %c0_i32_2 = arith.constant 0 : i32
    %9 = arith.cmpi eq, %c2_i32, %c0_i32_2 : i32
    %c1_i32 = arith.constant 1 : i32
    %10 = arith.select %9, %c1_i32, %c2_i32 : i32
    %11 = vector.broadcast %10 : i32 to vector<1024x16xi32>
    %12 = arith.remsi %8, %11 : vector<1024x16xi32>
    %c0_i32_3 = arith.constant 0 : i32
    %13 = vector.broadcast %c0_i32_3 : i32 to vector<1024x16xi32>
    %14 = arith.cmpi ne, %12, %13 : vector<1024x16xi32>
    %c0_i32_4 = arith.constant 0 : i32
    %15 = vector.broadcast %c0_i32_4 : i32 to vector<1024x16xi32>
    %16 = arith.cmpi slt, %12, %15 : vector<1024x16xi32>
    %c0_i32_5 = arith.constant 0 : i32
    %17 = arith.cmpi slt, %10, %c0_i32_5 : i32
    %18 = vector.broadcast %17 : i1 to vector<1024x16xi1>
    %19 = vector.broadcast %18 : vector<1024x16xi1> to vector<1024x16xi1>
    %20 = arith.xori %16, %19 : vector<1024x16xi1>
    %21 = arith.andi %20, %14 : vector<1024x16xi1>
    %22 = vector.broadcast %10 : i32 to vector<1024x16xi32>
    %23 = arith.addi %12, %22 : vector<1024x16xi32>
    %24 = arith.select %21, %23, %12 : vector<1024x16xi1>, vector<1024x16xi32>
    %c0_6 = arith.constant 0 : index
    %c0_7 = arith.constant 0 : index
    %c0_8 = arith.constant 0 : index
    %25 = vector.load %arg4[%c0_6, %c0_7, %c0_8] : memref<4x2x16xi8, #tpu.memory_space<vmem>>, vector<1x2x16xi8>
    %26 = vector.shape_cast %25 : vector<1x2x16xi8> to vector<2x16xi8>
    %27 = arith.extsi %26 : vector<2x16xi8> to vector<2x16xi32>
    %c255_i32 = arith.constant 255 : i32
    %28 = vector.broadcast %c255_i32 : i32 to vector<2x16xi32>
    %29 = arith.andi %27, %28 : vector<2x16xi32>
    %30 = vector.extract_strided_slice %29 {offsets = [0, 0], sizes = [1, 16], strides = [1, 1]} : vector<2x16xi32> to vector<1x16xi32>
    %c2_i32_9 = arith.constant 2 : i32
    %31 = vector.broadcast %c2_i32_9 : i32 to vector<1x16xi32>
    %32 = arith.muli %30, %31 : vector<1x16xi32>
    %33 = vector.broadcast %32 : vector<1x16xi32> to vector<1024x16xi32>
    %34 = arith.addi %33, %24 : vector<1024x16xi32>
    %c0_i32_10 = arith.constant 0 : i32
    %35 = vector.broadcast %c0_i32_10 : i32 to vector<1024x16xi32>
    %36 = arith.addi %34, %35 : vector<1024x16xi32>
    %37 = arith.cmpi eq, %4, %36 : vector<1024x16xi32>
    %38 = arith.extui %37 : vector<1024x16xi1> to vector<1024x16xi32>
    %39 = arith.sitofp %38 : vector<1024x16xi32> to vector<1024x16xf32>
    %40 = arith.truncf %39 : vector<1024x16xf32> to vector<1024x16xbf16>
    %41 = vector.extract_strided_slice %29 {offsets = [1, 0], sizes = [1, 16], strides = [1, 1]} : vector<2x16xi32> to vector<1x16xi32>
    %c2_i32_11 = arith.constant 2 : i32
    %42 = vector.broadcast %c2_i32_11 : i32 to vector<1x16xi32>
    %43 = arith.muli %41, %42 : vector<1x16xi32>
    %44 = vector.broadcast %43 : vector<1x16xi32> to vector<1024x16xi32>
    %45 = arith.addi %44, %24 : vector<1024x16xi32>
    %c512_i32 = arith.constant 512 : i32
    %46 = vector.broadcast %c512_i32 : i32 to vector<1024x16xi32>
    %47 = arith.addi %45, %46 : vector<1024x16xi32>
    %48 = arith.cmpi eq, %4, %47 : vector<1024x16xi32>
    %49 = arith.extui %48 : vector<1024x16xi1> to vector<1024x16xi32>
    %50 = arith.sitofp %49 : vector<1024x16xi32> to vector<1024x16xf32>
    %51 = arith.truncf %50 : vector<1024x16xf32> to vector<1024x16xbf16>
    %52 = arith.addf %40, %51 : vector<1024x16xbf16>
    %cst = arith.constant dense<0.000000e+00> : vector<8x16xf32>
    %53 = tpu.matmul %3, %52, %cst {dimension_numbers = #tpu.dot_dimension_numbers<[1], [0], [0], [1], [0, 0, 1, 1], [], []>} : vector<8x1024xbf16>, vector<1024x16xbf16>, vector<8x16xf32> -> vector<8x16xf32>
    %54 = arith.truncf %53 : vector<8x16xf32> to vector<8x16xbf16>
    %c0_12 = arith.constant 0 : index
    %c0_13 = arith.constant 0 : index
    %55 = vector.load %arg10[%c0_12, %c0_13] : memref<32x16xbf16, #tpu.memory_space<vmem>>, vector<8x16xbf16>
    tpu.vector_store %arg10[%c0_12, %c0_13], %54 {strides = array<i32>} : memref<32x16xbf16, #tpu.memory_space<vmem>>, vector<8x16xbf16>,
    %c1 = arith.constant 1 : index
    %c0_14 = arith.constant 0 : index
    %c0_15 = arith.constant 0 : index
    %56 = vector.load %arg4[%c1, %c0_14, %c0_15] : memref<4x2x16xi8, #tpu.memory_space<vmem>>, vector<1x2x16xi8>
    %57 = vector.shape_cast %56 : vector<1x2x16xi8> to vector<2x16xi8>
    %58 = arith.extsi %57 : vector<2x16xi8> to vector<2x16xi32>
    %c255_i32_16 = arith.constant 255 : i32
    %59 = vector.broadcast %c255_i32_16 : i32 to vector<2x16xi32>
    %60 = arith.andi %58, %59 : vector<2x16xi32>
    %61 = vector.extract_strided_slice %60 {offsets = [0, 0], sizes = [1, 16], strides = [1, 1]} : vector<2x16xi32> to vector<1x16xi32>
    %c2_i32_17 = arith.constant 2 : i32
    %62 = vector.broadcast %c2_i32_17 : i32 to vector<1x16xi32>
    %63 = arith.muli %61, %62 : vector<1x16xi32>
    %64 = vector.broadcast %63 : vector<1x16xi32> to vector<1024x16xi32>
    %65 = arith.addi %64, %24 : vector<1024x16xi32>
    %c0_i32_18 = arith.constant 0 : i32
    %66 = vector.broadcast %c0_i32_18 : i32 to vector<1024x16xi32>
    %67 = arith.addi %65, %66 : vector<1024x16xi32>
    %68 = arith.cmpi eq, %4, %67 : vector<1024x16xi32>
    %69 = arith.extui %68 : vector<1024x16xi1> to vector<1024x16xi32>
    %70 = arith.sitofp %69 : vector<1024x16xi32> to vector<1024x16xf32>
    %71 = arith.truncf %70 : vector<1024x16xf32> to vector<1024x16xbf16>
    %72 = vector.extract_strided_slice %60 {offsets = [1, 0], sizes = [1, 16], strides = [1, 1]} : vector<2x16xi32> to vector<1x16xi32>
    %c2_i32_19 = arith.constant 2 : i32
    %73 = vector.broadcast %c2_i32_19 : i32 to vector<1x16xi32>
    %74 = arith.muli %72, %73 : vector<1x16xi32>
    %75 = vector.broadcast %74 : vector<1x16xi32> to vector<1024x16xi32>
    %76 = arith.addi %75, %24 : vector<1024x16xi32>
    %c512_i32_20 = arith.constant 512 : i32
    %77 = vector.broadcast %c512_i32_20 : i32 to vector<1024x16xi32>
    %78 = arith.addi %76, %77 : vector<1024x16xi32>
    %79 = arith.cmpi eq, %4, %78 : vector<1024x16xi32>
    %80 = arith.extui %79 : vector<1024x16xi1> to vector<1024x16xi32>
    %81 = arith.sitofp %80 : vector<1024x16xi32> to vector<1024x16xf32>
    %82 = arith.truncf %81 : vector<1024x16xf32> to vector<1024x16xbf16>
    %83 = arith.addf %71, %82 : vector<1024x16xbf16>
    %cst_21 = arith.constant dense<0.000000e+00> : vector<8x16xf32>
    %84 = tpu.matmul %3, %83, %cst_21 {dimension_numbers = #tpu.dot_dimension_numbers<[1], [0], [0], [1], [0, 0, 1, 1], [], []>} : vector<8x1024xbf16>, vector<1024x16xbf16>, vector<8x16xf32> -> vector<8x16xf32>
    %85 = arith.truncf %84 : vector<8x16xf32> to vector<8x16xbf16>
    %c8 = arith.constant 8 : index
    %c0_22 = arith.constant 0 : index
    %86 = vector.load %arg10[%c8, %c0_22] : memref<32x16xbf16, #tpu.memory_space<vmem>>, vector<8x16xbf16>
    tpu.vector_store %arg10[%c8, %c0_22], %85 {strides = array<i32>} : memref<32x16xbf16, #tpu.memory_space<vmem>>, vector<8x16xbf16>,
    %c2 = arith.constant 2 : index
    %c0_23 = arith.constant 0 : index
    %c0_24 = arith.constant 0 : index
    %87 = vector.load %arg4[%c2, %c0_23, %c0_24] : memref<4x2x16xi8, #tpu.memory_space<vmem>>, vector<1x2x16xi8>
    %88 = vector.shape_cast %87 : vector<1x2x16xi8> to vector<2x16xi8>
    %89 = arith.extsi %88 : vector<2x16xi8> to vector<2x16xi32>
    %c255_i32_25 = arith.constant 255 : i32
    %90 = vector.broadcast %c255_i32_25 : i32 to vector<2x16xi32>
    %91 = arith.andi %89, %90 : vector<2x16xi32>
    %92 = vector.extract_strided_slice %91 {offsets = [0, 0], sizes = [1, 16], strides = [1, 1]} : vector<2x16xi32> to vector<1x16xi32>
    %c2_i32_26 = arith.constant 2 : i32
    %93 = vector.broadcast %c2_i32_26 : i32 to vector<1x16xi32>
    %94 = arith.muli %92, %93 : vector<1x16xi32>
    %95 = vector.broadcast %94 : vector<1x16xi32> to vector<1024x16xi32>
    %96 = arith.addi %95, %24 : vector<1024x16xi32>
    %c0_i32_27 = arith.constant 0 : i32
    %97 = vector.broadcast %c0_i32_27 : i32 to vector<1024x16xi32>
    %98 = arith.addi %96, %97 : vector<1024x16xi32>
    %99 = arith.cmpi eq, %4, %98 : vector<1024x16xi32>
    %100 = arith.extui %99 : vector<1024x16xi1> to vector<1024x16xi32>
    %101 = arith.sitofp %100 : vector<1024x16xi32> to vector<1024x16xf32>
    %102 = arith.truncf %101 : vector<1024x16xf32> to vector<1024x16xbf16>
    %103 = vector.extract_strided_slice %91 {offsets = [1, 0], sizes = [1, 16], strides = [1, 1]} : vector<2x16xi32> to vector<1x16xi32>
    %c2_i32_28 = arith.constant 2 : i32
    %104 = vector.broadcast %c2_i32_28 : i32 to vector<1x16xi32>
    %105 = arith.muli %103, %104 : vector<1x16xi32>
    %106 = vector.broadcast %105 : vector<1x16xi32> to vector<1024x16xi32>
    %107 = arith.addi %106, %24 : vector<1024x16xi32>
    %c512_i32_29 = arith.constant 512 : i32
    %108 = vector.broadcast %c512_i32_29 : i32 to vector<1024x16xi32>
    %109 = arith.addi %107, %108 : vector<1024x16xi32>
    %110 = arith.cmpi eq, %4, %109 : vector<1024x16xi32>
    %111 = arith.extui %110 : vector<1024x16xi1> to vector<1024x16xi32>
    %112 = arith.sitofp %111 : vector<1024x16xi32> to vector<1024x16xf32>
    %113 = arith.truncf %112 : vector<1024x16xf32> to vector<1024x16xbf16>
    %114 = arith.addf %102, %113 : vector<1024x16xbf16>
    %cst_30 = arith.constant dense<0.000000e+00> : vector<8x16xf32>
    %115 = tpu.matmul %3, %114, %cst_30 {dimension_numbers = #tpu.dot_dimension_numbers<[1], [0], [0], [1], [0, 0, 1, 1], [], []>} : vector<8x1024xbf16>, vector<1024x16xbf16>, vector<8x16xf32> -> vector<8x16xf32>
    %116 = arith.truncf %115 : vector<8x16xf32> to vector<8x16xbf16>
    %c16 = arith.constant 16 : index
    %c0_31 = arith.constant 0 : index
    %117 = vector.load %arg10[%c16, %c0_31] : memref<32x16xbf16, #tpu.memory_space<vmem>>, vector<8x16xbf16>
    tpu.vector_store %arg10[%c16, %c0_31], %116 {strides = array<i32>} : memref<32x16xbf16, #tpu.memory_space<vmem>>, vector<8x16xbf16>,
    %c3 = arith.constant 3 : index
    %c0_32 = arith.constant 0 : index
    %c0_33 = arith.constant 0 : index
    %118 = vector.load %arg4[%c3, %c0_32, %c0_33] : memref<4x2x16xi8, #tpu.memory_space<vmem>>, vector<1x2x16xi8>
    %119 = vector.shape_cast %118 : vector<1x2x16xi8> to vector<2x16xi8>
    %120 = arith.extsi %119 : vector<2x16xi8> to vector<2x16xi32>
    %c255_i32_34 = arith.constant 255 : i32
    %121 = vector.broadcast %c255_i32_34 : i32 to vector<2x16xi32>
    %122 = arith.andi %120, %121 : vector<2x16xi32>
    %123 = vector.extract_strided_slice %122 {offsets = [0, 0], sizes = [1, 16], strides = [1, 1]} : vector<2x16xi32> to vector<1x16xi32>
    %c2_i32_35 = arith.constant 2 : i32
    %124 = vector.broadcast %c2_i32_35 : i32 to vector<1x16xi32>
    %125 = arith.muli %123, %124 : vector<1x16xi32>
    %126 = vector.broadcast %125 : vector<1x16xi32> to vector<1024x16xi32>
    %127 = arith.addi %126, %24 : vector<1024x16xi32>
    %c0_i32_36 = arith.constant 0 : i32
    %128 = vector.broadcast %c0_i32_36 : i32 to vector<1024x16xi32>
    %129 = arith.addi %127, %128 : vector<1024x16xi32>
    %130 = arith.cmpi eq, %4, %129 : vector<1024x16xi32>
    %131 = arith.extui %130 : vector<1024x16xi1> to vector<1024x16xi32>
    %132 = arith.sitofp %131 : vector<1024x16xi32> to vector<1024x16xf32>
    %133 = arith.truncf %132 : vector<1024x16xf32> to vector<1024x16xbf16>
    %134 = vector.extract_strided_slice %122 {offsets = [1, 0], sizes = [1, 16], strides = [1, 1]} : vector<2x16xi32> to vector<1x16xi32>
    %c2_i32_37 = arith.constant 2 : i32
    %135 = vector.broadcast %c2_i32_37 : i32 to vector<1x16xi32>
    %136 = arith.muli %134, %135 : vector<1x16xi32>
    %137 = vector.broadcast %136 : vector<1x16xi32> to vector<1024x16xi32>
    %138 = arith.addi %137, %24 : vector<1024x16xi32>
    %c512_i32_38 = arith.constant 512 : i32
    %139 = vector.broadcast %c512_i32_38 : i32 to vector<1024x16xi32>
    %140 = arith.addi %138, %139 : vector<1024x16xi32>
    %141 = arith.cmpi eq, %4, %140 : vector<1024x16xi32>
    %142 = arith.extui %141 : vector<1024x16xi1> to vector<1024x16xi32>
    %143 = arith.sitofp %142 : vector<1024x16xi32> to vector<1024x16xf32>
    %144 = arith.truncf %143 : vector<1024x16xf32> to vector<1024x16xbf16>
    %145 = arith.addf %133, %144 : vector<1024x16xbf16>
    %cst_39 = arith.constant dense<0.000000e+00> : vector<8x16xf32>
    %146 = tpu.matmul %3, %145, %cst_39 {dimension_numbers = #tpu.dot_dimension_numbers<[1], [0], [0], [1], [0, 0, 1, 1], [], []>} : vector<8x1024xbf16>, vector<1024x16xbf16>, vector<8x16xf32> -> vector<8x16xf32>
    %147 = arith.truncf %146 : vector<8x16xf32> to vector<8x16xbf16>
    %c24 = arith.constant 24 : index
    %c0_40 = arith.constant 0 : index
    %148 = vector.load %arg10[%c24, %c0_40] : memref<32x16xbf16, #tpu.memory_space<vmem>>, vector<8x16xbf16>
    tpu.vector_store %arg10[%c24, %c0_40], %147 {strides = array<i32>} : memref<32x16xbf16, #tpu.memory_space<vmem>>, vector<8x16xbf16>,
    %c0_41 = arith.constant 0 : index
    %c0_42 = arith.constant 0 : index
    %149 = vector.load %arg9[%c0_41, %c0_42] : memref<16x16xf32, #tpu.memory_space<vmem>>, vector<16x16xf32>
    %c0_43 = arith.constant 0 : index
    %c0_44 = arith.constant 0 : index
    %150 = vector.load %arg3[%c0_43, %c0_44] : memref<16x32xbf16, #tpu.memory_space<vmem>>, vector<16x32xbf16>
    %c0_45 = arith.constant 0 : index
    %c0_46 = arith.constant 0 : index
    %151 = vector.load %arg10[%c0_45, %c0_46] : memref<32x16xbf16, #tpu.memory_space<vmem>>, vector<32x16xbf16>
    %cst_47 = arith.constant dense<0.000000e+00> : vector<16x16xf32>
    %152 = tpu.matmul %150, %151, %cst_47 {dimension_numbers = #tpu.dot_dimension_numbers<[1], [0], [0], [1], [0, 0, 1, 1], [], []>} : vector<16x32xbf16>, vector<32x16xbf16>, vector<16x16xf32> -> vector<16x16xf32>
    %153 = arith.addf %149, %152 : vector<16x16xf32>
    %c0_48 = arith.constant 0 : index
    %c0_49 = arith.constant 0 : index
    %154 = vector.load %arg9[%c0_48, %c0_49] : memref<16x16xf32, #tpu.memory_space<vmem>>, vector<16x16xf32>
    tpu.vector_store %arg9[%c0_48, %c0_49], %153 {strides = array<i32>} : memref<16x16xf32, #tpu.memory_space<vmem>>, vector<16x16xf32>,
    %c0_i32_50 = arith.constant 0 : i32
    %155 = arith.cmpi eq, %arg2, %c0_i32_50 : i32
    %156 = arith.extui %155 : i1 to i32
    %c0_i32_51 = arith.constant 0 : i32
    %157 = arith.cmpi ne, %156, %c0_i32_51 : i32
    scf.if %157 {
      %c0_52 = arith.constant 0 : index
      %c0_53 = arith.constant 0 : index
      %158 = vector.load %arg9[%c0_52, %c0_53] : memref<16x16xf32, #tpu.memory_space<vmem>>, vector<16x16xf32>
      %c0_54 = arith.constant 0 : index
      %c0_55 = arith.constant 0 : index
      %159 = vector.load %arg6[%c0_54, %c0_55] : memref<1x16xf32, #tpu.memory_space<vmem>>, vector<1x16xf32>
      %160 = vector.broadcast %159 : vector<1x16xf32> to vector<16x16xf32>
      %161 = arith.mulf %158, %160 : vector<16x16xf32>
      %c0_56 = arith.constant 0 : index
      %c0_57 = arith.constant 0 : index
      %162 = vector.load %arg7[%c0_56, %c0_57] : memref<1x16xf32, #tpu.memory_space<vmem>>, vector<1x16xf32>
      %163 = vector.broadcast %162 : vector<1x16xf32> to vector<16x16xf32>
      %164 = arith.addf %161, %163 : vector<16x16xf32>
      %c0_58 = arith.constant 0 : index
      %c0_59 = arith.constant 0 : index
      %165 = vector.load %arg8[%c0_58, %c0_59] : memref<16x16xf32, #tpu.memory_space<vmem>>, vector<16x16xf32>
      tpu.vector_store %arg8[%c0_58, %c0_59], %164 {strides = array<i32>} : memref<16x16xf32, #tpu.memory_space<vmem>>, vector<16x16xf32>,
    } else {
    }
    return
  }
  func.func @transform_0(%arg0: i32, %arg1: i32, %arg2: i32) -> (i32, i32) {
    %c0_i32 = arith.constant 0 : i32
    return %arg0, %arg2 : i32, i32
  }
  func.func @transform_1(%arg0: i32, %arg1: i32, %arg2: i32) -> (i32, i32, i32) {
    %c0_i32 = arith.constant 0 : i32
    %c0_i32_0 = arith.constant 0 : i32
    return %arg2, %c0_i32, %arg1 : i32, i32, i32
  }
  func.func @transform_2(%arg0: i32, %arg1: i32, %arg2: i32) -> (i32, i32) {
    %c0_i32 = arith.constant 0 : i32
    %c0_i32_0 = arith.constant 0 : i32
    %c0_i32_1 = arith.constant 0 : i32
    return %c0_i32, %c0_i32_0 : i32, i32
  }
  func.func @transform_3(%arg0: i32, %arg1: i32, %arg2: i32) -> (i32, i32) {
    %c0_i32 = arith.constant 0 : i32
    %c0_i32_0 = arith.constant 0 : i32
    return %c0_i32, %arg1 : i32, i32
  }
  func.func @transform_4(%arg0: i32, %arg1: i32, %arg2: i32) -> (i32, i32) {
    %c0_i32 = arith.constant 0 : i32
    %c0_i32_0 = arith.constant 0 : i32
    return %c0_i32, %arg1 : i32, i32
  }
  func.func @transform_5(%arg0: i32, %arg1: i32, %arg2: i32) -> (i32, i32) {
    %c0_i32 = arith.constant 0 : i32
    return %arg0, %arg1 : i32, i32
  }
}

</mosaic_0001>

<bundles_post_ra>
// kernel: quantized_linear_forward.1
= control target key start
LH: loop header
LB: loop body
LE: loop exit
PB: predicated region body
PF: predicated region fallthrough
CT: control target
= control target key end

     0   :  { %v33_v0 = vlaneseq  ;;  %s10009_s0 = inlined_call_operand.vmem [shape: bf16[16,32], index: 0, kind: input, shape index: {}]   ;;  %s10010_s1 = inlined_call_operand.vmem [shape: s8[4,2,16], index: 1, kind: input, shape index: {}]   ;;  %s10011_s2 = inlined_call_operand.vmem [shape: bf16[8,1024], index: 2, kind: input, shape index: {}]   ;;  %s10012_s3 = inlined_call_operand.vmem [shape: f32[1,16], index: 3, kind: input, shape index: {}]   ;;  %s10013_s4 = inlined_call_operand.vmem [shape: f32[1,16], index: 4, kind: input, shape index: {}]   ;;  %s10014_s5 = inlined_call_operand.hbm [shape: f32[16,16], index: 5, kind: output, shape index: {}]  }
   0x1   :  { %v179_v1 = vld [vmem:[%s10010_s1] sm:$0x1]  ;;  %v30_v3 = vld [vmem:[%s10011_s2 + $0x8] sm:$0xff] }
   0x2   :  { %v29_v2 = vld [vmem:[%s10011_s2] sm:$0xff]  ;;  %v180_v4 = vunpack.c.0.s8 %v179_v1  ;;  %v6354_v6 = vcombine.high %v30_v3, %v30_v3 }
   0x3   :  { %v6352_v5 = vcombine.high %v29_v2, %v29_v2 }
   0x4   :  { %10 = vsyncpa [#allocation5], 0  ;;  %v6356_v7 = vshrl.u32 %v33_v0, 7  ;;  %v163_v8 = vand.u32 127, %v33_v0  ;;  %v181_v9 = vand.u32 255, %v180_v4  ;;  %1254 = vmatprep.mubr.bf16.mxu1 %v6354_v6  ;;  %v6360_v10 = vcombine.low %v29_v2, %v29_v2  ;;  %s6310_s12 = smov [#allocation4]  }
   0x5   :  { %1214 = vmatprep.mubr.bf16.mxu0 %v6352_v5  ;;  %v6362_v11 = vcombine.low %v30_v3, %v30_v3  ;;  %v6308_v41 = vmov 0.0   ;;  %s4857_s13 = sshll.u32 %s6310_s12, 4  ;;  %s4858_s13 = int_to_ptr.vmem [resolvable:$true] %s4857_s13 }
   0x6   :  { %10382 = vst [vmem:[#allocation7_spill] sm:$0xff] %v6360_v10  ;;  %v6365_v12 = vadd.s32 128, %v6356_v7  ;;  %v6368_v13 = vadd.s32 136, %v6356_v7  ;;  %v6370_v14 = vand.u32 1, %v163_v8  ;;  %v6373_v15 = vsub.s32 0, %v6356_v7  ;;  %s6284_s14 = scalar_lea.vmem %s4858_s13, 256  ;;  %p6289_p1 = scmp.lt.s32.totalorder %s4858_s13, %s4858_s13 }
   0x7   :  { %10383 = vst [vmem:[#allocation8_spill] sm:$0xff] %v6362_v11  ;;  %v182_v16 = vmul.u32 2, %v181_v9  ;;  %v6376_v17 = vsub.s32 1, %v6356_v7  ;;  %v6379_v18 = vadd.s32 384, %v6356_v7  ;;  %v6382_v19 = vadd.s32 392, %v6356_v7  ;;  %p6285_p0 = scmp.ne.s32.totalorder %s4858_s13, %s6284_s14  ;;  %p6290_p2 = scmp.lt.s32.totalorder %s6284_s14, %s6284_s14 }
   0x8   :  { %v6385_v20 = vadd.s32 8, %v6356_v7  ;;  %v6388_v21 = vadd.s32 256, %v6356_v7  ;;  %v6391_v22 = vadd.s32 264, %v6356_v7  ;;  %v6394_v23 = vadd.s32 144, %v6356_v7 }
   0x9   :  { %10384 = vst [vmem:[#allocation9_spill] sm:$0xff] %v6382_v19  ;;  %v186_v24 = vrot.slane %v182_v16, %v6373_v15  ;;  %v639_v25 = vrot.slane %v182_v16, %v6376_v17  ;;  %v6399_v26 = vadd.s32 152, %v6356_v7  ;;  %v6402_v27 = vadd.s32 400, %v6356_v7  ;;  %p6291_p3 = por %p6290_p2, %p6289_p1 }
   0xa   :  { %v6405_v28 = vadd.s32 408, %v6356_v7  ;;  %v6408_v29 = vadd.s32 16, %v6356_v7  ;;  %v6411_v30 = vadd.s32 24, %v6356_v7  ;;  %v6414_v31 = vadd.s32 272, %v6356_v7 }
   0xb   :  { %v6417_v32 = vadd.s32 %v186_v24, %v6370_v14  ;;  %v640_v33 = vadd.s32 %v639_v25, %v6370_v14  ;;  %v6421_v34 = vadd.s32 280, %v6356_v7  ;;  %v6424_v35 = vadd.s32 160, %v6356_v7  ;;  %p6292_p4 = pnand %p6291_p3, %p6285_p0 }
   0xc   :  { %v6427_v36 = vadd.s32 168, %v6356_v7  ;;  %v6430_v37 = vadd.s32 416, %v6356_v7  ;;  %v6433_v38 = vadd.s32 424, %v6356_v7  ;;  %v6436_v39 = vadd.s32 32, %v6356_v7 }
   0xd   :  { %vm204_vm0 = vcmp.eq.s32.totalorder %v6365_v12, %v6417_v32  ;;  %vm205_vm1 = vcmp.eq.s32.totalorder %v6368_v13, %v6417_v32  ;;  %v6442_v40 = vadd.s32 512, %v640_v33  ;;  %vm236_vm2 = vcmp.eq.s32.totalorder %v6379_v18, %v6417_v32 }
   0xe   :  { %v4884_v42 = vsel %vm204_vm0, 1.0, %v6308_v41  ;;  %v4885_v43 = vsel %vm205_vm1, 1.0, %v6308_v41  ;;  %vm237_vm3 = vcmp.eq.s32.totalorder %v6382_v19, %v6417_v32  ;;  %v4916_v44 = vsel %vm236_vm2, 1.0, %v6308_v41 }
   0xf   :  { %v580_v45 = vpack.c.bf16 %v4885_v43, %v4884_v42  ;;  %vm658_vm4 = vcmp.eq.s32.totalorder %v6365_v12, %v6442_v40  ;;  %vm659_vm5 = vcmp.eq.s32.totalorder %v6368_v13, %v6442_v40  ;;  %v4917_v46 = vsel %vm237_vm3, 1.0, %v6308_v41 }
  0x10   :  { %v5012_v47 = vsel %vm658_vm4, 1.0, %v6308_v41  ;;  %v5013_v48 = vsel %vm659_vm5, 1.0, %v6308_v41  ;;  %v596_v49 = vpack.c.bf16 %v4917_v46, %v4916_v44  ;;  %vm690_vm6 = vcmp.eq.s32.totalorder %v6379_v18, %v6442_v40 }
  0x11   :  { %v1034_v50 = vpack.c.bf16 %v5013_v48, %v5012_v47  ;;  %vm691_vm7 = vcmp.eq.s32.totalorder %v6382_v19, %v6442_v40  ;;  %v5044_v51 = vsel %vm690_vm6, 1.0, %v6308_v41  ;;  %vm188_vm8 = vcmp.eq.s32.totalorder %v6356_v7, %v6417_v32 }
  0x12   :  { %v5045_v52 = vsel %vm691_vm7, 1.0, %v6308_v41  ;;  %vm189_vm9 = vcmp.eq.s32.totalorder %v6385_v20, %v6417_v32  ;;  %v4868_v53 = vsel %vm188_vm8, 1.0, %v6308_v41  ;;  %vm642_vm10 = vcmp.eq.s32.totalorder %v6356_v7, %v6442_v40 }
  0x13   :  { %v1098_v54 = vadd.bf16 %v1034_v50, %v580_v45  ;;  %v1050_v55 = vpack.c.bf16 %v5045_v52, %v5044_v51  ;;  %v4869_v56 = vsel %vm189_vm9, 1.0, %v6308_v41  ;;  %vm643_vm11 = vcmp.eq.s32.totalorder %v6385_v20, %v6442_v40 }
  0x14   :  { %v572_v57 = vpack.c.bf16 %v4869_v56, %v4868_v53  ;;  %v4996_v58 = vsel %vm642_vm10, 1.0, %v6308_v41  ;;  %v4997_v59 = vsel %vm643_vm11, 1.0, %v6308_v41  ;;  %vm220_vm12 = vcmp.eq.s32.totalorder %v6388_v21, %v6417_v32 }
  0x15   :  { %5907 = vmatprep.subr.bf16.mxu0 %v1098_v54  ;;  %v1114_v60 = vadd.bf16 %v1050_v55, %v596_v49  ;;  %v1026_v61 = vpack.c.bf16 %v4997_v59, %v4996_v58  ;;  %vm221_vm13 = vcmp.eq.s32.totalorder %v6391_v22, %v6417_v32  ;;  %v4900_v62 = vsel %vm220_vm12, 1.0, %v6308_v41 }
  0x16   :  { %v4901_v63 = vsel %vm221_vm13, 1.0, %v6308_v41  ;;  %vm674_vm14 = vcmp.eq.s32.totalorder %v6388_v21, %v6442_v40  ;;  %vm675_vm15 = vcmp.eq.s32.totalorder %v6391_v22, %v6442_v40  ;;  %vm206_vm0 = vcmp.eq.s32.totalorder %v6394_v23, %v6417_v32 }
  0x17   :  { %5929 = vmatprep.subr.bf16.mxu1 %v1114_v60  ;;  %v1090_v0 = vadd.bf16 %v1026_v61, %v572_v57  ;;  %v588_v1 = vpack.c.bf16 %v4901_v63, %v4900_v62  ;;  %v5028_v2 = vsel %vm674_vm14, 1.0, %v6308_v41  ;;  %v5029_v3 = vsel %vm675_vm15, 1.0, %v6308_v41 }
  0x18   :  { %v1042_v4 = vpack.c.bf16 %v5029_v3, %v5028_v2  ;;  %vm207_vm1 = vcmp.eq.s32.totalorder %v6399_v26, %v6417_v32  ;;  %v4886_v8 = vsel %vm206_vm0, 1.0, %v6308_v41  ;;  %vm660_vm2 = vcmp.eq.s32.totalorder %v6394_v23, %v6442_v40 }
  0x19   :  { %5908 = vmatpush3.bf16.msra.mxu0 %v1090_v0  ;;  %v4887_v9 = vsel %vm207_vm1, 1.0, %v6308_v41  ;;  %vm661_vm3 = vcmp.eq.s32.totalorder %v6399_v26, %v6442_v40  ;;  %v5014_v16 = vsel %vm660_vm2, 1.0, %v6308_v41  ;;  %vm238_vm4 = vcmp.eq.s32.totalorder %v6402_v27, %v6417_v32 }
  0x1a   :  { %v1106_v24 = vadd.bf16 %v1042_v4, %v588_v1  ;;  %v581_v25 = vpack.c.bf16 %v4887_v9, %v4886_v8  ;;  %v5015_v33 = vsel %vm661_vm3, 1.0, %v6308_v41  ;;  %vm239_vm5 = vcmp.eq.s32.totalorder %v6405_v28, %v6417_v32 }
  0x1b   :  { %v1035_v42 = vpack.c.bf16 %v5015_v33, %v5014_v16  ;;  %v4918_v43 = vsel %vm238_vm4, 1.0, %v6308_v41  ;;  %v4919_v44 = vsel %vm239_vm5, 1.0, %v6308_v41  ;;  %vm692_vm6 = vcmp.eq.s32.totalorder %v6402_v27, %v6442_v40 }
  0x1c   :  { %5930 = vmatpush3.bf16.msra.mxu1 %v1106_v24  ;;  %v597_v45 = vpack.c.bf16 %v4919_v44, %v4918_v43  ;;  %vm693_vm7 = vcmp.eq.s32.totalorder %v6405_v28, %v6442_v40  ;;  %v5046_v46 = vsel %vm692_vm6, 1.0, %v6308_v41  ;;  %vm190_vm8 = vcmp.eq.s32.totalorder %v6408_v29, %v6417_v32 }
  0x1d   :  { %v1099_v47 = vadd.bf16 %v1035_v42, %v581_v25  ;;  %v5047_v48 = vsel %vm693_vm7, 1.0, %v6308_v41  ;;  %vm191_vm9 = vcmp.eq.s32.totalorder %v6411_v30, %v6417_v32  ;;  %v4870_v49 = vsel %vm190_vm8, 1.0, %v6308_v41 }
  0x1e   :  { %v1051_v50 = vpack.c.bf16 %v5047_v48, %v5046_v46  ;;  %v4871_v51 = vsel %vm191_vm9, 1.0, %v6308_v41  ;;  %vm644_vm10 = vcmp.eq.s32.totalorder %v6408_v29, %v6442_v40  ;;  %vm645_vm11 = vcmp.eq.s32.totalorder %v6411_v30, %v6442_v40 }
  0x1f   :  { %5909 = vmatprep.subr.bf16.mxu0 %v1099_v47  ;;  %v573_v52 = vpack.c.bf16 %v4871_v51, %v4870_v49  ;;  %v4998_v53 = vsel %vm644_vm10, 1.0, %v6308_v41  ;;  %v4999_v54 = vsel %vm645_vm11, 1.0, %v6308_v41  ;;  %vm222_vm12 = vcmp.eq.s32.totalorder %v6414_v31, %v6417_v32 }
  0x20   :  { %v1115_v55 = vadd.bf16 %v1051_v50, %v597_v45  ;;  %v1027_v56 = vpack.c.bf16 %v4999_v54, %v4998_v53  ;;  %vm223_vm13 = vcmp.eq.s32.totalorder %v6421_v34, %v6417_v32  ;;  %v4902_v57 = vsel %vm222_vm12, 1.0, %v6308_v41 }
  0x21   :  { %v4903_v58 = vsel %vm223_vm13, 1.0, %v6308_v41  ;;  %vm676_vm14 = vcmp.eq.s32.totalorder %v6414_v31, %v6442_v40  ;;  %vm677_vm15 = vcmp.eq.s32.totalorder %v6421_v34, %v6442_v40  ;;  %vm208_vm0 = vcmp.eq.s32.totalorder %v6424_v35, %v6417_v32 }
  0x22   :  { %5931 = vmatprep.subr.bf16.mxu1 %v1115_v55  ;;  %v1091_v59 = vadd.bf16 %v1027_v56, %v573_v52  ;;  %v589_v60 = vpack.c.bf16 %v4903_v58, %v4902_v57  ;;  %v5030_v61 = vsel %vm676_vm14, 1.0, %v6308_v41  ;;  %v5031_v62 = vsel %vm677_vm15, 1.0, %v6308_v41 }
  0x23   :  { %v1043_v63 = vpack.c.bf16 %v5031_v62, %v5030_v61  ;;  %vm209_vm1 = vcmp.eq.s32.totalorder %v6427_v36, %v6417_v32  ;;  %v4888_v0 = vsel %vm208_vm0, 1.0, %v6308_v41  ;;  %vm662_vm2 = vcmp.eq.s32.totalorder %v6424_v35, %v6442_v40 }
  0x24   :  { %5910 = vmatpush3.bf16.msra.mxu0 %v1091_v59  ;;  %v4889_v1 = vsel %vm209_vm1, 1.0, %v6308_v41  ;;  %vm663_vm3 = vcmp.eq.s32.totalorder %v6427_v36, %v6442_v40  ;;  %v5016_v2 = vsel %vm662_vm2, 1.0, %v6308_v41  ;;  %vm240_vm4 = vcmp.eq.s32.totalorder %v6430_v37, %v6417_v32 }
  0x25   :  { %v1107_v3 = vadd.bf16 %v1043_v63, %v589_v60  ;;  %v582_v4 = vpack.c.bf16 %v4889_v1, %v4888_v0  ;;  %v5017_v8 = vsel %vm663_vm3, 1.0, %v6308_v41  ;;  %vm241_vm5 = vcmp.eq.s32.totalorder %v6433_v38, %v6417_v32 }
  0x26   :  { %v1036_v9 = vpack.c.bf16 %v5017_v8, %v5016_v2  ;;  %v4920_v16 = vsel %vm240_vm4, 1.0, %v6308_v41  ;;  %v4921_v24 = vsel %vm241_vm5, 1.0, %v6308_v41  ;;  %vm694_vm6 = vcmp.eq.s32.totalorder %v6430_v37, %v6442_v40 }
  0x27   :  { %5932 = vmatpush3.bf16.msra.mxu1 %v1107_v3  ;;  %v598_v25 = vpack.c.bf16 %v4921_v24, %v4920_v16  ;;  %vm695_vm7 = vcmp.eq.s32.totalorder %v6433_v38, %v6442_v40  ;;  %v5048_v33 = vsel %vm694_vm6, 1.0, %v6308_v41  ;;  %v6560_v42 = vadd.s32 40, %v6356_v7 }
  0x28   :  { %v1100_v43 = vadd.bf16 %v1036_v9, %v582_v4  ;;  %v5049_v44 = vsel %vm695_vm7, 1.0, %v6308_v41  ;;  %vm192_vm8 = vcmp.eq.s32.totalorder %v6436_v39, %v6417_v32  ;;  %vm646_vm9 = vcmp.eq.s32.totalorder %v6436_v39, %v6442_v40 }
  0x29   :  { %v1052_v45 = vpack.c.bf16 %v5049_v44, %v5048_v33  ;;  %vm193_vm10 = vcmp.eq.s32.totalorder %v6560_v42, %v6417_v32  ;;  %v4872_v46 = vsel %vm192_vm8, 1.0, %v6308_v41  ;;  %vm647_vm11 = vcmp.eq.s32.totalorder %v6560_v42, %v6442_v40 }
  0x2a   :  { %5911 = vmatprep.subr.bf16.mxu0 %v1100_v43  ;;  %v4873_v47 = vsel %vm193_vm10, 1.0, %v6308_v41  ;;  %v5000_v48 = vsel %vm646_vm9, 1.0, %v6308_v41  ;;  %v5001_v49 = vsel %vm647_vm11, 1.0, %v6308_v41  ;;  %v6576_v50 = vadd.s32 288, %v6356_v7 }
  0x2b   :  { %v1116_v51 = vadd.bf16 %v1052_v45, %v598_v25  ;;  %v574_v52 = vpack.c.bf16 %v4873_v47, %v4872_v46  ;;  %v1028_v53 = vpack.c.bf16 %v5001_v49, %v5000_v48  ;;  %v6579_v54 = vadd.s32 296, %v6356_v7 }
  0x2c   :  { %vm224_vm12 = vcmp.eq.s32.totalorder %v6576_v50, %v6417_v32  ;;  %vm678_vm13 = vcmp.eq.s32.totalorder %v6576_v50, %v6442_v40  ;;  %v6586_v55 = vadd.s32 176, %v6356_v7  ;;  %v6589_v56 = vadd.s32 184, %v6356_v7 }
  0x2d   :  { %5933 = vmatprep.subr.bf16.mxu1 %v1116_v51  ;;  %v1092_v57 = vadd.bf16 %v1028_v53, %v574_v52  ;;  %vm225_vm14 = vcmp.eq.s32.totalorder %v6579_v54, %v6417_v32  ;;  %v4904_v58 = vsel %vm224_vm12, 1.0, %v6308_v41  ;;  %vm679_vm15 = vcmp.eq.s32.totalorder %v6579_v54, %v6442_v40 }
  0x2e   :  { %v4905_v59 = vsel %vm225_vm14, 1.0, %v6308_v41  ;;  %v5032_v60 = vsel %vm678_vm13, 1.0, %v6308_v41  ;;  %v5033_v61 = vsel %vm679_vm15, 1.0, %v6308_v41  ;;  %vm210_vm0 = vcmp.eq.s32.totalorder %v6586_v55, %v6417_v32 }
  0x2f   :  { %5912 = vmatpush3.bf16.msra.mxu0 %v1092_v57  ;;  %v590_v62 = vpack.c.bf16 %v4905_v59, %v4904_v58  ;;  %v1044_v63 = vpack.c.bf16 %v5033_v61, %v5032_v60  ;;  %vm211_vm1 = vcmp.eq.s32.totalorder %v6589_v56, %v6417_v32  ;;  %v4890_v0 = vsel %vm210_vm0, 1.0, %v6308_v41 }
  0x30   :  { %v4891_v1 = vsel %vm211_vm1, 1.0, %v6308_v41  ;;  %vm664_vm2 = vcmp.eq.s32.totalorder %v6586_v55, %v6442_v40  ;;  %vm665_vm3 = vcmp.eq.s32.totalorder %v6589_v56, %v6442_v40  ;;  %v6610_v2 = vadd.s32 432, %v6356_v7 }
  0x31   :  { %v1108_v3 = vadd.bf16 %v1044_v63, %v590_v62  ;;  %v583_v4 = vpack.c.bf16 %v4891_v1, %v4890_v0  ;;  %v5018_v8 = vsel %vm664_vm2, 1.0, %v6308_v41  ;;  %v5019_v9 = vsel %vm665_vm3, 1.0, %v6308_v41 }
  0x32   :  { %v1037_v16 = vpack.c.bf16 %v5019_v9, %v5018_v8  ;;  %v6615_v24 = vadd.s32 440, %v6356_v7  ;;  %vm242_vm4 = vcmp.eq.s32.totalorder %v6610_v2, %v6417_v32  ;;  %vm696_vm5 = vcmp.eq.s32.totalorder %v6610_v2, %v6442_v40 }
  0x33   :  { %5934 = vmatpush3.bf16.msra.mxu1 %v1108_v3  ;;  %v4922_v25 = vsel %vm242_vm4, 1.0, %v6308_v41  ;;  %v5050_v33 = vsel %vm696_vm5, 1.0, %v6308_v41  ;;  %v6624_v43 = vadd.s32 48, %v6356_v7  ;;  %v6627_v44 = vadd.s32 56, %v6356_v7 }
  0x34   :  { %v1101_v45 = vadd.bf16 %v1037_v16, %v583_v4  ;;  %vm243_vm6 = vcmp.eq.s32.totalorder %v6615_v24, %v6417_v32  ;;  %vm697_vm7 = vcmp.eq.s32.totalorder %v6615_v24, %v6442_v40  ;;  %v6634_v46 = vadd.s32 304, %v6356_v7 }
  0x35   :  { %v4923_v47 = vsel %vm243_vm6, 1.0, %v6308_v41  ;;  %v5051_v48 = vsel %vm697_vm7, 1.0, %v6308_v41  ;;  %vm194_vm8 = vcmp.eq.s32.totalorder %v6624_v43, %v6417_v32  ;;  %vm195_vm9 = vcmp.eq.s32.totalorder %v6627_v44, %v6417_v32 }
  0x36   :  { %5913 = vmatprep.subr.bf16.mxu0 %v1101_v45  ;;  %v599_v49 = vpack.c.bf16 %v4923_v47, %v4922_v25  ;;  %v1053_v51 = vpack.c.bf16 %v5051_v48, %v5050_v33  ;;  %v4874_v52 = vsel %vm194_vm8, 1.0, %v6308_v41  ;;  %v4875_v53 = vsel %vm195_vm9, 1.0, %v6308_v41 }
  0x37   :  { %v575_v57 = vpack.c.bf16 %v4875_v53, %v4874_v52  ;;  %vm648_vm10 = vcmp.eq.s32.totalorder %v6624_v43, %v6442_v40  ;;  %vm649_vm11 = vcmp.eq.s32.totalorder %v6627_v44, %v6442_v40  ;;  %v6649_v58 = vadd.s32 312, %v6356_v7 }
  0x38   :  { %v1117_v59 = vadd.bf16 %v1053_v51, %v599_v49  ;;  %v5002_v60 = vsel %vm648_vm10, 1.0, %v6308_v41  ;;  %v5003_v61 = vsel %vm649_vm11, 1.0, %v6308_v41  ;;  %vm226_vm12 = vcmp.eq.s32.totalorder %v6634_v46, %v6417_v32 }
  0x39   :  { %v1029_v62 = vpack.c.bf16 %v5003_v61, %v5002_v60  ;;  %vm227_vm13 = vcmp.eq.s32.totalorder %v6649_v58, %v6417_v32  ;;  %v4906_v63 = vsel %vm226_vm12, 1.0, %v6308_v41  ;;  %vm680_vm14 = vcmp.eq.s32.totalorder %v6634_v46, %v6442_v40 }
  0x3a   :  { %5935 = vmatprep.subr.bf16.mxu1 %v1117_v59  ;;  %v4907_v0 = vsel %vm227_vm13, 1.0, %v6308_v41  ;;  %vm681_vm15 = vcmp.eq.s32.totalorder %v6649_v58, %v6442_v40  ;;  %v5034_v1 = vsel %vm680_vm14, 1.0, %v6308_v41  ;;  %v6665_v3 = vadd.s32 192, %v6356_v7 }
  0x3b   :  { %v1093_v4 = vadd.bf16 %v1029_v62, %v575_v57  ;;  %v591_v8 = vpack.c.bf16 %v4907_v0, %v4906_v63  ;;  %v5035_v9 = vsel %vm681_vm15, 1.0, %v6308_v41  ;;  %v6669_v16 = vadd.s32 200, %v6356_v7 }
  0x3c   :  { %v1045_v25 = vpack.c.bf16 %v5035_v9, %v5034_v1  ;;  %vm212_vm0 = vcmp.eq.s32.totalorder %v6665_v3, %v6417_v32  ;;  %vm666_vm1 = vcmp.eq.s32.totalorder %v6665_v3, %v6442_v40  ;;  %v6676_v33 = vadd.s32 448, %v6356_v7 }
  0x3d   :  { %5914 = vmatpush3.bf16.msra.mxu0 %v1093_v4  ;;  %vm213_vm2 = vcmp.eq.s32.totalorder %v6669_v16, %v6417_v32  ;;  %v4892_v45 = vsel %vm212_vm0, 1.0, %v6308_v41  ;;  %vm667_vm3 = vcmp.eq.s32.totalorder %v6669_v16, %v6442_v40  ;;  %v5020_v47 = vsel %vm666_vm1, 1.0, %v6308_v41 }
  0x3e   :  { %v1109_v48 = vadd.bf16 %v1045_v25, %v591_v8  ;;  %v4893_v49 = vsel %vm213_vm2, 1.0, %v6308_v41  ;;  %v5021_v51 = vsel %vm667_vm3, 1.0, %v6308_v41  ;;  %v6687_v52 = vadd.s32 456, %v6356_v7 }
  0x3f   :  { %v584_v53 = vpack.c.bf16 %v4893_v49, %v4892_v45  ;;  %v1038_v57 = vpack.c.bf16 %v5021_v51, %v5020_v47  ;;  %vm244_vm4 = vcmp.eq.s32.totalorder %v6676_v33, %v6417_v32  ;;  %vm698_vm5 = vcmp.eq.s32.totalorder %v6676_v33, %v6442_v40 }
  0x40   :  { %5936 = vmatpush3.bf16.msra.mxu1 %v1109_v48  ;;  %vm245_vm6 = vcmp.eq.s32.totalorder %v6687_v52, %v6417_v32  ;;  %v4924_v59 = vsel %vm244_vm4, 1.0, %v6308_v41  ;;  %vm699_vm7 = vcmp.eq.s32.totalorder %v6687_v52, %v6442_v40  ;;  %v5052_v60 = vsel %vm698_vm5, 1.0, %v6308_v41 }
  0x41   :  { %v1102_v61 = vadd.bf16 %v1038_v57, %v584_v53  ;;  %v4925_v62 = vsel %vm245_vm6, 1.0, %v6308_v41  ;;  %v5053_v63 = vsel %vm699_vm7, 1.0, %v6308_v41  ;;  %v6702_v0 = vadd.s32 64, %v6356_v7 }
  0x42   :  { %v600_v1 = vpack.c.bf16 %v4925_v62, %v4924_v59  ;;  %v1054_v4 = vpack.c.bf16 %v5053_v63, %v5052_v60  ;;  %v6705_v8 = vadd.s32 72, %v6356_v7  ;;  %v6708_v9 = vadd.s32 320, %v6356_v7 }
  0x43   :  { %5915 = vmatprep.subr.bf16.mxu0 %v1102_v61  ;;  %vm196_vm8 = vcmp.eq.s32.totalorder %v6702_v0, %v6417_v32  ;;  %vm650_vm9 = vcmp.eq.s32.totalorder %v6702_v0, %v6442_v40  ;;  %v6715_v25 = vadd.s32 328, %v6356_v7  ;;  %v6718_v45 = vadd.s32 208, %v6356_v7 }
  0x44   :  { %10385 = vst [vmem:[#allocation10_spill] sm:$0xff] %v6705_v8  ;;  %10386 = vst [vmem:[#allocation11_spill] sm:$0xff] %v6708_v9  ;;  %v1118_v47 = vadd.bf16 %v1054_v4, %v600_v1  ;;  %vm197_vm10 = vcmp.eq.s32.totalorder %v6705_v8, %v6417_v32  ;;  %v4876_v48 = vsel %vm196_vm8, 1.0, %v6308_v41  ;;  %vm651_vm11 = vcmp.eq.s32.totalorder %v6705_v8, %v6442_v40 }
  0x45   :  { %10387 = vst [vmem:[#allocation12_spill] sm:$0xff] %v6715_v25  ;;  %10388 = vst [vmem:[#allocation13_spill] sm:$0xff] %v6718_v45  ;;  %v4877_v49 = vsel %vm197_vm10, 1.0, %v6308_v41  ;;  %v5004_v51 = vsel %vm650_vm9, 1.0, %v6308_v41  ;;  %v5005_v53 = vsel %vm651_vm11, 1.0, %v6308_v41  ;;  %vm228_vm12 = vcmp.eq.s32.totalorder %v6708_v9, %v6417_v32 }
  0x46   :  { %5937 = vmatprep.subr.bf16.mxu1 %v1118_v47  ;;  %v576_v57 = vpack.c.bf16 %v4877_v49, %v4876_v48  ;;  %v1030_v59 = vpack.c.bf16 %v5005_v53, %v5004_v51  ;;  %vm229_vm13 = vcmp.eq.s32.totalorder %v6715_v25, %v6417_v32  ;;  %v4908_v60 = vsel %vm228_vm12, 1.0, %v6308_v41 }
  0x47   :  { %v4909_v61 = vsel %vm229_vm13, 1.0, %v6308_v41  ;;  %vm682_vm14 = vcmp.eq.s32.totalorder %v6708_v9, %v6442_v40  ;;  %vm683_vm15 = vcmp.eq.s32.totalorder %v6715_v25, %v6442_v40  ;;  %v6739_v62 = vadd.s32 216, %v6356_v7 }
  0x48   :  { %v1094_v63 = vadd.bf16 %v1030_v59, %v576_v57  ;;  %v592_v1 = vpack.c.bf16 %v4909_v61, %v4908_v60  ;;  %v5036_v4 = vsel %vm682_vm14, 1.0, %v6308_v41  ;;  %v5037_v47 = vsel %vm683_vm15, 1.0, %v6308_v41 }
  0x49   :  { %10389 = vst [vmem:[#allocation14_spill] sm:$0xff] %v6739_v62  ;;  %v1046_v48 = vpack.c.bf16 %v5037_v47, %v5036_v4  ;;  %vm214_vm0 = vcmp.eq.s32.totalorder %v6718_v45, %v6417_v32  ;;  %vm215_vm1 = vcmp.eq.s32.totalorder %v6739_v62, %v6417_v32  ;;  %vm668_vm2 = vcmp.eq.s32.totalorder %v6718_v45, %v6442_v40 }
  0x4a   :  { %5916 = vmatpush3.bf16.msra.mxu0 %v1094_v63  ;;  %v4894_v49 = vsel %vm214_vm0, 1.0, %v6308_v41  ;;  %v4895_v51 = vsel %vm215_vm1, 1.0, %v6308_v41  ;;  %vm669_vm3 = vcmp.eq.s32.totalorder %v6739_v62, %v6442_v40  ;;  %v5022_v53 = vsel %vm668_vm2, 1.0, %v6308_v41 }
  0x4b   :  { %v1110_v57 = vadd.bf16 %v1046_v48, %v592_v1  ;;  %v585_v59 = vpack.c.bf16 %v4895_v51, %v4894_v49  ;;  %v5023_v60 = vsel %vm669_vm3, 1.0, %v6308_v41  ;;  %v6756_v61 = vadd.s32 464, %v6356_v7 }
  0x4c   :  { %v1039_v4 = vpack.c.bf16 %v5023_v60, %v5022_v53  ;;  %v6759_v47 = vadd.s32 472, %v6356_v7  ;;  %v6762_v63 = vadd.s32 80, %v6356_v7  ;;  %v6765_v45 = vadd.s32 88, %v6356_v7 }
  0x4d   :  { %10390 = vst [vmem:[#allocation15_spill] sm:$0xff] %v6756_v61  ;;  %5938 = vmatpush3.bf16.msra.mxu1 %v1110_v57  ;;  %vm246_vm4 = vcmp.eq.s32.totalorder %v6756_v61, %v6417_v32  ;;  %vm700_vm5 = vcmp.eq.s32.totalorder %v6756_v61, %v6442_v40  ;;  %v6772_v1 = vadd.s32 336, %v6356_v7  ;;  %v6775_v48 = vadd.s32 344, %v6356_v7 }
  0x4e   :  { %10391 = vst [vmem:[#allocation16_spill] sm:$0xff] %v6759_v47  ;;  %10392 = vst [vmem:[#allocation17_spill] sm:$0xff] %v6762_v63  ;;  %v1103_v49 = vadd.bf16 %v1039_v4, %v585_v59  ;;  %vm247_vm6 = vcmp.eq.s32.totalorder %v6759_v47, %v6417_v32  ;;  %v4926_v51 = vsel %vm246_vm4, 1.0, %v6308_v41  ;;  %vm701_vm7 = vcmp.eq.s32.totalorder %v6759_v47, %v6442_v40 }
  0x4f   :  { %10393 = vst [vmem:[#allocation18_spill] sm:$0xff] %v6765_v45  ;;  %10394 = vst [vmem:[#allocation19_spill] sm:$0xff] %v6772_v1  ;;  %v4927_v53 = vsel %vm247_vm6, 1.0, %v6308_v41  ;;  %v5054_v57 = vsel %vm700_vm5, 1.0, %v6308_v41  ;;  %v5055_v60 = vsel %vm701_vm7, 1.0, %v6308_v41  ;;  %vm198_vm8 = vcmp.eq.s32.totalorder %v6762_v63, %v6417_v32 }
  0x50   :  { %10395 = vst [vmem:[#allocation20_spill] sm:$0xff] %v6775_v48  ;;  %5917 = vmatprep.subr.bf16.mxu0 %v1103_v49  ;;  %v601_v61 = vpack.c.bf16 %v4927_v53, %v4926_v51  ;;  %v1055_v59 = vpack.c.bf16 %v5055_v60, %v5054_v57  ;;  %vm199_vm9 = vcmp.eq.s32.totalorder %v6765_v45, %v6417_v32  ;;  %v4878_v4 = vsel %vm198_vm8, 1.0, %v6308_v41 }
  0x51   :  { %v4879_v62 = vsel %vm199_vm9, 1.0, %v6308_v41  ;;  %vm652_vm10 = vcmp.eq.s32.totalorder %v6762_v63, %v6442_v40  ;;  %vm653_vm11 = vcmp.eq.s32.totalorder %v6765_v45, %v6442_v40  ;;  %vm230_vm12 = vcmp.eq.s32.totalorder %v6772_v1, %v6417_v32 }
  0x52   :  { %v1119_v47 = vadd.bf16 %v1055_v59, %v601_v61  ;;  %v577_v49 = vpack.c.bf16 %v4879_v62, %v4878_v4  ;;  %v5006_v51 = vsel %vm652_vm10, 1.0, %v6308_v41  ;;  %v5007_v53 = vsel %vm653_vm11, 1.0, %v6308_v41 }
  0x53   :  { %v1031_v57 = vpack.c.bf16 %v5007_v53, %v5006_v51  ;;  %vm231_vm13 = vcmp.eq.s32.totalorder %v6775_v48, %v6417_v32  ;;  %v4910_v60 = vsel %vm230_vm12, 1.0, %v6308_v41  ;;  %vm684_vm14 = vcmp.eq.s32.totalorder %v6772_v1, %v6442_v40 }
  0x54   :  { %5939 = vmatprep.subr.bf16.mxu1 %v1119_v47  ;;  %v4911_v45 = vsel %vm231_vm13, 1.0, %v6308_v41  ;;  %vm685_vm15 = vcmp.eq.s32.totalorder %v6775_v48, %v6442_v40  ;;  %v5038_v62 = vsel %vm684_vm14, 1.0, %v6308_v41  ;;  %v6809_v61 = vadd.s32 224, %v6356_v7 }
  0x55   :  { %v1095_v59 = vadd.bf16 %v1031_v57, %v577_v49  ;;  %v593_v4 = vpack.c.bf16 %v4911_v45, %v4910_v60  ;;  %v5039_v51 = vsel %vm685_vm15, 1.0, %v6308_v41  ;;  %v6813_v53 = vadd.s32 232, %v6356_v7 }
  0x56   :  { %10396 = vst [vmem:[#allocation21_spill] sm:$0xff] %v6809_v61  ;;  %v1047_v63 = vpack.c.bf16 %v5039_v51, %v5038_v62  ;;  %vm216_vm0 = vcmp.eq.s32.totalorder %v6809_v61, %v6417_v32  ;;  %vm670_vm1 = vcmp.eq.s32.totalorder %v6809_v61, %v6442_v40  ;;  %v6820_v47 = vadd.s32 480, %v6356_v7 }
  0x57   :  { %10397 = vst [vmem:[#allocation22_spill] sm:$0xff] %v6813_v53  ;;  %5918 = vmatpush3.bf16.msra.mxu0 %v1095_v59  ;;  %vm217_vm2 = vcmp.eq.s32.totalorder %v6813_v53, %v6417_v32  ;;  %v4896_v45 = vsel %vm216_vm0, 1.0, %v6308_v41  ;;  %vm671_vm3 = vcmp.eq.s32.totalorder %v6813_v53, %v6442_v40  ;;  %v5024_v49 = vsel %vm670_vm1, 1.0, %v6308_v41 }
  0x58   :  { %10398 = vst [vmem:[#allocation23_spill] sm:$0xff] %v6820_v47  ;;  %v1111_v57 = vadd.bf16 %v1047_v63, %v593_v4  ;;  %v4897_v60 = vsel %vm217_vm2, 1.0, %v6308_v41  ;;  %v5025_v62 = vsel %vm671_vm3, 1.0, %v6308_v41  ;;  %v6831_v51 = vadd.s32 488, %v6356_v7 }
  0x59   :  { %v586_v61 = vpack.c.bf16 %v4897_v60, %v4896_v45  ;;  %v1040_v59 = vpack.c.bf16 %v5025_v62, %v5024_v49  ;;  %vm248_vm4 = vcmp.eq.s32.totalorder %v6820_v47, %v6417_v32  ;;  %vm702_vm5 = vcmp.eq.s32.totalorder %v6820_v47, %v6442_v40 }
  0x5a   :  { %10399 = vst [vmem:[#allocation24_spill] sm:$0xff] %v6831_v51  ;;  %5940 = vmatpush3.bf16.msra.mxu1 %v1111_v57  ;;  %vm249_vm6 = vcmp.eq.s32.totalorder %v6831_v51, %v6417_v32  ;;  %v4928_v63 = vsel %vm248_vm4, 1.0, %v6308_v41  ;;  %vm703_vm7 = vcmp.eq.s32.totalorder %v6831_v51, %v6442_v40  ;;  %v5056_v4 = vsel %vm702_vm5, 1.0, %v6308_v41 }
  0x5b   :  { %v1104_v53 = vadd.bf16 %v1040_v59, %v586_v61  ;;  %v4929_v45 = vsel %vm249_vm6, 1.0, %v6308_v41  ;;  %v5057_v49 = vsel %vm703_vm7, 1.0, %v6308_v41  ;;  %v6846_v60 = vadd.s32 96, %v6356_v7 }
  0x5c   :  { %v602_v62 = vpack.c.bf16 %v4929_v45, %v4928_v63  ;;  %v1056_v57 = vpack.c.bf16 %v5057_v49, %v5056_v4  ;;  %v6849_v47 = vadd.s32 104, %v6356_v7  ;;  %v6852_v48 = vadd.s32 352, %v6356_v7 }
  0x5d   :  { %10400 = vst [vmem:[#allocation25_spill] sm:$0xff] %v6846_v60  ;;  %5919 = vmatprep.subr.bf16.mxu0 %v1104_v53  ;;  %vm200_vm8 = vcmp.eq.s32.totalorder %v6846_v60, %v6417_v32  ;;  %vm654_vm9 = vcmp.eq.s32.totalorder %v6846_v60, %v6442_v40  ;;  %v6859_v61 = vadd.s32 360, %v6356_v7  ;;  %v6862_v59 = vadd.s32 240, %v6356_v7 }
  0x5e   :  { %10401 = vst [vmem:[#allocation26_spill] sm:$0xff] %v6849_v47  ;;  %10402 = vst [vmem:[#allocation27_spill] sm:$0xff] %v6852_v48  ;;  %v1120_v63 = vadd.bf16 %v1056_v57, %v602_v62  ;;  %vm201_vm10 = vcmp.eq.s32.totalorder %v6849_v47, %v6417_v32  ;;  %v4880_v4 = vsel %vm200_vm8, 1.0, %v6308_v41  ;;  %vm655_vm11 = vcmp.eq.s32.totalorder %v6849_v47, %v6442_v40 }
  0x5f   :  { %10403 = vst [vmem:[#allocation28_spill] sm:$0xff] %v6859_v61  ;;  %10404 = vst [vmem:[#allocation29_spill] sm:$0xff] %v6862_v59  ;;  %v4881_v53 = vsel %vm201_vm10, 1.0, %v6308_v41  ;;  %v5008_v45 = vsel %vm654_vm9, 1.0, %v6308_v41  ;;  %v5009_v49 = vsel %vm655_vm11, 1.0, %v6308_v41  ;;  %vm232_vm12 = vcmp.eq.s32.totalorder %v6852_v48, %v6417_v32 }
  0x60   :  { %5941 = vmatprep.subr.bf16.mxu1 %v1120_v63  ;;  %v578_v60 = vpack.c.bf16 %v4881_v53, %v4880_v4  ;;  %v1032_v62 = vpack.c.bf16 %v5009_v49, %v5008_v45  ;;  %vm233_vm13 = vcmp.eq.s32.totalorder %v6859_v61, %v6417_v32  ;;  %v4912_v57 = vsel %vm232_vm12, 1.0, %v6308_v41 }
  0x61   :  { %v4913_v51 = vsel %vm233_vm13, 1.0, %v6308_v41  ;;  %vm686_vm14 = vcmp.eq.s32.totalorder %v6852_v48, %v6442_v40  ;;  %vm687_vm15 = vcmp.eq.s32.totalorder %v6859_v61, %v6442_v40  ;;  %v6883_v47 = vadd.s32 248, %v6356_v7 }
  0x62   :  { %v1096_v1 = vadd.bf16 %v1032_v62, %v578_v60  ;;  %v594_v63 = vpack.c.bf16 %v4913_v51, %v4912_v57  ;;  %v5040_v4 = vsel %vm686_vm14, 1.0, %v6308_v41  ;;  %v5041_v53 = vsel %vm687_vm15, 1.0, %v6308_v41 }
  0x63   :  { %10405 = vst [vmem:[#allocation30_spill] sm:$0xff] %v6883_v47  ;;  %v1048_v45 = vpack.c.bf16 %v5041_v53, %v5040_v4  ;;  %vm218_vm0 = vcmp.eq.s32.totalorder %v6862_v59, %v6417_v32  ;;  %vm219_vm1 = vcmp.eq.s32.totalorder %v6883_v47, %v6417_v32  ;;  %vm672_vm2 = vcmp.eq.s32.totalorder %v6862_v59, %v6442_v40 }
  0x64   :  { %5920 = vmatpush3.bf16.msra.mxu0 %v1096_v1  ;;  %v4898_v49 = vsel %vm218_vm0, 1.0, %v6308_v41  ;;  %v4899_v60 = vsel %vm219_vm1, 1.0, %v6308_v41  ;;  %vm673_vm3 = vcmp.eq.s32.totalorder %v6883_v47, %v6442_v40  ;;  %v5026_v51 = vsel %vm672_vm2, 1.0, %v6308_v41 }
  0x65   :  { %v1112_v62 = vadd.bf16 %v1048_v45, %v594_v63  ;;  %v587_v57 = vpack.c.bf16 %v4899_v60, %v4898_v49  ;;  %v5027_v4 = vsel %vm673_vm3, 1.0, %v6308_v41  ;;  %v6900_v53 = vadd.s32 496, %v6356_v7 }
  0x66   :  { %v1041_v61 = vpack.c.bf16 %v5027_v4, %v5026_v51  ;;  %v6903_v59 = vadd.s32 504, %v6356_v7  ;;  %v6906_v1 = vadd.s32 112, %v6356_v7  ;;  %v6909_v48 = vadd.s32 120, %v6356_v7 }
  0x67   :  { %10406 = vst [vmem:[#allocation31_spill] sm:$0xff] %v6900_v53  ;;  %5942 = vmatpush3.bf16.msra.mxu1 %v1112_v62  ;;  %vm250_vm4 = vcmp.eq.s32.totalorder %v6900_v53, %v6417_v32  ;;  %vm704_vm5 = vcmp.eq.s32.totalorder %v6900_v53, %v6442_v40  ;;  %v6916_v63 = vadd.s32 368, %v6356_v7  ;;  %v6919_v45 = vadd.s32 376, %v6356_v7 }
  0x68   :  { %10407 = vst [vmem:[#allocation32_spill] sm:$0xff] %v6903_v59  ;;  %10408 = vst [vmem:[#allocation33_spill] sm:$0xff] %v6906_v1  ;;  %v1105_v49 = vadd.bf16 %v1041_v61, %v587_v57  ;;  %vm251_vm6 = vcmp.eq.s32.totalorder %v6903_v59, %v6417_v32  ;;  %v4930_v60 = vsel %vm250_vm4, 1.0, %v6308_v41  ;;  %vm705_vm7 = vcmp.eq.s32.totalorder %v6903_v59, %v6442_v40 }
  0x69   :  { %10409 = vst [vmem:[#allocation34_spill] sm:$0xff] %v6909_v48  ;;  %10410 = vst [vmem:[#allocation35_spill] sm:$0xff] %v6916_v63  ;;  %v4931_v51 = vsel %vm251_vm6, 1.0, %v6308_v41  ;;  %v5058_v62 = vsel %vm704_vm5, 1.0, %v6308_v41  ;;  %v5059_v4 = vsel %vm705_vm7, 1.0, %v6308_v41  ;;  %vm202_vm8 = vcmp.eq.s32.totalorder %v6906_v1, %v6417_v32 }
  0x6a   :  { %10411 = vst [vmem:[#allocation36_spill] sm:$0xff] %v6919_v45  ;;  %5921 = vmatprep.subr.bf16.mxu0 %v1105_v49  ;;  %v603_v53 = vpack.c.bf16 %v4931_v51, %v4930_v60  ;;  %v1057_v61 = vpack.c.bf16 %v5059_v4, %v5058_v62  ;;  %vm203_vm9 = vcmp.eq.s32.totalorder %v6909_v48, %v6417_v32  ;;  %v4882_v57 = vsel %vm202_vm8, 1.0, %v6308_v41 }
  0x6b   :  { %v4883_v47 = vsel %vm203_vm9, 1.0, %v6308_v41  ;;  %vm656_vm10 = vcmp.eq.s32.totalorder %v6906_v1, %v6442_v40  ;;  %vm657_vm11 = vcmp.eq.s32.totalorder %v6909_v48, %v6442_v40  ;;  %vm234_vm12 = vcmp.eq.s32.totalorder %v6916_v63, %v6417_v32 }
  0x6c   :  { %v1121_v59 = vadd.bf16 %v1057_v61, %v603_v53  ;;  %v579_v49 = vpack.c.bf16 %v4883_v47, %v4882_v57  ;;  %v5010_v60 = vsel %vm656_vm10, 1.0, %v6308_v41  ;;  %v5011_v51 = vsel %vm657_vm11, 1.0, %v6308_v41 }
  0x6d   :  { %v1033_v62 = vpack.c.bf16 %v5011_v51, %v5010_v60  ;;  %vm235_vm13 = vcmp.eq.s32.totalorder %v6919_v45, %v6417_v32  ;;  %v4914_v4 = vsel %vm234_vm12, 1.0, %v6308_v41  ;;  %vm688_vm14 = vcmp.eq.s32.totalorder %v6916_v63, %v6442_v40 }
  0x6e   :  { %5943 = vmatprep.subr.bf16.mxu1 %v1121_v59  ;;  %v4915_v48 = vsel %vm235_vm13, 1.0, %v6308_v41  ;;  %vm689_vm15 = vcmp.eq.s32.totalorder %v6919_v45, %v6442_v40  ;;  %v5042_v47 = vsel %vm688_vm14, 1.0, %v6308_v41  ;;  %v6953_v53 = vadd.s32 640, %v6356_v7 }
  0x6f   :  { %v1097_v61 = vadd.bf16 %v1033_v62, %v579_v49  ;;  %v595_v57 = vpack.c.bf16 %v4915_v48, %v4914_v4  ;;  %v5043_v60 = vsel %vm689_vm15, 1.0, %v6308_v41  ;;  %v6957_v51 = vadd.s32 648, %v6356_v7 }
  0x70   :  { %10412 = vst [vmem:[#allocation37_spill] sm:$0xff] %v6953_v53  ;;  %v1049_v1 = vpack.c.bf16 %v5043_v60, %v5042_v47  ;;  %vm268_vm0 = vcmp.eq.s32.totalorder %v6953_v53, %v6417_v32  ;;  %vm722_vm1 = vcmp.eq.s32.totalorder %v6953_v53, %v6442_v40  ;;  %v6964_v59 = vadd.s32 896, %v6356_v7 }
  0x71   :  { %10413 = vst [vmem:[#allocation38_spill] sm:$0xff] %v6957_v51  ;;  %5922 = vmatpush3.bf16.msra.mxu0 %v1097_v61  ;;  %vm269_vm2 = vcmp.eq.s32.totalorder %v6957_v51, %v6417_v32  ;;  %v4948_v48 = vsel %vm268_vm0, 1.0, %v6308_v41  ;;  %vm723_vm3 = vcmp.eq.s32.totalorder %v6957_v51, %v6442_v40  ;;  %v5076_v49 = vsel %vm722_vm1, 1.0, %v6308_v41 }
  0x72   :  { %10414 = vst [vmem:[#allocation39_spill] sm:$0xff] %v6964_v59  ;;  %v1113_v62 = vadd.bf16 %v1049_v1, %v595_v57  ;;  %v4949_v4 = vsel %vm269_vm2, 1.0, %v6308_v41  ;;  %v5077_v47 = vsel %vm723_vm3, 1.0, %v6308_v41  ;;  %v6975_v60 = vadd.s32 904, %v6356_v7 }
  0x73   :  { %v612_v53 = vpack.c.bf16 %v4949_v4, %v4948_v48  ;;  %v1066_v61 = vpack.c.bf16 %v5077_v47, %v5076_v49  ;;  %vm300_vm4 = vcmp.eq.s32.totalorder %v6964_v59, %v6417_v32  ;;  %vm754_vm5 = vcmp.eq.s32.totalorder %v6964_v59, %v6442_v40 }
  0x74   :  { %10415 = vst [vmem:[#allocation40_spill] sm:$0xff] %v6975_v60  ;;  %5944 = vmatpush3.bf16.msra.mxu1 %v1113_v62  ;;  %1215 = vmatmul.mubr.bf16.vlgmr.msra.gmra.mrb[0].mxu0 %v6360_v10  ;;  %vm301_vm6 = vcmp.eq.s32.totalorder %v6975_v60, %v6417_v32  ;;  %v4980_v1 = vsel %vm300_vm4, 1.0, %v6308_v41  ;;  %vm755_vm7 = vcmp.eq.s32.totalorder %v6975_v60, %v6442_v40  ;;  %v5108_v57 = vsel %vm754_vm5, 1.0, %v6308_v41 }
  0x75   :  { %v1130_v48 = vadd.bf16 %v1066_v61, %v612_v53  ;;  %v4981_v49 = vsel %vm301_vm6, 1.0, %v6308_v41  ;;  %v5109_v4 = vsel %vm755_vm7, 1.0, %v6308_v41  ;;  %v6991_v47 = vadd.s32 512, %v6356_v7 }
  0x76   :  { %v628_v62 = vpack.c.bf16 %v4981_v49, %v4980_v1  ;;  %v1082_v10 = vpack.c.bf16 %v5109_v4, %v5108_v57  ;;  %v6994_v59 = vadd.s32 520, %v6356_v7  ;;  %v6997_v51 = vadd.s32 768, %v6356_v7 }
  0x77   :  { %10416 = vst [vmem:[#allocation41_spill] sm:$0xff] %v6991_v47  ;;  %1255 = vmatmul.mubr.bf16.vlgmr.msra.gmra.mrb[0].mxu1 %v6362_v11  ;;  %5951 = vmatprep.subr.bf16.mxu0 %v1130_v48  ;;  %vm252_vm8 = vcmp.eq.s32.totalorder %v6991_v47, %v6417_v32  ;;  %vm706_vm9 = vcmp.eq.s32.totalorder %v6991_v47, %v6442_v40  ;;  %v7005_v53 = vadd.s32 776, %v6356_v7  ;;  %v7008_v61 = vadd.s32 656, %v6356_v7 }
  0x78   :  { %10417 = vst [vmem:[#allocation42_spill] sm:$0xff] %v6994_v59  ;;  %10418 = vst [vmem:[#allocation43_spill] sm:$0xff] %v6997_v51  ;;  %v1146_v1 = vadd.bf16 %v1082_v10, %v628_v62  ;;  %vm253_vm10 = vcmp.eq.s32.totalorder %v6994_v59, %v6417_v32  ;;  %v4932_v57 = vsel %vm252_vm8, 1.0, %v6308_v41  ;;  %vm707_vm11 = vcmp.eq.s32.totalorder %v6994_v59, %v6442_v40 }
  0x79   :  { %10419 = vst [vmem:[#allocation44_spill] sm:$0xff] %v7005_v53  ;;  %10420 = vst [vmem:[#allocation45_spill] sm:$0xff] %v7008_v61  ;;  %v4933_v48 = vsel %vm253_vm10, 1.0, %v6308_v41  ;;  %v5060_v49 = vsel %vm706_vm9, 1.0, %v6308_v41  ;;  %v5061_v4 = vsel %vm707_vm11, 1.0, %v6308_v41  ;;  %vm284_vm12 = vcmp.eq.s32.totalorder %v6997_v51, %v6417_v32 }
  0x7a   :  { %5973 = vmatprep.subr.bf16.mxu1 %v1146_v1  ;;  %v604_v11 = vpack.c.bf16 %v4933_v48, %v4932_v57  ;;  %v1058_v10 = vpack.c.bf16 %v5061_v4, %v5060_v49  ;;  %vm285_vm13 = vcmp.eq.s32.totalorder %v7005_v53, %v6417_v32  ;;  %v4964_v62 = vsel %vm284_vm12, 1.0, %v6308_v41 }
  0x7b   :  { %v4965_v47 = vsel %vm285_vm13, 1.0, %v6308_v41  ;;  %vm738_vm14 = vcmp.eq.s32.totalorder %v6997_v51, %v6442_v40  ;;  %vm739_vm15 = vcmp.eq.s32.totalorder %v7005_v53, %v6442_v40  ;;  %v7029_v59 = vadd.s32 664, %v6356_v7 }
  0x7c   :  { %v1122_v60 = vadd.bf16 %v1058_v10, %v604_v11  ;;  %v620_v1 = vpack.c.bf16 %v4965_v47, %v4964_v62  ;;  %v5092_v57 = vsel %vm738_vm14, 1.0, %v6308_v41  ;;  %v5093_v48 = vsel %vm739_vm15, 1.0, %v6308_v41 }
  0x7d   :  { %10421 = vst [vmem:[#allocation46_spill] sm:$0xff] %v7029_v59  ;;  %v1074_v49 = vpack.c.bf16 %v5093_v48, %v5092_v57  ;;  %vm270_vm0 = vcmp.eq.s32.totalorder %v7008_v61, %v6417_v32  ;;  %vm271_vm1 = vcmp.eq.s32.totalorder %v7029_v59, %v6417_v32  ;;  %vm724_vm2 = vcmp.eq.s32.totalorder %v7008_v61, %v6442_v40 }
  0x7e   :  { %5952 = vmatpush3.bf16.msra.mxu0 %v1122_v60  ;;  %v4950_v4 = vsel %vm270_vm0, 1.0, %v6308_v41  ;;  %v4951_v11 = vsel %vm271_vm1, 1.0, %v6308_v41  ;;  %vm725_vm3 = vcmp.eq.s32.totalorder %v7029_v59, %v6442_v40  ;;  %v5078_v47 = vsel %vm724_vm2, 1.0, %v6308_v41 }
  0x7f   :  { %v1138_v10 = vadd.bf16 %v1074_v49, %v620_v1  ;;  %v613_v62 = vpack.c.bf16 %v4951_v11, %v4950_v4  ;;  %v5079_v57 = vsel %vm725_vm3, 1.0, %v6308_v41  ;;  %v7046_v48 = vadd.s32 912, %v6356_v7 }
  0x80   :  { %v1067_v53 = vpack.c.bf16 %v5079_v57, %v5078_v47  ;;  %v7049_v61 = vadd.s32 920, %v6356_v7  ;;  %v7052_v60 = vadd.s32 528, %v6356_v7  ;;  %v7055_v51 = vadd.s32 536, %v6356_v7 }
  0x81   :  { %10422 = vst [vmem:[#allocation47_spill] sm:$0xff] %v7046_v48  ;;  %5974 = vmatpush3.bf16.msra.mxu1 %v1138_v10  ;;  %vm302_vm4 = vcmp.eq.s32.totalorder %v7046_v48, %v6417_v32  ;;  %vm756_vm5 = vcmp.eq.s32.totalorder %v7046_v48, %v6442_v40  ;;  %v7062_v1 = vadd.s32 784, %v6356_v7  ;;  %v7065_v49 = vadd.s32 792, %v6356_v7 }
  0x82   :  { %10423 = vst [vmem:[#allocation48_spill] sm:$0xff] %v7049_v61  ;;  %10424 = vst [vmem:[#allocation49_spill] sm:$0xff] %v7052_v60  ;;  %v1131_v4 = vadd.bf16 %v1067_v53, %v613_v62  ;;  %vm303_vm6 = vcmp.eq.s32.totalorder %v7049_v61, %v6417_v32  ;;  %v4982_v11 = vsel %vm302_vm4, 1.0, %v6308_v41  ;;  %vm757_vm7 = vcmp.eq.s32.totalorder %v7049_v61, %v6442_v40 }
  0x83   :  { %10425 = vst [vmem:[#allocation50_spill] sm:$0xff] %v7055_v51  ;;  %10426 = vst [vmem:[#allocation51_spill] sm:$0xff] %v7062_v1  ;;  %v4983_v47 = vsel %vm303_vm6, 1.0, %v6308_v41  ;;  %v5110_v10 = vsel %vm756_vm5, 1.0, %v6308_v41  ;;  %v5111_v57 = vsel %vm757_vm7, 1.0, %v6308_v41  ;;  %vm254_vm8 = vcmp.eq.s32.totalorder %v7052_v60, %v6417_v32 }
  0x84   :  { %10427 = vst [vmem:[#allocation52_spill] sm:$0xff] %v7065_v49  ;;  %5953 = vmatprep.subr.bf16.mxu0 %v1131_v4  ;;  %v629_v48 = vpack.c.bf16 %v4983_v47, %v4982_v11  ;;  %v1083_v53 = vpack.c.bf16 %v5111_v57, %v5110_v10  ;;  %vm255_vm9 = vcmp.eq.s32.totalorder %v7055_v51, %v6417_v32  ;;  %v4934_v62 = vsel %vm254_vm8, 1.0, %v6308_v41 }
  0x85   :  { %v4935_v59 = vsel %vm255_vm9, 1.0, %v6308_v41  ;;  %vm708_vm10 = vcmp.eq.s32.totalorder %v7052_v60, %v6442_v40  ;;  %vm709_vm11 = vcmp.eq.s32.totalorder %v7055_v51, %v6442_v40  ;;  %vm286_vm12 = vcmp.eq.s32.totalorder %v7062_v1, %v6417_v32 }
  0x86   :  { %v1147_v61 = vadd.bf16 %v1083_v53, %v629_v48  ;;  %v605_v4 = vpack.c.bf16 %v4935_v59, %v4934_v62  ;;  %v5062_v11 = vsel %vm708_vm10, 1.0, %v6308_v41  ;;  %v5063_v47 = vsel %vm709_vm11, 1.0, %v6308_v41 }
  0x87   :  { %v1059_v10 = vpack.c.bf16 %v5063_v47, %v5062_v11  ;;  %vm287_vm13 = vcmp.eq.s32.totalorder %v7065_v49, %v6417_v32  ;;  %v4966_v57 = vsel %vm286_vm12, 1.0, %v6308_v41  ;;  %vm740_vm14 = vcmp.eq.s32.totalorder %v7062_v1, %v6442_v40 }
  0x88   :  { %5975 = vmatprep.subr.bf16.mxu1 %v1147_v61  ;;  %v4967_v51 = vsel %vm287_vm13, 1.0, %v6308_v41  ;;  %vm741_vm15 = vcmp.eq.s32.totalorder %v7065_v49, %v6442_v40  ;;  %v5094_v59 = vsel %vm740_vm14, 1.0, %v6308_v41  ;;  %v7099_v48 = vadd.s32 672, %v6356_v7 }
  0x89   :  { %v1123_v53 = vadd.bf16 %v1059_v10, %v605_v4  ;;  %v621_v62 = vpack.c.bf16 %v4967_v51, %v4966_v57  ;;  %v5095_v11 = vsel %vm741_vm15, 1.0, %v6308_v41  ;;  %v7103_v47 = vadd.s32 680, %v6356_v7 }
  0x8a   :  { %10428 = vst [vmem:[#allocation53_spill] sm:$0xff] %v7099_v48  ;;  %v1075_v60 = vpack.c.bf16 %v5095_v11, %v5094_v59  ;;  %vm272_vm0 = vcmp.eq.s32.totalorder %v7099_v48, %v6417_v32  ;;  %vm726_vm1 = vcmp.eq.s32.totalorder %v7099_v48, %v6442_v40  ;;  %v7110_v61 = vadd.s32 928, %v6356_v7 }
  0x8b   :  { %10429 = vst [vmem:[#allocation54_spill] sm:$0xff] %v7103_v47  ;;  %5954 = vmatpush3.bf16.msra.mxu0 %v1123_v53  ;;  %vm273_vm2 = vcmp.eq.s32.totalorder %v7103_v47, %v6417_v32  ;;  %v4952_v51 = vsel %vm272_vm0, 1.0, %v6308_v41  ;;  %vm727_vm3 = vcmp.eq.s32.totalorder %v7103_v47, %v6442_v40  ;;  %v5080_v4 = vsel %vm726_vm1, 1.0, %v6308_v41 }
  0x8c   :  { %10430 = vst [vmem:[#allocation55_spill] sm:$0xff] %v7110_v61  ;;  %v1139_v10 = vadd.bf16 %v1075_v60, %v621_v62  ;;  %v4953_v57 = vsel %vm273_vm2, 1.0, %v6308_v41  ;;  %v5081_v59 = vsel %vm727_vm3, 1.0, %v6308_v41  ;;  %v7121_v11 = vadd.s32 936, %v6356_v7 }
  0x8d   :  { %v614_v48 = vpack.c.bf16 %v4953_v57, %v4952_v51  ;;  %v1068_v53 = vpack.c.bf16 %v5081_v59, %v5080_v4  ;;  %vm304_vm4 = vcmp.eq.s32.totalorder %v7110_v61, %v6417_v32  ;;  %vm758_vm5 = vcmp.eq.s32.totalorder %v7110_v61, %v6442_v40 }
  0x8e   :  { %10431 = vst [vmem:[#allocation56_spill] sm:$0xff] %v7121_v11  ;;  %5976 = vmatpush3.bf16.msra.mxu1 %v1139_v10  ;;  %vm305_vm6 = vcmp.eq.s32.totalorder %v7121_v11, %v6417_v32  ;;  %v4984_v60 = vsel %vm304_vm4, 1.0, %v6308_v41  ;;  %vm759_vm7 = vcmp.eq.s32.totalorder %v7121_v11, %v6442_v40  ;;  %v5112_v62 = vsel %vm758_vm5, 1.0, %v6308_v41 }
  0x8f   :  { %v1132_v47 = vadd.bf16 %v1068_v53, %v614_v48  ;;  %v4985_v51 = vsel %vm305_vm6, 1.0, %v6308_v41  ;;  %v5113_v4 = vsel %vm759_vm7, 1.0, %v6308_v41  ;;  %v7136_v57 = vadd.s32 544, %v6356_v7 }
  0x90   :  { %v630_v59 = vpack.c.bf16 %v4985_v51, %v4984_v60  ;;  %v1084_v10 = vpack.c.bf16 %v5113_v4, %v5112_v62  ;;  %v7139_v61 = vadd.s32 552, %v6356_v7  ;;  %v7142_v49 = vadd.s32 800, %v6356_v7 }
  0x91   :  { %10432 = vst [vmem:[#allocation57_spill] sm:$0xff] %v7136_v57  ;;  %5955 = vmatprep.subr.bf16.mxu0 %v1132_v47  ;;  %vm256_vm8 = vcmp.eq.s32.totalorder %v7136_v57, %v6417_v32  ;;  %vm710_vm9 = vcmp.eq.s32.totalorder %v7136_v57, %v6442_v40  ;;  %v7149_v48 = vadd.s32 808, %v6356_v7  ;;  %v7152_v53 = vadd.s32 688, %v6356_v7 }
  0x92   :  { %10433 = vst [vmem:[#allocation58_spill] sm:$0xff] %v7139_v61  ;;  %10434 = vst [vmem:[#allocation59_spill] sm:$0xff] %v7142_v49  ;;  %v1148_v60 = vadd.bf16 %v1084_v10, %v630_v59  ;;  %vm257_vm10 = vcmp.eq.s32.totalorder %v7139_v61, %v6417_v32  ;;  %v4936_v62 = vsel %vm256_vm8, 1.0, %v6308_v41  ;;  %vm711_vm11 = vcmp.eq.s32.totalorder %v7139_v61, %v6442_v40 }
  0x93   :  { %10435 = vst [vmem:[#allocation60_spill] sm:$0xff] %v7149_v48  ;;  %10436 = vst [vmem:[#allocation61_spill] sm:$0xff] %v7152_v53  ;;  %v4937_v47 = vsel %vm257_vm10, 1.0, %v6308_v41  ;;  %v5064_v51 = vsel %vm710_vm9, 1.0, %v6308_v41  ;;  %v5065_v4 = vsel %vm711_vm11, 1.0, %v6308_v41  ;;  %vm288_vm12 = vcmp.eq.s32.totalorder %v7142_v49, %v6417_v32 }
  0x94   :  { %5977 = vmatprep.subr.bf16.mxu1 %v1148_v60  ;;  %v606_v57 = vpack.c.bf16 %v4937_v47, %v4936_v62  ;;  %v1060_v59 = vpack.c.bf16 %v5065_v4, %v5064_v51  ;;  %vm289_vm13 = vcmp.eq.s32.totalorder %v7149_v48, %v6417_v32  ;;  %v4968_v10 = vsel %vm288_vm12, 1.0, %v6308_v41 }
  0x95   :  { %v4969_v11 = vsel %vm289_vm13, 1.0, %v6308_v41  ;;  %vm742_vm14 = vcmp.eq.s32.totalorder %v7142_v49, %v6442_v40  ;;  %vm743_vm15 = vcmp.eq.s32.totalorder %v7149_v48, %v6442_v40  ;;  %v7173_v61 = vadd.s32 696, %v6356_v7 }
  0x96   :  { %v1124_v1 = vadd.bf16 %v1060_v59, %v606_v57  ;;  %v622_v60 = vpack.c.bf16 %v4969_v11, %v4968_v10  ;;  %v5096_v62 = vsel %vm742_vm14, 1.0, %v6308_v41  ;;  %v5097_v47 = vsel %vm743_vm15, 1.0, %v6308_v41 }
  0x97   :  { %10437 = vst [vmem:[#allocation62_spill] sm:$0xff] %v7173_v61  ;;  %v1076_v51 = vpack.c.bf16 %v5097_v47, %v5096_v62  ;;  %vm274_vm0 = vcmp.eq.s32.totalorder %v7152_v53, %v6417_v32  ;;  %vm275_vm1 = vcmp.eq.s32.totalorder %v7173_v61, %v6417_v32  ;;  %vm728_vm2 = vcmp.eq.s32.totalorder %v7152_v53, %v6442_v40 }
  0x98   :  { %5956 = vmatpush3.bf16.msra.mxu0 %v1124_v1  ;;  %v4954_v4 = vsel %vm274_vm0, 1.0, %v6308_v41  ;;  %v4955_v57 = vsel %vm275_vm1, 1.0, %v6308_v41  ;;  %vm729_vm3 = vcmp.eq.s32.totalorder %v7173_v61, %v6442_v40  ;;  %v5082_v11 = vsel %vm728_vm2, 1.0, %v6308_v41 }
  0x99   :  { %v1140_v59 = vadd.bf16 %v1076_v51, %v622_v60  ;;  %v615_v10 = vpack.c.bf16 %v4955_v57, %v4954_v4  ;;  %v5083_v62 = vsel %vm729_vm3, 1.0, %v6308_v41  ;;  %v7190_v47 = vadd.s32 944, %v6356_v7 }
  0x9a   :  { %v1069_v48 = vpack.c.bf16 %v5083_v62, %v5082_v11  ;;  %v7193_v53 = vadd.s32 952, %v6356_v7  ;;  %v7196_v1 = vadd.s32 560, %v6356_v7  ;;  %v7199_v49 = vadd.s32 568, %v6356_v7 }
  0x9b   :  { %10438 = vst [vmem:[#allocation63_spill] sm:$0xff] %v7190_v47  ;;  %5978 = vmatpush3.bf16.msra.mxu1 %v1140_v59  ;;  %vm306_vm4 = vcmp.eq.s32.totalorder %v7190_v47, %v6417_v32  ;;  %vm760_vm5 = vcmp.eq.s32.totalorder %v7190_v47, %v6442_v40  ;;  %v7206_v60 = vadd.s32 816, %v6356_v7  ;;  %v7209_v51 = vadd.s32 824, %v6356_v7 }
  0x9c   :  { %10439 = vst [vmem:[#allocation64_spill] sm:$0xff] %v7193_v53  ;;  %10440 = vst [vmem:[#allocation65_spill] sm:$0xff] %v7196_v1  ;;  %v1133_v4 = vadd.bf16 %v1069_v48, %v615_v10  ;;  %vm307_vm6 = vcmp.eq.s32.totalorder %v7193_v53, %v6417_v32  ;;  %v4986_v57 = vsel %vm306_vm4, 1.0, %v6308_v41  ;;  %vm761_vm7 = vcmp.eq.s32.totalorder %v7193_v53, %v6442_v40 }
  0x9d   :  { %10441 = vst [vmem:[#allocation66_spill] sm:$0xff] %v7199_v49  ;;  %10442 = vst [vmem:[#allocation67_spill] sm:$0xff] %v7206_v60  ;;  %v4987_v11 = vsel %vm307_vm6, 1.0, %v6308_v41  ;;  %v5114_v59 = vsel %vm760_vm5, 1.0, %v6308_v41  ;;  %v5115_v62 = vsel %vm761_vm7, 1.0, %v6308_v41  ;;  %vm258_vm8 = vcmp.eq.s32.totalorder %v7196_v1, %v6417_v32 }
  0x9e   :  { %10443 = vst [vmem:[#allocation68_spill] sm:$0xff] %v7209_v51  ;;  %5957 = vmatprep.subr.bf16.mxu0 %v1133_v4  ;;  %v631_v47 = vpack.c.bf16 %v4987_v11, %v4986_v57  ;;  %v1085_v48 = vpack.c.bf16 %v5115_v62, %v5114_v59  ;;  %vm259_vm9 = vcmp.eq.s32.totalorder %v7199_v49, %v6417_v32  ;;  %v4938_v10 = vsel %vm258_vm8, 1.0, %v6308_v41 }
  0x9f   :  { %v4939_v61 = vsel %vm259_vm9, 1.0, %v6308_v41  ;;  %vm712_vm10 = vcmp.eq.s32.totalorder %v7196_v1, %v6442_v40  ;;  %vm713_vm11 = vcmp.eq.s32.totalorder %v7199_v49, %v6442_v40  ;;  %vm290_vm12 = vcmp.eq.s32.totalorder %v7206_v60, %v6417_v32 }
  0xa0   :  { %v1149_v53 = vadd.bf16 %v1085_v48, %v631_v47  ;;  %v607_v4 = vpack.c.bf16 %v4939_v61, %v4938_v10  ;;  %v5066_v57 = vsel %vm712_vm10, 1.0, %v6308_v41  ;;  %v5067_v11 = vsel %vm713_vm11, 1.0, %v6308_v41 }
  0xa1   :  { %v1061_v59 = vpack.c.bf16 %v5067_v11, %v5066_v57  ;;  %vm291_vm13 = vcmp.eq.s32.totalorder %v7209_v51, %v6417_v32  ;;  %v4970_v62 = vsel %vm290_vm12, 1.0, %v6308_v41  ;;  %vm744_vm14 = vcmp.eq.s32.totalorder %v7206_v60, %v6442_v40 }
  0xa2   :  { %5979 = vmatprep.subr.bf16.mxu1 %v1149_v53  ;;  %v4971_v49 = vsel %vm291_vm13, 1.0, %v6308_v41  ;;  %vm745_vm15 = vcmp.eq.s32.totalorder %v7209_v51, %v6442_v40  ;;  %v5098_v61 = vsel %vm744_vm14, 1.0, %v6308_v41  ;;  %v7243_v47 = vadd.s32 704, %v6356_v7 }
  0xa3   :  { %v1125_v48 = vadd.bf16 %v1061_v59, %v607_v4  ;;  %v623_v10 = vpack.c.bf16 %v4971_v49, %v4970_v62  ;;  %v5099_v57 = vsel %vm745_vm15, 1.0, %v6308_v41  ;;  %v7247_v11 = vadd.s32 712, %v6356_v7 }
  0xa4   :  { %10444 = vst [vmem:[#allocation69_spill] sm:$0xff] %v7243_v47  ;;  %v1077_v1 = vpack.c.bf16 %v5099_v57, %v5098_v61  ;;  %vm276_vm0 = vcmp.eq.s32.totalorder %v7243_v47, %v6417_v32  ;;  %vm730_vm1 = vcmp.eq.s32.totalorder %v7243_v47, %v6442_v40  ;;  %v7254_v53 = vadd.s32 960, %v6356_v7 }
  0xa5   :  { %10445 = vst [vmem:[#allocation70_spill] sm:$0xff] %v7247_v11  ;;  %5958 = vmatpush3.bf16.msra.mxu0 %v1125_v48  ;;  %vm277_vm2 = vcmp.eq.s32.totalorder %v7247_v11, %v6417_v32  ;;  %v4956_v49 = vsel %vm276_vm0, 1.0, %v6308_v41  ;;  %vm731_vm3 = vcmp.eq.s32.totalorder %v7247_v11, %v6442_v40  ;;  %v5084_v4 = vsel %vm730_vm1, 1.0, %v6308_v41 }
  0xa6   :  { %10446 = vst [vmem:[#allocation71_spill] sm:$0xff] %v7254_v53  ;;  %v1141_v59 = vadd.bf16 %v1077_v1, %v623_v10  ;;  %v4957_v62 = vsel %vm277_vm2, 1.0, %v6308_v41  ;;  %v5085_v61 = vsel %vm731_vm3, 1.0, %v6308_v41  ;;  %v7265_v57 = vadd.s32 968, %v6356_v7 }
  0xa7   :  { %v616_v47 = vpack.c.bf16 %v4957_v62, %v4956_v49  ;;  %v1070_v48 = vpack.c.bf16 %v5085_v61, %v5084_v4  ;;  %vm308_vm4 = vcmp.eq.s32.totalorder %v7254_v53, %v6417_v32  ;;  %vm762_vm5 = vcmp.eq.s32.totalorder %v7254_v53, %v6442_v40 }
  0xa8   :  { %10447 = vst [vmem:[#allocation72_spill] sm:$0xff] %v7265_v57  ;;  %5980 = vmatpush3.bf16.msra.mxu1 %v1141_v59  ;;  %vm309_vm6 = vcmp.eq.s32.totalorder %v7265_v57, %v6417_v32  ;;  %v4988_v1 = vsel %vm308_vm4, 1.0, %v6308_v41  ;;  %vm763_vm7 = vcmp.eq.s32.totalorder %v7265_v57, %v6442_v40  ;;  %v5116_v10 = vsel %vm762_vm5, 1.0, %v6308_v41 }
  0xa9   :  { %v1134_v11 = vadd.bf16 %v1070_v48, %v616_v47  ;;  %v4989_v49 = vsel %vm309_vm6, 1.0, %v6308_v41  ;;  %v5117_v4 = vsel %vm763_vm7, 1.0, %v6308_v41  ;;  %v7280_v62 = vadd.s32 576, %v6356_v7 }
  0xaa   :  { %v632_v61 = vpack.c.bf16 %v4989_v49, %v4988_v1  ;;  %v1086_v59 = vpack.c.bf16 %v5117_v4, %v5116_v10  ;;  %v7283_v53 = vadd.s32 584, %v6356_v7  ;;  %v7286_v51 = vadd.s32 832, %v6356_v7 }
  0xab   :  { %10448 = vst [vmem:[#allocation73_spill] sm:$0xff] %v7280_v62  ;;  %5959 = vmatprep.subr.bf16.mxu0 %v1134_v11  ;;  %vm260_vm8 = vcmp.eq.s32.totalorder %v7280_v62, %v6417_v32  ;;  %vm714_vm9 = vcmp.eq.s32.totalorder %v7280_v62, %v6442_v40  ;;  %v7293_v47 = vadd.s32 840, %v6356_v7  ;;  %v7296_v48 = vadd.s32 720, %v6356_v7 }
  0xac   :  { %10449 = vst [vmem:[#allocation74_spill] sm:$0xff] %v7283_v53  ;;  %10450 = vst [vmem:[#allocation75_spill] sm:$0xff] %v7286_v51  ;;  %v1150_v1 = vadd.bf16 %v1086_v59, %v632_v61  ;;  %vm261_vm10 = vcmp.eq.s32.totalorder %v7283_v53, %v6417_v32  ;;  %v4940_v10 = vsel %vm260_vm8, 1.0, %v6308_v41  ;;  %vm715_vm11 = vcmp.eq.s32.totalorder %v7283_v53, %v6442_v40 }
  0xad   :  { %10451 = vst [vmem:[#allocation76_spill] sm:$0xff] %v7293_v47  ;;  %10452 = vst [vmem:[#allocation77_spill] sm:$0xff] %v7296_v48  ;;  %v4941_v11 = vsel %vm261_vm10, 1.0, %v6308_v41  ;;  %v5068_v49 = vsel %vm714_vm9, 1.0, %v6308_v41  ;;  %v5069_v4 = vsel %vm715_vm11, 1.0, %v6308_v41  ;;  %vm292_vm12 = vcmp.eq.s32.totalorder %v7286_v51, %v6417_v32 }
  0xae   :  { %5981 = vmatprep.subr.bf16.mxu1 %v1150_v1  ;;  %v608_v62 = vpack.c.bf16 %v4941_v11, %v4940_v10  ;;  %v1062_v61 = vpack.c.bf16 %v5069_v4, %v5068_v49  ;;  %vm293_vm13 = vcmp.eq.s32.totalorder %v7293_v47, %v6417_v32  ;;  %v4972_v59 = vsel %vm292_vm12, 1.0, %v6308_v41 }
  0xaf   :  { %v4973_v57 = vsel %vm293_vm13, 1.0, %v6308_v41  ;;  %vm746_vm14 = vcmp.eq.s32.totalorder %v7286_v51, %v6442_v40  ;;  %vm747_vm15 = vcmp.eq.s32.totalorder %v7293_v47, %v6442_v40  ;;  %v7317_v53 = vadd.s32 728, %v6356_v7 }
  0xb0   :  { %v1126_v60 = vadd.bf16 %v1062_v61, %v608_v62  ;;  %v624_v1 = vpack.c.bf16 %v4973_v57, %v4972_v59  ;;  %v5100_v10 = vsel %vm746_vm14, 1.0, %v6308_v41  ;;  %v5101_v11 = vsel %vm747_vm15, 1.0, %v6308_v41 }
  0xb1   :  { %10453 = vst [vmem:[#allocation78_spill] sm:$0xff] %v7317_v53  ;;  %v1078_v49 = vpack.c.bf16 %v5101_v11, %v5100_v10  ;;  %vm278_vm0 = vcmp.eq.s32.totalorder %v7296_v48, %v6417_v32  ;;  %vm279_vm1 = vcmp.eq.s32.totalorder %v7317_v53, %v6417_v32  ;;  %vm732_vm2 = vcmp.eq.s32.totalorder %v7296_v48, %v6442_v40 }
  0xb2   :  { %5960 = vmatpush3.bf16.msra.mxu0 %v1126_v60  ;;  %v4958_v4 = vsel %vm278_vm0, 1.0, %v6308_v41  ;;  %v4959_v62 = vsel %vm279_vm1, 1.0, %v6308_v41  ;;  %vm733_vm3 = vcmp.eq.s32.totalorder %v7317_v53, %v6442_v40  ;;  %v5086_v57 = vsel %vm732_vm2, 1.0, %v6308_v41 }
  0xb3   :  { %v1142_v61 = vadd.bf16 %v1078_v49, %v624_v1  ;;  %v617_v59 = vpack.c.bf16 %v4959_v62, %v4958_v4  ;;  %v5087_v10 = vsel %vm733_vm3, 1.0, %v6308_v41  ;;  %v7334_v11 = vadd.s32 976, %v6356_v7 }
  0xb4   :  { %v1071_v47 = vpack.c.bf16 %v5087_v10, %v5086_v57  ;;  %v7337_v48 = vadd.s32 984, %v6356_v7  ;;  %v7340_v60 = vadd.s32 592, %v6356_v7  ;;  %v7343_v51 = vadd.s32 600, %v6356_v7 }
  0xb5   :  { %10454 = vst [vmem:[#allocation79_spill] sm:$0xff] %v7334_v11  ;;  %5982 = vmatpush3.bf16.msra.mxu1 %v1142_v61  ;;  %vm310_vm4 = vcmp.eq.s32.totalorder %v7334_v11, %v6417_v32  ;;  %vm764_vm5 = vcmp.eq.s32.totalorder %v7334_v11, %v6442_v40  ;;  %v7350_v1 = vadd.s32 848, %v6356_v7  ;;  %v7353_v49 = vadd.s32 856, %v6356_v7 }
  0xb6   :  { %10455 = vst [vmem:[#allocation80_spill] sm:$0xff] %v7337_v48  ;;  %10456 = vst [vmem:[#allocation81_spill] sm:$0xff] %v7340_v60  ;;  %v1135_v4 = vadd.bf16 %v1071_v47, %v617_v59  ;;  %vm311_vm6 = vcmp.eq.s32.totalorder %v7337_v48, %v6417_v32  ;;  %v4990_v62 = vsel %vm310_vm4, 1.0, %v6308_v41  ;;  %vm765_vm7 = vcmp.eq.s32.totalorder %v7337_v48, %v6442_v40 }
  0xb7   :  { %10457 = vst [vmem:[#allocation82_spill] sm:$0xff] %v7343_v51  ;;  %10458 = vst [vmem:[#allocation83_spill] sm:$0xff] %v7350_v1  ;;  %v4991_v57 = vsel %vm311_vm6, 1.0, %v6308_v41  ;;  %v5118_v61 = vsel %vm764_vm5, 1.0, %v6308_v41  ;;  %v5119_v10 = vsel %vm765_vm7, 1.0, %v6308_v41  ;;  %vm262_vm8 = vcmp.eq.s32.totalorder %v7340_v60, %v6417_v32 }
  0xb8   :  { %10459 = vst [vmem:[#allocation84_spill] sm:$0xff] %v7353_v49  ;;  %5961 = vmatprep.subr.bf16.mxu0 %v1135_v4  ;;  %v633_v11 = vpack.c.bf16 %v4991_v57, %v4990_v62  ;;  %v1087_v47 = vpack.c.bf16 %v5119_v10, %v5118_v61  ;;  %vm263_vm9 = vcmp.eq.s32.totalorder %v7343_v51, %v6417_v32  ;;  %v4942_v59 = vsel %vm262_vm8, 1.0, %v6308_v41 }
  0xb9   :  { %v4943_v53 = vsel %vm263_vm9, 1.0, %v6308_v41  ;;  %vm716_vm10 = vcmp.eq.s32.totalorder %v7340_v60, %v6442_v40  ;;  %vm717_vm11 = vcmp.eq.s32.totalorder %v7343_v51, %v6442_v40  ;;  %vm294_vm12 = vcmp.eq.s32.totalorder %v7350_v1, %v6417_v32 }
  0xba   :  { %v1151_v48 = vadd.bf16 %v1087_v47, %v633_v11  ;;  %v609_v4 = vpack.c.bf16 %v4943_v53, %v4942_v59  ;;  %v5070_v62 = vsel %vm716_vm10, 1.0, %v6308_v41  ;;  %v5071_v57 = vsel %vm717_vm11, 1.0, %v6308_v41 }
  0xbb   :  { %v1063_v61 = vpack.c.bf16 %v5071_v57, %v5070_v62  ;;  %vm295_vm13 = vcmp.eq.s32.totalorder %v7353_v49, %v6417_v32  ;;  %v4974_v10 = vsel %vm294_vm12, 1.0, %v6308_v41  ;;  %vm748_vm14 = vcmp.eq.s32.totalorder %v7350_v1, %v6442_v40 }
  0xbc   :  { %5983 = vmatprep.subr.bf16.mxu1 %v1151_v48  ;;  %v4975_v51 = vsel %vm295_vm13, 1.0, %v6308_v41  ;;  %vm749_vm15 = vcmp.eq.s32.totalorder %v7353_v49, %v6442_v40  ;;  %v5102_v53 = vsel %vm748_vm14, 1.0, %v6308_v41  ;;  %v7387_v11 = vadd.s32 736, %v6356_v7 }
  0xbd   :  { %v1127_v47 = vadd.bf16 %v1063_v61, %v609_v4  ;;  %v625_v59 = vpack.c.bf16 %v4975_v51, %v4974_v10  ;;  %v5103_v62 = vsel %vm749_vm15, 1.0, %v6308_v41  ;;  %v7391_v57 = vadd.s32 744, %v6356_v7 }
  0xbe   :  { %10460 = vst [vmem:[#allocation85_spill] sm:$0xff] %v7387_v11  ;;  %v1079_v60 = vpack.c.bf16 %v5103_v62, %v5102_v53  ;;  %vm280_vm0 = vcmp.eq.s32.totalorder %v7387_v11, %v6417_v32  ;;  %vm734_vm1 = vcmp.eq.s32.totalorder %v7387_v11, %v6442_v40  ;;  %v7398_v48 = vadd.s32 992, %v6356_v7 }
  0xbf   :  { %10461 = vst [vmem:[#allocation86_spill] sm:$0xff] %v7391_v57  ;;  %5962 = vmatpush3.bf16.msra.mxu0 %v1127_v47  ;;  %vm281_vm2 = vcmp.eq.s32.totalorder %v7391_v57, %v6417_v32  ;;  %v4960_v51 = vsel %vm280_vm0, 1.0, %v6308_v41  ;;  %vm735_vm3 = vcmp.eq.s32.totalorder %v7391_v57, %v6442_v40  ;;  %v5088_v4 = vsel %vm734_vm1, 1.0, %v6308_v41 }
  0xc0   :  { %10462 = vst [vmem:[#allocation87_spill] sm:$0xff] %v7398_v48  ;;  %v1143_v61 = vadd.bf16 %v1079_v60, %v625_v59  ;;  %v4961_v10 = vsel %vm281_vm2, 1.0, %v6308_v41  ;;  %v5089_v53 = vsel %vm735_vm3, 1.0, %v6308_v41  ;;  %v7409_v62 = vadd.s32 1000, %v6356_v7 }
  0xc1   :  { %v618_v11 = vpack.c.bf16 %v4961_v10, %v4960_v51  ;;  %v1072_v47 = vpack.c.bf16 %v5089_v53, %v5088_v4  ;;  %vm312_vm4 = vcmp.eq.s32.totalorder %v7398_v48, %v6417_v32  ;;  %vm766_vm5 = vcmp.eq.s32.totalorder %v7398_v48, %v6442_v40 }
  0xc2   :  { %10463 = vst [vmem:[#allocation88_spill] sm:$0xff] %v7409_v62  ;;  %5984 = vmatpush3.bf16.msra.mxu1 %v1143_v61  ;;  %vm313_vm6 = vcmp.eq.s32.totalorder %v7409_v62, %v6417_v32  ;;  %v4992_v60 = vsel %vm312_vm4, 1.0, %v6308_v41  ;;  %vm767_vm7 = vcmp.eq.s32.totalorder %v7409_v62, %v6442_v40  ;;  %v5120_v59 = vsel %vm766_vm5, 1.0, %v6308_v41 }
  0xc3   :  { %v1136_v57 = vadd.bf16 %v1072_v47, %v618_v11  ;;  %v4993_v51 = vsel %vm313_vm6, 1.0, %v6308_v41  ;;  %v5121_v4 = vsel %vm767_vm7, 1.0, %v6308_v41  ;;  %v7424_v10 = vadd.s32 608, %v6356_v7 }
  0xc4   :  { %v634_v53 = vpack.c.bf16 %v4993_v51, %v4992_v60  ;;  %v1088_v61 = vpack.c.bf16 %v5121_v4, %v5120_v59  ;;  %v7427_v48 = vadd.s32 616, %v6356_v7  ;;  %v7430_v49 = vadd.s32 864, %v6356_v7 }
  0xc5   :  { %10464 = vst [vmem:[#allocation89_spill] sm:$0xff] %v7424_v10  ;;  %5963 = vmatprep.subr.bf16.mxu0 %v1136_v57  ;;  %vm264_vm8 = vcmp.eq.s32.totalorder %v7424_v10, %v6417_v32  ;;  %vm718_vm9 = vcmp.eq.s32.totalorder %v7424_v10, %v6442_v40  ;;  %v7437_v11 = vadd.s32 872, %v6356_v7  ;;  %v7440_v47 = vadd.s32 752, %v6356_v7 }
  0xc6   :  { %10465 = vst [vmem:[#allocation90_spill] sm:$0xff] %v7427_v48  ;;  %10466 = vst [vmem:[#allocation91_spill] sm:$0xff] %v7430_v49  ;;  %v1152_v60 = vadd.bf16 %v1088_v61, %v634_v53  ;;  %vm265_vm10 = vcmp.eq.s32.totalorder %v7427_v48, %v6417_v32  ;;  %v4944_v59 = vsel %vm264_vm8, 1.0, %v6308_v41  ;;  %vm719_vm11 = vcmp.eq.s32.totalorder %v7427_v48, %v6442_v40 }
  0xc7   :  { %10467 = vst [vmem:[#allocation92_spill] sm:$0xff] %v7437_v11  ;;  %10468 = vst [vmem:[#allocation93_spill] sm:$0xff] %v7440_v47  ;;  %v4945_v57 = vsel %vm265_vm10, 1.0, %v6308_v41  ;;  %v5072_v51 = vsel %vm718_vm9, 1.0, %v6308_v41  ;;  %v5073_v4 = vsel %vm719_vm11, 1.0, %v6308_v41  ;;  %vm296_vm12 = vcmp.eq.s32.totalorder %v7430_v49, %v6417_v32 }
  0xc8   :  { %5985 = vmatprep.subr.bf16.mxu1 %v1152_v60  ;;  %v610_v10 = vpack.c.bf16 %v4945_v57, %v4944_v59  ;;  %v1064_v53 = vpack.c.bf16 %v5073_v4, %v5072_v51  ;;  %vm297_vm13 = vcmp.eq.s32.totalorder %v7437_v11, %v6417_v32  ;;  %v4976_v61 = vsel %vm296_vm12, 1.0, %v6308_v41 }
  0xc9   :  { %v4977_v62 = vsel %vm297_vm13, 1.0, %v6308_v41  ;;  %vm750_vm14 = vcmp.eq.s32.totalorder %v7430_v49, %v6442_v40  ;;  %vm751_vm15 = vcmp.eq.s32.totalorder %v7437_v11, %v6442_v40  ;;  %v7461_v48 = vadd.s32 760, %v6356_v7 }
  0xca   :  { %v1128_v1 = vadd.bf16 %v1064_v53, %v610_v10  ;;  %v626_v60 = vpack.c.bf16 %v4977_v62, %v4976_v61  ;;  %v5104_v59 = vsel %vm750_vm14, 1.0, %v6308_v41  ;;  %v5105_v57 = vsel %vm751_vm15, 1.0, %v6308_v41 }
  0xcb   :  { %10469 = vst [vmem:[#allocation94_spill] sm:$0xff] %v7461_v48  ;;  %v1080_v51 = vpack.c.bf16 %v5105_v57, %v5104_v59  ;;  %vm282_vm0 = vcmp.eq.s32.totalorder %v7440_v47, %v6417_v32  ;;  %vm283_vm1 = vcmp.eq.s32.totalorder %v7461_v48, %v6417_v32  ;;  %vm736_vm2 = vcmp.eq.s32.totalorder %v7440_v47, %v6442_v40 }
  0xcc   :  { %5964 = vmatpush3.bf16.msra.mxu0 %v1128_v1  ;;  %v4962_v4 = vsel %vm282_vm0, 1.0, %v6308_v41  ;;  %v4963_v10 = vsel %vm283_vm1, 1.0, %v6308_v41  ;;  %vm737_vm3 = vcmp.eq.s32.totalorder %v7461_v48, %v6442_v40  ;;  %v5090_v62 = vsel %vm736_vm2, 1.0, %v6308_v41 }
  0xcd   :  { %v1144_v53 = vadd.bf16 %v1080_v51, %v626_v60  ;;  %v619_v61 = vpack.c.bf16 %v4963_v10, %v4962_v4  ;;  %v5091_v59 = vsel %vm737_vm3, 1.0, %v6308_v41  ;;  %v7478_v57 = vadd.s32 1008, %v6356_v7 }
  0xce   :  { %v1073_v11 = vpack.c.bf16 %v5091_v59, %v5090_v62  ;;  %v7481_v47 = vadd.s32 1016, %v6356_v7  ;;  %v7484_v1 = vadd.s32 624, %v6356_v7  ;;  %v7487_v49 = vadd.s32 632, %v6356_v7 }
  0xcf   :  { %10470 = vst [vmem:[#allocation95_spill] sm:$0xff] %v7478_v57  ;;  %5986 = vmatpush3.bf16.msra.mxu1 %v1144_v53  ;;  %vm314_vm4 = vcmp.eq.s32.totalorder %v7478_v57, %v6417_v32  ;;  %vm768_vm5 = vcmp.eq.s32.totalorder %v7478_v57, %v6442_v40  ;;  %v7494_v60 = vadd.s32 880, %v6356_v7  ;;  %v7497_v51 = vadd.s32 888, %v6356_v7 }
  0xd0   :  { %10471 = vst [vmem:[#allocation96_spill] sm:$0xff] %v7481_v47  ;;  %10472 = vst [vmem:[#allocation97_spill] sm:$0xff] %v7484_v1  ;;  %v1137_v4 = vadd.bf16 %v1073_v11, %v619_v61  ;;  %vm315_vm6 = vcmp.eq.s32.totalorder %v7481_v47, %v6417_v32  ;;  %v4994_v10 = vsel %vm314_vm4, 1.0, %v6308_v41  ;;  %vm769_vm7 = vcmp.eq.s32.totalorder %v7481_v47, %v6442_v40 }
  0xd1   :  { %10473 = vst [vmem:[#allocation98_spill] sm:$0xff] %v7487_v49  ;;  %10474 = vst [vmem:[#allocation99_spill] sm:$0xff] %v7494_v60  ;;  %v4995_v62 = vsel %vm315_vm6, 1.0, %v6308_v41  ;;  %v5122_v53 = vsel %vm768_vm5, 1.0, %v6308_v41  ;;  %v5123_v59 = vsel %vm769_vm7, 1.0, %v6308_v41  ;;  %vm266_vm8 = vcmp.eq.s32.totalorder %v7484_v1, %v6417_v32 }
  0xd2   :  { %10475 = vst [vmem:[#allocation100_spill] sm:$0xff] %v7497_v51  ;;  %5965 = vmatprep.subr.bf16.mxu0 %v1137_v4  ;;  %v635_v57 = vpack.c.bf16 %v4995_v62, %v4994_v10  ;;  %v1089_v11 = vpack.c.bf16 %v5123_v59, %v5122_v53  ;;  %vm267_vm9 = vcmp.eq.s32.totalorder %v7487_v49, %v6417_v32  ;;  %v4946_v61 = vsel %vm266_vm8, 1.0, %v6308_v41  ;;  %v31_v4 = vld [vmem:[%s10011_s2 + $0x10] sm:$0xff] }
  0xd3   :  { %v4947_v48 = vsel %vm267_vm9, 1.0, %v6308_v41  ;;  %vm720_vm10 = vcmp.eq.s32.totalorder %v7484_v1, %v6442_v40  ;;  %vm721_vm11 = vcmp.eq.s32.totalorder %v7487_v49, %v6442_v40  ;;  %vm298_vm12 = vcmp.eq.s32.totalorder %v7494_v60, %v6417_v32  ;;  %v32_v1 = vld [vmem:[%s10011_s2 + $0x18] sm:$0xff] }
  0xd4   :  { %v1153_v10 = vadd.bf16 %v1089_v11, %v635_v57  ;;  %v611_v62 = vpack.c.bf16 %v4947_v48, %v4946_v61  ;;  %v5074_v53 = vsel %vm720_vm10, 1.0, %v6308_v41  ;;  %v5075_v59 = vsel %vm721_vm11, 1.0, %v6308_v41  ;;  %v5132_v48 = vld [vmem:[%s10010_s1 + $0x1] sm:$0x1] }
  0xd5   :  { %v1065_v47 = vpack.c.bf16 %v5075_v59, %v5074_v53  ;;  %vm299_vm13 = vcmp.eq.s32.totalorder %v7497_v51, %v6417_v32  ;;  %v4978_v49 = vsel %vm298_vm12, 1.0, %v6308_v41  ;;  %vm752_vm14 = vcmp.eq.s32.totalorder %v7494_v60, %v6442_v40 }
  0xd6   :  { %5987 = vmatprep.subr.bf16.mxu1 %v1153_v10  ;;  %v4979_v57 = vsel %vm299_vm13, 1.0, %v6308_v41  ;;  %vm753_vm15 = vcmp.eq.s32.totalorder %v7497_v51, %v6442_v40  ;;  %v5106_v11 = vsel %vm752_vm14, 1.0, %v6308_v41  ;;  %v7539_v61 = vcombine.high %v31_v4, %v31_v4 }
  0xd7   :  { %v1129_v32 = vadd.bf16 %v1065_v47, %v611_v62  ;;  %v627_v53 = vpack.c.bf16 %v4979_v57, %v4978_v49  ;;  %v5107_v59 = vsel %vm753_vm15, 1.0, %v6308_v41  ;;  %v7542_v45 = vcombine.high %v32_v1, %v32_v1 }
  0xd8   :  { %10476 = vst [vmem:[#allocation101_spill] sm:$0xff] %v7539_v61  ;;  %v1081_v60 = vpack.c.bf16 %v5107_v59, %v5106_v11  ;;  %1294 = vmatprep.mubr.bf16.mxu0 %v7539_v61  ;;  %v7545_v63 = vcombine.low %v31_v4, %v31_v4  ;;  %v1347_v10 = vunpack.c.0.s8 %v5132_v48  ;;  %v7548_v25 = vcombine.low %v32_v1, %v32_v1 }
  0xd9   :  { %10477 = vst [vmem:[#allocation102_spill] sm:$0xff] %v7542_v45  ;;  %5966 = vmatpush3.bf16.msra.mxu0 %v1129_v32  ;;  %1334 = vmatprep.mubr.bf16.mxu1 %v7542_v45 }
  0xda   :  { %v1145_v40 = vadd.bf16 %v1081_v60, %v627_v53  ;;  %v1348_v51 = vand.u32 255, %v1347_v10 }
  0xdc   :  { %5988 = vmatpush3.bf16.msra.mxu1 %v1145_v40  ;;  %1295 = vmatmul.mubr.bf16.vlgmr.msra.gmra.mrb[4].mxu0 %v7545_v63  ;;  %v1349_v49 = vmul.u32 2, %v1348_v51 }
  0xdd   :  { %2353 = vmatprep.mubr.bf16.mxu0 %v6352_v5 }
  0xde   :  { %v1353_v47 = vrot.slane %v1349_v49, %v6373_v15  ;;  %v1806_v62 = vrot.slane %v1349_v49, %v6376_v17 }
  0xdf   :  { %1335 = vmatmul.mubr.bf16.vlgmr.msra.gmra.mrb[4].mxu1 %v7548_v25 }
  0xe0   :  { %v7556_v4 = vadd.s32 %v1353_v47, %v6370_v14  ;;  %v1807_v60 = vadd.s32 %v1806_v62, %v6370_v14  ;;  %2393 = vmatprep.mubr.bf16.mxu1 %v6354_v6 }
  0xe2   :  { %vm1371_vm0 = vcmp.eq.s32.totalorder %v6365_v12, %v7556_v4  ;;  %vm1372_vm1 = vcmp.eq.s32.totalorder %v6368_v13, %v7556_v4  ;;  %v7564_v1 = vadd.s32 512, %v1807_v60  ;;  %vm1403_vm2 = vcmp.eq.s32.totalorder %v6379_v18, %v7556_v4 }
  0xe3   :  { %v5149_v51 = vsel %vm1371_vm0, 1.0, %v6308_v41  ;;  %v5150_v48 = vsel %vm1372_vm1, 1.0, %v6308_v41  ;;  %vm1404_vm3 = vcmp.eq.s32.totalorder %v6382_v19, %v7556_v4  ;;  %v5181_v57 = vsel %vm1403_vm2, 1.0, %v6308_v41 }
  0xe4   :  { %v1747_v11 = vpack.c.bf16 %v5150_v48, %v5149_v51  ;;  %vm1825_vm4 = vcmp.eq.s32.totalorder %v6365_v12, %v7564_v1  ;;  %vm1826_vm5 = vcmp.eq.s32.totalorder %v6368_v13, %v7564_v1  ;;  %v5182_v32 = vsel %vm1404_vm3, 1.0, %v6308_v41 }
  0xe5   :  { %v5277_v53 = vsel %vm1825_vm4, 1.0, %v6308_v41  ;;  %v5278_v59 = vsel %vm1826_vm5, 1.0, %v6308_v41  ;;  %v1763_v10 = vpack.c.bf16 %v5182_v32, %v5181_v57  ;;  %vm1857_vm6 = vcmp.eq.s32.totalorder %v6379_v18, %v7564_v1 }
  0xe6   :  { %v2201_v40 = vpack.c.bf16 %v5278_v59, %v5277_v53  ;;  %vm1858_vm7 = vcmp.eq.s32.totalorder %v6382_v19, %v7564_v1  ;;  %v5309_v49 = vsel %vm1857_vm6, 1.0, %v6308_v41  ;;  %vm1355_vm8 = vcmp.eq.s32.totalorder %v6356_v7, %v7556_v4 }
  0xe7   :  { %v5310_v47 = vsel %vm1858_vm7, 1.0, %v6308_v41  ;;  %vm1356_vm9 = vcmp.eq.s32.totalorder %v6385_v20, %v7556_v4  ;;  %v5133_v62 = vsel %vm1355_vm8, 1.0, %v6308_v41  ;;  %vm1809_vm10 = vcmp.eq.s32.totalorder %v6356_v7, %v7564_v1 }
  0xe8   :  { %v2265_v60 = vadd.bf16 %v2201_v40, %v1747_v11  ;;  %v2217_v51 = vpack.c.bf16 %v5310_v47, %v5309_v49  ;;  %v5134_v48 = vsel %vm1356_vm9, 1.0, %v6308_v41  ;;  %vm1810_vm11 = vcmp.eq.s32.totalorder %v6385_v20, %v7564_v1 }
  0xe9   :  { %v1739_v57 = vpack.c.bf16 %v5134_v48, %v5133_v62  ;;  %v5261_v32 = vsel %vm1809_vm10, 1.0, %v6308_v41  ;;  %v5262_v53 = vsel %vm1810_vm11, 1.0, %v6308_v41  ;;  %vm1387_vm12 = vcmp.eq.s32.totalorder %v6388_v21, %v7556_v4 }
  0xea   :  { %5995 = vmatprep.subr.bf16.mxu0 %v2265_v60  ;;  %v2281_v59 = vadd.bf16 %v2217_v51, %v1763_v10  ;;  %v2193_v19 = vpack.c.bf16 %v5262_v53, %v5261_v32  ;;  %vm1388_vm13 = vcmp.eq.s32.totalorder %v6391_v22, %v7556_v4  ;;  %v5165_v11 = vsel %vm1387_vm12, 1.0, %v6308_v41 }
  0xeb   :  { %v5166_v40 = vsel %vm1388_vm13, 1.0, %v6308_v41  ;;  %vm1841_vm14 = vcmp.eq.s32.totalorder %v6388_v21, %v7564_v1  ;;  %vm1842_vm15 = vcmp.eq.s32.totalorder %v6391_v22, %v7564_v1  ;;  %vm1373_vm0 = vcmp.eq.s32.totalorder %v6394_v23, %v7556_v4 }
  0xec   :  { %6017 = vmatprep.subr.bf16.mxu1 %v2281_v59  ;;  %v2257_v49 = vadd.bf16 %v2193_v19, %v1739_v57  ;;  %v1755_v10 = vpack.c.bf16 %v5166_v40, %v5165_v11  ;;  %v5293_v47 = vsel %vm1841_vm14, 1.0, %v6308_v41  ;;  %v5294_v62 = vsel %vm1842_vm15, 1.0, %v6308_v41 }
  0xed   :  { %v2209_v60 = vpack.c.bf16 %v5294_v62, %v5293_v47  ;;  %vm1374_vm1 = vcmp.eq.s32.totalorder %v6399_v26, %v7556_v4  ;;  %v5151_v51 = vsel %vm1373_vm0, 1.0, %v6308_v41  ;;  %vm1827_vm2 = vcmp.eq.s32.totalorder %v6394_v23, %v7564_v1 }
  0xee   :  { %5996 = vmatpush3.bf16.msra.mxu0 %v2257_v49  ;;  %v5152_v48 = vsel %vm1374_vm1, 1.0, %v6308_v41  ;;  %vm1828_vm3 = vcmp.eq.s32.totalorder %v6399_v26, %v7564_v1  ;;  %v5279_v19 = vsel %vm1827_vm2, 1.0, %v6308_v41  ;;  %vm1405_vm4 = vcmp.eq.s32.totalorder %v6402_v27, %v7556_v4 }
  0xef   :  { %v2273_v57 = vadd.bf16 %v2209_v60, %v1755_v10  ;;  %v1748_v32 = vpack.c.bf16 %v5152_v48, %v5151_v51  ;;  %v5280_v53 = vsel %vm1828_vm3, 1.0, %v6308_v41  ;;  %vm1406_vm5 = vcmp.eq.s32.totalorder %v6405_v28, %v7556_v4 }
  0xf0   :  { %v2202_v59 = vpack.c.bf16 %v5280_v53, %v5279_v19  ;;  %v5183_v11 = vsel %vm1405_vm4, 1.0, %v6308_v41  ;;  %v5184_v40 = vsel %vm1406_vm5, 1.0, %v6308_v41  ;;  %vm1859_vm6 = vcmp.eq.s32.totalorder %v6402_v27, %v7564_v1 }
  0xf1   :  { %6018 = vmatpush3.bf16.msra.mxu1 %v2273_v57  ;;  %v1764_v49 = vpack.c.bf16 %v5184_v40, %v5183_v11  ;;  %vm1860_vm7 = vcmp.eq.s32.totalorder %v6405_v28, %v7564_v1  ;;  %v5311_v10 = vsel %vm1859_vm6, 1.0, %v6308_v41  ;;  %vm1357_vm8 = vcmp.eq.s32.totalorder %v6408_v29, %v7556_v4 }
  0xf2   :  { %v2266_v47 = vadd.bf16 %v2202_v59, %v1748_v32  ;;  %v5312_v62 = vsel %vm1860_vm7, 1.0, %v6308_v41  ;;  %vm1358_vm9 = vcmp.eq.s32.totalorder %v6411_v30, %v7556_v4  ;;  %v5135_v60 = vsel %vm1357_vm8, 1.0, %v6308_v41 }
  0xf3   :  { %v2218_v51 = vpack.c.bf16 %v5312_v62, %v5311_v10  ;;  %v5136_v48 = vsel %vm1358_vm9, 1.0, %v6308_v41  ;;  %vm1811_vm10 = vcmp.eq.s32.totalorder %v6408_v29, %v7564_v1  ;;  %vm1812_vm11 = vcmp.eq.s32.totalorder %v6411_v30, %v7564_v1 }
  0xf4   :  { %5997 = vmatprep.subr.bf16.mxu0 %v2266_v47  ;;  %v1740_v19 = vpack.c.bf16 %v5136_v48, %v5135_v60  ;;  %v5263_v57 = vsel %vm1811_vm10, 1.0, %v6308_v41  ;;  %v5264_v32 = vsel %vm1812_vm11, 1.0, %v6308_v41  ;;  %vm1389_vm12 = vcmp.eq.s32.totalorder %v6414_v31, %v7556_v4 }
  0xf5   :  { %v2282_v53 = vadd.bf16 %v2218_v51, %v1764_v49  ;;  %v2194_v59 = vpack.c.bf16 %v5264_v32, %v5263_v57  ;;  %vm1390_vm13 = vcmp.eq.s32.totalorder %v6421_v34, %v7556_v4  ;;  %v5167_v11 = vsel %vm1389_vm12, 1.0, %v6308_v41 }
  0xf6   :  { %v5168_v40 = vsel %vm1390_vm13, 1.0, %v6308_v41  ;;  %vm1843_vm14 = vcmp.eq.s32.totalorder %v6414_v31, %v7564_v1  ;;  %vm1844_vm15 = vcmp.eq.s32.totalorder %v6421_v34, %v7564_v1  ;;  %vm1375_vm0 = vcmp.eq.s32.totalorder %v6424_v35, %v7556_v4 }
  0xf7   :  { %6019 = vmatprep.subr.bf16.mxu1 %v2282_v53  ;;  %v2258_v10 = vadd.bf16 %v2194_v59, %v1740_v19  ;;  %v1756_v49 = vpack.c.bf16 %v5168_v40, %v5167_v11  ;;  %v5295_v47 = vsel %vm1843_vm14, 1.0, %v6308_v41  ;;  %v5296_v62 = vsel %vm1844_vm15, 1.0, %v6308_v41 }
  0xf8   :  { %v2210_v60 = vpack.c.bf16 %v5296_v62, %v5295_v47  ;;  %vm1376_vm1 = vcmp.eq.s32.totalorder %v6427_v36, %v7556_v4  ;;  %v5153_v51 = vsel %vm1375_vm0, 1.0, %v6308_v41  ;;  %vm1829_vm2 = vcmp.eq.s32.totalorder %v6424_v35, %v7564_v1 }
  0xf9   :  { %5998 = vmatpush3.bf16.msra.mxu0 %v2258_v10  ;;  %v5154_v48 = vsel %vm1376_vm1, 1.0, %v6308_v41  ;;  %vm1830_vm3 = vcmp.eq.s32.totalorder %v6427_v36, %v7564_v1  ;;  %v5281_v19 = vsel %vm1829_vm2, 1.0, %v6308_v41  ;;  %vm1407_vm4 = vcmp.eq.s32.totalorder %v6430_v37, %v7556_v4 }
  0xfa   :  { %v2274_v57 = vadd.bf16 %v2210_v60, %v1756_v49  ;;  %v1749_v32 = vpack.c.bf16 %v5154_v48, %v5153_v51  ;;  %v5282_v53 = vsel %vm1830_vm3, 1.0, %v6308_v41  ;;  %vm1408_vm5 = vcmp.eq.s32.totalorder %v6433_v38, %v7556_v4 }
  0xfb   :  { %v2203_v59 = vpack.c.bf16 %v5282_v53, %v5281_v19  ;;  %v5185_v11 = vsel %vm1407_vm4, 1.0, %v6308_v41  ;;  %v5186_v40 = vsel %vm1408_vm5, 1.0, %v6308_v41  ;;  %vm1861_vm6 = vcmp.eq.s32.totalorder %v6430_v37, %v7564_v1 }
  0xfc   :  { %6020 = vmatpush3.bf16.msra.mxu1 %v2274_v57  ;;  %v1765_v10 = vpack.c.bf16 %v5186_v40, %v5185_v11  ;;  %vm1862_vm7 = vcmp.eq.s32.totalorder %v6433_v38, %v7564_v1  ;;  %v5313_v49 = vsel %vm1861_vm6, 1.0, %v6308_v41  ;;  %vm1359_vm8 = vcmp.eq.s32.totalorder %v6436_v39, %v7556_v4 }
  0xfd   :  { %v2267_v47 = vadd.bf16 %v2203_v59, %v1749_v32  ;;  %v5314_v62 = vsel %vm1862_vm7, 1.0, %v6308_v41  ;;  %vm1360_vm9 = vcmp.eq.s32.totalorder %v6560_v42, %v7556_v4  ;;  %v5137_v60 = vsel %vm1359_vm8, 1.0, %v6308_v41 }
  0xfe   :  { %v2219_v51 = vpack.c.bf16 %v5314_v62, %v5313_v49  ;;  %v5138_v48 = vsel %vm1360_vm9, 1.0, %v6308_v41  ;;  %vm1813_vm10 = vcmp.eq.s32.totalorder %v6436_v39, %v7564_v1  ;;  %vm1814_vm11 = vcmp.eq.s32.totalorder %v6560_v42, %v7564_v1 }
  0xff   :  { %5999 = vmatprep.subr.bf16.mxu0 %v2267_v47  ;;  %v1741_v19 = vpack.c.bf16 %v5138_v48, %v5137_v60  ;;  %v5265_v57 = vsel %vm1813_vm10, 1.0, %v6308_v41  ;;  %v5266_v32 = vsel %vm1814_vm11, 1.0, %v6308_v41  ;;  %vm1391_vm12 = vcmp.eq.s32.totalorder %v6576_v50, %v7556_v4 }
 0x100   :  { %v2283_v53 = vadd.bf16 %v2219_v51, %v1765_v10  ;;  %v2195_v59 = vpack.c.bf16 %v5266_v32, %v5265_v57  ;;  %vm1392_vm13 = vcmp.eq.s32.totalorder %v6579_v54, %v7556_v4  ;;  %v5169_v11 = vsel %vm1391_vm12, 1.0, %v6308_v41 }
 0x101   :  { %v5170_v40 = vsel %vm1392_vm13, 1.0, %v6308_v41  ;;  %vm1845_vm14 = vcmp.eq.s32.totalorder %v6576_v50, %v7564_v1  ;;  %vm1846_vm15 = vcmp.eq.s32.totalorder %v6579_v54, %v7564_v1  ;;  %vm1377_vm0 = vcmp.eq.s32.totalorder %v6586_v55, %v7556_v4 }
 0x102   :  { %6021 = vmatprep.subr.bf16.mxu1 %v2283_v53  ;;  %v2259_v49 = vadd.bf16 %v2195_v59, %v1741_v19  ;;  %v1757_v10 = vpack.c.bf16 %v5170_v40, %v5169_v11  ;;  %v5297_v47 = vsel %vm1845_vm14, 1.0, %v6308_v41  ;;  %v5298_v62 = vsel %vm1846_vm15, 1.0, %v6308_v41 }
 0x103   :  { %v2211_v60 = vpack.c.bf16 %v5298_v62, %v5297_v47  ;;  %vm1378_vm1 = vcmp.eq.s32.totalorder %v6589_v56, %v7556_v4  ;;  %v5155_v51 = vsel %vm1377_vm0, 1.0, %v6308_v41  ;;  %vm1831_vm2 = vcmp.eq.s32.totalorder %v6586_v55, %v7564_v1 }
 0x104   :  { %6000 = vmatpush3.bf16.msra.mxu0 %v2259_v49  ;;  %v5156_v48 = vsel %vm1378_vm1, 1.0, %v6308_v41  ;;  %vm1832_vm3 = vcmp.eq.s32.totalorder %v6589_v56, %v7564_v1  ;;  %v5283_v19 = vsel %vm1831_vm2, 1.0, %v6308_v41  ;;  %vm1409_vm4 = vcmp.eq.s32.totalorder %v6610_v2, %v7556_v4 }
 0x105   :  { %v2275_v57 = vadd.bf16 %v2211_v60, %v1757_v10  ;;  %v1750_v32 = vpack.c.bf16 %v5156_v48, %v5155_v51  ;;  %v5284_v53 = vsel %vm1832_vm3, 1.0, %v6308_v41  ;;  %vm1410_vm5 = vcmp.eq.s32.totalorder %v6615_v24, %v7556_v4 }
 0x106   :  { %v2204_v59 = vpack.c.bf16 %v5284_v53, %v5283_v19  ;;  %v5187_v11 = vsel %vm1409_vm4, 1.0, %v6308_v41  ;;  %v5188_v40 = vsel %vm1410_vm5, 1.0, %v6308_v41  ;;  %vm1863_vm6 = vcmp.eq.s32.totalorder %v6610_v2, %v7564_v1 }
 0x107   :  { %6022 = vmatpush3.bf16.msra.mxu1 %v2275_v57  ;;  %v1766_v49 = vpack.c.bf16 %v5188_v40, %v5187_v11  ;;  %vm1864_vm7 = vcmp.eq.s32.totalorder %v6615_v24, %v7564_v1  ;;  %v5315_v10 = vsel %vm1863_vm6, 1.0, %v6308_v41  ;;  %vm1361_vm8 = vcmp.eq.s32.totalorder %v6624_v43, %v7556_v4 }
 0x108   :  { %v2268_v47 = vadd.bf16 %v2204_v59, %v1750_v32  ;;  %v5316_v62 = vsel %vm1864_vm7, 1.0, %v6308_v41  ;;  %vm1362_vm9 = vcmp.eq.s32.totalorder %v6627_v44, %v7556_v4  ;;  %v5139_v60 = vsel %vm1361_vm8, 1.0, %v6308_v41 }
 0x109   :  { %v2220_v51 = vpack.c.bf16 %v5316_v62, %v5315_v10  ;;  %v5140_v48 = vsel %vm1362_vm9, 1.0, %v6308_v41  ;;  %vm1815_vm10 = vcmp.eq.s32.totalorder %v6624_v43, %v7564_v1  ;;  %vm1816_vm11 = vcmp.eq.s32.totalorder %v6627_v44, %v7564_v1 }
 0x10a   :  { %6001 = vmatprep.subr.bf16.mxu0 %v2268_v47  ;;  %v1742_v19 = vpack.c.bf16 %v5140_v48, %v5139_v60  ;;  %v5267_v57 = vsel %vm1815_vm10, 1.0, %v6308_v41  ;;  %v5268_v32 = vsel %vm1816_vm11, 1.0, %v6308_v41  ;;  %vm1393_vm12 = vcmp.eq.s32.totalorder %v6634_v46, %v7556_v4 }
 0x10b   :  { %v2284_v53 = vadd.bf16 %v2220_v51, %v1766_v49  ;;  %v2196_v59 = vpack.c.bf16 %v5268_v32, %v5267_v57  ;;  %vm1394_vm13 = vcmp.eq.s32.totalorder %v6649_v58, %v7556_v4  ;;  %v5171_v11 = vsel %vm1393_vm12, 1.0, %v6308_v41 }
 0x10c   :  { %v5172_v40 = vsel %vm1394_vm13, 1.0, %v6308_v41  ;;  %vm1847_vm14 = vcmp.eq.s32.totalorder %v6634_v46, %v7564_v1  ;;  %vm1848_vm15 = vcmp.eq.s32.totalorder %v6649_v58, %v7564_v1  ;;  %vm1379_vm0 = vcmp.eq.s32.totalorder %v6665_v3, %v7556_v4 }
 0x10d   :  { %6023 = vmatprep.subr.bf16.mxu1 %v2284_v53  ;;  %v2260_v10 = vadd.bf16 %v2196_v59, %v1742_v19  ;;  %v1758_v49 = vpack.c.bf16 %v5172_v40, %v5171_v11  ;;  %v5299_v47 = vsel %vm1847_vm14, 1.0, %v6308_v41  ;;  %v5300_v62 = vsel %vm1848_vm15, 1.0, %v6308_v41 }
 0x10e   :  { %v2212_v60 = vpack.c.bf16 %v5300_v62, %v5299_v47  ;;  %vm1380_vm1 = vcmp.eq.s32.totalorder %v6669_v16, %v7556_v4  ;;  %v5157_v51 = vsel %vm1379_vm0, 1.0, %v6308_v41  ;;  %vm1833_vm2 = vcmp.eq.s32.totalorder %v6665_v3, %v7564_v1 }
 0x10f   :  { %6002 = vmatpush3.bf16.msra.mxu0 %v2260_v10  ;;  %v5158_v48 = vsel %vm1380_vm1, 1.0, %v6308_v41  ;;  %vm1834_vm3 = vcmp.eq.s32.totalorder %v6669_v16, %v7564_v1  ;;  %v5285_v19 = vsel %vm1833_vm2, 1.0, %v6308_v41  ;;  %vm1411_vm4 = vcmp.eq.s32.totalorder %v6676_v33, %v7556_v4 }
 0x110   :  { %v2276_v57 = vadd.bf16 %v2212_v60, %v1758_v49  ;;  %v1751_v32 = vpack.c.bf16 %v5158_v48, %v5157_v51  ;;  %v5286_v53 = vsel %vm1834_vm3, 1.0, %v6308_v41  ;;  %vm1412_vm5 = vcmp.eq.s32.totalorder %v6687_v52, %v7556_v4 }
 0x111   :  { %v2205_v59 = vpack.c.bf16 %v5286_v53, %v5285_v19  ;;  %v5189_v11 = vsel %vm1411_vm4, 1.0, %v6308_v41  ;;  %v5190_v40 = vsel %vm1412_vm5, 1.0, %v6308_v41  ;;  %vm1865_vm6 = vcmp.eq.s32.totalorder %v6676_v33, %v7564_v1 }
 0x112   :  { %6024 = vmatpush3.bf16.msra.mxu1 %v2276_v57  ;;  %v1767_v10 = vpack.c.bf16 %v5190_v40, %v5189_v11  ;;  %vm1866_vm7 = vcmp.eq.s32.totalorder %v6687_v52, %v7564_v1  ;;  %v5317_v49 = vsel %vm1865_vm6, 1.0, %v6308_v41  ;;  %vm1363_vm8 = vcmp.eq.s32.totalorder %v6702_v0, %v7556_v4  ;;  %v10478_v11 = vld [vmem:[#allocation12_spill] sm:$0xff] }
 0x113   :  { %v2269_v47 = vadd.bf16 %v2205_v59, %v1751_v32  ;;  %v5318_v62 = vsel %vm1866_vm7, 1.0, %v6308_v41  ;;  %vm1364_vm9 = vcmp.eq.s32.totalorder %v6705_v8, %v7556_v4  ;;  %v5141_v60 = vsel %vm1363_vm8, 1.0, %v6308_v41 }
 0x114   :  { %v2221_v51 = vpack.c.bf16 %v5318_v62, %v5317_v49  ;;  %v5142_v48 = vsel %vm1364_vm9, 1.0, %v6308_v41  ;;  %vm1817_vm10 = vcmp.eq.s32.totalorder %v6702_v0, %v7564_v1  ;;  %vm1818_vm11 = vcmp.eq.s32.totalorder %v6705_v8, %v7564_v1 }
 0x115   :  { %6003 = vmatprep.subr.bf16.mxu0 %v2269_v47  ;;  %v1743_v19 = vpack.c.bf16 %v5142_v48, %v5141_v60  ;;  %v5269_v57 = vsel %vm1817_vm10, 1.0, %v6308_v41  ;;  %v5270_v32 = vsel %vm1818_vm11, 1.0, %v6308_v41  ;;  %vm1395_vm12 = vcmp.eq.s32.totalorder %v6708_v9, %v7556_v4  ;;  %v10479_v47 = vld [vmem:[#allocation13_spill] sm:$0xff] }
 0x116   :  { %v2285_v53 = vadd.bf16 %v2221_v51, %v1767_v10  ;;  %v2197_v59 = vpack.c.bf16 %v5270_v32, %v5269_v57  ;;  %vm1396_vm13 = vcmp.eq.s32.totalorder %v10478_v11, %v7556_v4  ;;  %v5173_v40 = vsel %vm1395_vm12, 1.0, %v6308_v41  ;;  %v10480_v57 = vld [vmem:[#allocation14_spill] sm:$0xff] }
 0x117   :  { %v5174_v49 = vsel %vm1396_vm13, 1.0, %v6308_v41  ;;  %vm1849_vm14 = vcmp.eq.s32.totalorder %v6708_v9, %v7564_v1  ;;  %vm1850_vm15 = vcmp.eq.s32.totalorder %v10478_v11, %v7564_v1  ;;  %vm1381_vm0 = vcmp.eq.s32.totalorder %v10479_v47, %v7556_v4 }
 0x118   :  { %6025 = vmatprep.subr.bf16.mxu1 %v2285_v53  ;;  %v2261_v62 = vadd.bf16 %v2197_v59, %v1743_v19  ;;  %v1759_v10 = vpack.c.bf16 %v5174_v49, %v5173_v40  ;;  %v5301_v60 = vsel %vm1849_vm14, 1.0, %v6308_v41  ;;  %v5302_v51 = vsel %vm1850_vm15, 1.0, %v6308_v41  ;;  %v10481_v53 = vld [vmem:[#allocation15_spill] sm:$0xff] }
 0x119   :  { %v2213_v48 = vpack.c.bf16 %v5302_v51, %v5301_v60  ;;  %vm1382_vm1 = vcmp.eq.s32.totalorder %v10480_v57, %v7556_v4  ;;  %v5159_v32 = vsel %vm1381_vm0, 1.0, %v6308_v41  ;;  %vm1835_vm2 = vcmp.eq.s32.totalorder %v10479_v47, %v7564_v1  ;;  %v10482_v60 = vld [vmem:[#allocation16_spill] sm:$0xff] }
 0x11a   :  { %6004 = vmatpush3.bf16.msra.mxu0 %v2261_v62  ;;  %v5160_v11 = vsel %vm1382_vm1, 1.0, %v6308_v41  ;;  %vm1836_vm3 = vcmp.eq.s32.totalorder %v10480_v57, %v7564_v1  ;;  %v5287_v19 = vsel %vm1835_vm2, 1.0, %v6308_v41  ;;  %vm1413_vm4 = vcmp.eq.s32.totalorder %v10481_v53, %v7556_v4 }
 0x11b   :  { %v2277_v59 = vadd.bf16 %v2213_v48, %v1759_v10  ;;  %v1752_v40 = vpack.c.bf16 %v5160_v11, %v5159_v32  ;;  %v5288_v49 = vsel %vm1836_vm3, 1.0, %v6308_v41  ;;  %vm1414_vm5 = vcmp.eq.s32.totalorder %v10482_v60, %v7556_v4  ;;  %v10483_v10 = vld [vmem:[#allocation17_spill] sm:$0xff] }
 0x11c   :  { %v2206_v51 = vpack.c.bf16 %v5288_v49, %v5287_v19  ;;  %v5191_v62 = vsel %vm1413_vm4, 1.0, %v6308_v41  ;;  %v5192_v47 = vsel %vm1414_vm5, 1.0, %v6308_v41  ;;  %vm1867_vm6 = vcmp.eq.s32.totalorder %v10481_v53, %v7564_v1  ;;  %v10484_v19 = vld [vmem:[#allocation18_spill] sm:$0xff] }
 0x11d   :  { %6026 = vmatpush3.bf16.msra.mxu1 %v2277_v59  ;;  %v1768_v57 = vpack.c.bf16 %v5192_v47, %v5191_v62  ;;  %vm1868_vm7 = vcmp.eq.s32.totalorder %v10482_v60, %v7564_v1  ;;  %v5319_v11 = vsel %vm1867_vm6, 1.0, %v6308_v41  ;;  %vm1365_vm8 = vcmp.eq.s32.totalorder %v10483_v10, %v7556_v4  ;;  %v10485_v62 = vld [vmem:[#allocation19_spill] sm:$0xff] }
 0x11e   :  { %v2270_v48 = vadd.bf16 %v2206_v51, %v1752_v40  ;;  %v5320_v32 = vsel %vm1868_vm7, 1.0, %v6308_v41  ;;  %vm1366_vm9 = vcmp.eq.s32.totalorder %v10484_v19, %v7556_v4  ;;  %v5143_v49 = vsel %vm1365_vm8, 1.0, %v6308_v41 }
 0x11f   :  { %v2222_v9 = vpack.c.bf16 %v5320_v32, %v5319_v11  ;;  %v5144_v59 = vsel %vm1366_vm9, 1.0, %v6308_v41  ;;  %vm1819_vm10 = vcmp.eq.s32.totalorder %v10483_v10, %v7564_v1  ;;  %vm1820_vm11 = vcmp.eq.s32.totalorder %v10484_v19, %v7564_v1  ;;  %v10486_v11 = vld [vmem:[#allocation20_spill] sm:$0xff] }
 0x120   :  { %6005 = vmatprep.subr.bf16.mxu0 %v2270_v48  ;;  %v1744_v47 = vpack.c.bf16 %v5144_v59, %v5143_v49  ;;  %v5271_v40 = vsel %vm1819_vm10, 1.0, %v6308_v41  ;;  %v5272_v51 = vsel %vm1820_vm11, 1.0, %v6308_v41  ;;  %vm1397_vm12 = vcmp.eq.s32.totalorder %v10485_v62, %v7556_v4  ;;  %v10487_v48 = vld [vmem:[#allocation21_spill] sm:$0xff] }
 0x121   :  { %v2286_v60 = vadd.bf16 %v2222_v9, %v1768_v57  ;;  %v2198_v53 = vpack.c.bf16 %v5272_v51, %v5271_v40  ;;  %vm1398_vm13 = vcmp.eq.s32.totalorder %v10486_v11, %v7556_v4  ;;  %v5175_v32 = vsel %vm1397_vm12, 1.0, %v6308_v41  ;;  %v10488_v51 = vld [vmem:[#allocation22_spill] sm:$0xff] }
 0x122   :  { %v5176_v10 = vsel %vm1398_vm13, 1.0, %v6308_v41  ;;  %vm1851_vm14 = vcmp.eq.s32.totalorder %v10485_v62, %v7564_v1  ;;  %vm1852_vm15 = vcmp.eq.s32.totalorder %v10486_v11, %v7564_v1  ;;  %vm1383_vm0 = vcmp.eq.s32.totalorder %v10487_v48, %v7556_v4 }
 0x123   :  { %6027 = vmatprep.subr.bf16.mxu1 %v2286_v60  ;;  %v2262_v49 = vadd.bf16 %v2198_v53, %v1744_v47  ;;  %v1760_v9 = vpack.c.bf16 %v5176_v10, %v5175_v32  ;;  %v5303_v57 = vsel %vm1851_vm14, 1.0, %v6308_v41  ;;  %v5304_v59 = vsel %vm1852_vm15, 1.0, %v6308_v41  ;;  %v10489_v60 = vld [vmem:[#allocation23_spill] sm:$0xff] }
 0x124   :  { %v2214_v40 = vpack.c.bf16 %v5304_v59, %v5303_v57  ;;  %vm1384_vm1 = vcmp.eq.s32.totalorder %v10488_v51, %v7556_v4  ;;  %v5161_v19 = vsel %vm1383_vm0, 1.0, %v6308_v41  ;;  %vm1837_vm2 = vcmp.eq.s32.totalorder %v10487_v48, %v7564_v1  ;;  %v10490_v57 = vld [vmem:[#allocation24_spill] sm:$0xff] }
 0x125   :  { %6006 = vmatpush3.bf16.msra.mxu0 %v2262_v49  ;;  %v5162_v11 = vsel %vm1384_vm1, 1.0, %v6308_v41  ;;  %vm1838_vm3 = vcmp.eq.s32.totalorder %v10488_v51, %v7564_v1  ;;  %v5289_v53 = vsel %vm1837_vm2, 1.0, %v6308_v41  ;;  %vm1415_vm4 = vcmp.eq.s32.totalorder %v10489_v60, %v7556_v4 }
 0x126   :  { %v2278_v10 = vadd.bf16 %v2214_v40, %v1760_v9  ;;  %v1753_v47 = vpack.c.bf16 %v5162_v11, %v5161_v19  ;;  %v5290_v32 = vsel %vm1838_vm3, 1.0, %v6308_v41  ;;  %vm1416_vm5 = vcmp.eq.s32.totalorder %v10490_v57, %v7556_v4  ;;  %v10491_v11 = vld [vmem:[#allocation25_spill] sm:$0xff] }
 0x127   :  { %v2207_v59 = vpack.c.bf16 %v5290_v32, %v5289_v53  ;;  %v5193_v49 = vsel %vm1415_vm4, 1.0, %v6308_v41  ;;  %v5194_v48 = vsel %vm1416_vm5, 1.0, %v6308_v41  ;;  %vm1869_vm6 = vcmp.eq.s32.totalorder %v10489_v60, %v7564_v1  ;;  %v10492_v53 = vld [vmem:[#allocation26_spill] sm:$0xff] }
 0x128   :  { %6028 = vmatpush3.bf16.msra.mxu1 %v2278_v10  ;;  %v1769_v51 = vpack.c.bf16 %v5194_v48, %v5193_v49  ;;  %vm1870_vm7 = vcmp.eq.s32.totalorder %v10490_v57, %v7564_v1  ;;  %v5321_v19 = vsel %vm1869_vm6, 1.0, %v6308_v41  ;;  %vm1367_vm8 = vcmp.eq.s32.totalorder %v10491_v11, %v7556_v4  ;;  %v10493_v49 = vld [vmem:[#allocation27_spill] sm:$0xff] }
 0x129   :  { %v2271_v9 = vadd.bf16 %v2207_v59, %v1753_v47  ;;  %v5322_v40 = vsel %vm1870_vm7, 1.0, %v6308_v41  ;;  %vm1368_vm9 = vcmp.eq.s32.totalorder %v10492_v53, %v7556_v4  ;;  %v5145_v32 = vsel %vm1367_vm8, 1.0, %v6308_v41 }
 0x12a   :  { %v2223_v62 = vpack.c.bf16 %v5322_v40, %v5321_v19  ;;  %v5146_v10 = vsel %vm1368_vm9, 1.0, %v6308_v41  ;;  %vm1821_vm10 = vcmp.eq.s32.totalorder %v10491_v11, %v7564_v1  ;;  %vm1822_vm11 = vcmp.eq.s32.totalorder %v10492_v53, %v7564_v1  ;;  %v10494_v19 = vld [vmem:[#allocation28_spill] sm:$0xff] }
 0x12b   :  { %6007 = vmatprep.subr.bf16.mxu0 %v2271_v9  ;;  %v1745_v48 = vpack.c.bf16 %v5146_v10, %v5145_v32  ;;  %v5273_v47 = vsel %vm1821_vm10, 1.0, %v6308_v41  ;;  %v5274_v59 = vsel %vm1822_vm11, 1.0, %v6308_v41  ;;  %vm1399_vm12 = vcmp.eq.s32.totalorder %v10493_v49, %v7556_v4  ;;  %v10495_v9 = vld [vmem:[#allocation29_spill] sm:$0xff] }
 0x12c   :  { %v2287_v57 = vadd.bf16 %v2223_v62, %v1769_v51  ;;  %v2199_v60 = vpack.c.bf16 %v5274_v59, %v5273_v47  ;;  %vm1400_vm13 = vcmp.eq.s32.totalorder %v10494_v19, %v7556_v4  ;;  %v5177_v40 = vsel %vm1399_vm12, 1.0, %v6308_v41  ;;  %v10496_v59 = vld [vmem:[#allocation30_spill] sm:$0xff] }
 0x12d   :  { %v5178_v11 = vsel %vm1400_vm13, 1.0, %v6308_v41  ;;  %vm1853_vm14 = vcmp.eq.s32.totalorder %v10493_v49, %v7564_v1  ;;  %vm1854_vm15 = vcmp.eq.s32.totalorder %v10494_v19, %v7564_v1  ;;  %vm1385_vm0 = vcmp.eq.s32.totalorder %v10495_v9, %v7556_v4 }
 0x12e   :  { %6029 = vmatprep.subr.bf16.mxu1 %v2287_v57  ;;  %v2263_v32 = vadd.bf16 %v2199_v60, %v1745_v48  ;;  %v1761_v62 = vpack.c.bf16 %v5178_v11, %v5177_v40  ;;  %v5305_v51 = vsel %vm1853_vm14, 1.0, %v6308_v41  ;;  %v5306_v10 = vsel %vm1854_vm15, 1.0, %v6308_v41  ;;  %v10497_v57 = vld [vmem:[#allocation31_spill] sm:$0xff] }
 0x12f   :  { %v2215_v47 = vpack.c.bf16 %v5306_v10, %v5305_v51  ;;  %vm1386_vm1 = vcmp.eq.s32.totalorder %v10496_v59, %v7556_v4  ;;  %v5163_v53 = vsel %vm1385_vm0, 1.0, %v6308_v41  ;;  %vm1839_vm2 = vcmp.eq.s32.totalorder %v10495_v9, %v7564_v1  ;;  %v10498_v51 = vld [vmem:[#allocation32_spill] sm:$0xff] }
 0x130   :  { %6008 = vmatpush3.bf16.msra.mxu0 %v2263_v32  ;;  %v5164_v19 = vsel %vm1386_vm1, 1.0, %v6308_v41  ;;  %vm1840_vm3 = vcmp.eq.s32.totalorder %v10496_v59, %v7564_v1  ;;  %v5291_v60 = vsel %vm1839_vm2, 1.0, %v6308_v41  ;;  %vm1417_vm4 = vcmp.eq.s32.totalorder %v10497_v57, %v7556_v4 }
 0x131   :  { %v2279_v11 = vadd.bf16 %v2215_v47, %v1761_v62  ;;  %v1754_v48 = vpack.c.bf16 %v5164_v19, %v5163_v53  ;;  %v5292_v40 = vsel %vm1840_vm3, 1.0, %v6308_v41  ;;  %vm1418_vm5 = vcmp.eq.s32.totalorder %v10498_v51, %v7556_v4  ;;  %v10499_v19 = vld [vmem:[#allocation33_spill] sm:$0xff] }
 0x132   :  { %v2208_v10 = vpack.c.bf16 %v5292_v40, %v5291_v60  ;;  %v5195_v32 = vsel %vm1417_vm4, 1.0, %v6308_v41  ;;  %v5196_v9 = vsel %vm1418_vm5, 1.0, %v6308_v41  ;;  %vm1871_vm6 = vcmp.eq.s32.totalorder %v10497_v57, %v7564_v1  ;;  %v10500_v60 = vld [vmem:[#allocation34_spill] sm:$0xff] }
 0x133   :  { %6030 = vmatpush3.bf16.msra.mxu1 %v2279_v11  ;;  %v1770_v59 = vpack.c.bf16 %v5196_v9, %v5195_v32  ;;  %vm1872_vm7 = vcmp.eq.s32.totalorder %v10498_v51, %v7564_v1  ;;  %v5323_v53 = vsel %vm1871_vm6, 1.0, %v6308_v41  ;;  %vm1369_vm8 = vcmp.eq.s32.totalorder %v10499_v19, %v7556_v4  ;;  %v10501_v32 = vld [vmem:[#allocation35_spill] sm:$0xff] }
 0x134   :  { %v2272_v62 = vadd.bf16 %v2208_v10, %v1754_v48  ;;  %v5324_v47 = vsel %vm1872_vm7, 1.0, %v6308_v41  ;;  %vm1370_vm9 = vcmp.eq.s32.totalorder %v10500_v60, %v7556_v4  ;;  %v5147_v40 = vsel %vm1369_vm8, 1.0, %v6308_v41 }
 0x135   :  { %v2224_v49 = vpack.c.bf16 %v5324_v47, %v5323_v53  ;;  %v5148_v11 = vsel %vm1370_vm9, 1.0, %v6308_v41  ;;  %vm1823_vm10 = vcmp.eq.s32.totalorder %v10499_v19, %v7564_v1  ;;  %vm1824_vm11 = vcmp.eq.s32.totalorder %v10500_v60, %v7564_v1  ;;  %v10502_v53 = vld [vmem:[#allocation36_spill] sm:$0xff] }
 0x136   :  { %6009 = vmatprep.subr.bf16.mxu0 %v2272_v62  ;;  %v1746_v9 = vpack.c.bf16 %v5148_v11, %v5147_v40  ;;  %v5275_v48 = vsel %vm1823_vm10, 1.0, %v6308_v41  ;;  %v5276_v10 = vsel %vm1824_vm11, 1.0, %v6308_v41  ;;  %vm1401_vm12 = vcmp.eq.s32.totalorder %v10501_v32, %v7556_v4  ;;  %v10503_v62 = vld [vmem:[#allocation37_spill] sm:$0xff] }
 0x137   :  { %v2288_v51 = vadd.bf16 %v2224_v49, %v1770_v59  ;;  %v2200_v57 = vpack.c.bf16 %v5276_v10, %v5275_v48  ;;  %vm1402_vm13 = vcmp.eq.s32.totalorder %v10502_v53, %v7556_v4  ;;  %v5179_v47 = vsel %vm1401_vm12, 1.0, %v6308_v41  ;;  %v10504_v10 = vld [vmem:[#allocation38_spill] sm:$0xff] }
 0x138   :  { %v5180_v19 = vsel %vm1402_vm13, 1.0, %v6308_v41  ;;  %vm1855_vm14 = vcmp.eq.s32.totalorder %v10501_v32, %v7564_v1  ;;  %vm1856_vm15 = vcmp.eq.s32.totalorder %v10502_v53, %v7564_v1  ;;  %vm1435_vm0 = vcmp.eq.s32.totalorder %v10503_v62, %v7556_v4 }
 0x139   :  { %6031 = vmatprep.subr.bf16.mxu1 %v2288_v51  ;;  %v2264_v40 = vadd.bf16 %v2200_v57, %v1746_v9  ;;  %v1762_v49 = vpack.c.bf16 %v5180_v19, %v5179_v47  ;;  %v5307_v59 = vsel %vm1855_vm14, 1.0, %v6308_v41  ;;  %v5308_v11 = vsel %vm1856_vm15, 1.0, %v6308_v41  ;;  %v10505_v51 = vld [vmem:[#allocation39_spill] sm:$0xff] }
 0x13a   :  { %v2216_v48 = vpack.c.bf16 %v5308_v11, %v5307_v59  ;;  %vm1436_vm1 = vcmp.eq.s32.totalorder %v10504_v10, %v7556_v4  ;;  %v5213_v60 = vsel %vm1435_vm0, 1.0, %v6308_v41  ;;  %vm1889_vm2 = vcmp.eq.s32.totalorder %v10503_v62, %v7564_v1  ;;  %v10506_v59 = vld [vmem:[#allocation40_spill] sm:$0xff] }
 0x13b   :  { %6010 = vmatpush3.bf16.msra.mxu0 %v2264_v40  ;;  %v5214_v53 = vsel %vm1436_vm1, 1.0, %v6308_v41  ;;  %vm1890_vm3 = vcmp.eq.s32.totalorder %v10504_v10, %v7564_v1  ;;  %v5341_v57 = vsel %vm1889_vm2, 1.0, %v6308_v41  ;;  %vm1467_vm4 = vcmp.eq.s32.totalorder %v10505_v51, %v7556_v4  ;;  %v10507_v10 = vld [vmem:[#allocation7_spill] sm:$0xff] }
 0x13c   :  { %v2280_v19 = vadd.bf16 %v2216_v48, %v1762_v49  ;;  %v1779_v9 = vpack.c.bf16 %v5214_v53, %v5213_v60  ;;  %v5342_v47 = vsel %vm1890_vm3, 1.0, %v6308_v41  ;;  %vm1468_vm5 = vcmp.eq.s32.totalorder %v10506_v59, %v7556_v4  ;;  %v10508_v53 = vld [vmem:[#allocation41_spill] sm:$0xff] }
 0x13d   :  { %v2233_v11 = vpack.c.bf16 %v5342_v47, %v5341_v57  ;;  %v5245_v40 = vsel %vm1467_vm4, 1.0, %v6308_v41  ;;  %v5246_v62 = vsel %vm1468_vm5, 1.0, %v6308_v41  ;;  %vm1921_vm6 = vcmp.eq.s32.totalorder %v10505_v51, %v7564_v1  ;;  %v10509_v57 = vld [vmem:[#allocation42_spill] sm:$0xff] }
 0x13e   :  { %6032 = vmatpush3.bf16.msra.mxu1 %v2280_v19  ;;  %2354 = vmatmul.mubr.bf16.vlgmr.msra.gmra.mrb[8].mxu0 %v10507_v10  ;;  %v1795_v32 = vpack.c.bf16 %v5246_v62, %v5245_v40  ;;  %vm1922_vm7 = vcmp.eq.s32.totalorder %v10506_v59, %v7564_v1  ;;  %v5373_v60 = vsel %vm1921_vm6, 1.0, %v6308_v41  ;;  %vm1419_vm8 = vcmp.eq.s32.totalorder %v10508_v53, %v7556_v4  ;;  %v10510_v40 = vld [vmem:[#allocation8_spill] sm:$0xff]  ;;  %v10511_v59 = vld [vmem:[#allocation43_spill] sm:$0xff] }
 0x13f   :  { %v2297_v49 = vadd.bf16 %v2233_v11, %v1779_v9  ;;  %v5374_v48 = vsel %vm1922_vm7, 1.0, %v6308_v41  ;;  %vm1420_vm9 = vcmp.eq.s32.totalorder %v10509_v57, %v7556_v4  ;;  %v5197_v47 = vsel %vm1419_vm8, 1.0, %v6308_v41  ;;  %2433 = vmatprep.mubr.bf16.mxu0 %v7539_v61  ;;  %v10512_v61 = vld [vmem:[#allocation44_spill] sm:$0xff] }
 0x140   :  { %v2249_v19 = vpack.c.bf16 %v5374_v48, %v5373_v60  ;;  %v5198_v62 = vsel %vm1420_vm9, 1.0, %v6308_v41  ;;  %vm1873_vm10 = vcmp.eq.s32.totalorder %v10508_v53, %v7564_v1  ;;  %vm1874_vm11 = vcmp.eq.s32.totalorder %v10509_v57, %v7564_v1 }
 0x141   :  { %2394 = vmatmul.mubr.bf16.vlgmr.msra.gmra.mrb[8].mxu1 %v10510_v40  ;;  %6039 = vmatprep.subr.bf16.mxu0 %v2297_v49  ;;  %v1771_v9 = vpack.c.bf16 %v5198_v62, %v5197_v47  ;;  %v5325_v11 = vsel %vm1873_vm10, 1.0, %v6308_v41  ;;  %v5326_v10 = vsel %vm1874_vm11, 1.0, %v6308_v41  ;;  %vm1451_vm12 = vcmp.eq.s32.totalorder %v10511_v59, %v7556_v4  ;;  %v10513_v49 = vld [vmem:[#allocation45_spill] sm:$0xff] }
 0x142   :  { %v2313_v60 = vadd.bf16 %v2249_v19, %v1795_v32  ;;  %v2225_v48 = vpack.c.bf16 %v5326_v10, %v5325_v11  ;;  %vm1452_vm13 = vcmp.eq.s32.totalorder %v10512_v61, %v7556_v4  ;;  %v5229_v53 = vsel %vm1451_vm12, 1.0, %v6308_v41  ;;  %2473 = vmatprep.mubr.bf16.mxu1 %v7542_v45  ;;  %v10514_v11 = vld [vmem:[#allocation46_spill] sm:$0xff] }
 0x143   :  { %v5230_v40 = vsel %vm1452_vm13, 1.0, %v6308_v41  ;;  %vm1905_vm14 = vcmp.eq.s32.totalorder %v10511_v59, %v7564_v1  ;;  %vm1906_vm15 = vcmp.eq.s32.totalorder %v10512_v61, %v7564_v1  ;;  %vm1437_vm0 = vcmp.eq.s32.totalorder %v10513_v49, %v7556_v4 }
 0x144   :  { %6061 = vmatprep.subr.bf16.mxu1 %v2313_v60  ;;  %v2289_v32 = vadd.bf16 %v2225_v48, %v1771_v9  ;;  %v1787_v10 = vpack.c.bf16 %v5230_v40, %v5229_v53  ;;  %v5357_v47 = vsel %vm1905_vm14, 1.0, %v6308_v41  ;;  %v5358_v19 = vsel %vm1906_vm15, 1.0, %v6308_v41  ;;  %v10515_v40 = vld [vmem:[#allocation47_spill] sm:$0xff] }
 0x145   :  { %v2241_v62 = vpack.c.bf16 %v5358_v19, %v5357_v47  ;;  %vm1438_vm1 = vcmp.eq.s32.totalorder %v10514_v11, %v7556_v4  ;;  %v5215_v45 = vsel %vm1437_vm0, 1.0, %v6308_v41  ;;  %vm1891_vm2 = vcmp.eq.s32.totalorder %v10513_v49, %v7564_v1  ;;  %v10516_v47 = vld [vmem:[#allocation48_spill] sm:$0xff] }
 0x146   :  { %6040 = vmatpush3.bf16.msra.mxu0 %v2289_v32  ;;  %v5216_v61 = vsel %vm1438_vm1, 1.0, %v6308_v41  ;;  %vm1892_vm3 = vcmp.eq.s32.totalorder %v10514_v11, %v7564_v1  ;;  %v5343_v53 = vsel %vm1891_vm2, 1.0, %v6308_v41  ;;  %vm1469_vm4 = vcmp.eq.s32.totalorder %v10515_v40, %v7556_v4 }
 0x147   :  { %v2305_v9 = vadd.bf16 %v2241_v62, %v1787_v10  ;;  %v1780_v60 = vpack.c.bf16 %v5216_v61, %v5215_v45  ;;  %v5344_v48 = vsel %vm1892_vm3, 1.0, %v6308_v41  ;;  %vm1470_vm5 = vcmp.eq.s32.totalorder %v10516_v47, %v7556_v4  ;;  %v10517_v61 = vld [vmem:[#allocation49_spill] sm:$0xff] }
 0x148   :  { %v2234_v19 = vpack.c.bf16 %v5344_v48, %v5343_v53  ;;  %v5247_v32 = vsel %vm1469_vm4, 1.0, %v6308_v41  ;;  %v5248_v49 = vsel %vm1470_vm5, 1.0, %v6308_v41  ;;  %vm1923_vm6 = vcmp.eq.s32.totalorder %v10515_v40, %v7564_v1  ;;  %v10518_v53 = vld [vmem:[#allocation50_spill] sm:$0xff] }
 0x149   :  { %6062 = vmatpush3.bf16.msra.mxu1 %v2305_v9  ;;  %v1796_v11 = vpack.c.bf16 %v5248_v49, %v5247_v32  ;;  %vm1924_vm7 = vcmp.eq.s32.totalorder %v10516_v47, %v7564_v1  ;;  %v5375_v45 = vsel %vm1923_vm6, 1.0, %v6308_v41  ;;  %vm1421_vm8 = vcmp.eq.s32.totalorder %v10517_v61, %v7556_v4  ;;  %v10519_v32 = vld [vmem:[#allocation51_spill] sm:$0xff] }
 0x14a   :  { %v2298_v10 = vadd.bf16 %v2234_v19, %v1780_v60  ;;  %v5376_v62 = vsel %vm1924_vm7, 1.0, %v6308_v41  ;;  %vm1422_vm9 = vcmp.eq.s32.totalorder %v10518_v53, %v7556_v4  ;;  %v5199_v48 = vsel %vm1421_vm8, 1.0, %v6308_v41 }
 0x14b   :  { %v2250_v59 = vpack.c.bf16 %v5376_v62, %v5375_v45  ;;  %v5200_v9 = vsel %vm1422_vm9, 1.0, %v6308_v41  ;;  %vm1875_vm10 = vcmp.eq.s32.totalorder %v10517_v61, %v7564_v1  ;;  %vm1876_vm11 = vcmp.eq.s32.totalorder %v10518_v53, %v7564_v1  ;;  %v10520_v45 = vld [vmem:[#allocation52_spill] sm:$0xff] }
 0x14c   :  { %6041 = vmatprep.subr.bf16.mxu0 %v2298_v10  ;;  %v1772_v49 = vpack.c.bf16 %v5200_v9, %v5199_v48  ;;  %v5327_v60 = vsel %vm1875_vm10, 1.0, %v6308_v41  ;;  %v5328_v19 = vsel %vm1876_vm11, 1.0, %v6308_v41  ;;  %vm1453_vm12 = vcmp.eq.s32.totalorder %v10519_v32, %v7556_v4  ;;  %v10521_v10 = vld [vmem:[#allocation53_spill] sm:$0xff] }
 0x14d   :  { %v2314_v47 = vadd.bf16 %v2250_v59, %v1796_v11  ;;  %v2226_v40 = vpack.c.bf16 %v5328_v19, %v5327_v60  ;;  %vm1454_vm13 = vcmp.eq.s32.totalorder %v10520_v45, %v7556_v4  ;;  %v5231_v62 = vsel %vm1453_vm12, 1.0, %v6308_v41  ;;  %v10522_v19 = vld [vmem:[#allocation54_spill] sm:$0xff] }
 0x14e   :  { %v5232_v61 = vsel %vm1454_vm13, 1.0, %v6308_v41  ;;  %vm1907_vm14 = vcmp.eq.s32.totalorder %v10519_v32, %v7564_v1  ;;  %vm1908_vm15 = vcmp.eq.s32.totalorder %v10520_v45, %v7564_v1  ;;  %vm1439_vm0 = vcmp.eq.s32.totalorder %v10521_v10, %v7556_v4 }
 0x14f   :  { %6063 = vmatprep.subr.bf16.mxu1 %v2314_v47  ;;  %v2290_v48 = vadd.bf16 %v2226_v40, %v1772_v49  ;;  %v1788_v59 = vpack.c.bf16 %v5232_v61, %v5231_v62  ;;  %v5359_v11 = vsel %vm1907_vm14, 1.0, %v6308_v41  ;;  %v5360_v9 = vsel %vm1908_vm15, 1.0, %v6308_v41  ;;  %v10523_v47 = vld [vmem:[#allocation55_spill] sm:$0xff] }
 0x150   :  { %v2242_v60 = vpack.c.bf16 %v5360_v9, %v5359_v11  ;;  %vm1440_vm1 = vcmp.eq.s32.totalorder %v10522_v19, %v7556_v4  ;;  %v5217_v53 = vsel %vm1439_vm0, 1.0, %v6308_v41  ;;  %vm1893_vm2 = vcmp.eq.s32.totalorder %v10521_v10, %v7564_v1  ;;  %v10524_v11 = vld [vmem:[#allocation56_spill] sm:$0xff] }
 0x151   :  { %6042 = vmatpush3.bf16.msra.mxu0 %v2290_v48  ;;  %v5218_v45 = vsel %vm1440_vm1, 1.0, %v6308_v41  ;;  %vm1894_vm3 = vcmp.eq.s32.totalorder %v10522_v19, %v7564_v1  ;;  %v5345_v40 = vsel %vm1893_vm2, 1.0, %v6308_v41  ;;  %vm1471_vm4 = vcmp.eq.s32.totalorder %v10523_v47, %v7556_v4 }
 0x152   :  { %v2306_v61 = vadd.bf16 %v2242_v60, %v1788_v59  ;;  %v1781_v49 = vpack.c.bf16 %v5218_v45, %v5217_v53  ;;  %v5346_v62 = vsel %vm1894_vm3, 1.0, %v6308_v41  ;;  %vm1472_vm5 = vcmp.eq.s32.totalorder %v10524_v11, %v7556_v4  ;;  %v10525_v45 = vld [vmem:[#allocation57_spill] sm:$0xff] }
 0x153   :  { %v2235_v9 = vpack.c.bf16 %v5346_v62, %v5345_v40  ;;  %v5249_v48 = vsel %vm1471_vm4, 1.0, %v6308_v41  ;;  %v5250_v10 = vsel %vm1472_vm5, 1.0, %v6308_v41  ;;  %vm1925_vm6 = vcmp.eq.s32.totalorder %v10523_v47, %v7564_v1  ;;  %v10526_v40 = vld [vmem:[#allocation58_spill] sm:$0xff] }
 0x154   :  { %6064 = vmatpush3.bf16.msra.mxu1 %v2306_v61  ;;  %v1797_v19 = vpack.c.bf16 %v5250_v10, %v5249_v48  ;;  %vm1926_vm7 = vcmp.eq.s32.totalorder %v10524_v11, %v7564_v1  ;;  %v5377_v53 = vsel %vm1925_vm6, 1.0, %v6308_v41  ;;  %vm1423_vm8 = vcmp.eq.s32.totalorder %v10525_v45, %v7556_v4  ;;  %v10527_v48 = vld [vmem:[#allocation59_spill] sm:$0xff] }
 0x155   :  { %v2299_v59 = vadd.bf16 %v2235_v9, %v1781_v49  ;;  %v5378_v60 = vsel %vm1926_vm7, 1.0, %v6308_v41  ;;  %vm1424_vm9 = vcmp.eq.s32.totalorder %v10526_v40, %v7556_v4  ;;  %v5201_v62 = vsel %vm1423_vm8, 1.0, %v6308_v41 }
 0x156   :  { %v2251_v32 = vpack.c.bf16 %v5378_v60, %v5377_v53  ;;  %v5202_v61 = vsel %vm1424_vm9, 1.0, %v6308_v41  ;;  %vm1877_vm10 = vcmp.eq.s32.totalorder %v10525_v45, %v7564_v1  ;;  %vm1878_vm11 = vcmp.eq.s32.totalorder %v10526_v40, %v7564_v1  ;;  %v10528_v53 = vld [vmem:[#allocation60_spill] sm:$0xff] }
 0x157   :  { %6043 = vmatprep.subr.bf16.mxu0 %v2299_v59  ;;  %v1773_v10 = vpack.c.bf16 %v5202_v61, %v5201_v62  ;;  %v5329_v49 = vsel %vm1877_vm10, 1.0, %v6308_v41  ;;  %v5330_v9 = vsel %vm1878_vm11, 1.0, %v6308_v41  ;;  %vm1455_vm12 = vcmp.eq.s32.totalorder %v10527_v48, %v7556_v4  ;;  %v10529_v59 = vld [vmem:[#allocation61_spill] sm:$0xff] }
 0x158   :  { %v2315_v11 = vadd.bf16 %v2251_v32, %v1797_v19  ;;  %v2227_v47 = vpack.c.bf16 %v5330_v9, %v5329_v49  ;;  %vm1456_vm13 = vcmp.eq.s32.totalorder %v10528_v53, %v7556_v4  ;;  %v5233_v60 = vsel %vm1455_vm12, 1.0, %v6308_v41  ;;  %v10530_v9 = vld [vmem:[#allocation62_spill] sm:$0xff] }
 0x159   :  { %v5234_v45 = vsel %vm1456_vm13, 1.0, %v6308_v41  ;;  %vm1909_vm14 = vcmp.eq.s32.totalorder %v10527_v48, %v7564_v1  ;;  %vm1910_vm15 = vcmp.eq.s32.totalorder %v10528_v53, %v7564_v1  ;;  %vm1441_vm0 = vcmp.eq.s32.totalorder %v10529_v59, %v7556_v4 }
 0x15a   :  { %6065 = vmatprep.subr.bf16.mxu1 %v2315_v11  ;;  %v2291_v62 = vadd.bf16 %v2227_v47, %v1773_v10  ;;  %v1789_v32 = vpack.c.bf16 %v5234_v45, %v5233_v60  ;;  %v5361_v19 = vsel %vm1909_vm14, 1.0, %v6308_v41  ;;  %v5362_v61 = vsel %vm1910_vm15, 1.0, %v6308_v41  ;;  %v10531_v11 = vld [vmem:[#allocation63_spill] sm:$0xff] }
 0x15b   :  { %v2243_v49 = vpack.c.bf16 %v5362_v61, %v5361_v19  ;;  %vm1442_vm1 = vcmp.eq.s32.totalorder %v10530_v9, %v7556_v4  ;;  %v5219_v40 = vsel %vm1441_vm0, 1.0, %v6308_v41  ;;  %vm1895_vm2 = vcmp.eq.s32.totalorder %v10529_v59, %v7564_v1  ;;  %v10532_v19 = vld [vmem:[#allocation64_spill] sm:$0xff] }
 0x15c   :  { %6044 = vmatpush3.bf16.msra.mxu0 %v2291_v62  ;;  %v5220_v53 = vsel %vm1442_vm1, 1.0, %v6308_v41  ;;  %vm1896_vm3 = vcmp.eq.s32.totalorder %v10530_v9, %v7564_v1  ;;  %v5347_v47 = vsel %vm1895_vm2, 1.0, %v6308_v41  ;;  %vm1473_vm4 = vcmp.eq.s32.totalorder %v10531_v11, %v7556_v4 }
 0x15d   :  { %v2307_v45 = vadd.bf16 %v2243_v49, %v1789_v32  ;;  %v1782_v10 = vpack.c.bf16 %v5220_v53, %v5219_v40  ;;  %v5348_v60 = vsel %vm1896_vm3, 1.0, %v6308_v41  ;;  %vm1474_vm5 = vcmp.eq.s32.totalorder %v10532_v19, %v7556_v4  ;;  %v10533_v53 = vld [vmem:[#allocation65_spill] sm:$0xff] }
 0x15e   :  { %v2236_v61 = vpack.c.bf16 %v5348_v60, %v5347_v47  ;;  %v5251_v62 = vsel %vm1473_vm4, 1.0, %v6308_v41  ;;  %v5252_v59 = vsel %vm1474_vm5, 1.0, %v6308_v41  ;;  %vm1927_vm6 = vcmp.eq.s32.totalorder %v10531_v11, %v7564_v1  ;;  %v10534_v47 = vld [vmem:[#allocation66_spill] sm:$0xff] }
 0x15f   :  { %6066 = vmatpush3.bf16.msra.mxu1 %v2307_v45  ;;  %v1798_v9 = vpack.c.bf16 %v5252_v59, %v5251_v62  ;;  %vm1928_vm7 = vcmp.eq.s32.totalorder %v10532_v19, %v7564_v1  ;;  %v5379_v40 = vsel %vm1927_vm6, 1.0, %v6308_v41  ;;  %vm1425_vm8 = vcmp.eq.s32.totalorder %v10533_v53, %v7556_v4  ;;  %v10535_v62 = vld [vmem:[#allocation67_spill] sm:$0xff] }
 0x160   :  { %v2300_v32 = vadd.bf16 %v2236_v61, %v1782_v10  ;;  %v5380_v49 = vsel %vm1928_vm7, 1.0, %v6308_v41  ;;  %vm1426_vm9 = vcmp.eq.s32.totalorder %v10534_v47, %v7556_v4  ;;  %v5203_v60 = vsel %vm1425_vm8, 1.0, %v6308_v41 }
 0x161   :  { %v2252_v48 = vpack.c.bf16 %v5380_v49, %v5379_v40  ;;  %v5204_v45 = vsel %vm1426_vm9, 1.0, %v6308_v41  ;;  %vm1879_vm10 = vcmp.eq.s32.totalorder %v10533_v53, %v7564_v1  ;;  %vm1880_vm11 = vcmp.eq.s32.totalorder %v10534_v47, %v7564_v1  ;;  %v10536_v40 = vld [vmem:[#allocation68_spill] sm:$0xff] }
 0x162   :  { %6045 = vmatprep.subr.bf16.mxu0 %v2300_v32  ;;  %v1774_v59 = vpack.c.bf16 %v5204_v45, %v5203_v60  ;;  %v5331_v10 = vsel %vm1879_vm10, 1.0, %v6308_v41  ;;  %v5332_v61 = vsel %vm1880_vm11, 1.0, %v6308_v41  ;;  %vm1457_vm12 = vcmp.eq.s32.totalorder %v10535_v62, %v7556_v4  ;;  %v10537_v32 = vld [vmem:[#allocation69_spill] sm:$0xff] }
 0x163   :  { %v2316_v19 = vadd.bf16 %v2252_v48, %v1798_v9  ;;  %v2228_v11 = vpack.c.bf16 %v5332_v61, %v5331_v10  ;;  %vm1458_vm13 = vcmp.eq.s32.totalorder %v10536_v40, %v7556_v4  ;;  %v5235_v49 = vsel %vm1457_vm12, 1.0, %v6308_v41  ;;  %v10538_v61 = vld [vmem:[#allocation70_spill] sm:$0xff] }
 0x164   :  { %v5236_v53 = vsel %vm1458_vm13, 1.0, %v6308_v41  ;;  %vm1911_vm14 = vcmp.eq.s32.totalorder %v10535_v62, %v7564_v1  ;;  %vm1912_vm15 = vcmp.eq.s32.totalorder %v10536_v40, %v7564_v1  ;;  %vm1443_vm0 = vcmp.eq.s32.totalorder %v10537_v32, %v7556_v4 }
 0x165   :  { %6067 = vmatprep.subr.bf16.mxu1 %v2316_v19  ;;  %v2292_v60 = vadd.bf16 %v2228_v11, %v1774_v59  ;;  %v1790_v48 = vpack.c.bf16 %v5236_v53, %v5235_v49  ;;  %v5363_v9 = vsel %vm1911_vm14, 1.0, %v6308_v41  ;;  %v5364_v45 = vsel %vm1912_vm15, 1.0, %v6308_v41  ;;  %v10539_v19 = vld [vmem:[#allocation71_spill] sm:$0xff] }
 0x166   :  { %v2244_v10 = vpack.c.bf16 %v5364_v45, %v5363_v9  ;;  %vm1444_vm1 = vcmp.eq.s32.totalorder %v10538_v61, %v7556_v4  ;;  %v5221_v47 = vsel %vm1443_vm0, 1.0, %v6308_v41  ;;  %vm1897_vm2 = vcmp.eq.s32.totalorder %v10537_v32, %v7564_v1  ;;  %v10540_v9 = vld [vmem:[#allocation72_spill] sm:$0xff] }
 0x167   :  { %6046 = vmatpush3.bf16.msra.mxu0 %v2292_v60  ;;  %v5222_v40 = vsel %vm1444_vm1, 1.0, %v6308_v41  ;;  %vm1898_vm3 = vcmp.eq.s32.totalorder %v10538_v61, %v7564_v1  ;;  %v5349_v11 = vsel %vm1897_vm2, 1.0, %v6308_v41  ;;  %vm1475_vm4 = vcmp.eq.s32.totalorder %v10539_v19, %v7556_v4 }
 0x168   :  { %v2308_v53 = vadd.bf16 %v2244_v10, %v1790_v48  ;;  %v1783_v59 = vpack.c.bf16 %v5222_v40, %v5221_v47  ;;  %v5350_v49 = vsel %vm1898_vm3, 1.0, %v6308_v41  ;;  %vm1476_vm5 = vcmp.eq.s32.totalorder %v10540_v9, %v7556_v4  ;;  %v10541_v40 = vld [vmem:[#allocation73_spill] sm:$0xff] }
 0x169   :  { %v2237_v45 = vpack.c.bf16 %v5350_v49, %v5349_v11  ;;  %v5253_v60 = vsel %vm1475_vm4, 1.0, %v6308_v41  ;;  %v5254_v32 = vsel %vm1476_vm5, 1.0, %v6308_v41  ;;  %vm1929_vm6 = vcmp.eq.s32.totalorder %v10539_v19, %v7564_v1  ;;  %v10542_v11 = vld [vmem:[#allocation74_spill] sm:$0xff] }
 0x16a   :  { %6068 = vmatpush3.bf16.msra.mxu1 %v2308_v53  ;;  %v1799_v61 = vpack.c.bf16 %v5254_v32, %v5253_v60  ;;  %vm1930_vm7 = vcmp.eq.s32.totalorder %v10540_v9, %v7564_v1  ;;  %v5381_v47 = vsel %vm1929_vm6, 1.0, %v6308_v41  ;;  %vm1427_vm8 = vcmp.eq.s32.totalorder %v10541_v40, %v7556_v4  ;;  %v10543_v60 = vld [vmem:[#allocation75_spill] sm:$0xff] }
 0x16b   :  { %v2301_v48 = vadd.bf16 %v2237_v45, %v1783_v59  ;;  %v5382_v10 = vsel %vm1930_vm7, 1.0, %v6308_v41  ;;  %vm1428_vm9 = vcmp.eq.s32.totalorder %v10542_v11, %v7556_v4  ;;  %v5205_v49 = vsel %vm1427_vm8, 1.0, %v6308_v41 }
 0x16c   :  { %v2253_v62 = vpack.c.bf16 %v5382_v10, %v5381_v47  ;;  %v5206_v53 = vsel %vm1428_vm9, 1.0, %v6308_v41  ;;  %vm1881_vm10 = vcmp.eq.s32.totalorder %v10541_v40, %v7564_v1  ;;  %vm1882_vm11 = vcmp.eq.s32.totalorder %v10542_v11, %v7564_v1  ;;  %v10544_v47 = vld [vmem:[#allocation76_spill] sm:$0xff] }
 0x16d   :  { %6047 = vmatprep.subr.bf16.mxu0 %v2301_v48  ;;  %v1775_v32 = vpack.c.bf16 %v5206_v53, %v5205_v49  ;;  %v5333_v59 = vsel %vm1881_vm10, 1.0, %v6308_v41  ;;  %v5334_v45 = vsel %vm1882_vm11, 1.0, %v6308_v41  ;;  %vm1459_vm12 = vcmp.eq.s32.totalorder %v10543_v60, %v7556_v4  ;;  %v10545_v48 = vld [vmem:[#allocation77_spill] sm:$0xff] }
 0x16e   :  { %v2317_v9 = vadd.bf16 %v2253_v62, %v1799_v61  ;;  %v2229_v19 = vpack.c.bf16 %v5334_v45, %v5333_v59  ;;  %vm1460_vm13 = vcmp.eq.s32.totalorder %v10544_v47, %v7556_v4  ;;  %v5237_v10 = vsel %vm1459_vm12, 1.0, %v6308_v41  ;;  %v10546_v45 = vld [vmem:[#allocation78_spill] sm:$0xff] }
 0x16f   :  { %v5238_v40 = vsel %vm1460_vm13, 1.0, %v6308_v41  ;;  %vm1913_vm14 = vcmp.eq.s32.totalorder %v10543_v60, %v7564_v1  ;;  %vm1914_vm15 = vcmp.eq.s32.totalorder %v10544_v47, %v7564_v1  ;;  %vm1445_vm0 = vcmp.eq.s32.totalorder %v10545_v48, %v7556_v4 }
 0x170   :  { %6069 = vmatprep.subr.bf16.mxu1 %v2317_v9  ;;  %v2293_v49 = vadd.bf16 %v2229_v19, %v1775_v32  ;;  %v1791_v62 = vpack.c.bf16 %v5238_v40, %v5237_v10  ;;  %v5365_v61 = vsel %vm1913_vm14, 1.0, %v6308_v41  ;;  %v5366_v53 = vsel %vm1914_vm15, 1.0, %v6308_v41  ;;  %v10547_v9 = vld [vmem:[#allocation79_spill] sm:$0xff] }
 0x171   :  { %v2245_v59 = vpack.c.bf16 %v5366_v53, %v5365_v61  ;;  %vm1446_vm1 = vcmp.eq.s32.totalorder %v10546_v45, %v7556_v4  ;;  %v5223_v11 = vsel %vm1445_vm0, 1.0, %v6308_v41  ;;  %vm1899_vm2 = vcmp.eq.s32.totalorder %v10545_v48, %v7564_v1  ;;  %v10548_v61 = vld [vmem:[#allocation80_spill] sm:$0xff] }
 0x172   :  { %6048 = vmatpush3.bf16.msra.mxu0 %v2293_v49  ;;  %v5224_v47 = vsel %vm1446_vm1, 1.0, %v6308_v41  ;;  %vm1900_vm3 = vcmp.eq.s32.totalorder %v10546_v45, %v7564_v1  ;;  %v5351_v19 = vsel %vm1899_vm2, 1.0, %v6308_v41  ;;  %vm1477_vm4 = vcmp.eq.s32.totalorder %v10547_v9, %v7556_v4 }
 0x173   :  { %v2309_v40 = vadd.bf16 %v2245_v59, %v1791_v62  ;;  %v1784_v32 = vpack.c.bf16 %v5224_v47, %v5223_v11  ;;  %v5352_v10 = vsel %vm1900_vm3, 1.0, %v6308_v41  ;;  %vm1478_vm5 = vcmp.eq.s32.totalorder %v10548_v61, %v7556_v4  ;;  %v10549_v47 = vld [vmem:[#allocation81_spill] sm:$0xff] }
 0x174   :  { %v2238_v53 = vpack.c.bf16 %v5352_v10, %v5351_v19  ;;  %v5255_v49 = vsel %vm1477_vm4, 1.0, %v6308_v41  ;;  %v5256_v48 = vsel %vm1478_vm5, 1.0, %v6308_v41  ;;  %vm1931_vm6 = vcmp.eq.s32.totalorder %v10547_v9, %v7564_v1  ;;  %v10550_v19 = vld [vmem:[#allocation82_spill] sm:$0xff] }
 0x175   :  { %6070 = vmatpush3.bf16.msra.mxu1 %v2309_v40  ;;  %v1800_v45 = vpack.c.bf16 %v5256_v48, %v5255_v49  ;;  %vm1932_vm7 = vcmp.eq.s32.totalorder %v10548_v61, %v7564_v1  ;;  %v5383_v11 = vsel %vm1931_vm6, 1.0, %v6308_v41  ;;  %vm1429_vm8 = vcmp.eq.s32.totalorder %v10549_v47, %v7556_v4  ;;  %v10551_v49 = vld [vmem:[#allocation83_spill] sm:$0xff] }
 0x176   :  { %v2302_v62 = vadd.bf16 %v2238_v53, %v1784_v32  ;;  %v5384_v59 = vsel %vm1932_vm7, 1.0, %v6308_v41  ;;  %vm1430_vm9 = vcmp.eq.s32.totalorder %v10550_v19, %v7556_v4  ;;  %v5207_v10 = vsel %vm1429_vm8, 1.0, %v6308_v41 }
 0x177   :  { %v2254_v60 = vpack.c.bf16 %v5384_v59, %v5383_v11  ;;  %v5208_v40 = vsel %vm1430_vm9, 1.0, %v6308_v41  ;;  %vm1883_vm10 = vcmp.eq.s32.totalorder %v10549_v47, %v7564_v1  ;;  %vm1884_vm11 = vcmp.eq.s32.totalorder %v10550_v19, %v7564_v1  ;;  %v10552_v11 = vld [vmem:[#allocation84_spill] sm:$0xff] }
 0x178   :  { %6049 = vmatprep.subr.bf16.mxu0 %v2302_v62  ;;  %v1776_v48 = vpack.c.bf16 %v5208_v40, %v5207_v10  ;;  %v5335_v32 = vsel %vm1883_vm10, 1.0, %v6308_v41  ;;  %v5336_v53 = vsel %vm1884_vm11, 1.0, %v6308_v41  ;;  %vm1461_vm12 = vcmp.eq.s32.totalorder %v10551_v49, %v7556_v4  ;;  %v10553_v62 = vld [vmem:[#allocation85_spill] sm:$0xff] }
 0x179   :  { %v2318_v61 = vadd.bf16 %v2254_v60, %v1800_v45  ;;  %v2230_v9 = vpack.c.bf16 %v5336_v53, %v5335_v32  ;;  %vm1462_vm13 = vcmp.eq.s32.totalorder %v10552_v11, %v7556_v4  ;;  %v5239_v59 = vsel %vm1461_vm12, 1.0, %v6308_v41  ;;  %v10554_v53 = vld [vmem:[#allocation86_spill] sm:$0xff] }
 0x17a   :  { %v5240_v47 = vsel %vm1462_vm13, 1.0, %v6308_v41  ;;  %vm1915_vm14 = vcmp.eq.s32.totalorder %v10551_v49, %v7564_v1  ;;  %vm1916_vm15 = vcmp.eq.s32.totalorder %v10552_v11, %v7564_v1  ;;  %vm1447_vm0 = vcmp.eq.s32.totalorder %v10553_v62, %v7556_v4 }
 0x17b   :  { %6071 = vmatprep.subr.bf16.mxu1 %v2318_v61  ;;  %v2294_v10 = vadd.bf16 %v2230_v9, %v1776_v48  ;;  %v1792_v60 = vpack.c.bf16 %v5240_v47, %v5239_v59  ;;  %v5367_v45 = vsel %vm1915_vm14, 1.0, %v6308_v41  ;;  %v5368_v40 = vsel %vm1916_vm15, 1.0, %v6308_v41  ;;  %v10555_v61 = vld [vmem:[#allocation87_spill] sm:$0xff] }
 0x17c   :  { %v2246_v32 = vpack.c.bf16 %v5368_v40, %v5367_v45  ;;  %vm1448_vm1 = vcmp.eq.s32.totalorder %v10554_v53, %v7556_v4  ;;  %v5225_v19 = vsel %vm1447_vm0, 1.0, %v6308_v41  ;;  %vm1901_vm2 = vcmp.eq.s32.totalorder %v10553_v62, %v7564_v1  ;;  %v10556_v45 = vld [vmem:[#allocation88_spill] sm:$0xff] }
 0x17d   :  { %6050 = vmatpush3.bf16.msra.mxu0 %v2294_v10  ;;  %v5226_v11 = vsel %vm1448_vm1, 1.0, %v6308_v41  ;;  %vm1902_vm3 = vcmp.eq.s32.totalorder %v10554_v53, %v7564_v1  ;;  %v5353_v9 = vsel %vm1901_vm2, 1.0, %v6308_v41  ;;  %vm1479_vm4 = vcmp.eq.s32.totalorder %v10555_v61, %v7556_v4 }
 0x17e   :  { %v2310_v47 = vadd.bf16 %v2246_v32, %v1792_v60  ;;  %v1785_v48 = vpack.c.bf16 %v5226_v11, %v5225_v19  ;;  %v5354_v59 = vsel %vm1902_vm3, 1.0, %v6308_v41  ;;  %vm1480_vm5 = vcmp.eq.s32.totalorder %v10556_v45, %v7556_v4  ;;  %v10557_v11 = vld [vmem:[#allocation89_spill] sm:$0xff] }
 0x17f   :  { %v2239_v40 = vpack.c.bf16 %v5354_v59, %v5353_v9  ;;  %v5257_v10 = vsel %vm1479_vm4, 1.0, %v6308_v41  ;;  %v5258_v62 = vsel %vm1480_vm5, 1.0, %v6308_v41  ;;  %vm1933_vm6 = vcmp.eq.s32.totalorder %v10555_v61, %v7564_v1  ;;  %v10558_v9 = vld [vmem:[#allocation90_spill] sm:$0xff] }
 0x180   :  { %6072 = vmatpush3.bf16.msra.mxu1 %v2310_v47  ;;  %v1801_v53 = vpack.c.bf16 %v5258_v62, %v5257_v10  ;;  %vm1934_vm7 = vcmp.eq.s32.totalorder %v10556_v45, %v7564_v1  ;;  %v5385_v19 = vsel %vm1933_vm6, 1.0, %v6308_v41  ;;  %vm1431_vm8 = vcmp.eq.s32.totalorder %v10557_v11, %v7556_v4  ;;  %v10559_v10 = vld [vmem:[#allocation91_spill] sm:$0xff] }
 0x181   :  { %v2303_v60 = vadd.bf16 %v2239_v40, %v1785_v48  ;;  %v5386_v32 = vsel %vm1934_vm7, 1.0, %v6308_v41  ;;  %vm1432_vm9 = vcmp.eq.s32.totalorder %v10558_v9, %v7556_v4  ;;  %v5209_v59 = vsel %vm1431_vm8, 1.0, %v6308_v41 }
 0x182   :  { %v2255_v49 = vpack.c.bf16 %v5386_v32, %v5385_v19  ;;  %v5210_v47 = vsel %vm1432_vm9, 1.0, %v6308_v41  ;;  %vm1885_vm10 = vcmp.eq.s32.totalorder %v10557_v11, %v7564_v1  ;;  %vm1886_vm11 = vcmp.eq.s32.totalorder %v10558_v9, %v7564_v1  ;;  %v10560_v19 = vld [vmem:[#allocation92_spill] sm:$0xff] }
 0x183   :  { %6051 = vmatprep.subr.bf16.mxu0 %v2303_v60  ;;  %v1777_v62 = vpack.c.bf16 %v5210_v47, %v5209_v59  ;;  %v5337_v48 = vsel %vm1885_vm10, 1.0, %v6308_v41  ;;  %v5338_v40 = vsel %vm1886_vm11, 1.0, %v6308_v41  ;;  %vm1463_vm12 = vcmp.eq.s32.totalorder %v10559_v10, %v7556_v4  ;;  %v10561_v60 = vld [vmem:[#allocation93_spill] sm:$0xff] }
 0x184   :  { %v2319_v45 = vadd.bf16 %v2255_v49, %v1801_v53  ;;  %v2231_v61 = vpack.c.bf16 %v5338_v40, %v5337_v48  ;;  %vm1464_vm13 = vcmp.eq.s32.totalorder %v10560_v19, %v7556_v4  ;;  %v5241_v32 = vsel %vm1463_vm12, 1.0, %v6308_v41  ;;  %v10562_v40 = vld [vmem:[#allocation94_spill] sm:$0xff] }
 0x185   :  { %v5242_v11 = vsel %vm1464_vm13, 1.0, %v6308_v41  ;;  %vm1917_vm14 = vcmp.eq.s32.totalorder %v10559_v10, %v7564_v1  ;;  %vm1918_vm15 = vcmp.eq.s32.totalorder %v10560_v19, %v7564_v1  ;;  %vm1449_vm0 = vcmp.eq.s32.totalorder %v10561_v60, %v7556_v4 }
 0x186   :  { %6073 = vmatprep.subr.bf16.mxu1 %v2319_v45  ;;  %v2295_v59 = vadd.bf16 %v2231_v61, %v1777_v62  ;;  %v1793_v49 = vpack.c.bf16 %v5242_v11, %v5241_v32  ;;  %v5369_v53 = vsel %vm1917_vm14, 1.0, %v6308_v41  ;;  %v5370_v47 = vsel %vm1918_vm15, 1.0, %v6308_v41  ;;  %v10563_v45 = vld [vmem:[#allocation95_spill] sm:$0xff] }
 0x187   :  { %v2247_v48 = vpack.c.bf16 %v5370_v47, %v5369_v53  ;;  %vm1450_vm1 = vcmp.eq.s32.totalorder %v10562_v40, %v7556_v4  ;;  %v5227_v9 = vsel %vm1449_vm0, 1.0, %v6308_v41  ;;  %vm1903_vm2 = vcmp.eq.s32.totalorder %v10561_v60, %v7564_v1  ;;  %v10564_v53 = vld [vmem:[#allocation96_spill] sm:$0xff] }
 0x188   :  { %6052 = vmatpush3.bf16.msra.mxu0 %v2295_v59  ;;  %v5228_v19 = vsel %vm1450_vm1, 1.0, %v6308_v41  ;;  %vm1904_vm3 = vcmp.eq.s32.totalorder %v10562_v40, %v7564_v1  ;;  %v5355_v61 = vsel %vm1903_vm2, 1.0, %v6308_v41  ;;  %vm1481_vm4 = vcmp.eq.s32.totalorder %v10563_v45, %v7556_v4 }
 0x189   :  { %v2311_v11 = vadd.bf16 %v2247_v48, %v1793_v49  ;;  %v1786_v62 = vpack.c.bf16 %v5228_v19, %v5227_v9  ;;  %v5356_v32 = vsel %vm1904_vm3, 1.0, %v6308_v41  ;;  %vm1482_vm5 = vcmp.eq.s32.totalorder %v10564_v53, %v7556_v4  ;;  %v10565_v19 = vld [vmem:[#allocation97_spill] sm:$0xff] }
 0x18a   :  { %v2240_v47 = vpack.c.bf16 %v5356_v32, %v5355_v61  ;;  %v5259_v59 = vsel %vm1481_vm4, 1.0, %v6308_v41  ;;  %v5260_v60 = vsel %vm1482_vm5, 1.0, %v6308_v41  ;;  %vm1935_vm6 = vcmp.eq.s32.totalorder %v10563_v45, %v7564_v1  ;;  %v10566_v61 = vld [vmem:[#allocation98_spill] sm:$0xff] }
 0x18b   :  { %6074 = vmatpush3.bf16.msra.mxu1 %v2311_v11  ;;  %v1802_v40 = vpack.c.bf16 %v5260_v60, %v5259_v59  ;;  %vm1936_vm7 = vcmp.eq.s32.totalorder %v10564_v53, %v7564_v1  ;;  %v5387_v9 = vsel %vm1935_vm6, 1.0, %v6308_v41  ;;  %vm1433_vm8 = vcmp.eq.s32.totalorder %v10565_v19, %v7556_v4  ;;  %v5389_v60 = vld [vmem:[%s10010_s1 + $0x2] sm:$0x1] }
 0x18c   :  { %v2304_v49 = vadd.bf16 %v2240_v47, %v1786_v62  ;;  %v5388_v48 = vsel %vm1936_vm7, 1.0, %v6308_v41  ;;  %vm1434_vm9 = vcmp.eq.s32.totalorder %v10566_v61, %v7556_v4  ;;  %v5211_v32 = vsel %vm1433_vm8, 1.0, %v6308_v41 }
 0x18d   :  { %v2256_v10 = vpack.c.bf16 %v5388_v48, %v5387_v9  ;;  %v5212_v11 = vsel %vm1434_vm9, 1.0, %v6308_v41  ;;  %vm1887_vm10 = vcmp.eq.s32.totalorder %v10565_v19, %v7564_v1  ;;  %vm1888_vm11 = vcmp.eq.s32.totalorder %v10566_v61, %v7564_v1  ;;  %v10567_v9 = vld [vmem:[#allocation99_spill] sm:$0xff]  ;;  %v10568_v19 = vld [vmem:[#allocation100_spill] sm:$0xff] }
 0x18e   :  { %6053 = vmatprep.subr.bf16.mxu0 %v2304_v49  ;;  %v1778_v62 = vpack.c.bf16 %v5212_v11, %v5211_v32  ;;  %v5339_v47 = vsel %vm1887_vm10, 1.0, %v6308_v41  ;;  %v5340_v59 = vsel %vm1888_vm11, 1.0, %v6308_v41  ;;  %vm1465_vm12 = vcmp.eq.s32.totalorder %v10567_v9, %v7556_v4 }
 0x18f   :  { %v2320_v48 = vadd.bf16 %v2256_v10, %v1802_v40  ;;  %v2232_v53 = vpack.c.bf16 %v5340_v59, %v5339_v47  ;;  %vm1466_vm13 = vcmp.eq.s32.totalorder %v10568_v19, %v7556_v4  ;;  %v5243_v61 = vsel %vm1465_vm12, 1.0, %v6308_v41 }
 0x190   :  { %v5244_v45 = vsel %vm1466_vm13, 1.0, %v6308_v41  ;;  %vm1919_vm14 = vcmp.eq.s32.totalorder %v10567_v9, %v7564_v1  ;;  %vm1920_vm15 = vcmp.eq.s32.totalorder %v10568_v19, %v7564_v1  ;;  %v2489_v49 = vunpack.c.0.s8 %v5389_v60 }
 0x191   :  { %6075 = vmatprep.subr.bf16.mxu1 %v2320_v48  ;;  %v2296_v32 = vadd.bf16 %v2232_v53, %v1778_v62  ;;  %v1794_v11 = vpack.c.bf16 %v5244_v45, %v5243_v61  ;;  %v5371_v10 = vsel %vm1919_vm14, 1.0, %v6308_v41  ;;  %v5372_v40 = vsel %vm1920_vm15, 1.0, %v6308_v41  ;;  %v10569_v62 = vld [vmem:[#allocation9_spill] sm:$0xff] }
 0x192   :  { %v2248_v47 = vpack.c.bf16 %v5372_v40, %v5371_v10  ;;  %v2490_v4 = vand.u32 255, %v2489_v49 }
 0x193   :  { %6054 = vmatpush3.bf16.msra.mxu0 %v2296_v32 }
 0x194   :  { %v2312_v59 = vadd.bf16 %v2248_v47, %v1794_v11  ;;  %v2491_v57 = vmul.u32 2, %v2490_v4 }
 0x196   :  { %6076 = vmatpush3.bf16.msra.mxu1 %v2312_v59  ;;  %2434 = vmatmul.mubr.bf16.vlgmr.msra.gmra.mrb[12].mxu0 %v7545_v63  ;;  %v2495_v9 = vrot.slane %v2491_v57, %v6373_v15  ;;  %v2948_v1 = vrot.slane %v2491_v57, %v6376_v17 }
 0x197   :  { %3495 = vmatprep.mubr.bf16.mxu0 %v6352_v5 }
 0x198   :  { %v8342_v45 = vadd.s32 %v2495_v9, %v6370_v14  ;;  %v2949_v53 = vadd.s32 %v2948_v1, %v6370_v14 }
 0x199   :  { %2474 = vmatmul.mubr.bf16.vlgmr.msra.gmra.mrb[12].mxu1 %v7548_v25 }
 0x19a   :  { %vm2513_vm0 = vcmp.eq.s32.totalorder %v6365_v12, %v8342_v45  ;;  %vm2514_vm1 = vcmp.eq.s32.totalorder %v6368_v13, %v8342_v45  ;;  %v8350_v61 = vadd.s32 512, %v2949_v53  ;;  %vm2545_vm2 = vcmp.eq.s32.totalorder %v6379_v18, %v8342_v45  ;;  %3535 = vmatprep.mubr.bf16.mxu1 %v6354_v6 }
 0x19b   :  { %v5406_v57 = vsel %vm2513_vm0, 1.0, %v6308_v41  ;;  %v5407_v60 = vsel %vm2514_vm1, 1.0, %v6308_v41  ;;  %vm2546_vm3 = vcmp.eq.s32.totalorder %v10569_v62, %v8342_v45  ;;  %v5438_v9 = vsel %vm2545_vm2, 1.0, %v6308_v41 }
 0x19c   :  { %v2889_v48 = vpack.c.bf16 %v5407_v60, %v5406_v57  ;;  %vm2967_vm4 = vcmp.eq.s32.totalorder %v6365_v12, %v8350_v61  ;;  %vm2968_vm5 = vcmp.eq.s32.totalorder %v6368_v13, %v8350_v61  ;;  %v5439_v49 = vsel %vm2546_vm3, 1.0, %v6308_v41 }
 0x19d   :  { %v5534_v32 = vsel %vm2967_vm4, 1.0, %v6308_v41  ;;  %v5535_v11 = vsel %vm2968_vm5, 1.0, %v6308_v41  ;;  %v2905_v10 = vpack.c.bf16 %v5439_v49, %v5438_v9  ;;  %vm2999_vm6 = vcmp.eq.s32.totalorder %v6379_v18, %v8350_v61 }
 0x19e   :  { %v3343_v40 = vpack.c.bf16 %v5535_v11, %v5534_v32  ;;  %vm3000_vm7 = vcmp.eq.s32.totalorder %v10569_v62, %v8350_v61  ;;  %v5566_v47 = vsel %vm2999_vm6, 1.0, %v6308_v41  ;;  %vm2497_vm8 = vcmp.eq.s32.totalorder %v6356_v7, %v8342_v45 }
 0x19f   :  { %v5567_v4 = vsel %vm3000_vm7, 1.0, %v6308_v41  ;;  %vm2498_vm9 = vcmp.eq.s32.totalorder %v6385_v20, %v8342_v45  ;;  %v5390_v59 = vsel %vm2497_vm8, 1.0, %v6308_v41  ;;  %vm2951_vm10 = vcmp.eq.s32.totalorder %v6356_v7, %v8350_v61 }
 0x1a0   :  { %v3407_v1 = vadd.bf16 %v3343_v40, %v2889_v48  ;;  %v3359_v53 = vpack.c.bf16 %v5567_v4, %v5566_v47  ;;  %v5391_v57 = vsel %vm2498_vm9, 1.0, %v6308_v41  ;;  %vm2952_vm11 = vcmp.eq.s32.totalorder %v6385_v20, %v8350_v61 }
 0x1a1   :  { %v2881_v60 = vpack.c.bf16 %v5391_v57, %v5390_v59  ;;  %v5518_v9 = vsel %vm2951_vm10, 1.0, %v6308_v41  ;;  %v5519_v49 = vsel %vm2952_vm11, 1.0, %v6308_v41  ;;  %vm2529_vm12 = vcmp.eq.s32.totalorder %v6388_v21, %v8342_v45 }
 0x1a2   :  { %6083 = vmatprep.subr.bf16.mxu0 %v3407_v1  ;;  %v3423_v32 = vadd.bf16 %v3359_v53, %v2905_v10  ;;  %v3335_v11 = vpack.c.bf16 %v5519_v49, %v5518_v9  ;;  %vm2530_vm13 = vcmp.eq.s32.totalorder %v6391_v22, %v8342_v45  ;;  %v5422_v48 = vsel %vm2529_vm12, 1.0, %v6308_v41 }
 0x1a3   :  { %v5423_v40 = vsel %vm2530_vm13, 1.0, %v6308_v41  ;;  %vm2983_vm14 = vcmp.eq.s32.totalorder %v6388_v21, %v8350_v61  ;;  %vm2984_vm15 = vcmp.eq.s32.totalorder %v6391_v22, %v8350_v61  ;;  %vm2515_vm0 = vcmp.eq.s32.totalorder %v6394_v23, %v8342_v45 }
 0x1a4   :  { %6105 = vmatprep.subr.bf16.mxu1 %v3423_v32  ;;  %v3399_v47 = vadd.bf16 %v3335_v11, %v2881_v60  ;;  %v2897_v10 = vpack.c.bf16 %v5423_v40, %v5422_v48  ;;  %v5550_v4 = vsel %vm2983_vm14, 1.0, %v6308_v41  ;;  %v5551_v59 = vsel %vm2984_vm15, 1.0, %v6308_v41 }
 0x1a5   :  { %v3351_v1 = vpack.c.bf16 %v5551_v59, %v5550_v4  ;;  %vm2516_vm1 = vcmp.eq.s32.totalorder %v6399_v26, %v8342_v45  ;;  %v5408_v53 = vsel %vm2515_vm0, 1.0, %v6308_v41  ;;  %vm2969_vm2 = vcmp.eq.s32.totalorder %v6394_v23, %v8350_v61 }
 0x1a6   :  { %6084 = vmatpush3.bf16.msra.mxu0 %v3399_v47  ;;  %v5409_v57 = vsel %vm2516_vm1, 1.0, %v6308_v41  ;;  %vm2970_vm3 = vcmp.eq.s32.totalorder %v6399_v26, %v8350_v61  ;;  %v5536_v60 = vsel %vm2969_vm2, 1.0, %v6308_v41  ;;  %vm2547_vm4 = vcmp.eq.s32.totalorder %v6402_v27, %v8342_v45 }
 0x1a7   :  { %v3415_v9 = vadd.bf16 %v3351_v1, %v2897_v10  ;;  %v2890_v49 = vpack.c.bf16 %v5409_v57, %v5408_v53  ;;  %v5537_v32 = vsel %vm2970_vm3, 1.0, %v6308_v41  ;;  %vm2548_vm5 = vcmp.eq.s32.totalorder %v6405_v28, %v8342_v45 }
 0x1a8   :  { %v3344_v11 = vpack.c.bf16 %v5537_v32, %v5536_v60  ;;  %v5440_v48 = vsel %vm2547_vm4, 1.0, %v6308_v41  ;;  %v5441_v40 = vsel %vm2548_vm5, 1.0, %v6308_v41  ;;  %vm3001_vm6 = vcmp.eq.s32.totalorder %v6402_v27, %v8350_v61 }
 0x1a9   :  { %6106 = vmatpush3.bf16.msra.mxu1 %v3415_v9  ;;  %v2906_v47 = vpack.c.bf16 %v5441_v40, %v5440_v48  ;;  %vm3002_vm7 = vcmp.eq.s32.totalorder %v6405_v28, %v8350_v61  ;;  %v5568_v10 = vsel %vm3001_vm6, 1.0, %v6308_v41  ;;  %vm2499_vm8 = vcmp.eq.s32.totalorder %v6408_v29, %v8342_v45 }
 0x1aa   :  { %v3408_v4 = vadd.bf16 %v3344_v11, %v2890_v49  ;;  %v5569_v59 = vsel %vm3002_vm7, 1.0, %v6308_v41  ;;  %vm2500_vm9 = vcmp.eq.s32.totalorder %v6411_v30, %v8342_v45  ;;  %v5392_v1 = vsel %vm2499_vm8, 1.0, %v6308_v41 }
 0x1ab   :  { %v3360_v53 = vpack.c.bf16 %v5569_v59, %v5568_v10  ;;  %v5393_v57 = vsel %vm2500_vm9, 1.0, %v6308_v41  ;;  %vm2953_vm10 = vcmp.eq.s32.totalorder %v6408_v29, %v8350_v61  ;;  %vm2954_vm11 = vcmp.eq.s32.totalorder %v6411_v30, %v8350_v61 }
 0x1ac   :  { %6085 = vmatprep.subr.bf16.mxu0 %v3408_v4  ;;  %v2882_v60 = vpack.c.bf16 %v5393_v57, %v5392_v1  ;;  %v5520_v9 = vsel %vm2953_vm10, 1.0, %v6308_v41  ;;  %v5521_v49 = vsel %vm2954_vm11, 1.0, %v6308_v41  ;;  %vm2531_vm12 = vcmp.eq.s32.totalorder %v6414_v31, %v8342_v45 }
 0x1ad   :  { %v3424_v32 = vadd.bf16 %v3360_v53, %v2906_v47  ;;  %v3336_v11 = vpack.c.bf16 %v5521_v49, %v5520_v9  ;;  %vm2532_vm13 = vcmp.eq.s32.totalorder %v6421_v34, %v8342_v45  ;;  %v5424_v48 = vsel %vm2531_vm12, 1.0, %v6308_v41 }
 0x1ae   :  { %v5425_v40 = vsel %vm2532_vm13, 1.0, %v6308_v41  ;;  %vm2985_vm14 = vcmp.eq.s32.totalorder %v6414_v31, %v8350_v61  ;;  %vm2986_vm15 = vcmp.eq.s32.totalorder %v6421_v34, %v8350_v61  ;;  %vm2517_vm0 = vcmp.eq.s32.totalorder %v6424_v35, %v8342_v45 }
 0x1af   :  { %6107 = vmatprep.subr.bf16.mxu1 %v3424_v32  ;;  %v3400_v10 = vadd.bf16 %v3336_v11, %v2882_v60  ;;  %v2898_v47 = vpack.c.bf16 %v5425_v40, %v5424_v48  ;;  %v5552_v4 = vsel %vm2985_vm14, 1.0, %v6308_v41  ;;  %v5553_v59 = vsel %vm2986_vm15, 1.0, %v6308_v41 }
 0x1b0   :  { %v3352_v1 = vpack.c.bf16 %v5553_v59, %v5552_v4  ;;  %vm2518_vm1 = vcmp.eq.s32.totalorder %v6427_v36, %v8342_v45  ;;  %v5410_v53 = vsel %vm2517_vm0, 1.0, %v6308_v41  ;;  %vm2971_vm2 = vcmp.eq.s32.totalorder %v6424_v35, %v8350_v61 }
 0x1b1   :  { %6086 = vmatpush3.bf16.msra.mxu0 %v3400_v10  ;;  %v5411_v57 = vsel %vm2518_vm1, 1.0, %v6308_v41  ;;  %vm2972_vm3 = vcmp.eq.s32.totalorder %v6427_v36, %v8350_v61  ;;  %v5538_v60 = vsel %vm2971_vm2, 1.0, %v6308_v41  ;;  %vm2549_vm4 = vcmp.eq.s32.totalorder %v6430_v37, %v8342_v45 }
 0x1b2   :  { %v3416_v9 = vadd.bf16 %v3352_v1, %v2898_v47  ;;  %v2891_v49 = vpack.c.bf16 %v5411_v57, %v5410_v53  ;;  %v5539_v32 = vsel %vm2972_vm3, 1.0, %v6308_v41  ;;  %vm2550_vm5 = vcmp.eq.s32.totalorder %v6433_v38, %v8342_v45 }
 0x1b3   :  { %v3345_v11 = vpack.c.bf16 %v5539_v32, %v5538_v60  ;;  %v5442_v48 = vsel %vm2549_vm4, 1.0, %v6308_v41  ;;  %v5443_v40 = vsel %vm2550_vm5, 1.0, %v6308_v41  ;;  %vm3003_vm6 = vcmp.eq.s32.totalorder %v6430_v37, %v8350_v61 }
 0x1b4   :  { %6108 = vmatpush3.bf16.msra.mxu1 %v3416_v9  ;;  %v2907_v10 = vpack.c.bf16 %v5443_v40, %v5442_v48  ;;  %vm3004_vm7 = vcmp.eq.s32.totalorder %v6433_v38, %v8350_v61  ;;  %v5570_v47 = vsel %vm3003_vm6, 1.0, %v6308_v41  ;;  %vm2501_vm8 = vcmp.eq.s32.totalorder %v6436_v39, %v8342_v45 }
 0x1b5   :  { %v3409_v4 = vadd.bf16 %v3345_v11, %v2891_v49  ;;  %v5571_v59 = vsel %vm3004_vm7, 1.0, %v6308_v41  ;;  %vm2502_vm9 = vcmp.eq.s32.totalorder %v6560_v42, %v8342_v45  ;;  %v5394_v1 = vsel %vm2501_vm8, 1.0, %v6308_v41 }
 0x1b6   :  { %v3361_v53 = vpack.c.bf16 %v5571_v59, %v5570_v47  ;;  %v5395_v57 = vsel %vm2502_vm9, 1.0, %v6308_v41  ;;  %vm2955_vm10 = vcmp.eq.s32.totalorder %v6436_v39, %v8350_v61  ;;  %vm2956_vm11 = vcmp.eq.s32.totalorder %v6560_v42, %v8350_v61 }
 0x1b7   :  { %6087 = vmatprep.subr.bf16.mxu0 %v3409_v4  ;;  %v2883_v60 = vpack.c.bf16 %v5395_v57, %v5394_v1  ;;  %v5522_v9 = vsel %vm2955_vm10, 1.0, %v6308_v41  ;;  %v5523_v49 = vsel %vm2956_vm11, 1.0, %v6308_v41  ;;  %vm2533_vm12 = vcmp.eq.s32.totalorder %v6576_v50, %v8342_v45 }
 0x1b8   :  { %v3425_v32 = vadd.bf16 %v3361_v53, %v2907_v10  ;;  %v3337_v11 = vpack.c.bf16 %v5523_v49, %v5522_v9  ;;  %vm2534_vm13 = vcmp.eq.s32.totalorder %v6579_v54, %v8342_v45  ;;  %v5426_v48 = vsel %vm2533_vm12, 1.0, %v6308_v41 }
 0x1b9   :  { %v5427_v40 = vsel %vm2534_vm13, 1.0, %v6308_v41  ;;  %vm2987_vm14 = vcmp.eq.s32.totalorder %v6576_v50, %v8350_v61  ;;  %vm2988_vm15 = vcmp.eq.s32.totalorder %v6579_v54, %v8350_v61  ;;  %vm2519_vm0 = vcmp.eq.s32.totalorder %v6586_v55, %v8342_v45 }
 0x1ba   :  { %6109 = vmatprep.subr.bf16.mxu1 %v3425_v32  ;;  %v3401_v47 = vadd.bf16 %v3337_v11, %v2883_v60  ;;  %v2899_v10 = vpack.c.bf16 %v5427_v40, %v5426_v48  ;;  %v5554_v4 = vsel %vm2987_vm14, 1.0, %v6308_v41  ;;  %v5555_v59 = vsel %vm2988_vm15, 1.0, %v6308_v41 }
 0x1bb   :  { %v3353_v1 = vpack.c.bf16 %v5555_v59, %v5554_v4  ;;  %vm2520_vm1 = vcmp.eq.s32.totalorder %v6589_v56, %v8342_v45  ;;  %v5412_v53 = vsel %vm2519_vm0, 1.0, %v6308_v41  ;;  %vm2973_vm2 = vcmp.eq.s32.totalorder %v6586_v55, %v8350_v61 }
 0x1bc   :  { %6088 = vmatpush3.bf16.msra.mxu0 %v3401_v47  ;;  %v5413_v57 = vsel %vm2520_vm1, 1.0, %v6308_v41  ;;  %vm2974_vm3 = vcmp.eq.s32.totalorder %v6589_v56, %v8350_v61  ;;  %v5540_v60 = vsel %vm2973_vm2, 1.0, %v6308_v41  ;;  %vm2551_vm4 = vcmp.eq.s32.totalorder %v6610_v2, %v8342_v45 }
 0x1bd   :  { %v3417_v9 = vadd.bf16 %v3353_v1, %v2899_v10  ;;  %v2892_v49 = vpack.c.bf16 %v5413_v57, %v5412_v53  ;;  %v5541_v32 = vsel %vm2974_vm3, 1.0, %v6308_v41  ;;  %vm2552_vm5 = vcmp.eq.s32.totalorder %v6615_v24, %v8342_v45 }
 0x1be   :  { %v3346_v11 = vpack.c.bf16 %v5541_v32, %v5540_v60  ;;  %v5444_v48 = vsel %vm2551_vm4, 1.0, %v6308_v41  ;;  %v5445_v40 = vsel %vm2552_vm5, 1.0, %v6308_v41  ;;  %vm3005_vm6 = vcmp.eq.s32.totalorder %v6610_v2, %v8350_v61 }
 0x1bf   :  { %6110 = vmatpush3.bf16.msra.mxu1 %v3417_v9  ;;  %v2908_v47 = vpack.c.bf16 %v5445_v40, %v5444_v48  ;;  %vm3006_vm7 = vcmp.eq.s32.totalorder %v6615_v24, %v8350_v61  ;;  %v5572_v10 = vsel %vm3005_vm6, 1.0, %v6308_v41  ;;  %vm2503_vm8 = vcmp.eq.s32.totalorder %v6624_v43, %v8342_v45 }
 0x1c0   :  { %v3410_v4 = vadd.bf16 %v3346_v11, %v2892_v49  ;;  %v5573_v59 = vsel %vm3006_vm7, 1.0, %v6308_v41  ;;  %vm2504_vm9 = vcmp.eq.s32.totalorder %v6627_v44, %v8342_v45  ;;  %v5396_v1 = vsel %vm2503_vm8, 1.0, %v6308_v41 }
 0x1c1   :  { %v3362_v53 = vpack.c.bf16 %v5573_v59, %v5572_v10  ;;  %v5397_v57 = vsel %vm2504_vm9, 1.0, %v6308_v41  ;;  %vm2957_vm10 = vcmp.eq.s32.totalorder %v6624_v43, %v8350_v61  ;;  %vm2958_vm11 = vcmp.eq.s32.totalorder %v6627_v44, %v8350_v61 }
 0x1c2   :  { %6089 = vmatprep.subr.bf16.mxu0 %v3410_v4  ;;  %v2884_v60 = vpack.c.bf16 %v5397_v57, %v5396_v1  ;;  %v5524_v9 = vsel %vm2957_vm10, 1.0, %v6308_v41  ;;  %v5525_v49 = vsel %vm2958_vm11, 1.0, %v6308_v41  ;;  %vm2535_vm12 = vcmp.eq.s32.totalorder %v6634_v46, %v8342_v45 }
 0x1c3   :  { %v3426_v32 = vadd.bf16 %v3362_v53, %v2908_v47  ;;  %v3338_v11 = vpack.c.bf16 %v5525_v49, %v5524_v9  ;;  %vm2536_vm13 = vcmp.eq.s32.totalorder %v6649_v58, %v8342_v45  ;;  %v5428_v48 = vsel %vm2535_vm12, 1.0, %v6308_v41 }
 0x1c4   :  { %v5429_v40 = vsel %vm2536_vm13, 1.0, %v6308_v41  ;;  %vm2989_vm14 = vcmp.eq.s32.totalorder %v6634_v46, %v8350_v61  ;;  %vm2990_vm15 = vcmp.eq.s32.totalorder %v6649_v58, %v8350_v61  ;;  %vm2521_vm0 = vcmp.eq.s32.totalorder %v6665_v3, %v8342_v45 }
 0x1c5   :  { %6111 = vmatprep.subr.bf16.mxu1 %v3426_v32  ;;  %v3402_v10 = vadd.bf16 %v3338_v11, %v2884_v60  ;;  %v2900_v47 = vpack.c.bf16 %v5429_v40, %v5428_v48  ;;  %v5556_v4 = vsel %vm2989_vm14, 1.0, %v6308_v41  ;;  %v5557_v59 = vsel %vm2990_vm15, 1.0, %v6308_v41 }
 0x1c6   :  { %v3354_v1 = vpack.c.bf16 %v5557_v59, %v5556_v4  ;;  %vm2522_vm1 = vcmp.eq.s32.totalorder %v6669_v16, %v8342_v45  ;;  %v5414_v53 = vsel %vm2521_vm0, 1.0, %v6308_v41  ;;  %vm2975_vm2 = vcmp.eq.s32.totalorder %v6665_v3, %v8350_v61 }
 0x1c7   :  { %6090 = vmatpush3.bf16.msra.mxu0 %v3402_v10  ;;  %v5415_v57 = vsel %vm2522_vm1, 1.0, %v6308_v41  ;;  %vm2976_vm3 = vcmp.eq.s32.totalorder %v6669_v16, %v8350_v61  ;;  %v5542_v60 = vsel %vm2975_vm2, 1.0, %v6308_v41  ;;  %vm2553_vm4 = vcmp.eq.s32.totalorder %v6676_v33, %v8342_v45 }
 0x1c8   :  { %v3418_v9 = vadd.bf16 %v3354_v1, %v2900_v47  ;;  %v2893_v49 = vpack.c.bf16 %v5415_v57, %v5414_v53  ;;  %v5543_v32 = vsel %vm2976_vm3, 1.0, %v6308_v41  ;;  %vm2554_vm5 = vcmp.eq.s32.totalorder %v6687_v52, %v8342_v45 }
 0x1c9   :  { %v3347_v11 = vpack.c.bf16 %v5543_v32, %v5542_v60  ;;  %v5446_v48 = vsel %vm2553_vm4, 1.0, %v6308_v41  ;;  %v5447_v40 = vsel %vm2554_vm5, 1.0, %v6308_v41  ;;  %vm3007_vm6 = vcmp.eq.s32.totalorder %v6676_v33, %v8350_v61  ;;  %v10570_v32 = vld [vmem:[#allocation11_spill] sm:$0xff] }
 0x1ca   :  { %6112 = vmatpush3.bf16.msra.mxu1 %v3418_v9  ;;  %v2909_v10 = vpack.c.bf16 %v5447_v40, %v5446_v48  ;;  %vm3008_vm7 = vcmp.eq.s32.totalorder %v6687_v52, %v8350_v61  ;;  %v5574_v47 = vsel %vm3007_vm6, 1.0, %v6308_v41  ;;  %vm2505_vm8 = vcmp.eq.s32.totalorder %v6702_v0, %v8342_v45  ;;  %v10571_v40 = vld [vmem:[#allocation12_spill] sm:$0xff] }
 0x1cb   :  { %v3411_v4 = vadd.bf16 %v3347_v11, %v2893_v49  ;;  %v5575_v59 = vsel %vm3008_vm7, 1.0, %v6308_v41  ;;  %vm2506_vm9 = vcmp.eq.s32.totalorder %v6705_v8, %v8342_v45  ;;  %v5398_v1 = vsel %vm2505_vm8, 1.0, %v6308_v41 }
 0x1cc   :  { %v3363_v53 = vpack.c.bf16 %v5575_v59, %v5574_v47  ;;  %v5399_v57 = vsel %vm2506_vm9, 1.0, %v6308_v41  ;;  %vm2959_vm10 = vcmp.eq.s32.totalorder %v6702_v0, %v8350_v61  ;;  %vm2960_vm11 = vcmp.eq.s32.totalorder %v6705_v8, %v8350_v61 }
 0x1cd   :  { %6091 = vmatprep.subr.bf16.mxu0 %v3411_v4  ;;  %v2885_v60 = vpack.c.bf16 %v5399_v57, %v5398_v1  ;;  %v5526_v9 = vsel %vm2959_vm10, 1.0, %v6308_v41  ;;  %v5527_v49 = vsel %vm2960_vm11, 1.0, %v6308_v41  ;;  %vm2537_vm12 = vcmp.eq.s32.totalorder %v10570_v32, %v8342_v45  ;;  %v10572_v4 = vld [vmem:[#allocation13_spill] sm:$0xff] }
 0x1ce   :  { %v3427_v11 = vadd.bf16 %v3363_v53, %v2909_v10  ;;  %v3339_v48 = vpack.c.bf16 %v5527_v49, %v5526_v9  ;;  %vm2538_vm13 = vcmp.eq.s32.totalorder %v10571_v40, %v8342_v45  ;;  %v5430_v47 = vsel %vm2537_vm12, 1.0, %v6308_v41  ;;  %v10573_v49 = vld [vmem:[#allocation14_spill] sm:$0xff] }
 0x1cf   :  { %v5431_v59 = vsel %vm2538_vm13, 1.0, %v6308_v41  ;;  %vm2991_vm14 = vcmp.eq.s32.totalorder %v10570_v32, %v8350_v61  ;;  %vm2992_vm15 = vcmp.eq.s32.totalorder %v10571_v40, %v8350_v61  ;;  %vm2523_vm0 = vcmp.eq.s32.totalorder %v10572_v4, %v8342_v45 }
 0x1d0   :  { %6113 = vmatprep.subr.bf16.mxu1 %v3427_v11  ;;  %v3403_v1 = vadd.bf16 %v3339_v48, %v2885_v60  ;;  %v2901_v10 = vpack.c.bf16 %v5431_v59, %v5430_v47  ;;  %v5558_v53 = vsel %vm2991_vm14, 1.0, %v6308_v41  ;;  %v5559_v57 = vsel %vm2992_vm15, 1.0, %v6308_v41  ;;  %v10574_v11 = vld [vmem:[#allocation15_spill] sm:$0xff] }
 0x1d1   :  { %v3355_v9 = vpack.c.bf16 %v5559_v57, %v5558_v53  ;;  %vm2524_vm1 = vcmp.eq.s32.totalorder %v10573_v49, %v8342_v45  ;;  %v5416_v8 = vsel %vm2523_vm0, 1.0, %v6308_v41  ;;  %vm2977_vm2 = vcmp.eq.s32.totalorder %v10572_v4, %v8350_v61  ;;  %v10575_v53 = vld [vmem:[#allocation16_spill] sm:$0xff] }
 0x1d2   :  { %6092 = vmatpush3.bf16.msra.mxu0 %v3403_v1  ;;  %v5417_v40 = vsel %vm2524_vm1, 1.0, %v6308_v41  ;;  %vm2978_vm3 = vcmp.eq.s32.totalorder %v10573_v49, %v8350_v61  ;;  %v5544_v60 = vsel %vm2977_vm2, 1.0, %v6308_v41  ;;  %vm2555_vm4 = vcmp.eq.s32.totalorder %v10574_v11, %v8342_v45 }
 0x1d3   :  { %v3419_v48 = vadd.bf16 %v3355_v9, %v2901_v10  ;;  %v2894_v47 = vpack.c.bf16 %v5417_v40, %v5416_v8  ;;  %v5545_v59 = vsel %vm2978_vm3, 1.0, %v6308_v41  ;;  %vm2556_vm5 = vcmp.eq.s32.totalorder %v10575_v53, %v8342_v45  ;;  %v10576_v40 = vld [vmem:[#allocation17_spill] sm:$0xff] }
 0x1d4   :  { %v3348_v57 = vpack.c.bf16 %v5545_v59, %v5544_v60  ;;  %v5448_v1 = vsel %vm2555_vm4, 1.0, %v6308_v41  ;;  %v5449_v4 = vsel %vm2556_vm5, 1.0, %v6308_v41  ;;  %vm3009_vm6 = vcmp.eq.s32.totalorder %v10574_v11, %v8350_v61  ;;  %v10577_v60 = vld [vmem:[#allocation18_spill] sm:$0xff] }
 0x1d5   :  { %6114 = vmatpush3.bf16.msra.mxu1 %v3419_v48  ;;  %v2910_v49 = vpack.c.bf16 %v5449_v4, %v5448_v1  ;;  %vm3010_vm7 = vcmp.eq.s32.totalorder %v10575_v53, %v8350_v61  ;;  %v5576_v8 = vsel %vm3009_vm6, 1.0, %v6308_v41  ;;  %vm2507_vm8 = vcmp.eq.s32.totalorder %v10576_v40, %v8342_v45  ;;  %v10578_v1 = vld [vmem:[#allocation19_spill] sm:$0xff] }
 0x1d6   :  { %v3412_v10 = vadd.bf16 %v3348_v57, %v2894_v47  ;;  %v5577_v9 = vsel %vm3010_vm7, 1.0, %v6308_v41  ;;  %vm2508_vm9 = vcmp.eq.s32.totalorder %v10577_v60, %v8342_v45  ;;  %v5400_v59 = vsel %vm2507_vm8, 1.0, %v6308_v41 }
 0x1d7   :  { %v3364_v32 = vpack.c.bf16 %v5577_v9, %v5576_v8  ;;  %v5401_v48 = vsel %vm2508_vm9, 1.0, %v6308_v41  ;;  %vm2961_vm10 = vcmp.eq.s32.totalorder %v10576_v40, %v8350_v61  ;;  %vm2962_vm11 = vcmp.eq.s32.totalorder %v10577_v60, %v8350_v61  ;;  %v10579_v8 = vld [vmem:[#allocation20_spill] sm:$0xff] }
 0x1d8   :  { %6093 = vmatprep.subr.bf16.mxu0 %v3412_v10  ;;  %v2886_v4 = vpack.c.bf16 %v5401_v48, %v5400_v59  ;;  %v5528_v47 = vsel %vm2961_vm10, 1.0, %v6308_v41  ;;  %v5529_v57 = vsel %vm2962_vm11, 1.0, %v6308_v41  ;;  %vm2539_vm12 = vcmp.eq.s32.totalorder %v10578_v1, %v8342_v45  ;;  %v10580_v10 = vld [vmem:[#allocation21_spill] sm:$0xff] }
 0x1d9   :  { %v3428_v53 = vadd.bf16 %v3364_v32, %v2910_v49  ;;  %v3340_v11 = vpack.c.bf16 %v5529_v57, %v5528_v47  ;;  %vm2540_vm13 = vcmp.eq.s32.totalorder %v10579_v8, %v8342_v45  ;;  %v5432_v9 = vsel %vm2539_vm12, 1.0, %v6308_v41  ;;  %v10581_v57 = vld [vmem:[#allocation22_spill] sm:$0xff] }
 0x1da   :  { %v5433_v40 = vsel %vm2540_vm13, 1.0, %v6308_v41  ;;  %vm2993_vm14 = vcmp.eq.s32.totalorder %v10578_v1, %v8350_v61  ;;  %vm2994_vm15 = vcmp.eq.s32.totalorder %v10579_v8, %v8350_v61  ;;  %vm2525_vm0 = vcmp.eq.s32.totalorder %v10580_v10, %v8342_v45 }
 0x1db   :  { %6115 = vmatprep.subr.bf16.mxu1 %v3428_v53  ;;  %v3404_v59 = vadd.bf16 %v3340_v11, %v2886_v4  ;;  %v2902_v32 = vpack.c.bf16 %v5433_v40, %v5432_v9  ;;  %v5560_v49 = vsel %vm2993_vm14, 1.0, %v6308_v41  ;;  %v5561_v48 = vsel %vm2994_vm15, 1.0, %v6308_v41  ;;  %v10582_v53 = vld [vmem:[#allocation23_spill] sm:$0xff] }
 0x1dc   :  { %v3356_v47 = vpack.c.bf16 %v5561_v48, %v5560_v49  ;;  %vm2526_vm1 = vcmp.eq.s32.totalorder %v10581_v57, %v8342_v45  ;;  %v5418_v60 = vsel %vm2525_vm0, 1.0, %v6308_v41  ;;  %vm2979_vm2 = vcmp.eq.s32.totalorder %v10580_v10, %v8350_v61  ;;  %v10583_v49 = vld [vmem:[#allocation24_spill] sm:$0xff] }
 0x1dd   :  { %6094 = vmatpush3.bf16.msra.mxu0 %v3404_v59  ;;  %v5419_v8 = vsel %vm2526_vm1, 1.0, %v6308_v41  ;;  %vm2980_vm3 = vcmp.eq.s32.totalorder %v10581_v57, %v8350_v61  ;;  %v5546_v11 = vsel %vm2979_vm2, 1.0, %v6308_v41  ;;  %vm2557_vm4 = vcmp.eq.s32.totalorder %v10582_v53, %v8342_v45 }
 0x1de   :  { %v3420_v40 = vadd.bf16 %v3356_v47, %v2902_v32  ;;  %v2895_v4 = vpack.c.bf16 %v5419_v8, %v5418_v60  ;;  %v5547_v9 = vsel %vm2980_vm3, 1.0, %v6308_v41  ;;  %vm2558_vm5 = vcmp.eq.s32.totalorder %v10583_v49, %v8342_v45  ;;  %v10584_v8 = vld [vmem:[#allocation25_spill] sm:$0xff] }
 0x1df   :  { %v3349_v48 = vpack.c.bf16 %v5547_v9, %v5546_v11  ;;  %v5450_v59 = vsel %vm2557_vm4, 1.0, %v6308_v41  ;;  %v5451_v10 = vsel %vm2558_vm5, 1.0, %v6308_v41  ;;  %vm3011_vm6 = vcmp.eq.s32.totalorder %v10582_v53, %v8350_v61  ;;  %v10585_v11 = vld [vmem:[#allocation26_spill] sm:$0xff] }
 0x1e0   :  { %6116 = vmatpush3.bf16.msra.mxu1 %v3420_v40  ;;  %v2911_v57 = vpack.c.bf16 %v5451_v10, %v5450_v59  ;;  %vm3012_vm7 = vcmp.eq.s32.totalorder %v10583_v49, %v8350_v61  ;;  %v5578_v60 = vsel %vm3011_vm6, 1.0, %v6308_v41  ;;  %vm2509_vm8 = vcmp.eq.s32.totalorder %v10584_v8, %v8342_v45  ;;  %v10586_v59 = vld [vmem:[#allocation27_spill] sm:$0xff] }
 0x1e1   :  { %v3413_v32 = vadd.bf16 %v3349_v48, %v2895_v4  ;;  %v5579_v47 = vsel %vm3012_vm7, 1.0, %v6308_v41  ;;  %vm2510_vm9 = vcmp.eq.s32.totalorder %v10585_v11, %v8342_v45  ;;  %v5402_v9 = vsel %vm2509_vm8, 1.0, %v6308_v41 }
 0x1e2   :  { %v3365_v1 = vpack.c.bf16 %v5579_v47, %v5578_v60  ;;  %v5403_v40 = vsel %vm2510_vm9, 1.0, %v6308_v41  ;;  %vm2963_vm10 = vcmp.eq.s32.totalorder %v10584_v8, %v8350_v61  ;;  %vm2964_vm11 = vcmp.eq.s32.totalorder %v10585_v11, %v8350_v61  ;;  %v10587_v60 = vld [vmem:[#allocation28_spill] sm:$0xff] }
 0x1e3   :  { %6095 = vmatprep.subr.bf16.mxu0 %v3413_v32  ;;  %v2887_v10 = vpack.c.bf16 %v5403_v40, %v5402_v9  ;;  %v5530_v4 = vsel %vm2963_vm10, 1.0, %v6308_v41  ;;  %v5531_v48 = vsel %vm2964_vm11, 1.0, %v6308_v41  ;;  %vm2541_vm12 = vcmp.eq.s32.totalorder %v10586_v59, %v8342_v45  ;;  %v10588_v32 = vld [vmem:[#allocation29_spill] sm:$0xff] }
 0x1e4   :  { %v3429_v49 = vadd.bf16 %v3365_v1, %v2911_v57  ;;  %v3341_v53 = vpack.c.bf16 %v5531_v48, %v5530_v4  ;;  %vm2542_vm13 = vcmp.eq.s32.totalorder %v10587_v60, %v8342_v45  ;;  %v5434_v47 = vsel %vm2541_vm12, 1.0, %v6308_v41  ;;  %v10589_v48 = vld [vmem:[#allocation30_spill] sm:$0xff] }
 0x1e5   :  { %v5435_v8 = vsel %vm2542_vm13, 1.0, %v6308_v41  ;;  %vm2995_vm14 = vcmp.eq.s32.totalorder %v10586_v59, %v8350_v61  ;;  %vm2996_vm15 = vcmp.eq.s32.totalorder %v10587_v60, %v8350_v61  ;;  %vm2527_vm0 = vcmp.eq.s32.totalorder %v10588_v32, %v8342_v45 }
 0x1e6   :  { %6117 = vmatprep.subr.bf16.mxu1 %v3429_v49  ;;  %v3405_v9 = vadd.bf16 %v3341_v53, %v2887_v10  ;;  %v2903_v1 = vpack.c.bf16 %v5435_v8, %v5434_v47  ;;  %v5562_v57 = vsel %vm2995_vm14, 1.0, %v6308_v41  ;;  %v5563_v40 = vsel %vm2996_vm15, 1.0, %v6308_v41  ;;  %v10590_v49 = vld [vmem:[#allocation31_spill] sm:$0xff] }
 0x1e7   :  { %v3357_v4 = vpack.c.bf16 %v5563_v40, %v5562_v57  ;;  %vm2528_vm1 = vcmp.eq.s32.totalorder %v10589_v48, %v8342_v45  ;;  %v5420_v11 = vsel %vm2527_vm0, 1.0, %v6308_v41  ;;  %vm2981_vm2 = vcmp.eq.s32.totalorder %v10588_v32, %v8350_v61  ;;  %v10591_v57 = vld [vmem:[#allocation32_spill] sm:$0xff] }
 0x1e8   :  { %6096 = vmatpush3.bf16.msra.mxu0 %v3405_v9  ;;  %v5421_v60 = vsel %vm2528_vm1, 1.0, %v6308_v41  ;;  %vm2982_vm3 = vcmp.eq.s32.totalorder %v10589_v48, %v8350_v61  ;;  %v5548_v53 = vsel %vm2981_vm2, 1.0, %v6308_v41  ;;  %vm2559_vm4 = vcmp.eq.s32.totalorder %v10590_v49, %v8342_v45 }
 0x1e9   :  { %v3421_v8 = vadd.bf16 %v3357_v4, %v2903_v1  ;;  %v2896_v10 = vpack.c.bf16 %v5421_v60, %v5420_v11  ;;  %v5549_v47 = vsel %vm2982_vm3, 1.0, %v6308_v41  ;;  %vm2560_vm5 = vcmp.eq.s32.totalorder %v10591_v57, %v8342_v45  ;;  %v10592_v60 = vld [vmem:[#allocation33_spill] sm:$0xff] }
 0x1ea   :  { %v3350_v40 = vpack.c.bf16 %v5549_v47, %v5548_v53  ;;  %v5452_v9 = vsel %vm2559_vm4, 1.0, %v6308_v41  ;;  %v5453_v32 = vsel %vm2560_vm5, 1.0, %v6308_v41  ;;  %vm3013_vm6 = vcmp.eq.s32.totalorder %v10590_v49, %v8350_v61  ;;  %v10593_v53 = vld [vmem:[#allocation34_spill] sm:$0xff] }
 0x1eb   :  { %6118 = vmatpush3.bf16.msra.mxu1 %v3421_v8  ;;  %v2912_v48 = vpack.c.bf16 %v5453_v32, %v5452_v9  ;;  %vm3014_vm7 = vcmp.eq.s32.totalorder %v10591_v57, %v8350_v61  ;;  %v5580_v11 = vsel %vm3013_vm6, 1.0, %v6308_v41  ;;  %vm2511_vm8 = vcmp.eq.s32.totalorder %v10592_v60, %v8342_v45  ;;  %v10594_v9 = vld [vmem:[#allocation35_spill] sm:$0xff] }
 0x1ec   :  { %v3414_v1 = vadd.bf16 %v3350_v40, %v2896_v10  ;;  %v5581_v4 = vsel %vm3014_vm7, 1.0, %v6308_v41  ;;  %vm2512_vm9 = vcmp.eq.s32.totalorder %v10593_v53, %v8342_v45  ;;  %v5404_v47 = vsel %vm2511_vm8, 1.0, %v6308_v41 }
 0x1ed   :  { %v3366_v59 = vpack.c.bf16 %v5581_v4, %v5580_v11  ;;  %v5405_v8 = vsel %vm2512_vm9, 1.0, %v6308_v41  ;;  %vm2965_vm10 = vcmp.eq.s32.totalorder %v10592_v60, %v8350_v61  ;;  %vm2966_vm11 = vcmp.eq.s32.totalorder %v10593_v53, %v8350_v61  ;;  %v10595_v11 = vld [vmem:[#allocation36_spill] sm:$0xff] }
 0x1ee   :  { %6097 = vmatprep.subr.bf16.mxu0 %v3414_v1  ;;  %v2888_v32 = vpack.c.bf16 %v5405_v8, %v5404_v47  ;;  %v5532_v10 = vsel %vm2965_vm10, 1.0, %v6308_v41  ;;  %v5533_v40 = vsel %vm2966_vm11, 1.0, %v6308_v41  ;;  %vm2543_vm12 = vcmp.eq.s32.totalorder %v10594_v9, %v8342_v45  ;;  %v10596_v1 = vld [vmem:[#allocation37_spill] sm:$0xff] }
 0x1ef   :  { %v3430_v57 = vadd.bf16 %v3366_v59, %v2912_v48  ;;  %v3342_v49 = vpack.c.bf16 %v5533_v40, %v5532_v10  ;;  %vm2544_vm13 = vcmp.eq.s32.totalorder %v10595_v11, %v8342_v45  ;;  %v5436_v4 = vsel %vm2543_vm12, 1.0, %v6308_v41  ;;  %v10597_v40 = vld [vmem:[#allocation38_spill] sm:$0xff] }
 0x1f0   :  { %v5437_v60 = vsel %vm2544_vm13, 1.0, %v6308_v41  ;;  %vm2997_vm14 = vcmp.eq.s32.totalorder %v10594_v9, %v8350_v61  ;;  %vm2998_vm15 = vcmp.eq.s32.totalorder %v10595_v11, %v8350_v61  ;;  %vm2577_vm0 = vcmp.eq.s32.totalorder %v10596_v1, %v8342_v45  ;;  %v10606_v9 = vld [vmem:[#allocation102_spill] sm:$0xff] }
 0x1f1   :  { %6119 = vmatprep.subr.bf16.mxu1 %v3430_v57  ;;  %v3406_v47 = vadd.bf16 %v3342_v49, %v2888_v32  ;;  %v2904_v59 = vpack.c.bf16 %v5437_v60, %v5436_v4  ;;  %v5564_v48 = vsel %vm2997_vm14, 1.0, %v6308_v41  ;;  %v5565_v8 = vsel %vm2998_vm15, 1.0, %v6308_v41  ;;  %v10598_v4 = vld [vmem:[#allocation40_spill] sm:$0xff] }
 0x1f2   :  { %v3358_v10 = vpack.c.bf16 %v5565_v8, %v5564_v48  ;;  %vm2578_vm1 = vcmp.eq.s32.totalorder %v10597_v40, %v8342_v45  ;;  %v5470_v53 = vsel %vm2577_vm0, 1.0, %v6308_v41  ;;  %vm3031_vm2 = vcmp.eq.s32.totalorder %v10596_v1, %v8350_v61 }
 0x1f3   :  { %6098 = vmatpush3.bf16.msra.mxu0 %v3406_v47  ;;  %v5471_v11 = vsel %vm2578_vm1, 1.0, %v6308_v41  ;;  %vm3032_vm3 = vcmp.eq.s32.totalorder %v10597_v40, %v8350_v61  ;;  %v5598_v49 = vsel %vm3031_vm2, 1.0, %v6308_v41  ;;  %vm2609_vm4 = vcmp.eq.s32.totalorder %v10505_v51, %v8342_v45  ;;  %v10599_v40 = vld [vmem:[#allocation7_spill] sm:$0xff] }
 0x1f4   :  { %v3422_v57 = vadd.bf16 %v3358_v10, %v2904_v59  ;;  %v2921_v60 = vpack.c.bf16 %v5471_v11, %v5470_v53  ;;  %v5599_v32 = vsel %vm3032_vm3, 1.0, %v6308_v41  ;;  %vm2610_vm5 = vcmp.eq.s32.totalorder %v10598_v4, %v8342_v45  ;;  %v10600_v11 = vld [vmem:[#allocation41_spill] sm:$0xff] }
 0x1f5   :  { %v3375_v48 = vpack.c.bf16 %v5599_v32, %v5598_v49  ;;  %v5502_v47 = vsel %vm2609_vm4, 1.0, %v6308_v41  ;;  %v5503_v8 = vsel %vm2610_vm5, 1.0, %v6308_v41  ;;  %vm3063_vm6 = vcmp.eq.s32.totalorder %v10505_v51, %v8350_v61  ;;  %v10601_v49 = vld [vmem:[#allocation42_spill] sm:$0xff]  ;;  %v10604_v51 = vld [vmem:[#allocation43_spill] sm:$0xff] }
 0x1f6   :  { %6120 = vmatpush3.bf16.msra.mxu1 %v3422_v57  ;;  %3496 = vmatmul.mubr.bf16.vlgmr.msra.gmra.mrb[16].mxu0 %v10599_v40  ;;  %v2937_v1 = vpack.c.bf16 %v5503_v8, %v5502_v47  ;;  %vm3064_vm7 = vcmp.eq.s32.totalorder %v10598_v4, %v8350_v61  ;;  %v5630_v53 = vsel %vm3063_vm6, 1.0, %v6308_v41  ;;  %vm2561_vm8 = vcmp.eq.s32.totalorder %v10600_v11, %v8342_v45  ;;  %v10602_v57 = vld [vmem:[#allocation101_spill] sm:$0xff]  ;;  %v10603_v8 = vld [vmem:[#allocation8_spill] sm:$0xff] }
 0x1f7   :  { %v3439_v59 = vadd.bf16 %v3375_v48, %v2921_v60  ;;  %v5631_v10 = vsel %vm3064_vm7, 1.0, %v6308_v41  ;;  %vm2562_vm9 = vcmp.eq.s32.totalorder %v10601_v49, %v8342_v45  ;;  %v5454_v32 = vsel %vm2561_vm8, 1.0, %v6308_v41  ;;  %3575 = vmatprep.mubr.bf16.mxu0 %v10602_v57  ;;  %v10605_v57 = vld [vmem:[#allocation44_spill] sm:$0xff] }
 0x1f8   :  { %v3391_v40 = vpack.c.bf16 %v5631_v10, %v5630_v53  ;;  %v5455_v47 = vsel %vm2562_vm9, 1.0, %v6308_v41  ;;  %vm3015_vm10 = vcmp.eq.s32.totalorder %v10600_v11, %v8350_v61  ;;  %vm3016_vm11 = vcmp.eq.s32.totalorder %v10601_v49, %v8350_v61 }
 0x1f9   :  { %3536 = vmatmul.mubr.bf16.vlgmr.msra.gmra.mrb[16].mxu1 %v10603_v8  ;;  %6127 = vmatprep.subr.bf16.mxu0 %v3439_v59  ;;  %v2913_v60 = vpack.c.bf16 %v5455_v47, %v5454_v32  ;;  %v5582_v48 = vsel %vm3015_vm10, 1.0, %v6308_v41  ;;  %v5583_v4 = vsel %vm3016_vm11, 1.0, %v6308_v41  ;;  %vm2593_vm12 = vcmp.eq.s32.totalorder %v10604_v51, %v8342_v45  ;;  %v10607_v59 = vld [vmem:[#allocation45_spill] sm:$0xff] }
 0x1fa   :  { %v3455_v53 = vadd.bf16 %v3391_v40, %v2937_v1  ;;  %v3367_v10 = vpack.c.bf16 %v5583_v4, %v5582_v48  ;;  %vm2594_vm13 = vcmp.eq.s32.totalorder %v10605_v57, %v8342_v45  ;;  %v5486_v11 = vsel %vm2593_vm12, 1.0, %v6308_v41  ;;  %3615 = vmatprep.mubr.bf16.mxu1 %v10606_v9  ;;  %v10608_v48 = vld [vmem:[#allocation46_spill] sm:$0xff] }
 0x1fb   :  { %v5487_v8 = vsel %vm2594_vm13, 1.0, %v6308_v41  ;;  %vm3047_vm14 = vcmp.eq.s32.totalorder %v10604_v51, %v8350_v61  ;;  %vm3048_vm15 = vcmp.eq.s32.totalorder %v10605_v57, %v8350_v61  ;;  %vm2579_vm0 = vcmp.eq.s32.totalorder %v10607_v59, %v8342_v45 }
 0x1fc   :  { %6149 = vmatprep.subr.bf16.mxu1 %v3455_v53  ;;  %v3431_v1 = vadd.bf16 %v3367_v10, %v2913_v60  ;;  %v2929_v40 = vpack.c.bf16 %v5487_v8, %v5486_v11  ;;  %v5614_v4 = vsel %vm3047_vm14, 1.0, %v6308_v41  ;;  %v5615_v32 = vsel %vm3048_vm15, 1.0, %v6308_v41  ;;  %v10609_v8 = vld [vmem:[#allocation47_spill] sm:$0xff] }
 0x1fd   :  { %v3383_v47 = vpack.c.bf16 %v5615_v32, %v5614_v4  ;;  %vm2580_vm1 = vcmp.eq.s32.totalorder %v10608_v48, %v8342_v45  ;;  %v5472_v9 = vsel %vm2579_vm0, 1.0, %v6308_v41  ;;  %vm3033_vm2 = vcmp.eq.s32.totalorder %v10607_v59, %v8350_v61  ;;  %v10610_v4 = vld [vmem:[#allocation48_spill] sm:$0xff] }
 0x1fe   :  { %6128 = vmatpush3.bf16.msra.mxu0 %v3431_v1  ;;  %v5473_v57 = vsel %vm2580_vm1, 1.0, %v6308_v41  ;;  %vm3034_vm3 = vcmp.eq.s32.totalorder %v10608_v48, %v8350_v61  ;;  %v5600_v11 = vsel %vm3033_vm2, 1.0, %v6308_v41  ;;  %vm2611_vm4 = vcmp.eq.s32.totalorder %v10609_v8, %v8342_v45 }
 0x1ff   :  { %v3447_v60 = vadd.bf16 %v3383_v47, %v2929_v40  ;;  %v2922_v53 = vpack.c.bf16 %v5473_v57, %v5472_v9  ;;  %v5601_v10 = vsel %vm3034_vm3, 1.0, %v6308_v41  ;;  %vm2612_vm5 = vcmp.eq.s32.totalorder %v10610_v4, %v8342_v45  ;;  %v10611_v57 = vld [vmem:[#allocation49_spill] sm:$0xff] }
 0x200   :  { %v3376_v32 = vpack.c.bf16 %v5601_v10, %v5600_v11  ;;  %v5504_v1 = vsel %vm2611_vm4, 1.0, %v6308_v41  ;;  %v5505_v59 = vsel %vm2612_vm5, 1.0, %v6308_v41  ;;  %vm3065_vm6 = vcmp.eq.s32.totalorder %v10609_v8, %v8350_v61  ;;  %v10612_v11 = vld [vmem:[#allocation50_spill] sm:$0xff] }
 0x201   :  { %6150 = vmatpush3.bf16.msra.mxu1 %v3447_v60  ;;  %v2938_v48 = vpack.c.bf16 %v5505_v59, %v5504_v1  ;;  %vm3066_vm7 = vcmp.eq.s32.totalorder %v10610_v4, %v8350_v61  ;;  %v5632_v9 = vsel %vm3065_vm6, 1.0, %v6308_v41  ;;  %vm2563_vm8 = vcmp.eq.s32.totalorder %v10611_v57, %v8342_v45  ;;  %v10613_v1 = vld [vmem:[#allocation51_spill] sm:$0xff] }
 0x202   :  { %v3440_v40 = vadd.bf16 %v3376_v32, %v2922_v53  ;;  %v5633_v47 = vsel %vm3066_vm7, 1.0, %v6308_v41  ;;  %vm2564_vm9 = vcmp.eq.s32.totalorder %v10612_v11, %v8342_v45  ;;  %v5456_v10 = vsel %vm2563_vm8, 1.0, %v6308_v41 }
 0x203   :  { %v3392_v51 = vpack.c.bf16 %v5633_v47, %v5632_v9  ;;  %v5457_v60 = vsel %vm2564_vm9, 1.0, %v6308_v41  ;;  %vm3017_vm10 = vcmp.eq.s32.totalorder %v10611_v57, %v8350_v61  ;;  %vm3018_vm11 = vcmp.eq.s32.totalorder %v10612_v11, %v8350_v61  ;;  %v10614_v9 = vld [vmem:[#allocation52_spill] sm:$0xff] }
 0x204   :  { %6129 = vmatprep.subr.bf16.mxu0 %v3440_v40  ;;  %v2914_v59 = vpack.c.bf16 %v5457_v60, %v5456_v10  ;;  %v5584_v53 = vsel %vm3017_vm10, 1.0, %v6308_v41  ;;  %v5585_v32 = vsel %vm3018_vm11, 1.0, %v6308_v41  ;;  %vm2595_vm12 = vcmp.eq.s32.totalorder %v10613_v1, %v8342_v45  ;;  %v10615_v40 = vld [vmem:[#allocation53_spill] sm:$0xff] }
 0x205   :  { %v3456_v4 = vadd.bf16 %v3392_v51, %v2938_v48  ;;  %v3368_v8 = vpack.c.bf16 %v5585_v32, %v5584_v53  ;;  %vm2596_vm13 = vcmp.eq.s32.totalorder %v10614_v9, %v8342_v45  ;;  %v5488_v47 = vsel %vm2595_vm12, 1.0, %v6308_v41  ;;  %v10616_v32 = vld [vmem:[#allocation54_spill] sm:$0xff] }
 0x206   :  { %v5489_v57 = vsel %vm2596_vm13, 1.0, %v6308_v41  ;;  %vm3049_vm14 = vcmp.eq.s32.totalorder %v10613_v1, %v8350_v61  ;;  %vm3050_vm15 = vcmp.eq.s32.totalorder %v10614_v9, %v8350_v61  ;;  %vm2581_vm0 = vcmp.eq.s32.totalorder %v10615_v40, %v8342_v45 }
 0x207   :  { %6151 = vmatprep.subr.bf16.mxu1 %v3456_v4  ;;  %v3432_v10 = vadd.bf16 %v3368_v8, %v2914_v59  ;;  %v2930_v51 = vpack.c.bf16 %v5489_v57, %v5488_v47  ;;  %v5616_v48 = vsel %vm3049_vm14, 1.0, %v6308_v41  ;;  %v5617_v60 = vsel %vm3050_vm15, 1.0, %v6308_v41  ;;  %v10617_v4 = vld [vmem:[#allocation55_spill] sm:$0xff] }
 0x208   :  { %v3384_v53 = vpack.c.bf16 %v5617_v60, %v5616_v48  ;;  %vm2582_vm1 = vcmp.eq.s32.totalorder %v10616_v32, %v8342_v45  ;;  %v5474_v11 = vsel %vm2581_vm0, 1.0, %v6308_v41  ;;  %vm3035_vm2 = vcmp.eq.s32.totalorder %v10615_v40, %v8350_v61  ;;  %v10618_v48 = vld [vmem:[#allocation56_spill] sm:$0xff] }
 0x209   :  { %6130 = vmatpush3.bf16.msra.mxu0 %v3432_v10  ;;  %v5475_v9 = vsel %vm2582_vm1, 1.0, %v6308_v41  ;;  %vm3036_vm3 = vcmp.eq.s32.totalorder %v10616_v32, %v8350_v61  ;;  %v5602_v8 = vsel %vm3035_vm2, 1.0, %v6308_v41  ;;  %vm2613_vm4 = vcmp.eq.s32.totalorder %v10617_v4, %v8342_v45 }
 0x20a   :  { %v3448_v57 = vadd.bf16 %v3384_v53, %v2930_v51  ;;  %v2923_v59 = vpack.c.bf16 %v5475_v9, %v5474_v11  ;;  %v5603_v47 = vsel %vm3036_vm3, 1.0, %v6308_v41  ;;  %vm2614_vm5 = vcmp.eq.s32.totalorder %v10618_v48, %v8342_v45  ;;  %v10619_v9 = vld [vmem:[#allocation57_spill] sm:$0xff] }
 0x20b   :  { %v3377_v60 = vpack.c.bf16 %v5603_v47, %v5602_v8  ;;  %v5506_v10 = vsel %vm2613_vm4, 1.0, %v6308_v41  ;;  %v5507_v40 = vsel %vm2614_vm5, 1.0, %v6308_v41  ;;  %vm3067_vm6 = vcmp.eq.s32.totalorder %v10617_v4, %v8350_v61  ;;  %v10620_v8 = vld [vmem:[#allocation58_spill] sm:$0xff] }
 0x20c   :  { %6152 = vmatpush3.bf16.msra.mxu1 %v3448_v57  ;;  %v2939_v32 = vpack.c.bf16 %v5507_v40, %v5506_v10  ;;  %vm3068_vm7 = vcmp.eq.s32.totalorder %v10618_v48, %v8350_v61  ;;  %v5634_v11 = vsel %vm3067_vm6, 1.0, %v6308_v41  ;;  %vm2565_vm8 = vcmp.eq.s32.totalorder %v10619_v9, %v8342_v45  ;;  %v10621_v10 = vld [vmem:[#allocation59_spill] sm:$0xff] }
 0x20d   :  { %v3441_v51 = vadd.bf16 %v3377_v60, %v2923_v59  ;;  %v5635_v53 = vsel %vm3068_vm7, 1.0, %v6308_v41  ;;  %vm2566_vm9 = vcmp.eq.s32.totalorder %v10620_v8, %v8342_v45  ;;  %v5458_v47 = vsel %vm2565_vm8, 1.0, %v6308_v41 }
 0x20e   :  { %v3393_v1 = vpack.c.bf16 %v5635_v53, %v5634_v11  ;;  %v5459_v57 = vsel %vm2566_vm9, 1.0, %v6308_v41  ;;  %vm3019_vm10 = vcmp.eq.s32.totalorder %v10619_v9, %v8350_v61  ;;  %vm3020_vm11 = vcmp.eq.s32.totalorder %v10620_v8, %v8350_v61  ;;  %v10622_v11 = vld [vmem:[#allocation60_spill] sm:$0xff] }
 0x20f   :  { %6131 = vmatprep.subr.bf16.mxu0 %v3441_v51  ;;  %v2915_v40 = vpack.c.bf16 %v5459_v57, %v5458_v47  ;;  %v5586_v59 = vsel %vm3019_vm10, 1.0, %v6308_v41  ;;  %v5587_v60 = vsel %vm3020_vm11, 1.0, %v6308_v41  ;;  %vm2597_vm12 = vcmp.eq.s32.totalorder %v10621_v10, %v8342_v45  ;;  %v10623_v51 = vld [vmem:[#allocation61_spill] sm:$0xff] }
 0x210   :  { %v3457_v48 = vadd.bf16 %v3393_v1, %v2939_v32  ;;  %v3369_v4 = vpack.c.bf16 %v5587_v60, %v5586_v59  ;;  %vm2598_vm13 = vcmp.eq.s32.totalorder %v10622_v11, %v8342_v45  ;;  %v5490_v53 = vsel %vm2597_vm12, 1.0, %v6308_v41  ;;  %v10624_v60 = vld [vmem:[#allocation62_spill] sm:$0xff] }
 0x211   :  { %v5491_v9 = vsel %vm2598_vm13, 1.0, %v6308_v41  ;;  %vm3051_vm14 = vcmp.eq.s32.totalorder %v10621_v10, %v8350_v61  ;;  %vm3052_vm15 = vcmp.eq.s32.totalorder %v10622_v11, %v8350_v61  ;;  %vm2583_vm0 = vcmp.eq.s32.totalorder %v10623_v51, %v8342_v45 }
 0x212   :  { %6153 = vmatprep.subr.bf16.mxu1 %v3457_v48  ;;  %v3433_v47 = vadd.bf16 %v3369_v4, %v2915_v40  ;;  %v2931_v1 = vpack.c.bf16 %v5491_v9, %v5490_v53  ;;  %v5618_v32 = vsel %vm3051_vm14, 1.0, %v6308_v41  ;;  %v5619_v57 = vsel %vm3052_vm15, 1.0, %v6308_v41  ;;  %v10625_v48 = vld [vmem:[#allocation63_spill] sm:$0xff] }
 0x213   :  { %v3385_v59 = vpack.c.bf16 %v5619_v57, %v5618_v32  ;;  %vm2584_vm1 = vcmp.eq.s32.totalorder %v10624_v60, %v8342_v45  ;;  %v5476_v8 = vsel %vm2583_vm0, 1.0, %v6308_v41  ;;  %vm3037_vm2 = vcmp.eq.s32.totalorder %v10623_v51, %v8350_v61  ;;  %v10626_v32 = vld [vmem:[#allocation64_spill] sm:$0xff] }
 0x214   :  { %6132 = vmatpush3.bf16.msra.mxu0 %v3433_v47  ;;  %v5477_v11 = vsel %vm2584_vm1, 1.0, %v6308_v41  ;;  %vm3038_vm3 = vcmp.eq.s32.totalorder %v10624_v60, %v8350_v61  ;;  %v5604_v4 = vsel %vm3037_vm2, 1.0, %v6308_v41  ;;  %vm2615_vm4 = vcmp.eq.s32.totalorder %v10625_v48, %v8342_v45 }
 0x215   :  { %v3449_v9 = vadd.bf16 %v3385_v59, %v2931_v1  ;;  %v2924_v40 = vpack.c.bf16 %v5477_v11, %v5476_v8  ;;  %v5605_v53 = vsel %vm3038_vm3, 1.0, %v6308_v41  ;;  %vm2616_vm5 = vcmp.eq.s32.totalorder %v10626_v32, %v8342_v45  ;;  %v10627_v11 = vld [vmem:[#allocation65_spill] sm:$0xff] }
 0x216   :  { %v3378_v57 = vpack.c.bf16 %v5605_v53, %v5604_v4  ;;  %v5508_v47 = vsel %vm2615_vm4, 1.0, %v6308_v41  ;;  %v5509_v51 = vsel %vm2616_vm5, 1.0, %v6308_v41  ;;  %vm3069_vm6 = vcmp.eq.s32.totalorder %v10625_v48, %v8350_v61  ;;  %v10628_v4 = vld [vmem:[#allocation66_spill] sm:$0xff] }
 0x217   :  { %6154 = vmatpush3.bf16.msra.mxu1 %v3449_v9  ;;  %v2940_v60 = vpack.c.bf16 %v5509_v51, %v5508_v47  ;;  %vm3070_vm7 = vcmp.eq.s32.totalorder %v10626_v32, %v8350_v61  ;;  %v5636_v8 = vsel %vm3069_vm6, 1.0, %v6308_v41  ;;  %vm2567_vm8 = vcmp.eq.s32.totalorder %v10627_v11, %v8342_v45  ;;  %v10629_v47 = vld [vmem:[#allocation67_spill] sm:$0xff] }
 0x218   :  { %v3442_v1 = vadd.bf16 %v3378_v57, %v2924_v40  ;;  %v5637_v59 = vsel %vm3070_vm7, 1.0, %v6308_v41  ;;  %vm2568_vm9 = vcmp.eq.s32.totalorder %v10628_v4, %v8342_v45  ;;  %v5460_v53 = vsel %vm2567_vm8, 1.0, %v6308_v41 }
 0x219   :  { %v3394_v10 = vpack.c.bf16 %v5637_v59, %v5636_v8  ;;  %v5461_v9 = vsel %vm2568_vm9, 1.0, %v6308_v41  ;;  %vm3021_vm10 = vcmp.eq.s32.totalorder %v10627_v11, %v8350_v61  ;;  %vm3022_vm11 = vcmp.eq.s32.totalorder %v10628_v4, %v8350_v61  ;;  %v10630_v8 = vld [vmem:[#allocation68_spill] sm:$0xff] }
 0x21a   :  { %6133 = vmatprep.subr.bf16.mxu0 %v3442_v1  ;;  %v2916_v51 = vpack.c.bf16 %v5461_v9, %v5460_v53  ;;  %v5588_v40 = vsel %vm3021_vm10, 1.0, %v6308_v41  ;;  %v5589_v57 = vsel %vm3022_vm11, 1.0, %v6308_v41  ;;  %vm2599_vm12 = vcmp.eq.s32.totalorder %v10629_v47, %v8342_v45  ;;  %v10631_v1 = vld [vmem:[#allocation69_spill] sm:$0xff] }
 0x21b   :  { %v3458_v32 = vadd.bf16 %v3394_v10, %v2940_v60  ;;  %v3370_v48 = vpack.c.bf16 %v5589_v57, %v5588_v40  ;;  %vm2600_vm13 = vcmp.eq.s32.totalorder %v10630_v8, %v8342_v45  ;;  %v5492_v59 = vsel %vm2599_vm12, 1.0, %v6308_v41  ;;  %v10632_v57 = vld [vmem:[#allocation70_spill] sm:$0xff] }
 0x21c   :  { %v5493_v11 = vsel %vm2600_vm13, 1.0, %v6308_v41  ;;  %vm3053_vm14 = vcmp.eq.s32.totalorder %v10629_v47, %v8350_v61  ;;  %vm3054_vm15 = vcmp.eq.s32.totalorder %v10630_v8, %v8350_v61  ;;  %vm2585_vm0 = vcmp.eq.s32.totalorder %v10631_v1, %v8342_v45 }
 0x21d   :  { %6155 = vmatprep.subr.bf16.mxu1 %v3458_v32  ;;  %v3434_v53 = vadd.bf16 %v3370_v48, %v2916_v51  ;;  %v2932_v10 = vpack.c.bf16 %v5493_v11, %v5492_v59  ;;  %v5620_v60 = vsel %vm3053_vm14, 1.0, %v6308_v41  ;;  %v5621_v9 = vsel %vm3054_vm15, 1.0, %v6308_v41  ;;  %v10633_v32 = vld [vmem:[#allocation71_spill] sm:$0xff] }
 0x21e   :  { %v3386_v40 = vpack.c.bf16 %v5621_v9, %v5620_v60  ;;  %vm2586_vm1 = vcmp.eq.s32.totalorder %v10632_v57, %v8342_v45  ;;  %v5478_v4 = vsel %vm2585_vm0, 1.0, %v6308_v41  ;;  %vm3039_vm2 = vcmp.eq.s32.totalorder %v10631_v1, %v8350_v61  ;;  %v10634_v60 = vld [vmem:[#allocation72_spill] sm:$0xff] }
 0x21f   :  { %6134 = vmatpush3.bf16.msra.mxu0 %v3434_v53  ;;  %v5479_v8 = vsel %vm2586_vm1, 1.0, %v6308_v41  ;;  %vm3040_vm3 = vcmp.eq.s32.totalorder %v10632_v57, %v8350_v61  ;;  %v5606_v48 = vsel %vm3039_vm2, 1.0, %v6308_v41  ;;  %vm2617_vm4 = vcmp.eq.s32.totalorder %v10633_v32, %v8342_v45 }
 0x220   :  { %v3450_v11 = vadd.bf16 %v3386_v40, %v2932_v10  ;;  %v2925_v51 = vpack.c.bf16 %v5479_v8, %v5478_v4  ;;  %v5607_v59 = vsel %vm3040_vm3, 1.0, %v6308_v41  ;;  %vm2618_vm5 = vcmp.eq.s32.totalorder %v10634_v60, %v8342_v45  ;;  %v10635_v8 = vld [vmem:[#allocation73_spill] sm:$0xff] }
 0x221   :  { %v3379_v9 = vpack.c.bf16 %v5607_v59, %v5606_v48  ;;  %v5510_v53 = vsel %vm2617_vm4, 1.0, %v6308_v41  ;;  %v5511_v1 = vsel %vm2618_vm5, 1.0, %v6308_v41  ;;  %vm3071_vm6 = vcmp.eq.s32.totalorder %v10633_v32, %v8350_v61  ;;  %v10636_v48 = vld [vmem:[#allocation74_spill] sm:$0xff] }
 0x222   :  { %6156 = vmatpush3.bf16.msra.mxu1 %v3450_v11  ;;  %v2941_v57 = vpack.c.bf16 %v5511_v1, %v5510_v53  ;;  %vm3072_vm7 = vcmp.eq.s32.totalorder %v10634_v60, %v8350_v61  ;;  %v5638_v4 = vsel %vm3071_vm6, 1.0, %v6308_v41  ;;  %vm2569_vm8 = vcmp.eq.s32.totalorder %v10635_v8, %v8342_v45  ;;  %v10637_v53 = vld [vmem:[#allocation75_spill] sm:$0xff] }
 0x223   :  { %v3443_v10 = vadd.bf16 %v3379_v9, %v2925_v51  ;;  %v5639_v40 = vsel %vm3072_vm7, 1.0, %v6308_v41  ;;  %vm2570_vm9 = vcmp.eq.s32.totalorder %v10636_v48, %v8342_v45  ;;  %v5462_v59 = vsel %vm2569_vm8, 1.0, %v6308_v41 }
 0x224   :  { %v3395_v47 = vpack.c.bf16 %v5639_v40, %v5638_v4  ;;  %v5463_v11 = vsel %vm2570_vm9, 1.0, %v6308_v41  ;;  %vm3023_vm10 = vcmp.eq.s32.totalorder %v10635_v8, %v8350_v61  ;;  %vm3024_vm11 = vcmp.eq.s32.totalorder %v10636_v48, %v8350_v61  ;;  %v10638_v4 = vld [vmem:[#allocation76_spill] sm:$0xff] }
 0x225   :  { %6135 = vmatprep.subr.bf16.mxu0 %v3443_v10  ;;  %v2917_v1 = vpack.c.bf16 %v5463_v11, %v5462_v59  ;;  %v5590_v51 = vsel %vm3023_vm10, 1.0, %v6308_v41  ;;  %v5591_v9 = vsel %vm3024_vm11, 1.0, %v6308_v41  ;;  %vm2601_vm12 = vcmp.eq.s32.totalorder %v10637_v53, %v8342_v45  ;;  %v10639_v10 = vld [vmem:[#allocation77_spill] sm:$0xff] }
 0x226   :  { %v3459_v60 = vadd.bf16 %v3395_v47, %v2941_v57  ;;  %v3371_v32 = vpack.c.bf16 %v5591_v9, %v5590_v51  ;;  %vm2602_vm13 = vcmp.eq.s32.totalorder %v10638_v4, %v8342_v45  ;;  %v5494_v40 = vsel %vm2601_vm12, 1.0, %v6308_v41  ;;  %v10640_v9 = vld [vmem:[#allocation78_spill] sm:$0xff] }
 0x227   :  { %v5495_v8 = vsel %vm2602_vm13, 1.0, %v6308_v41  ;;  %vm3055_vm14 = vcmp.eq.s32.totalorder %v10637_v53, %v8350_v61  ;;  %vm3056_vm15 = vcmp.eq.s32.totalorder %v10638_v4, %v8350_v61  ;;  %vm2587_vm0 = vcmp.eq.s32.totalorder %v10639_v10, %v8342_v45 }
 0x228   :  { %6157 = vmatprep.subr.bf16.mxu1 %v3459_v60  ;;  %v3435_v59 = vadd.bf16 %v3371_v32, %v2917_v1  ;;  %v2933_v47 = vpack.c.bf16 %v5495_v8, %v5494_v40  ;;  %v5622_v57 = vsel %vm3055_vm14, 1.0, %v6308_v41  ;;  %v5623_v11 = vsel %vm3056_vm15, 1.0, %v6308_v41  ;;  %v10641_v60 = vld [vmem:[#allocation79_spill] sm:$0xff] }
 0x229   :  { %v3387_v51 = vpack.c.bf16 %v5623_v11, %v5622_v57  ;;  %vm2588_vm1 = vcmp.eq.s32.totalorder %v10640_v9, %v8342_v45  ;;  %v5480_v48 = vsel %vm2587_vm0, 1.0, %v6308_v41  ;;  %vm3041_vm2 = vcmp.eq.s32.totalorder %v10639_v10, %v8350_v61  ;;  %v10642_v57 = vld [vmem:[#allocation80_spill] sm:$0xff] }
 0x22a   :  { %6136 = vmatpush3.bf16.msra.mxu0 %v3435_v59  ;;  %v5481_v4 = vsel %vm2588_vm1, 1.0, %v6308_v41  ;;  %vm3042_vm3 = vcmp.eq.s32.totalorder %v10640_v9, %v8350_v61  ;;  %v5608_v32 = vsel %vm3041_vm2, 1.0, %v6308_v41  ;;  %vm2619_vm4 = vcmp.eq.s32.totalorder %v10641_v60, %v8342_v45 }
 0x22b   :  { %v3451_v8 = vadd.bf16 %v3387_v51, %v2933_v47  ;;  %v2926_v1 = vpack.c.bf16 %v5481_v4, %v5480_v48  ;;  %v5609_v40 = vsel %vm3042_vm3, 1.0, %v6308_v41  ;;  %vm2620_vm5 = vcmp.eq.s32.totalorder %v10642_v57, %v8342_v45  ;;  %v10643_v4 = vld [vmem:[#allocation81_spill] sm:$0xff] }
 0x22c   :  { %v3380_v11 = vpack.c.bf16 %v5609_v40, %v5608_v32  ;;  %v5512_v59 = vsel %vm2619_vm4, 1.0, %v6308_v41  ;;  %v5513_v10 = vsel %vm2620_vm5, 1.0, %v6308_v41  ;;  %vm3073_vm6 = vcmp.eq.s32.totalorder %v10641_v60, %v8350_v61  ;;  %v10644_v32 = vld [vmem:[#allocation82_spill] sm:$0xff] }
 0x22d   :  { %6158 = vmatpush3.bf16.msra.mxu1 %v3451_v8  ;;  %v2942_v9 = vpack.c.bf16 %v5513_v10, %v5512_v59  ;;  %vm3074_vm7 = vcmp.eq.s32.totalorder %v10642_v57, %v8350_v61  ;;  %v5640_v48 = vsel %vm3073_vm6, 1.0, %v6308_v41  ;;  %vm2571_vm8 = vcmp.eq.s32.totalorder %v10643_v4, %v8342_v45  ;;  %v10645_v59 = vld [vmem:[#allocation83_spill] sm:$0xff] }
 0x22e   :  { %v3444_v47 = vadd.bf16 %v3380_v11, %v2926_v1  ;;  %v5641_v51 = vsel %vm3074_vm7, 1.0, %v6308_v41  ;;  %vm2572_vm9 = vcmp.eq.s32.totalorder %v10644_v32, %v8342_v45  ;;  %v5464_v40 = vsel %vm2571_vm8, 1.0, %v6308_v41 }
 0x22f   :  { %v3396_v53 = vpack.c.bf16 %v5641_v51, %v5640_v48  ;;  %v5465_v8 = vsel %vm2572_vm9, 1.0, %v6308_v41  ;;  %vm3025_vm10 = vcmp.eq.s32.totalorder %v10643_v4, %v8350_v61  ;;  %vm3026_vm11 = vcmp.eq.s32.totalorder %v10644_v32, %v8350_v61  ;;  %v10646_v48 = vld [vmem:[#allocation84_spill] sm:$0xff] }
 0x230   :  { %6137 = vmatprep.subr.bf16.mxu0 %v3444_v47  ;;  %v2918_v10 = vpack.c.bf16 %v5465_v8, %v5464_v40  ;;  %v5592_v1 = vsel %vm3025_vm10, 1.0, %v6308_v41  ;;  %v5593_v11 = vsel %vm3026_vm11, 1.0, %v6308_v41  ;;  %vm2603_vm12 = vcmp.eq.s32.totalorder %v10645_v59, %v8342_v45  ;;  %v10647_v47 = vld [vmem:[#allocation85_spill] sm:$0xff] }
 0x231   :  { %v3460_v57 = vadd.bf16 %v3396_v53, %v2942_v9  ;;  %v3372_v60 = vpack.c.bf16 %v5593_v11, %v5592_v1  ;;  %vm2604_vm13 = vcmp.eq.s32.totalorder %v10646_v48, %v8342_v45  ;;  %v5496_v51 = vsel %vm2603_vm12, 1.0, %v6308_v41  ;;  %v10648_v11 = vld [vmem:[#allocation86_spill] sm:$0xff] }
 0x232   :  { %v5497_v4 = vsel %vm2604_vm13, 1.0, %v6308_v41  ;;  %vm3057_vm14 = vcmp.eq.s32.totalorder %v10645_v59, %v8350_v61  ;;  %vm3058_vm15 = vcmp.eq.s32.totalorder %v10646_v48, %v8350_v61  ;;  %vm2589_vm0 = vcmp.eq.s32.totalorder %v10647_v47, %v8342_v45 }
 0x233   :  { %6159 = vmatprep.subr.bf16.mxu1 %v3460_v57  ;;  %v3436_v40 = vadd.bf16 %v3372_v60, %v2918_v10  ;;  %v2934_v53 = vpack.c.bf16 %v5497_v4, %v5496_v51  ;;  %v5624_v9 = vsel %vm3057_vm14, 1.0, %v6308_v41  ;;  %v5625_v8 = vsel %vm3058_vm15, 1.0, %v6308_v41  ;;  %v10649_v57 = vld [vmem:[#allocation87_spill] sm:$0xff] }
 0x234   :  { %v3388_v1 = vpack.c.bf16 %v5625_v8, %v5624_v9  ;;  %vm2590_vm1 = vcmp.eq.s32.totalorder %v10648_v11, %v8342_v45  ;;  %v5482_v32 = vsel %vm2589_vm0, 1.0, %v6308_v41  ;;  %vm3043_vm2 = vcmp.eq.s32.totalorder %v10647_v47, %v8350_v61  ;;  %v10650_v9 = vld [vmem:[#allocation88_spill] sm:$0xff] }
 0x235   :  { %6138 = vmatpush3.bf16.msra.mxu0 %v3436_v40  ;;  %v5483_v48 = vsel %vm2590_vm1, 1.0, %v6308_v41  ;;  %vm3044_vm3 = vcmp.eq.s32.totalorder %v10648_v11, %v8350_v61  ;;  %v5610_v60 = vsel %vm3043_vm2, 1.0, %v6308_v41  ;;  %vm2621_vm4 = vcmp.eq.s32.totalorder %v10649_v57, %v8342_v45 }
 0x236   :  { %v3452_v4 = vadd.bf16 %v3388_v1, %v2934_v53  ;;  %v2927_v10 = vpack.c.bf16 %v5483_v48, %v5482_v32  ;;  %v5611_v51 = vsel %vm3044_vm3, 1.0, %v6308_v41  ;;  %vm2622_vm5 = vcmp.eq.s32.totalorder %v10650_v9, %v8342_v45  ;;  %v10651_v48 = vld [vmem:[#allocation89_spill] sm:$0xff] }
 0x237   :  { %v3381_v8 = vpack.c.bf16 %v5611_v51, %v5610_v60  ;;  %v5514_v40 = vsel %vm2621_vm4, 1.0, %v6308_v41  ;;  %v5515_v47 = vsel %vm2622_vm5, 1.0, %v6308_v41  ;;  %vm3075_vm6 = vcmp.eq.s32.totalorder %v10649_v57, %v8350_v61  ;;  %v10652_v60 = vld [vmem:[#allocation90_spill] sm:$0xff] }
 0x238   :  { %6160 = vmatpush3.bf16.msra.mxu1 %v3452_v4  ;;  %v2943_v11 = vpack.c.bf16 %v5515_v47, %v5514_v40  ;;  %vm3076_vm7 = vcmp.eq.s32.totalorder %v10650_v9, %v8350_v61  ;;  %v5642_v32 = vsel %vm3075_vm6, 1.0, %v6308_v41  ;;  %vm2573_vm8 = vcmp.eq.s32.totalorder %v10651_v48, %v8342_v45  ;;  %v10653_v40 = vld [vmem:[#allocation91_spill] sm:$0xff] }
 0x239   :  { %v3445_v53 = vadd.bf16 %v3381_v8, %v2927_v10  ;;  %v5643_v1 = vsel %vm3076_vm7, 1.0, %v6308_v41  ;;  %vm2574_vm9 = vcmp.eq.s32.totalorder %v10652_v60, %v8342_v45  ;;  %v5466_v51 = vsel %vm2573_vm8, 1.0, %v6308_v41 }
 0x23a   :  { %v3397_v59 = vpack.c.bf16 %v5643_v1, %v5642_v32  ;;  %v5467_v4 = vsel %vm2574_vm9, 1.0, %v6308_v41  ;;  %vm3027_vm10 = vcmp.eq.s32.totalorder %v10651_v48, %v8350_v61  ;;  %vm3028_vm11 = vcmp.eq.s32.totalorder %v10652_v60, %v8350_v61  ;;  %v10654_v32 = vld [vmem:[#allocation92_spill] sm:$0xff] }
 0x23b   :  { %6139 = vmatprep.subr.bf16.mxu0 %v3445_v53  ;;  %v2919_v47 = vpack.c.bf16 %v5467_v4, %v5466_v51  ;;  %v5594_v10 = vsel %vm3027_vm10, 1.0, %v6308_v41  ;;  %v5595_v8 = vsel %vm3028_vm11, 1.0, %v6308_v41  ;;  %vm2605_vm12 = vcmp.eq.s32.totalorder %v10653_v40, %v8342_v45  ;;  %v10655_v53 = vld [vmem:[#allocation93_spill] sm:$0xff] }
 0x23c   :  { %v3461_v9 = vadd.bf16 %v3397_v59, %v2943_v11  ;;  %v3373_v57 = vpack.c.bf16 %v5595_v8, %v5594_v10  ;;  %vm2606_vm13 = vcmp.eq.s32.totalorder %v10654_v32, %v8342_v45  ;;  %v5498_v1 = vsel %vm2605_vm12, 1.0, %v6308_v41  ;;  %v10656_v8 = vld [vmem:[#allocation94_spill] sm:$0xff] }
 0x23d   :  { %v5499_v48 = vsel %vm2606_vm13, 1.0, %v6308_v41  ;;  %vm3059_vm14 = vcmp.eq.s32.totalorder %v10653_v40, %v8350_v61  ;;  %vm3060_vm15 = vcmp.eq.s32.totalorder %v10654_v32, %v8350_v61  ;;  %vm2591_vm0 = vcmp.eq.s32.totalorder %v10655_v53, %v8342_v45 }
 0x23e   :  { %6161 = vmatprep.subr.bf16.mxu1 %v3461_v9  ;;  %v3437_v51 = vadd.bf16 %v3373_v57, %v2919_v47  ;;  %v2935_v59 = vpack.c.bf16 %v5499_v48, %v5498_v1  ;;  %v5626_v11 = vsel %vm3059_vm14, 1.0, %v6308_v41  ;;  %v5627_v4 = vsel %vm3060_vm15, 1.0, %v6308_v41  ;;  %v10657_v9 = vld [vmem:[#allocation95_spill] sm:$0xff] }
 0x23f   :  { %v3389_v10 = vpack.c.bf16 %v5627_v4, %v5626_v11  ;;  %vm2592_vm1 = vcmp.eq.s32.totalorder %v10656_v8, %v8342_v45  ;;  %v5484_v60 = vsel %vm2591_vm0, 1.0, %v6308_v41  ;;  %vm3045_vm2 = vcmp.eq.s32.totalorder %v10655_v53, %v8350_v61  ;;  %v10658_v11 = vld [vmem:[#allocation96_spill] sm:$0xff] }
 0x240   :  { %6140 = vmatpush3.bf16.msra.mxu0 %v3437_v51  ;;  %v5485_v32 = vsel %vm2592_vm1, 1.0, %v6308_v41  ;;  %vm3046_vm3 = vcmp.eq.s32.totalorder %v10656_v8, %v8350_v61  ;;  %v5612_v57 = vsel %vm3045_vm2, 1.0, %v6308_v41  ;;  %vm2623_vm4 = vcmp.eq.s32.totalorder %v10657_v9, %v8342_v45 }
 0x241   :  { %v3453_v48 = vadd.bf16 %v3389_v10, %v2935_v59  ;;  %v2928_v47 = vpack.c.bf16 %v5485_v32, %v5484_v60  ;;  %v5613_v1 = vsel %vm3046_vm3, 1.0, %v6308_v41  ;;  %vm2624_vm5 = vcmp.eq.s32.totalorder %v10658_v11, %v8342_v45  ;;  %v10659_v32 = vld [vmem:[#allocation97_spill] sm:$0xff] }
 0x242   :  { %v3382_v4 = vpack.c.bf16 %v5613_v1, %v5612_v57  ;;  %v5516_v51 = vsel %vm2623_vm4, 1.0, %v6308_v41  ;;  %v5517_v53 = vsel %vm2624_vm5, 1.0, %v6308_v41  ;;  %vm3077_vm6 = vcmp.eq.s32.totalorder %v10657_v9, %v8350_v61  ;;  %v10660_v57 = vld [vmem:[#allocation98_spill] sm:$0xff] }
 0x243   :  { %6162 = vmatpush3.bf16.msra.mxu1 %v3453_v48  ;;  %v2944_v8 = vpack.c.bf16 %v5517_v53, %v5516_v51  ;;  %vm3078_vm7 = vcmp.eq.s32.totalorder %v10658_v11, %v8350_v61  ;;  %v5644_v60 = vsel %vm3077_vm6, 1.0, %v6308_v41  ;;  %vm2575_vm8 = vcmp.eq.s32.totalorder %v10659_v32, %v8342_v45  ;;  %v5646_v53 = vld [vmem:[%s10010_s1 + $0x3] sm:$0x1] }
 0x244   :  { %v3446_v59 = vadd.bf16 %v3382_v4, %v2928_v47  ;;  %v5645_v10 = vsel %vm3078_vm7, 1.0, %v6308_v41  ;;  %vm2576_vm9 = vcmp.eq.s32.totalorder %v10660_v57, %v8342_v45  ;;  %v5468_v1 = vsel %vm2575_vm8, 1.0, %v6308_v41 }
 0x245   :  { %v3398_v40 = vpack.c.bf16 %v5645_v10, %v5644_v60  ;;  %v5469_v48 = vsel %vm2576_vm9, 1.0, %v6308_v41  ;;  %vm3029_vm10 = vcmp.eq.s32.totalorder %v10659_v32, %v8350_v61  ;;  %vm3030_vm11 = vcmp.eq.s32.totalorder %v10660_v57, %v8350_v61  ;;  %v10661_v60 = vld [vmem:[#allocation99_spill] sm:$0xff] }
 0x246   :  { %6141 = vmatprep.subr.bf16.mxu0 %v3446_v59  ;;  %v2920_v47 = vpack.c.bf16 %v5469_v48, %v5468_v1  ;;  %v5596_v4 = vsel %vm3029_vm10, 1.0, %v6308_v41  ;;  %v5597_v51 = vsel %vm3030_vm11, 1.0, %v6308_v41  ;;  %vm2607_vm12 = vcmp.eq.s32.totalorder %v10661_v60, %v8342_v45 }
 0x247   :  { %v3462_v10 = vadd.bf16 %v3398_v40, %v2944_v8  ;;  %v3374_v11 = vpack.c.bf16 %v5597_v51, %v5596_v4  ;;  %vm2608_vm13 = vcmp.eq.s32.totalorder %v10568_v19, %v8342_v45  ;;  %v5500_v57 = vsel %vm2607_vm12, 1.0, %v6308_v41 }
 0x248   :  { %v5501_v32 = vsel %vm2608_vm13, 1.0, %v6308_v41  ;;  %vm3061_vm14 = vcmp.eq.s32.totalorder %v10661_v60, %v8350_v61  ;;  %vm3062_vm15 = vcmp.eq.s32.totalorder %v10568_v19, %v8350_v61  ;;  %v3627_v59 = vunpack.c.0.s8 %v5646_v53 }
 0x249   :  { %6163 = vmatprep.subr.bf16.mxu1 %v3462_v10  ;;  %v3438_v1 = vadd.bf16 %v3374_v11, %v2920_v47  ;;  %v2936_v48 = vpack.c.bf16 %v5501_v32, %v5500_v57  ;;  %v5628_v40 = vsel %vm3061_vm14, 1.0, %v6308_v41  ;;  %v5629_v8 = vsel %vm3062_vm15, 1.0, %v6308_v41 }
 0x24a   :  { %v3390_v4 = vpack.c.bf16 %v5629_v8, %v5628_v40  ;;  %v3628_v45 = vand.u32 255, %v3627_v59 }
 0x24b   :  { %6142 = vmatpush3.bf16.msra.mxu0 %v3438_v1 }
 0x24c   :  { %v3454_v51 = vadd.bf16 %v3390_v4, %v2936_v48  ;;  %v3629_v9 = vmul.u32 2, %v3628_v45 }
 0x24e   :  { %6164 = vmatpush3.bf16.msra.mxu1 %v3454_v51  ;;  %3576 = vmatmul.mubr.bf16.vlgmr.msra.gmra.mrb[20].mxu0 %v7545_v63  ;;  %v3633_v60 = vrot.slane %v3629_v9, %v6373_v15  ;;  %v4086_v61 = vrot.slane %v3629_v9, %v6376_v17 }
 0x24f   :  { %4633 = vmatprep.mubr.bf16.mxu0 %v6352_v5 }
 0x250   :  { %v9129_v11 = vadd.s32 %v3633_v60, %v6370_v14  ;;  %v4087_v32 = vadd.s32 %v4086_v61, %v6370_v14 }
 0x251   :  { %3616 = vmatmul.mubr.bf16.vlgmr.msra.gmra.mrb[20].mxu1 %v7548_v25 }
 0x252   :  { %vm3651_vm0 = vcmp.eq.s32.totalorder %v6365_v12, %v9129_v11  ;;  %vm3652_vm1 = vcmp.eq.s32.totalorder %v6368_v13, %v9129_v11  ;;  %v9137_v57 = vadd.s32 512, %v4087_v32  ;;  %vm3683_vm2 = vcmp.eq.s32.totalorder %v6379_v18, %v9129_v11  ;;  %4673 = vmatprep.mubr.bf16.mxu1 %v6354_v6 }
 0x253   :  { %v5663_v5 = vsel %vm3651_vm0, 1.0, %v6308_v41  ;;  %v5664_v15 = vsel %vm3652_vm1, 1.0, %v6308_v41  ;;  %vm3684_vm3 = vcmp.eq.s32.totalorder %v10569_v62, %v9129_v11  ;;  %v5695_v14 = vsel %vm3683_vm2, 1.0, %v6308_v41 }
 0x254   :  { %v4027_v17 = vpack.c.bf16 %v5664_v15, %v5663_v5  ;;  %vm4105_vm4 = vcmp.eq.s32.totalorder %v6365_v12, %v9137_v57  ;;  %vm4106_vm5 = vcmp.eq.s32.totalorder %v6368_v13, %v9137_v57  ;;  %v5696_v9 = vsel %vm3684_vm3, 1.0, %v6308_v41 }
 0x255   :  { %v5791_v6 = vsel %vm4105_vm4, 1.0, %v6308_v41  ;;  %v5792_v53 = vsel %vm4106_vm5, 1.0, %v6308_v41  ;;  %v4043_v47 = vpack.c.bf16 %v5696_v9, %v5695_v14  ;;  %vm4137_vm6 = vcmp.eq.s32.totalorder %v6379_v18, %v9137_v57 }
 0x256   :  { %v4481_v60 = vpack.c.bf16 %v5792_v53, %v5791_v6  ;;  %vm4138_vm7 = vcmp.eq.s32.totalorder %v10569_v62, %v9137_v57  ;;  %v5823_v10 = vsel %vm4137_vm6, 1.0, %v6308_v41  ;;  %vm3635_vm8 = vcmp.eq.s32.totalorder %v6356_v7, %v9129_v11 }
 0x257   :  { %v5824_v12 = vsel %vm4138_vm7, 1.0, %v6308_v41  ;;  %vm3636_vm9 = vcmp.eq.s32.totalorder %v6385_v20, %v9129_v11  ;;  %v5647_v13 = vsel %vm3635_vm8, 1.0, %v6308_v41  ;;  %vm4089_vm10 = vcmp.eq.s32.totalorder %v6356_v7, %v9137_v57 }
 0x258   :  { %v4545_v18 = vadd.bf16 %v4481_v60, %v4027_v17  ;;  %v4497_v59 = vpack.c.bf16 %v5824_v12, %v5823_v10  ;;  %v5648_v1 = vsel %vm3636_vm9, 1.0, %v6308_v41  ;;  %vm4090_vm11 = vcmp.eq.s32.totalorder %v6385_v20, %v9137_v57 }
 0x259   :  { %v4019_v62 = vpack.c.bf16 %v5648_v1, %v5647_v13  ;;  %v5775_v48 = vsel %vm4089_vm10, 1.0, %v6308_v41  ;;  %v5776_v40 = vsel %vm4090_vm11, 1.0, %v6308_v41  ;;  %vm3667_vm12 = vcmp.eq.s32.totalorder %v6388_v21, %v9129_v11 }
 0x25a   :  { %6171 = vmatprep.subr.bf16.mxu0 %v4545_v18  ;;  %v4561_v8 = vadd.bf16 %v4497_v59, %v4043_v47  ;;  %v4473_v4 = vpack.c.bf16 %v5776_v40, %v5775_v48  ;;  %vm3668_vm13 = vcmp.eq.s32.totalorder %v6391_v22, %v9129_v11  ;;  %v5679_v7 = vsel %vm3667_vm12, 1.0, %v6308_v41  ;;  %v9227_v40 = vpop.f32.mrb[0].mxu1 }
 0x25b   :  { %v5680_v45 = vsel %vm3668_vm13, 1.0, %v6308_v41  ;;  %vm4121_vm14 = vcmp.eq.s32.totalorder %v6388_v21, %v9137_v57  ;;  %vm4122_vm15 = vcmp.eq.s32.totalorder %v6391_v22, %v9137_v57  ;;  %vm3653_vm0 = vcmp.eq.s32.totalorder %v6394_v23, %v9129_v11 }
 0x25c   :  { %6193 = vmatprep.subr.bf16.mxu1 %v4561_v8  ;;  %v4537_v20 = vadd.bf16 %v4473_v4, %v4019_v62  ;;  %v4035_v51 = vpack.c.bf16 %v5680_v45, %v5679_v7  ;;  %v5807_v61 = vsel %vm4121_vm14, 1.0, %v6308_v41  ;;  %v5808_v32 = vsel %vm4122_vm15, 1.0, %v6308_v41  ;;  %v9238_v4 = vpop.f32.mrb[1].mxu1 }
 0x25d   :  { %v4489_v5 = vpack.c.bf16 %v5808_v32, %v5807_v61  ;;  %vm3654_vm1 = vcmp.eq.s32.totalorder %v6399_v26, %v9129_v11  ;;  %v5665_v15 = vsel %vm3653_vm0, 1.0, %v6308_v41  ;;  %vm4107_vm2 = vcmp.eq.s32.totalorder %v6394_v23, %v9137_v57  ;;  %v5948_v32 = vpop.f32.mrb[2].mxu1 }
 0x25e   :  { %6172 = vmatpush3.bf16.msra.mxu0 %v4537_v20  ;;  %v5666_v21 = vsel %vm3654_vm1, 1.0, %v6308_v41  ;;  %vm4108_vm3 = vcmp.eq.s32.totalorder %v6399_v26, %v9137_v57  ;;  %v5793_v22 = vsel %vm4107_vm2, 1.0, %v6308_v41  ;;  %vm3685_vm4 = vcmp.eq.s32.totalorder %v6402_v27, %v9129_v11 }
 0x25f   :  { %v4553_v14 = vadd.bf16 %v4489_v5, %v4035_v51  ;;  %v4028_v17 = vpack.c.bf16 %v5666_v21, %v5665_v15  ;;  %v5794_v9 = vsel %vm4108_vm3, 1.0, %v6308_v41  ;;  %vm3686_vm5 = vcmp.eq.s32.totalorder %v6405_v28, %v9129_v11  ;;  %v5949_v15 = vpop.f32.mrb[3].mxu1 }
 0x260   :  { %v4482_v6 = vpack.c.bf16 %v5794_v9, %v5793_v22  ;;  %v5697_v23 = vsel %vm3685_vm4, 1.0, %v6308_v41  ;;  %v5698_v53 = vsel %vm3686_vm5, 1.0, %v6308_v41  ;;  %vm4139_vm6 = vcmp.eq.s32.totalorder %v6402_v27, %v9137_v57 }
 0x261   :  { %6194 = vmatpush3.bf16.msra.mxu1 %v4553_v14  ;;  %v4044_v26 = vpack.c.bf16 %v5698_v53, %v5697_v23  ;;  %vm4140_vm7 = vcmp.eq.s32.totalorder %v6405_v28, %v9137_v57  ;;  %v5825_v47 = vsel %vm4139_vm6, 1.0, %v6308_v41  ;;  %vm3637_vm8 = vcmp.eq.s32.totalorder %v6408_v29, %v9129_v11 }
 0x262   :  { %v4546_v60 = vadd.bf16 %v4482_v6, %v4028_v17  ;;  %v5826_v10 = vsel %vm4140_vm7, 1.0, %v6308_v41  ;;  %vm3638_vm9 = vcmp.eq.s32.totalorder %v6411_v30, %v9129_v11  ;;  %v5649_v12 = vsel %vm3637_vm8, 1.0, %v6308_v41 }
 0x263   :  { %v4498_v13 = vpack.c.bf16 %v5826_v10, %v5825_v47  ;;  %v5650_v27 = vsel %vm3638_vm9, 1.0, %v6308_v41  ;;  %vm4091_vm10 = vcmp.eq.s32.totalorder %v6408_v29, %v9137_v57  ;;  %vm4092_vm11 = vcmp.eq.s32.totalorder %v6411_v30, %v9137_v57  ;;  %v9225_v29 = vpop.f32.mrb[0].mxu0 }
 0x264   :  { %6173 = vmatprep.subr.bf16.mxu0 %v4546_v60  ;;  %v4020_v28 = vpack.c.bf16 %v5650_v27, %v5649_v12  ;;  %v5777_v18 = vsel %vm4091_vm10, 1.0, %v6308_v41  ;;  %v5778_v59 = vsel %vm4092_vm11, 1.0, %v6308_v41  ;;  %vm3669_vm12 = vcmp.eq.s32.totalorder %v6414_v31, %v9129_v11  ;;  %v9236_v8 = vpop.f32.mrb[1].mxu0 }
 0x265   :  { %v4562_v1 = vadd.bf16 %v4498_v13, %v4044_v26  ;;  %v4474_v62 = vpack.c.bf16 %v5778_v59, %v5777_v18  ;;  %vm3670_vm13 = vcmp.eq.s32.totalorder %v6421_v34, %v9129_v11  ;;  %v5681_v48 = vsel %vm3669_vm12, 1.0, %v6308_v41  ;;  %v5926_v61 = vpop.f32.mrb[2].mxu0 }
 0x266   :  { %v5682_v30 = vsel %vm3670_vm13, 1.0, %v6308_v41  ;;  %vm4123_vm14 = vcmp.eq.s32.totalorder %v6414_v31, %v9137_v57  ;;  %vm4124_vm15 = vcmp.eq.s32.totalorder %v6421_v34, %v9137_v57  ;;  %vm3655_vm0 = vcmp.eq.s32.totalorder %v6424_v35, %v9129_v11  ;;  %v5927_v5 = vpop.f32.mrb[3].mxu0 }
 0x267   :  { %6195 = vmatprep.subr.bf16.mxu1 %v4562_v1  ;;  %v4538_v7 = vadd.bf16 %v4474_v62, %v4020_v28  ;;  %v4036_v45 = vpack.c.bf16 %v5682_v30, %v5681_v48  ;;  %v5809_v20 = vsel %vm4123_vm14, 1.0, %v6308_v41  ;;  %v5810_v51 = vsel %vm4124_vm15, 1.0, %v6308_v41 }
 0x268   :  { %v4490_v31 = vpack.c.bf16 %v5810_v51, %v5809_v20  ;;  %vm3656_vm1 = vcmp.eq.s32.totalorder %v6427_v36, %v9129_v11  ;;  %v5667_v34 = vsel %vm3655_vm0, 1.0, %v6308_v41  ;;  %vm4109_vm2 = vcmp.eq.s32.totalorder %v6424_v35, %v9137_v57 }
 0x269   :  { %6174 = vmatpush3.bf16.msra.mxu0 %v4538_v7  ;;  %v5668_v21 = vsel %vm3656_vm1, 1.0, %v6308_v41  ;;  %vm4110_vm3 = vcmp.eq.s32.totalorder %v6427_v36, %v9137_v57  ;;  %v5795_v22 = vsel %vm4109_vm2, 1.0, %v6308_v41  ;;  %vm3687_vm4 = vcmp.eq.s32.totalorder %v6430_v37, %v9129_v11 }
 0x26a   :  { %v4554_v14 = vadd.bf16 %v4490_v31, %v4036_v45  ;;  %v4029_v17 = vpack.c.bf16 %v5668_v21, %v5667_v34  ;;  %v5796_v9 = vsel %vm4110_vm3, 1.0, %v6308_v41  ;;  %vm3688_vm5 = vcmp.eq.s32.totalorder %v6433_v38, %v9129_v11 }
 0x26b   :  { %v4483_v35 = vpack.c.bf16 %v5796_v9, %v5795_v22  ;;  %v5699_v6 = vsel %vm3687_vm4, 1.0, %v6308_v41  ;;  %v5700_v23 = vsel %vm3688_vm5, 1.0, %v6308_v41  ;;  %vm4141_vm6 = vcmp.eq.s32.totalorder %v6430_v37, %v9137_v57 }
 0x26c   :  { %6196 = vmatpush3.bf16.msra.mxu1 %v4554_v14  ;;  %v4045_v36 = vpack.c.bf16 %v5700_v23, %v5699_v6  ;;  %vm4142_vm7 = vcmp.eq.s32.totalorder %v6433_v38, %v9137_v57  ;;  %v5827_v53 = vsel %vm4141_vm6, 1.0, %v6308_v41  ;;  %vm3639_vm8 = vcmp.eq.s32.totalorder %v6436_v39, %v9129_v11 }
 0x26d   :  { %v4547_v26 = vadd.bf16 %v4483_v35, %v4029_v17  ;;  %v5828_v47 = vsel %vm4142_vm7, 1.0, %v6308_v41  ;;  %vm3640_vm9 = vcmp.eq.s32.totalorder %v6560_v42, %v9129_v11  ;;  %v5651_v60 = vsel %vm3639_vm8, 1.0, %v6308_v41 }
 0x26e   :  { %v4499_v10 = vpack.c.bf16 %v5828_v47, %v5827_v53  ;;  %v5652_v37 = vsel %vm3640_vm9, 1.0, %v6308_v41  ;;  %vm4093_vm10 = vcmp.eq.s32.totalorder %v6436_v39, %v9137_v57  ;;  %vm4094_vm11 = vcmp.eq.s32.totalorder %v6560_v42, %v9137_v57 }
 0x26f   :  { %6175 = vmatprep.subr.bf16.mxu0 %v4547_v26  ;;  %v4021_v38 = vpack.c.bf16 %v5652_v37, %v5651_v60  ;;  %v5779_v12 = vsel %vm4093_vm10, 1.0, %v6308_v41  ;;  %v5780_v13 = vsel %vm4094_vm11, 1.0, %v6308_v41  ;;  %vm3671_vm12 = vcmp.eq.s32.totalorder %v6576_v50, %v9129_v11 }
 0x270   :  { %v4563_v27 = vadd.bf16 %v4499_v10, %v4045_v36  ;;  %v4475_v28 = vpack.c.bf16 %v5780_v13, %v5779_v12  ;;  %vm3672_vm13 = vcmp.eq.s32.totalorder %v6579_v54, %v9129_v11  ;;  %v5683_v18 = vsel %vm3671_vm12, 1.0, %v6308_v41 }
 0x271   :  { %v5684_v39 = vsel %vm3672_vm13, 1.0, %v6308_v41  ;;  %vm4125_vm14 = vcmp.eq.s32.totalorder %v6576_v50, %v9137_v57  ;;  %vm4126_vm15 = vcmp.eq.s32.totalorder %v6579_v54, %v9137_v57  ;;  %vm3657_vm0 = vcmp.eq.s32.totalorder %v6586_v55, %v9129_v11 }
 0x272   :  { %6197 = vmatprep.subr.bf16.mxu1 %v4563_v27  ;;  %v4539_v42 = vadd.bf16 %v4475_v28, %v4021_v38  ;;  %v4037_v59 = vpack.c.bf16 %v5684_v39, %v5683_v18  ;;  %v5811_v1 = vsel %vm4125_vm14, 1.0, %v6308_v41  ;;  %v5812_v62 = vsel %vm4126_vm15, 1.0, %v6308_v41  ;;  %v10662_v27 = vld [vmem:[#allocation10_spill] sm:$0xff] }
 0x273   :  { %v4491_v48 = vpack.c.bf16 %v5812_v62, %v5811_v1  ;;  %vm3658_vm1 = vcmp.eq.s32.totalorder %v6589_v56, %v9129_v11  ;;  %v5669_v30 = vsel %vm3657_vm0, 1.0, %v6308_v41  ;;  %vm4111_vm2 = vcmp.eq.s32.totalorder %v6586_v55, %v9137_v57 }
 0x274   :  { %6176 = vmatpush3.bf16.msra.mxu0 %v4539_v42  ;;  %v5670_v50 = vsel %vm3658_vm1, 1.0, %v6308_v41  ;;  %vm4112_vm3 = vcmp.eq.s32.totalorder %v6589_v56, %v9137_v57  ;;  %v5797_v54 = vsel %vm4111_vm2, 1.0, %v6308_v41  ;;  %vm3689_vm4 = vcmp.eq.s32.totalorder %v6610_v2, %v9129_v11 }
 0x275   :  { %v4555_v7 = vadd.bf16 %v4491_v48, %v4037_v59  ;;  %v4030_v45 = vpack.c.bf16 %v5670_v50, %v5669_v30  ;;  %v5798_v20 = vsel %vm4112_vm3, 1.0, %v6308_v41  ;;  %vm3690_vm5 = vcmp.eq.s32.totalorder %v6615_v24, %v9129_v11  ;;  %v10663_v59 = vld [vmem:[#allocation11_spill] sm:$0xff]  ;;  %v10664_v48 = vld [vmem:[#allocation12_spill] sm:$0xff]  ;;  %v10665_v50 = vld [vmem:[#allocation13_spill] sm:$0xff] }
 0x276   :  { %v4484_v51 = vpack.c.bf16 %v5798_v20, %v5797_v54  ;;  %v5701_v55 = vsel %vm3689_vm4, 1.0, %v6308_v41  ;;  %v5702_v61 = vsel %vm3690_vm5, 1.0, %v6308_v41  ;;  %vm4143_vm6 = vcmp.eq.s32.totalorder %v6610_v2, %v9137_v57 }
 0x277   :  { %6198 = vmatpush3.bf16.msra.mxu1 %v4555_v7  ;;  %v4046_v56 = vpack.c.bf16 %v5702_v61, %v5701_v55  ;;  %vm4144_vm7 = vcmp.eq.s32.totalorder %v6615_v24, %v9137_v57  ;;  %v5829_v32 = vsel %vm4143_vm6, 1.0, %v6308_v41  ;;  %vm3641_vm8 = vcmp.eq.s32.totalorder %v6624_v43, %v9129_v11  ;;  %v10666_v55 = vld [vmem:[#allocation14_spill] sm:$0xff] }
 0x278   :  { %v4548_v31 = vadd.bf16 %v4484_v51, %v4030_v45  ;;  %v5830_v34 = vsel %vm4144_vm7, 1.0, %v6308_v41  ;;  %vm3642_vm9 = vcmp.eq.s32.totalorder %v6627_v44, %v9129_v11  ;;  %v5653_v5 = vsel %vm3641_vm8, 1.0, %v6308_v41 }
 0x279   :  { %v4500_v15 = vpack.c.bf16 %v5830_v34, %v5829_v32  ;;  %v5654_v2 = vsel %vm3642_vm9, 1.0, %v6308_v41  ;;  %vm4095_vm10 = vcmp.eq.s32.totalorder %v6624_v43, %v9137_v57  ;;  %vm4096_vm11 = vcmp.eq.s32.totalorder %v6627_v44, %v9137_v57  ;;  %v9397_v34 = vpop.f32.mrb[4].mxu0 }
 0x27a   :  { %6177 = vmatprep.subr.bf16.mxu0 %v4548_v31  ;;  %v4022_v24 = vpack.c.bf16 %v5654_v2, %v5653_v5  ;;  %v5781_v21 = vsel %vm4095_vm10, 1.0, %v6308_v41  ;;  %v5782_v22 = vsel %vm4096_vm11, 1.0, %v6308_v41  ;;  %vm3673_vm12 = vcmp.eq.s32.totalorder %v6634_v46, %v9129_v11  ;;  %v10667_v31 = vld [vmem:[#allocation15_spill] sm:$0xff]  ;;  %v9399_v5 = vpop.f32.mrb[4].mxu1 }
 0x27b   :  { %v4564_v14 = vadd.bf16 %v4500_v15, %v4046_v56  ;;  %v4476_v17 = vpack.c.bf16 %v5782_v22, %v5781_v21  ;;  %vm3674_vm13 = vcmp.eq.s32.totalorder %v6649_v58, %v9129_v11  ;;  %v5685_v9 = vsel %vm3673_vm12, 1.0, %v6308_v41  ;;  %v10668_v21 = vld [vmem:[#allocation16_spill] sm:$0xff]  ;;  %v9404_v22 = vpop.f32.mrb[5].mxu0 }
 0x27c   :  { %v5686_v43 = vsel %vm3674_vm13, 1.0, %v6308_v41  ;;  %vm4127_vm14 = vcmp.eq.s32.totalorder %v6634_v46, %v9137_v57  ;;  %vm4128_vm15 = vcmp.eq.s32.totalorder %v6649_v58, %v9137_v57  ;;  %vm3659_vm0 = vcmp.eq.s32.totalorder %v6665_v3, %v9129_v11 }
 0x27d   :  { %6199 = vmatprep.subr.bf16.mxu1 %v4564_v14  ;;  %v4540_v44 = vadd.bf16 %v4476_v17, %v4022_v24  ;;  %v4038_v35 = vpack.c.bf16 %v5686_v43, %v5685_v9  ;;  %v5813_v6 = vsel %vm4127_vm14, 1.0, %v6308_v41  ;;  %v5814_v23 = vsel %vm4128_vm15, 1.0, %v6308_v41  ;;  %v9406_v14 = vpop.f32.mrb[5].mxu1 }
 0x27e   :  { %v4492_v36 = vpack.c.bf16 %v5814_v23, %v5813_v6  ;;  %vm3660_vm1 = vcmp.eq.s32.totalorder %v6669_v16, %v9129_v11  ;;  %v5671_v53 = vsel %vm3659_vm0, 1.0, %v6308_v41  ;;  %vm4113_vm2 = vcmp.eq.s32.totalorder %v6665_v3, %v9137_v57 }
 0x27f   :  { %6178 = vmatpush3.bf16.msra.mxu0 %v4540_v44  ;;  %v5672_v46 = vsel %vm3660_vm1, 1.0, %v6308_v41  ;;  %vm4114_vm3 = vcmp.eq.s32.totalorder %v6669_v16, %v9137_v57  ;;  %v5799_v58 = vsel %vm4113_vm2, 1.0, %v6308_v41  ;;  %vm3691_vm4 = vcmp.eq.s32.totalorder %v6676_v33, %v9129_v11  ;;  %v5970_v44 = vpop.f32.mrb[6].mxu0 }
 0x280   :  { %v4556_v26 = vadd.bf16 %v4492_v36, %v4038_v35  ;;  %v4031_v47 = vpack.c.bf16 %v5672_v46, %v5671_v53  ;;  %v5800_v60 = vsel %vm4114_vm3, 1.0, %v6308_v41  ;;  %vm3692_vm5 = vcmp.eq.s32.totalorder %v6687_v52, %v9129_v11  ;;  %v5992_v35 = vpop.f32.mrb[6].mxu1  ;;  %v10669_v36 = vld [vmem:[#allocation17_spill] sm:$0xff]  ;;  %v5971_v53 = vpop.f32.mrb[7].mxu0 }
 0x281   :  { %v4485_v10 = vpack.c.bf16 %v5800_v60, %v5799_v58  ;;  %v5703_v3 = vsel %vm3691_vm4, 1.0, %v6308_v41  ;;  %v5704_v37 = vsel %vm3692_vm5, 1.0, %v6308_v41  ;;  %vm4145_vm6 = vcmp.eq.s32.totalorder %v6676_v33, %v9137_v57  ;;  %v5993_v46 = vpop.f32.mrb[7].mxu1 }
 0x282   :  { %6200 = vmatpush3.bf16.msra.mxu1 %v4556_v26  ;;  %v4047_v16 = vpack.c.bf16 %v5704_v37, %v5703_v3  ;;  %vm4146_vm7 = vcmp.eq.s32.totalorder %v6687_v52, %v9137_v57  ;;  %v5831_v38 = vsel %vm4145_vm6, 1.0, %v6308_v41  ;;  %vm3643_vm8 = vcmp.eq.s32.totalorder %v6702_v0, %v9129_v11  ;;  %v9423_v3 = vpop.f32.mrb[8].mxu1 }
 0x283   :  { %v4549_v12 = vadd.bf16 %v4485_v10, %v4031_v47  ;;  %v5832_v13 = vsel %vm4146_vm7, 1.0, %v6308_v41  ;;  %vm3644_vm9 = vcmp.eq.s32.totalorder %v10662_v27, %v9129_v11  ;;  %v5655_v28 = vsel %vm3643_vm8, 1.0, %v6308_v41  ;;  %v10670_v47 = vld [vmem:[#allocation18_spill] sm:$0xff]  ;;  %v9421_v10 = vpop.f32.mrb[8].mxu0 }
 0x284   :  { %v4501_v18 = vpack.c.bf16 %v5832_v13, %v5831_v38  ;;  %v5656_v33 = vsel %vm3644_vm9, 1.0, %v6308_v41  ;;  %vm4097_vm10 = vcmp.eq.s32.totalorder %v6702_v0, %v9137_v57  ;;  %vm4098_vm11 = vcmp.eq.s32.totalorder %v10662_v27, %v9137_v57  ;;  %v9430_v38 = vpop.f32.mrb[9].mxu0 }
 0x285   :  { %6179 = vmatprep.subr.bf16.mxu0 %v4549_v12  ;;  %v4023_v52 = vpack.c.bf16 %v5656_v33, %v5655_v28  ;;  %v5783_v39 = vsel %vm4097_vm10, 1.0, %v6308_v41  ;;  %v5784_v42 = vsel %vm4098_vm11, 1.0, %v6308_v41  ;;  %vm3675_vm12 = vcmp.eq.s32.totalorder %v10663_v59, %v9129_v11  ;;  %v9432_v12 = vpop.f32.mrb[9].mxu1  ;;  %v6014_v33 = vpop.f32.mrb[10].mxu0 }
 0x286   :  { %v4565_v1 = vadd.bf16 %v4501_v18, %v4047_v16  ;;  %v4477_v62 = vpack.c.bf16 %v5784_v42, %v5783_v39  ;;  %vm3676_vm13 = vcmp.eq.s32.totalorder %v10664_v48, %v9129_v11  ;;  %v5687_v30 = vsel %vm3675_vm12, 1.0, %v6308_v41  ;;  %v10671_v18 = vld [vmem:[#allocation19_spill] sm:$0xff] }
 0x287   :  { %v5688_v0 = vsel %vm3676_vm13, 1.0, %v6308_v41  ;;  %vm4129_vm14 = vcmp.eq.s32.totalorder %v10663_v59, %v9137_v57  ;;  %vm4130_vm15 = vcmp.eq.s32.totalorder %v10664_v48, %v9137_v57  ;;  %vm3661_vm0 = vcmp.eq.s32.totalorder %v10665_v50, %v9129_v11  ;;  %v10672_v59 = vld [vmem:[#allocation20_spill] sm:$0xff] }
 0x288   :  { %6201 = vmatprep.subr.bf16.mxu1 %v4565_v1  ;;  %v4541_v54 = vadd.bf16 %v4477_v62, %v4023_v52  ;;  %v4039_v7 = vpack.c.bf16 %v5688_v0, %v5687_v30  ;;  %v5815_v45 = vsel %vm4129_vm14, 1.0, %v6308_v41  ;;  %v5816_v20 = vsel %vm4130_vm15, 1.0, %v6308_v41  ;;  %v6036_v52 = vpop.f32.mrb[10].mxu1  ;;  %v6015_v62 = vpop.f32.mrb[11].mxu0  ;;  %v10673_v0 = vld [vmem:[#allocation21_spill] sm:$0xff] }
 0x289   :  { %v4493_v51 = vpack.c.bf16 %v5816_v20, %v5815_v45  ;;  %vm3662_vm1 = vcmp.eq.s32.totalorder %v10666_v55, %v9129_v11  ;;  %v5673_v61 = vsel %vm3661_vm0, 1.0, %v6308_v41  ;;  %vm4115_vm2 = vcmp.eq.s32.totalorder %v10665_v50, %v9137_v57  ;;  %v6037_v48 = vpop.f32.mrb[11].mxu1  ;;  %v9448_v50 = vpop.f32.mrb[12].mxu0 }
 0x28a   :  { %6180 = vmatpush3.bf16.msra.mxu0 %v4541_v54  ;;  %v5674_v56 = vsel %vm3662_vm1, 1.0, %v6308_v41  ;;  %vm4116_vm3 = vcmp.eq.s32.totalorder %v10666_v55, %v9137_v57  ;;  %v5801_v32 = vsel %vm4115_vm2, 1.0, %v6308_v41  ;;  %vm3693_vm4 = vcmp.eq.s32.totalorder %v10667_v31, %v9129_v11  ;;  %v9450_v54 = vpop.f32.mrb[12].mxu1  ;;  %v9454_v55 = vpop.f32.mrb[13].mxu0 }
 0x28b   :  { %v4557_v15 = vadd.bf16 %v4493_v51, %v4039_v7  ;;  %v4032_v2 = vpack.c.bf16 %v5674_v56, %v5673_v61  ;;  %v5802_v24 = vsel %vm4116_vm3, 1.0, %v6308_v41  ;;  %vm3694_vm5 = vcmp.eq.s32.totalorder %v10668_v21, %v9129_v11  ;;  %v9456_v61 = vpop.f32.mrb[13].mxu1 }
 0x28c   :  { %v4486_v17 = vpack.c.bf16 %v5802_v24, %v5801_v32  ;;  %v5705_v9 = vsel %vm3693_vm4, 1.0, %v6308_v41  ;;  %v5706_v43 = vsel %vm3694_vm5, 1.0, %v6308_v41  ;;  %vm4147_vm6 = vcmp.eq.s32.totalorder %v10667_v31, %v9137_v57  ;;  %v10674_v32 = vld [vmem:[#allocation22_spill] sm:$0xff] }
 0x28d   :  { %6202 = vmatpush3.bf16.msra.mxu1 %v4557_v15  ;;  %v4048_v6 = vpack.c.bf16 %v5706_v43, %v5705_v9  ;;  %vm4148_vm7 = vcmp.eq.s32.totalorder %v10668_v21, %v9137_v57  ;;  %v5833_v23 = vsel %vm4147_vm6, 1.0, %v6308_v41  ;;  %vm3645_vm8 = vcmp.eq.s32.totalorder %v10669_v36, %v9129_v11  ;;  %v6058_v15 = vpop.f32.mrb[14].mxu0 }
 0x28e   :  { %v4550_v58 = vadd.bf16 %v4486_v17, %v4032_v2  ;;  %v5834_v26 = vsel %vm4148_vm7, 1.0, %v6308_v41  ;;  %vm3646_vm9 = vcmp.eq.s32.totalorder %v10670_v47, %v9129_v11  ;;  %v5657_v60 = vsel %vm3645_vm8, 1.0, %v6308_v41  ;;  %v6080_v2 = vpop.f32.mrb[14].mxu1  ;;  %v10675_v17 = vld [vmem:[#allocation23_spill] sm:$0xff]  ;;  %v6059_v9 = vpop.f32.mrb[15].mxu0 }
 0x28f   :  { %v4502_v37 = vpack.c.bf16 %v5834_v26, %v5833_v23  ;;  %v5658_v16 = vsel %vm3646_vm9, 1.0, %v6308_v41  ;;  %vm4099_vm10 = vcmp.eq.s32.totalorder %v10669_v36, %v9137_v57  ;;  %vm4100_vm11 = vcmp.eq.s32.totalorder %v10670_v47, %v9137_v57  ;;  %v6081_v43 = vpop.f32.mrb[15].mxu1  ;;  %v10676_v23 = vld [vmem:[#allocation24_spill] sm:$0xff]  ;;  %v10677_v47 = vld [vmem:[#allocation25_spill] sm:$0xff]  ;;  %v10683_v2 = vld [vmem:[#allocation31_spill] sm:$0xff] }
 0x290   :  { %6181 = vmatprep.subr.bf16.mxu0 %v4550_v58  ;;  %v4024_v13 = vpack.c.bf16 %v5658_v16, %v5657_v60  ;;  %v5785_v27 = vsel %vm4099_vm10, 1.0, %v6308_v41  ;;  %v5786_v28 = vsel %vm4100_vm11, 1.0, %v6308_v41  ;;  %vm3677_vm12 = vcmp.eq.s32.totalorder %v10671_v18, %v9129_v11  ;;  %v10678_v16 = vld [vmem:[#allocation26_spill] sm:$0xff]  ;;  %v10684_v9 = vld [vmem:[#allocation32_spill] sm:$0xff] }
 0x291   :  { %v4566_v39 = vadd.bf16 %v4502_v37, %v4048_v6  ;;  %v4478_v42 = vpack.c.bf16 %v5786_v28, %v5785_v27  ;;  %vm3678_vm13 = vcmp.eq.s32.totalorder %v10672_v59, %v9129_v11  ;;  %v5689_v1 = vsel %vm3677_vm12, 1.0, %v6308_v41 }
 0x292   :  { %v5690_v30 = vsel %vm3678_vm13, 1.0, %v6308_v41  ;;  %vm4131_vm14 = vcmp.eq.s32.totalorder %v10671_v18, %v9137_v57  ;;  %vm4132_vm15 = vcmp.eq.s32.totalorder %v10672_v59, %v9137_v57  ;;  %vm3663_vm0 = vcmp.eq.s32.totalorder %v10673_v0, %v9129_v11 }
 0x293   :  { %6203 = vmatprep.subr.bf16.mxu1 %v4566_v39  ;;  %v4542_v7 = vadd.bf16 %v4478_v42, %v4024_v13  ;;  %v4040_v45 = vpack.c.bf16 %v5690_v30, %v5689_v1  ;;  %v5817_v20 = vsel %vm4131_vm14, 1.0, %v6308_v41  ;;  %v5818_v51 = vsel %vm4132_vm15, 1.0, %v6308_v41  ;;  %v10679_v39 = vld [vmem:[#allocation27_spill] sm:$0xff]  ;;  %v10680_v1 = vld [vmem:[#allocation28_spill] sm:$0xff]  ;;  %v10681_v30 = vld [vmem:[#allocation29_spill] sm:$0xff] }
 0x294   :  { %v4494_v56 = vpack.c.bf16 %v5818_v51, %v5817_v20  ;;  %vm3664_vm1 = vcmp.eq.s32.totalorder %v10674_v32, %v9129_v11  ;;  %v5675_v31 = vsel %vm3663_vm0, 1.0, %v6308_v41  ;;  %vm4117_vm2 = vcmp.eq.s32.totalorder %v10673_v0, %v9137_v57 }
 0x295   :  { %6182 = vmatpush3.bf16.msra.mxu0 %v4542_v7  ;;  %v5676_v24 = vsel %vm3664_vm1, 1.0, %v6308_v41  ;;  %vm4118_vm3 = vcmp.eq.s32.totalorder %v10674_v32, %v9137_v57  ;;  %v5803_v21 = vsel %vm4117_vm2, 1.0, %v6308_v41  ;;  %vm3695_vm4 = vcmp.eq.s32.totalorder %v10675_v17, %v9129_v11 }
 0x296   :  { %v4558_v44 = vadd.bf16 %v4494_v56, %v4040_v45  ;;  %v4033_v35 = vpack.c.bf16 %v5676_v24, %v5675_v31  ;;  %v5804_v6 = vsel %vm4118_vm3, 1.0, %v6308_v41  ;;  %vm3696_vm5 = vcmp.eq.s32.totalorder %v10676_v23, %v9129_v11  ;;  %v10682_v56 = vld [vmem:[#allocation30_spill] sm:$0xff] }
 0x297   :  { %v4487_v36 = vpack.c.bf16 %v5804_v6, %v5803_v21  ;;  %v5707_v53 = vsel %vm3695_vm4, 1.0, %v6308_v41  ;;  %v5708_v46 = vsel %vm3696_vm5, 1.0, %v6308_v41  ;;  %vm4149_vm6 = vcmp.eq.s32.totalorder %v10675_v17, %v9137_v57 }
 0x298   :  { %6204 = vmatpush3.bf16.msra.mxu1 %v4558_v44  ;;  %v4049_v58 = vpack.c.bf16 %v5708_v46, %v5707_v53  ;;  %vm4150_vm7 = vcmp.eq.s32.totalorder %v10676_v23, %v9137_v57  ;;  %v5835_v26 = vsel %vm4149_vm6, 1.0, %v6308_v41  ;;  %vm3647_vm8 = vcmp.eq.s32.totalorder %v10677_v47, %v9129_v11 }
 0x299   :  { %v4551_v60 = vadd.bf16 %v4487_v36, %v4033_v35  ;;  %v5836_v37 = vsel %vm4150_vm7, 1.0, %v6308_v41  ;;  %vm3648_vm9 = vcmp.eq.s32.totalorder %v10678_v16, %v9129_v11  ;;  %v5659_v13 = vsel %vm3647_vm8, 1.0, %v6308_v41  ;;  %v10685_v36 = vld [vmem:[#allocation33_spill] sm:$0xff] }
 0x29a   :  { %v4503_v27 = vpack.c.bf16 %v5836_v37, %v5835_v26  ;;  %v5660_v28 = vsel %vm3648_vm9, 1.0, %v6308_v41  ;;  %vm4101_vm10 = vcmp.eq.s32.totalorder %v10677_v47, %v9137_v57  ;;  %vm4102_vm11 = vcmp.eq.s32.totalorder %v10678_v16, %v9137_v57 }
 0x29b   :  { %6183 = vmatprep.subr.bf16.mxu0 %v4551_v60  ;;  %v4025_v18 = vpack.c.bf16 %v5660_v28, %v5659_v13  ;;  %v5787_v33 = vsel %vm4101_vm10, 1.0, %v6308_v41  ;;  %v5788_v52 = vsel %vm4102_vm11, 1.0, %v6308_v41  ;;  %vm3679_vm12 = vcmp.eq.s32.totalorder %v10679_v39, %v9129_v11 }
 0x29c   :  { %v4567_v42 = vadd.bf16 %v4503_v27, %v4049_v58  ;;  %v4479_v59 = vpack.c.bf16 %v5788_v52, %v5787_v33  ;;  %vm3680_vm13 = vcmp.eq.s32.totalorder %v10680_v1, %v9129_v11  ;;  %v5691_v62 = vsel %vm3679_vm12, 1.0, %v6308_v41  ;;  %v10686_v58 = vld [vmem:[#allocation34_spill] sm:$0xff]  ;;  %v10687_v27 = vld [vmem:[#allocation35_spill] sm:$0xff]  ;;  %v10688_v33 = vld [vmem:[#allocation36_spill] sm:$0xff] }
 0x29d   :  { %v5692_v48 = vsel %vm3680_vm13, 1.0, %v6308_v41  ;;  %vm4133_vm14 = vcmp.eq.s32.totalorder %v10679_v39, %v9137_v57  ;;  %vm4134_vm15 = vcmp.eq.s32.totalorder %v10680_v1, %v9137_v57  ;;  %vm3665_vm0 = vcmp.eq.s32.totalorder %v10681_v30, %v9129_v11 }
 0x29e   :  { %6205 = vmatprep.subr.bf16.mxu1 %v4567_v42  ;;  %v4543_v0 = vadd.bf16 %v4479_v59, %v4025_v18  ;;  %v4041_v7 = vpack.c.bf16 %v5692_v48, %v5691_v62  ;;  %v5819_v45 = vsel %vm4133_vm14, 1.0, %v6308_v41  ;;  %v5820_v20 = vsel %vm4134_vm15, 1.0, %v6308_v41  ;;  %v10689_v42 = vld [vmem:[#allocation37_spill] sm:$0xff] }
 0x29f   :  { %v4495_v51 = vpack.c.bf16 %v5820_v20, %v5819_v45  ;;  %vm3666_vm1 = vcmp.eq.s32.totalorder %v10682_v56, %v9129_v11  ;;  %v5677_v32 = vsel %vm3665_vm0, 1.0, %v6308_v41  ;;  %vm4119_vm2 = vcmp.eq.s32.totalorder %v10681_v30, %v9137_v57 }
 0x2a0   :  { %6184 = vmatpush3.bf16.msra.mxu0 %v4543_v0  ;;  %v5678_v31 = vsel %vm3666_vm1, 1.0, %v6308_v41  ;;  %vm4120_vm3 = vcmp.eq.s32.totalorder %v10682_v56, %v9137_v57  ;;  %v5805_v15 = vsel %vm4119_vm2, 1.0, %v6308_v41  ;;  %vm3697_vm4 = vcmp.eq.s32.totalorder %v10683_v2, %v9129_v11  ;;  %v10690_v0 = vld [vmem:[#allocation38_spill] sm:$0xff] }
 0x2a1   :  { %v4559_v24 = vadd.bf16 %v4495_v51, %v4041_v7  ;;  %v4034_v21 = vpack.c.bf16 %v5678_v31, %v5677_v32  ;;  %v5806_v17 = vsel %vm4120_vm3, 1.0, %v6308_v41  ;;  %vm3698_vm5 = vcmp.eq.s32.totalorder %v10684_v9, %v9129_v11  ;;  %v10691_v51 = vld [vmem:[#allocation39_spill] sm:$0xff] }
 0x2a2   :  { %v4488_v43 = vpack.c.bf16 %v5806_v17, %v5805_v15  ;;  %v5709_v44 = vsel %vm3697_vm4, 1.0, %v6308_v41  ;;  %v5710_v35 = vsel %vm3698_vm5, 1.0, %v6308_v41  ;;  %vm4151_vm6 = vcmp.eq.s32.totalorder %v10683_v2, %v9137_v57  ;;  %v10692_v15 = vld [vmem:[#allocation40_spill] sm:$0xff]  ;;  %v10693_v17 = vld [vmem:[#allocation7_spill] sm:$0xff] }
 0x2a3   :  { %6206 = vmatpush3.bf16.msra.mxu1 %v4559_v24  ;;  %v4050_v6 = vpack.c.bf16 %v5710_v35, %v5709_v44  ;;  %vm4152_vm7 = vcmp.eq.s32.totalorder %v10684_v9, %v9137_v57  ;;  %v5837_v23 = vsel %vm4151_vm6, 1.0, %v6308_v41  ;;  %vm3649_vm8 = vcmp.eq.s32.totalorder %v10685_v36, %v9129_v11  ;;  %v10694_v44 = vld [vmem:[#allocation41_spill] sm:$0xff] }
 0x2a4   :  { %v4552_v53 = vadd.bf16 %v4488_v43, %v4034_v21  ;;  %v5838_v46 = vsel %vm4152_vm7, 1.0, %v6308_v41  ;;  %vm3650_vm9 = vcmp.eq.s32.totalorder %v10686_v58, %v9129_v11  ;;  %v5661_v26 = vsel %vm3649_vm8, 1.0, %v6308_v41 }
 0x2a5   :  { %v4504_v47 = vpack.c.bf16 %v5838_v46, %v5837_v23  ;;  %v5662_v60 = vsel %vm3650_vm9, 1.0, %v6308_v41  ;;  %vm4103_vm10 = vcmp.eq.s32.totalorder %v10685_v36, %v9137_v57  ;;  %vm4104_vm11 = vcmp.eq.s32.totalorder %v10686_v58, %v9137_v57  ;;  %v10695_v36 = vld [vmem:[#allocation101_spill] sm:$0xff]  ;;  %v10696_v58 = vld [vmem:[#allocation8_spill] sm:$0xff] }
 0x2a6   :  { %6185 = vmatprep.subr.bf16.mxu0 %v4552_v53  ;;  %v4026_v37 = vpack.c.bf16 %v5662_v60, %v5661_v26  ;;  %v5789_v16 = vsel %vm4103_vm10, 1.0, %v6308_v41  ;;  %v5790_v13 = vsel %vm4104_vm11, 1.0, %v6308_v41  ;;  %vm3681_vm12 = vcmp.eq.s32.totalorder %v10687_v27, %v9129_v11 }
 0x2a7   :  { %v4568_v28 = vadd.bf16 %v4504_v47, %v4050_v6  ;;  %v4480_v18 = vpack.c.bf16 %v5790_v13, %v5789_v16  ;;  %vm3682_vm13 = vcmp.eq.s32.totalorder %v10688_v33, %v9129_v11  ;;  %v5693_v52 = vsel %vm3681_vm12, 1.0, %v6308_v41 }
 0x2a8   :  { %v5694_v39 = vsel %vm3682_vm13, 1.0, %v6308_v41  ;;  %vm4135_vm14 = vcmp.eq.s32.totalorder %v10687_v27, %v9137_v57  ;;  %vm4136_vm15 = vcmp.eq.s32.totalorder %v10688_v33, %v9137_v57  ;;  %vm3715_vm0 = vcmp.eq.s32.totalorder %v10689_v42, %v9129_v11  ;;  %v10698_v27 = vld [vmem:[#allocation44_spill] sm:$0xff]  ;;  %v10700_v33 = vld [vmem:[#allocation45_spill] sm:$0xff] }
 0x2a9   :  { %6207 = vmatprep.subr.bf16.mxu1 %v4568_v28  ;;  %v4544_v59 = vadd.bf16 %v4480_v18, %v4026_v37  ;;  %v4042_v1 = vpack.c.bf16 %v5694_v39, %v5693_v52  ;;  %v5821_v62 = vsel %vm4135_vm14, 1.0, %v6308_v41  ;;  %v5822_v48 = vsel %vm4136_vm15, 1.0, %v6308_v41  ;;  %v10697_v37 = vld [vmem:[#allocation43_spill] sm:$0xff]  ;;  %v10699_v18 = vld [vmem:[#allocation102_spill] sm:$0xff] }
 0x2aa   :  { %v4496_v30 = vpack.c.bf16 %v5822_v48, %v5821_v62  ;;  %vm3716_vm1 = vcmp.eq.s32.totalorder %v10690_v0, %v9129_v11  ;;  %v5727_v7 = vsel %vm3715_vm0, 1.0, %v6308_v41  ;;  %vm4169_vm2 = vcmp.eq.s32.totalorder %v10689_v42, %v9137_v57  ;;  %v10701_v62 = vld [vmem:[#allocation46_spill] sm:$0xff] }
 0x2ab   :  { %6186 = vmatpush3.bf16.msra.mxu0 %v4544_v59  ;;  %v5728_v45 = vsel %vm3716_vm1, 1.0, %v6308_v41  ;;  %vm4170_vm3 = vcmp.eq.s32.totalorder %v10690_v0, %v9137_v57  ;;  %v5855_v20 = vsel %vm4169_vm2, 1.0, %v6308_v41  ;;  %vm3747_vm4 = vcmp.eq.s32.totalorder %v10691_v51, %v9129_v11 }
 0x2ac   :  { %v4560_v56 = vadd.bf16 %v4496_v30, %v4042_v1  ;;  %v4059_v32 = vpack.c.bf16 %v5728_v45, %v5727_v7  ;;  %v5856_v31 = vsel %vm4170_vm3, 1.0, %v6308_v41  ;;  %vm3748_vm5 = vcmp.eq.s32.totalorder %v10692_v15, %v9129_v11  ;;  %v10702_v7 = vld [vmem:[#allocation47_spill] sm:$0xff] }
 0x2ad   :  { %v4513_v2 = vpack.c.bf16 %v5856_v31, %v5855_v20  ;;  %v5759_v24 = vsel %vm3747_vm4, 1.0, %v6308_v41  ;;  %v5760_v21 = vsel %vm3748_vm5, 1.0, %v6308_v41  ;;  %vm4201_vm6 = vcmp.eq.s32.totalorder %v10691_v51, %v9137_v57 }
 0x2ae   :  { %6208 = vmatpush3.bf16.msra.mxu1 %v4560_v56  ;;  %4634 = vmatmul.mubr.bf16.vlgmr.msra.gmra.mrb[24].mxu0 %v10693_v17  ;;  %v4075_v9 = vpack.c.bf16 %v5760_v21, %v5759_v24  ;;  %vm4202_vm7 = vcmp.eq.s32.totalorder %v10692_v15, %v9137_v57  ;;  %v5887_v43 = vsel %vm4201_vm6, 1.0, %v6308_v41  ;;  %vm3699_vm8 = vcmp.eq.s32.totalorder %v10694_v44, %v9129_v11  ;;  %v10703_v56 = vld [vmem:[#allocation48_spill] sm:$0xff]  ;;  %v10704_v21 = vld [vmem:[#allocation49_spill] sm:$0xff] }
 0x2af   :  { %v4577_v35 = vadd.bf16 %v4513_v2, %v4059_v32  ;;  %v5888_v6 = vsel %vm4202_vm7, 1.0, %v6308_v41  ;;  %vm3700_vm9 = vcmp.eq.s32.totalorder %v10601_v49, %v9129_v11  ;;  %v5711_v23 = vsel %vm3699_vm8, 1.0, %v6308_v41  ;;  %4713 = vmatprep.mubr.bf16.mxu0 %v10695_v36 }
 0x2b0   :  { %v4529_v53 = vpack.c.bf16 %v5888_v6, %v5887_v43  ;;  %v5712_v46 = vsel %vm3700_vm9, 1.0, %v6308_v41  ;;  %vm4153_vm10 = vcmp.eq.s32.totalorder %v10694_v44, %v9137_v57  ;;  %vm4154_vm11 = vcmp.eq.s32.totalorder %v10601_v49, %v9137_v57  ;;  %v10705_v43 = vld [vmem:[#allocation50_spill] sm:$0xff] }
 0x2b1   :  { %4674 = vmatmul.mubr.bf16.vlgmr.msra.gmra.mrb[24].mxu1 %v10696_v58  ;;  %6215 = vmatprep.subr.bf16.mxu0 %v4577_v35  ;;  %v4051_v26 = vpack.c.bf16 %v5712_v46, %v5711_v23  ;;  %v5839_v47 = vsel %vm4153_vm10, 1.0, %v6308_v41  ;;  %v5840_v60 = vsel %vm4154_vm11, 1.0, %v6308_v41  ;;  %vm3731_vm12 = vcmp.eq.s32.totalorder %v10697_v37, %v9129_v11  ;;  %v10706_v46 = vld [vmem:[#allocation51_spill] sm:$0xff] }
 0x2b2   :  { %v4593_v16 = vadd.bf16 %v4529_v53, %v4075_v9  ;;  %v4505_v13 = vpack.c.bf16 %v5840_v60, %v5839_v47  ;;  %vm3732_vm13 = vcmp.eq.s32.totalorder %v10698_v27, %v9129_v11  ;;  %v5743_v28 = vsel %vm3731_vm12, 1.0, %v6308_v41  ;;  %4753 = vmatprep.mubr.bf16.mxu1 %v10699_v18  ;;  %v10707_v47 = vld [vmem:[#allocation52_spill] sm:$0xff] }
 0x2b3   :  { %v5744_v49 = vsel %vm3732_vm13, 1.0, %v6308_v41  ;;  %vm4185_vm14 = vcmp.eq.s32.totalorder %v10697_v37, %v9137_v57  ;;  %vm4186_vm15 = vcmp.eq.s32.totalorder %v10698_v27, %v9137_v57  ;;  %vm3717_vm0 = vcmp.eq.s32.totalorder %v10700_v33, %v9129_v11 }
 0x2b4   :  { %6237 = vmatprep.subr.bf16.mxu1 %v4593_v16  ;;  %v4569_v52 = vadd.bf16 %v4505_v13, %v4051_v26  ;;  %v4067_v39 = vpack.c.bf16 %v5744_v49, %v5743_v28  ;;  %v5871_v42 = vsel %vm4185_vm14, 1.0, %v6308_v41  ;;  %v5872_v59 = vsel %vm4186_vm15, 1.0, %v6308_v41  ;;  %v10708_v16 = vld [vmem:[#allocation53_spill] sm:$0xff] }
 0x2b5   :  { %v4521_v1 = vpack.c.bf16 %v5872_v59, %v5871_v42  ;;  %vm3718_vm1 = vcmp.eq.s32.totalorder %v10701_v62, %v9129_v11  ;;  %v5729_v48 = vsel %vm3717_vm0, 1.0, %v6308_v41  ;;  %vm4171_vm2 = vcmp.eq.s32.totalorder %v10700_v33, %v9137_v57  ;;  %v10709_v33 = vld [vmem:[#allocation54_spill] sm:$0xff]  ;;  %v10710_v59 = vld [vmem:[#allocation55_spill] sm:$0xff] }
 0x2b6   :  { %6216 = vmatpush3.bf16.msra.mxu0 %v4569_v52  ;;  %v5730_v30 = vsel %vm3718_vm1, 1.0, %v6308_v41  ;;  %vm4172_vm3 = vcmp.eq.s32.totalorder %v10701_v62, %v9137_v57  ;;  %v5857_v0 = vsel %vm4171_vm2, 1.0, %v6308_v41  ;;  %vm3749_vm4 = vcmp.eq.s32.totalorder %v10702_v7, %v9129_v11 }
 0x2b7   :  { %v4585_v45 = vadd.bf16 %v4521_v1, %v4067_v39  ;;  %v4060_v20 = vpack.c.bf16 %v5730_v30, %v5729_v48  ;;  %v5858_v51 = vsel %vm4172_vm3, 1.0, %v6308_v41  ;;  %vm3750_vm5 = vcmp.eq.s32.totalorder %v10703_v56, %v9129_v11  ;;  %v10711_v30 = vld [vmem:[#allocation56_spill] sm:$0xff] }
 0x2b8   :  { %v4514_v32 = vpack.c.bf16 %v5858_v51, %v5857_v0  ;;  %v5761_v31 = vsel %vm3749_vm4, 1.0, %v6308_v41  ;;  %v5762_v15 = vsel %vm3750_vm5, 1.0, %v6308_v41  ;;  %vm4203_vm6 = vcmp.eq.s32.totalorder %v10702_v7, %v9137_v57 }
 0x2b9   :  { %6238 = vmatpush3.bf16.msra.mxu1 %v4585_v45  ;;  %v4076_v2 = vpack.c.bf16 %v5762_v15, %v5761_v31  ;;  %vm4204_vm7 = vcmp.eq.s32.totalorder %v10703_v56, %v9137_v57  ;;  %v5889_v24 = vsel %vm4203_vm6, 1.0, %v6308_v41  ;;  %vm3701_vm8 = vcmp.eq.s32.totalorder %v10704_v21, %v9129_v11  ;;  %v10712_v56 = vld [vmem:[#allocation57_spill] sm:$0xff]  ;;  %v10713_v15 = vld [vmem:[#allocation58_spill] sm:$0xff] }
 0x2ba   :  { %v4578_v17 = vadd.bf16 %v4514_v32, %v4060_v20  ;;  %v5890_v9 = vsel %vm4204_vm7, 1.0, %v6308_v41  ;;  %vm3702_vm9 = vcmp.eq.s32.totalorder %v10705_v43, %v9129_v11  ;;  %v5713_v44 = vsel %vm3701_vm8, 1.0, %v6308_v41 }
 0x2bb   :  { %v4530_v35 = vpack.c.bf16 %v5890_v9, %v5889_v24  ;;  %v5714_v6 = vsel %vm3702_vm9, 1.0, %v6308_v41  ;;  %vm4155_vm10 = vcmp.eq.s32.totalorder %v10704_v21, %v9137_v57  ;;  %vm4156_vm11 = vcmp.eq.s32.totalorder %v10705_v43, %v9137_v57 }
 0x2bc   :  { %6217 = vmatprep.subr.bf16.mxu0 %v4578_v17  ;;  %v4052_v23 = vpack.c.bf16 %v5714_v6, %v5713_v44  ;;  %v5841_v36 = vsel %vm4155_vm10, 1.0, %v6308_v41  ;;  %v5842_v53 = vsel %vm4156_vm11, 1.0, %v6308_v41  ;;  %vm3733_vm12 = vcmp.eq.s32.totalorder %v10706_v46, %v9129_v11  ;;  %v10714_v44 = vld [vmem:[#allocation59_spill] sm:$0xff] }
 0x2bd   :  { %v4594_v58 = vadd.bf16 %v4530_v35, %v4076_v2  ;;  %v4506_v26 = vpack.c.bf16 %v5842_v53, %v5841_v36  ;;  %vm3734_vm13 = vcmp.eq.s32.totalorder %v10707_v47, %v9129_v11  ;;  %v5745_v60 = vsel %vm3733_vm12, 1.0, %v6308_v41 }
 0x2be   :  { %v5746_v37 = vsel %vm3734_vm13, 1.0, %v6308_v41  ;;  %vm4187_vm14 = vcmp.eq.s32.totalorder %v10706_v46, %v9137_v57  ;;  %vm4188_vm15 = vcmp.eq.s32.totalorder %v10707_v47, %v9137_v57  ;;  %vm3719_vm0 = vcmp.eq.s32.totalorder %v10708_v16, %v9129_v11  ;;  %v10716_v46 = vld [vmem:[#allocation61_spill] sm:$0xff] }
 0x2bf   :  { %6239 = vmatprep.subr.bf16.mxu1 %v4594_v58  ;;  %v4570_v13 = vadd.bf16 %v4506_v26, %v4052_v23  ;;  %v4068_v27 = vpack.c.bf16 %v5746_v37, %v5745_v60  ;;  %v5873_v28 = vsel %vm4187_vm14, 1.0, %v6308_v41  ;;  %v5874_v18 = vsel %vm4188_vm15, 1.0, %v6308_v41  ;;  %v10715_v23 = vld [vmem:[#allocation60_spill] sm:$0xff] }
 0x2c0   :  { %v4522_v49 = vpack.c.bf16 %v5874_v18, %v5873_v28  ;;  %vm3720_vm1 = vcmp.eq.s32.totalorder %v10709_v33, %v9129_v11  ;;  %v5731_v52 = vsel %vm3719_vm0, 1.0, %v6308_v41  ;;  %vm4173_vm2 = vcmp.eq.s32.totalorder %v10708_v16, %v9137_v57 }
 0x2c1   :  { %6218 = vmatpush3.bf16.msra.mxu0 %v4570_v13  ;;  %v5732_v39 = vsel %vm3720_vm1, 1.0, %v6308_v41  ;;  %vm4174_vm3 = vcmp.eq.s32.totalorder %v10709_v33, %v9137_v57  ;;  %v5859_v42 = vsel %vm4173_vm2, 1.0, %v6308_v41  ;;  %vm3751_vm4 = vcmp.eq.s32.totalorder %v10710_v59, %v9129_v11 }
 0x2c2   :  { %v4586_v1 = vadd.bf16 %v4522_v49, %v4068_v27  ;;  %v4061_v62 = vpack.c.bf16 %v5732_v39, %v5731_v52  ;;  %v5860_v48 = vsel %vm4174_vm3, 1.0, %v6308_v41  ;;  %vm3752_vm5 = vcmp.eq.s32.totalorder %v10711_v30, %v9129_v11  ;;  %v10717_v27 = vld [vmem:[#allocation62_spill] sm:$0xff]  ;;  %v10718_v52 = vld [vmem:[#allocation63_spill] sm:$0xff] }
 0x2c3   :  { %v4515_v0 = vpack.c.bf16 %v5860_v48, %v5859_v42  ;;  %v5763_v7 = vsel %vm3751_vm4, 1.0, %v6308_v41  ;;  %v5764_v45 = vsel %vm3752_vm5, 1.0, %v6308_v41  ;;  %vm4205_vm6 = vcmp.eq.s32.totalorder %v10710_v59, %v9137_v57  ;;  %v10719_v48 = vld [vmem:[#allocation64_spill] sm:$0xff] }
 0x2c4   :  { %6240 = vmatpush3.bf16.msra.mxu1 %v4586_v1  ;;  %v4077_v20 = vpack.c.bf16 %v5764_v45, %v5763_v7  ;;  %vm4206_vm7 = vcmp.eq.s32.totalorder %v10711_v30, %v9137_v57  ;;  %v5891_v51 = vsel %vm4205_vm6, 1.0, %v6308_v41  ;;  %vm3703_vm8 = vcmp.eq.s32.totalorder %v10712_v56, %v9129_v11 }
 0x2c5   :  { %v4579_v32 = vadd.bf16 %v4515_v0, %v4061_v62  ;;  %v5892_v31 = vsel %vm4206_vm7, 1.0, %v6308_v41  ;;  %vm3704_vm9 = vcmp.eq.s32.totalorder %v10713_v15, %v9129_v11  ;;  %v5715_v2 = vsel %vm3703_vm8, 1.0, %v6308_v41 }
 0x2c6   :  { %v4531_v24 = vpack.c.bf16 %v5892_v31, %v5891_v51  ;;  %v5716_v21 = vsel %vm3704_vm9, 1.0, %v6308_v41  ;;  %vm4157_vm10 = vcmp.eq.s32.totalorder %v10712_v56, %v9137_v57  ;;  %vm4158_vm11 = vcmp.eq.s32.totalorder %v10713_v15, %v9137_v57 }
 0x2c7   :  { %6219 = vmatprep.subr.bf16.mxu0 %v4579_v32  ;;  %v4053_v17 = vpack.c.bf16 %v5716_v21, %v5715_v2  ;;  %v5843_v9 = vsel %vm4157_vm10, 1.0, %v6308_v41  ;;  %v5844_v43 = vsel %vm4158_vm11, 1.0, %v6308_v41  ;;  %vm3735_vm12 = vcmp.eq.s32.totalorder %v10714_v44, %v9129_v11  ;;  %v10720_v32 = vld [vmem:[#allocation65_spill] sm:$0xff] }
 0x2c8   :  { %v4595_v35 = vadd.bf16 %v4531_v24, %v4077_v20  ;;  %v4507_v6 = vpack.c.bf16 %v5844_v43, %v5843_v9  ;;  %vm3736_vm13 = vcmp.eq.s32.totalorder %v10715_v23, %v9129_v11  ;;  %v5747_v36 = vsel %vm3735_vm12, 1.0, %v6308_v41  ;;  %v10721_v24 = vld [vmem:[#allocation66_spill] sm:$0xff] }
 0x2c9   :  { %v5748_v53 = vsel %vm3736_vm13, 1.0, %v6308_v41  ;;  %vm4189_vm14 = vcmp.eq.s32.totalorder %v10714_v44, %v9137_v57  ;;  %vm4190_vm15 = vcmp.eq.s32.totalorder %v10715_v23, %v9137_v57  ;;  %vm3721_vm0 = vcmp.eq.s32.totalorder %v10716_v46, %v9129_v11  ;;  %v9700_v58 = vpop.f32.mrb[16].mxu0 }
 0x2ca   :  { %6241 = vmatprep.subr.bf16.mxu1 %v4595_v35  ;;  %v4571_v26 = vadd.bf16 %v4507_v6, %v4053_v17  ;;  %v4069_v47 = vpack.c.bf16 %v5748_v53, %v5747_v36  ;;  %v5875_v60 = vsel %vm4189_vm14, 1.0, %v6308_v41  ;;  %v5876_v37 = vsel %vm4190_vm15, 1.0, %v6308_v41  ;;  %v9704_v16 = vpop.f32.mrb[17].mxu0  ;;  %v10722_v6 = vld [vmem:[#allocation67_spill] sm:$0xff]  ;;  %v10723_v53 = vld [vmem:[#allocation68_spill] sm:$0xff] }
 0x2cb   :  { %v4523_v13 = vpack.c.bf16 %v5876_v37, %v5875_v60  ;;  %vm3722_vm1 = vcmp.eq.s32.totalorder %v10717_v27, %v9129_v11  ;;  %v5733_v28 = vsel %vm3721_vm0, 1.0, %v6308_v41  ;;  %vm4175_vm2 = vcmp.eq.s32.totalorder %v10716_v46, %v9137_v57  ;;  %v6102_v18 = vpop.f32.mrb[18].mxu0 }
 0x2cc   :  { %6220 = vmatpush3.bf16.msra.mxu0 %v4571_v26  ;;  %v5734_v49 = vsel %vm3722_vm1, 1.0, %v6308_v41  ;;  %vm4176_vm3 = vcmp.eq.s32.totalorder %v10717_v27, %v9137_v57  ;;  %v5861_v33 = vsel %vm4175_vm2, 1.0, %v6308_v41  ;;  %vm3753_vm4 = vcmp.eq.s32.totalorder %v10718_v52, %v9129_v11  ;;  %v9717_v39 = vpop.f32.mrb[16].mxu1  ;;  %v6103_v42 = vpop.f32.mrb[19].mxu0  ;;  %v10725_v18 = vld [vmem:[#allocation70_spill] sm:$0xff] }
 0x2cd   :  { %v4587_v59 = vadd.bf16 %v4523_v13, %v4069_v47  ;;  %v4062_v1 = vpack.c.bf16 %v5734_v49, %v5733_v28  ;;  %v5862_v62 = vsel %vm4176_vm3, 1.0, %v6308_v41  ;;  %vm3754_vm5 = vcmp.eq.s32.totalorder %v10719_v48, %v9129_v11  ;;  %v9722_v30 = vpop.f32.mrb[17].mxu1  ;;  %v10724_v47 = vld [vmem:[#allocation69_spill] sm:$0xff]  ;;  %v10726_v42 = vld [vmem:[#allocation71_spill] sm:$0xff] }
 0x2ce   :  { %v4516_v0 = vpack.c.bf16 %v5862_v62, %v5861_v33  ;;  %v5765_v7 = vsel %vm3753_vm4, 1.0, %v6308_v41  ;;  %v5766_v45 = vsel %vm3754_vm5, 1.0, %v6308_v41  ;;  %vm4207_vm6 = vcmp.eq.s32.totalorder %v10718_v52, %v9137_v57  ;;  %v6124_v20 = vpop.f32.mrb[18].mxu1 }
 0x2cf   :  { %6242 = vmatpush3.bf16.msra.mxu1 %v4587_v59  ;;  %v4078_v51 = vpack.c.bf16 %v5766_v45, %v5765_v7  ;;  %vm4208_vm7 = vcmp.eq.s32.totalorder %v10719_v48, %v9137_v57  ;;  %v5893_v56 = vsel %vm4207_vm6, 1.0, %v6308_v41  ;;  %vm3705_vm8 = vcmp.eq.s32.totalorder %v10720_v32, %v9129_v11  ;;  %v6125_v31 = vpop.f32.mrb[19].mxu1  ;;  %v10727_v48 = vld [vmem:[#allocation72_spill] sm:$0xff] }
 0x2d0   :  { %v4580_v15 = vadd.bf16 %v4516_v0, %v4062_v1  ;;  %v5894_v2 = vsel %vm4208_vm7, 1.0, %v6308_v41  ;;  %vm3706_vm9 = vcmp.eq.s32.totalorder %v10721_v24, %v9129_v11  ;;  %v5717_v21 = vsel %vm3705_vm8, 1.0, %v6308_v41 }
 0x2d1   :  { %v4532_v17 = vpack.c.bf16 %v5894_v2, %v5893_v56  ;;  %v5718_v9 = vsel %vm3706_vm9, 1.0, %v6308_v41  ;;  %vm4159_vm10 = vcmp.eq.s32.totalorder %v10720_v32, %v9137_v57  ;;  %vm4160_vm11 = vcmp.eq.s32.totalorder %v10721_v24, %v9137_v57  ;;  %v10728_v56 = vld [vmem:[#allocation73_spill] sm:$0xff] }
 0x2d2   :  { %6221 = vmatprep.subr.bf16.mxu0 %v4580_v15  ;;  %v4054_v43 = vpack.c.bf16 %v5718_v9, %v5717_v21  ;;  %v5845_v44 = vsel %vm4159_vm10, 1.0, %v6308_v41  ;;  %v5846_v35 = vsel %vm4160_vm11, 1.0, %v6308_v41  ;;  %vm3737_vm12 = vcmp.eq.s32.totalorder %v10722_v6, %v9129_v11  ;;  %v10729_v15 = vld [vmem:[#allocation74_spill] sm:$0xff] }
 0x2d3   :  { %v4596_v23 = vadd.bf16 %v4532_v17, %v4078_v51  ;;  %v4508_v36 = vpack.c.bf16 %v5846_v35, %v5845_v44  ;;  %vm3738_vm13 = vcmp.eq.s32.totalorder %v10723_v53, %v9129_v11  ;;  %v5749_v46 = vsel %vm3737_vm12, 1.0, %v6308_v41  ;;  %v10730_v44 = vld [vmem:[#allocation75_spill] sm:$0xff] }
 0x2d4   :  { %v5750_v26 = vsel %vm3738_vm13, 1.0, %v6308_v41  ;;  %vm4191_vm14 = vcmp.eq.s32.totalorder %v10722_v6, %v9137_v57  ;;  %vm4192_vm15 = vcmp.eq.s32.totalorder %v10723_v53, %v9137_v57  ;;  %vm3723_vm0 = vcmp.eq.s32.totalorder %v10724_v47, %v9129_v11 }
 0x2d5   :  { %6243 = vmatprep.subr.bf16.mxu1 %v4596_v23  ;;  %v4572_v60 = vadd.bf16 %v4508_v36, %v4054_v43  ;;  %v4070_v37 = vpack.c.bf16 %v5750_v26, %v5749_v46  ;;  %v5877_v13 = vsel %vm4191_vm14, 1.0, %v6308_v41  ;;  %v5878_v27 = vsel %vm4192_vm15, 1.0, %v6308_v41  ;;  %v10731_v23 = vld [vmem:[#allocation76_spill] sm:$0xff] }
 0x2d6   :  { %v4524_v28 = vpack.c.bf16 %v5878_v27, %v5877_v13  ;;  %vm3724_vm1 = vcmp.eq.s32.totalorder %v10725_v18, %v9129_v11  ;;  %v5735_v49 = vsel %vm3723_vm0, 1.0, %v6308_v41  ;;  %vm4177_vm2 = vcmp.eq.s32.totalorder %v10724_v47, %v9137_v57 }
 0x2d7   :  { %6222 = vmatpush3.bf16.msra.mxu0 %v4572_v60  ;;  %v5736_v33 = vsel %vm3724_vm1, 1.0, %v6308_v41  ;;  %vm4178_vm3 = vcmp.eq.s32.totalorder %v10725_v18, %v9137_v57  ;;  %v5863_v52 = vsel %vm4177_vm2, 1.0, %v6308_v41  ;;  %vm3755_vm4 = vcmp.eq.s32.totalorder %v10726_v42, %v9129_v11  ;;  %v10733_v18 = vld [vmem:[#allocation78_spill] sm:$0xff] }
 0x2d8   :  { %v4588_v59 = vadd.bf16 %v4524_v28, %v4070_v37  ;;  %v4063_v1 = vpack.c.bf16 %v5736_v33, %v5735_v49  ;;  %v5864_v62 = vsel %vm4178_vm3, 1.0, %v6308_v41  ;;  %vm3756_vm5 = vcmp.eq.s32.totalorder %v10727_v48, %v9129_v11  ;;  %v10732_v28 = vld [vmem:[#allocation77_spill] sm:$0xff] }
 0x2d9   :  { %v4517_v0 = vpack.c.bf16 %v5864_v62, %v5863_v52  ;;  %v5767_v7 = vsel %vm3755_vm4, 1.0, %v6308_v41  ;;  %v5768_v45 = vsel %vm3756_vm5, 1.0, %v6308_v41  ;;  %vm4209_vm6 = vcmp.eq.s32.totalorder %v10726_v42, %v9137_v57  ;;  %v10734_v42 = vld [vmem:[#allocation79_spill] sm:$0xff] }
 0x2da   :  { %6244 = vmatpush3.bf16.msra.mxu1 %v4588_v59  ;;  %v4079_v20 = vpack.c.bf16 %v5768_v45, %v5767_v7  ;;  %vm4210_vm7 = vcmp.eq.s32.totalorder %v10727_v48, %v9137_v57  ;;  %v5895_v51 = vsel %vm4209_vm6, 1.0, %v6308_v41  ;;  %vm3707_vm8 = vcmp.eq.s32.totalorder %v10728_v56, %v9129_v11  ;;  %v10735_v59 = vld [vmem:[#allocation80_spill] sm:$0xff] }
 0x2db   :  { %v4581_v32 = vadd.bf16 %v4517_v0, %v4063_v1  ;;  %v5896_v31 = vsel %vm4210_vm7, 1.0, %v6308_v41  ;;  %vm3708_vm9 = vcmp.eq.s32.totalorder %v10729_v15, %v9129_v11  ;;  %v5719_v2 = vsel %vm3707_vm8, 1.0, %v6308_v41 }
 0x2dc   :  { %v4533_v24 = vpack.c.bf16 %v5896_v31, %v5895_v51  ;;  %v5720_v21 = vsel %vm3708_vm9, 1.0, %v6308_v41  ;;  %vm4161_vm10 = vcmp.eq.s32.totalorder %v10728_v56, %v9137_v57  ;;  %vm4162_vm11 = vcmp.eq.s32.totalorder %v10729_v15, %v9137_v57 }
 0x2dd   :  { %6223 = vmatprep.subr.bf16.mxu0 %v4581_v32  ;;  %v4055_v17 = vpack.c.bf16 %v5720_v21, %v5719_v2  ;;  %v5847_v9 = vsel %vm4161_vm10, 1.0, %v6308_v41  ;;  %v5848_v43 = vsel %vm4162_vm11, 1.0, %v6308_v41  ;;  %vm3739_vm12 = vcmp.eq.s32.totalorder %v10730_v44, %v9129_v11  ;;  %v10737_v32 = vld [vmem:[#allocation82_spill] sm:$0xff]  ;;  %v10738_v2 = vld [vmem:[#allocation83_spill] sm:$0xff] }
 0x2de   :  { %v4597_v35 = vadd.bf16 %v4533_v24, %v4079_v20  ;;  %v4509_v6 = vpack.c.bf16 %v5848_v43, %v5847_v9  ;;  %vm3740_vm13 = vcmp.eq.s32.totalorder %v10731_v23, %v9129_v11  ;;  %v5751_v36 = vsel %vm3739_vm12, 1.0, %v6308_v41  ;;  %v10736_v20 = vld [vmem:[#allocation81_spill] sm:$0xff] }
 0x2df   :  { %v5752_v53 = vsel %vm3740_vm13, 1.0, %v6308_v41  ;;  %vm4193_vm14 = vcmp.eq.s32.totalorder %v10730_v44, %v9137_v57  ;;  %vm4194_vm15 = vcmp.eq.s32.totalorder %v10731_v23, %v9137_v57  ;;  %v5925_v46 = vadd.f32 %v9236_v8, %v9225_v29  ;;  %v10739_v44 = vld [vmem:[#allocation84_spill] sm:$0xff] }
 0x2e0   :  { %6245 = vmatprep.subr.bf16.mxu1 %v4597_v35  ;;  %v4573_v26 = vadd.bf16 %v4509_v6, %v4055_v17  ;;  %v4071_v47 = vpack.c.bf16 %v5752_v53, %v5751_v36  ;;  %v5879_v60 = vsel %vm4193_vm14, 1.0, %v6308_v41  ;;  %v5880_v37 = vsel %vm4194_vm15, 1.0, %v6308_v41  ;;  %v10740_v36 = vld [vmem:[#allocation85_spill] sm:$0xff] }
 0x2e1   :  { %v4525_v13 = vpack.c.bf16 %v5880_v37, %v5879_v60  ;;  %v5947_v27 = vadd.f32 %v9238_v4, %v9227_v40  ;;  %vm3725_vm0 = vcmp.eq.s32.totalorder %v10732_v28, %v9129_v11  ;;  %vm3726_vm1 = vcmp.eq.s32.totalorder %v10733_v18, %v9129_v11 }
 0x2e2   :  { %6224 = vmatpush3.bf16.msra.mxu0 %v4573_v26  ;;  %v5737_v29 = vsel %vm3725_vm0, 1.0, %v6308_v41  ;;  %v5738_v8 = vsel %vm3726_vm1, 1.0, %v6308_v41  ;;  %vm4179_vm2 = vcmp.eq.s32.totalorder %v10732_v28, %v9137_v57  ;;  %vm4180_vm3 = vcmp.eq.s32.totalorder %v10733_v18, %v9137_v57  ;;  %v10742_v18 = vld [vmem:[#allocation87_spill] sm:$0xff] }
 0x2e3   :  { %v4589_v49 = vadd.bf16 %v4525_v13, %v4071_v47  ;;  %v9818_v33 = vadd.f32 %v5947_v27, %v5925_v46  ;;  %v4064_v40 = vpack.c.bf16 %v5738_v8, %v5737_v29  ;;  %v5865_v4 = vsel %vm4179_vm2, 1.0, %v6308_v41  ;;  %v10741_v47 = vld [vmem:[#allocation86_spill] sm:$0xff] }
 0x2e4   :  { %v5866_v52 = vsel %vm4180_vm3, 1.0, %v6308_v41  ;;  %vm3757_vm4 = vcmp.eq.s32.totalorder %v10734_v42, %v9129_v11  ;;  %vm3758_vm5 = vcmp.eq.s32.totalorder %v10735_v59, %v9129_v11  ;;  %vm4211_vm6 = vcmp.eq.s32.totalorder %v10734_v42, %v9137_v57 }
 0x2e5   :  { %6246 = vmatpush3.bf16.msra.mxu1 %v4589_v49  ;;  %v4518_v1 = vpack.c.bf16 %v5866_v52, %v5865_v4  ;;  %v5769_v62 = vsel %vm3757_vm4, 1.0, %v6308_v41  ;;  %v5770_v48 = vsel %vm3758_vm5, 1.0, %v6308_v41  ;;  %vm4212_vm7 = vcmp.eq.s32.totalorder %v10735_v59, %v9137_v57  ;;  %v10743_v49 = vld [vmem:[#allocation88_spill] sm:$0xff] }
 0x2e6   :  { %v4080_v0 = vpack.c.bf16 %v5770_v48, %v5769_v62  ;;  %v5897_v7 = vsel %vm4211_vm6, 1.0, %v6308_v41  ;;  %v5898_v45 = vsel %vm4212_vm7, 1.0, %v6308_v41  ;;  %vm3709_vm8 = vcmp.eq.s32.totalorder %v10736_v20, %v9129_v11  ;;  %v10744_v62 = vld [vmem:[#allocation89_spill] sm:$0xff] }
 0x2e7   :  { %v4582_v51 = vadd.bf16 %v4518_v1, %v4064_v40  ;;  %v4534_v56 = vpack.c.bf16 %v5898_v45, %v5897_v7  ;;  %vm3710_vm9 = vcmp.eq.s32.totalorder %v10737_v32, %v9129_v11  ;;  %v5721_v31 = vsel %vm3709_vm8, 1.0, %v6308_v41  ;;  %v10745_v7 = vld [vmem:[#allocation90_spill] sm:$0xff] }
 0x2e8   :  { %v5722_v15 = vsel %vm3710_vm9, 1.0, %v6308_v41  ;;  %vm4163_vm10 = vcmp.eq.s32.totalorder %v10736_v20, %v9137_v57  ;;  %vm4164_vm11 = vcmp.eq.s32.totalorder %v10737_v32, %v9137_v57  ;;  %vm3741_vm12 = vcmp.eq.s32.totalorder %v10738_v2, %v9129_v11 }
 0x2e9   :  { %6225 = vmatprep.subr.bf16.mxu0 %v4582_v51  ;;  %v4598_v24 = vadd.bf16 %v4534_v56, %v4080_v0  ;;  %v4056_v21 = vpack.c.bf16 %v5722_v15, %v5721_v31  ;;  %v5849_v17 = vsel %vm4163_vm10, 1.0, %v6308_v41  ;;  %v5850_v9 = vsel %vm4164_vm11, 1.0, %v6308_v41  ;;  %v10746_v51 = vld [vmem:[#allocation91_spill] sm:$0xff] }
 0x2ea   :  { %v4510_v43 = vpack.c.bf16 %v5850_v9, %v5849_v17  ;;  %vm3742_vm13 = vcmp.eq.s32.totalorder %v10739_v44, %v9129_v11  ;;  %v5753_v35 = vsel %vm3741_vm12, 1.0, %v6308_v41  ;;  %vm4195_vm14 = vcmp.eq.s32.totalorder %v10738_v2, %v9137_v57 }
 0x2eb   :  { %6247 = vmatprep.subr.bf16.mxu1 %v4598_v24  ;;  %v5754_v6 = vsel %vm3742_vm13, 1.0, %v6308_v41  ;;  %vm4196_vm15 = vcmp.eq.s32.totalorder %v10739_v44, %v9137_v57  ;;  %v5881_v23 = vsel %vm4195_vm14, 1.0, %v6308_v41  ;;  %vm3727_vm0 = vcmp.eq.s32.totalorder %v10740_v36, %v9129_v11  ;;  %v10747_v24 = vld [vmem:[#allocation92_spill] sm:$0xff] }
 0x2ec   :  { %v4574_v53 = vadd.bf16 %v4510_v43, %v4056_v21  ;;  %v4072_v46 = vpack.c.bf16 %v5754_v6, %v5753_v35  ;;  %v5882_v26 = vsel %vm4196_vm15, 1.0, %v6308_v41  ;;  %vm3728_vm1 = vcmp.eq.s32.totalorder %v10741_v47, %v9129_v11  ;;  %v10748_v43 = vld [vmem:[#allocation93_spill] sm:$0xff] }
 0x2ed   :  { %v4526_v60 = vpack.c.bf16 %v5882_v26, %v5881_v23  ;;  %v5739_v37 = vsel %vm3727_vm0, 1.0, %v6308_v41  ;;  %v5740_v13 = vsel %vm3728_vm1, 1.0, %v6308_v41  ;;  %vm4181_vm2 = vcmp.eq.s32.totalorder %v10740_v36, %v9137_v57  ;;  %v10749_v23 = vld [vmem:[#allocation94_spill] sm:$0xff] }
 0x2ee   :  { %6226 = vmatpush3.bf16.msra.mxu0 %v4574_v53  ;;  %v4065_v27 = vpack.c.bf16 %v5740_v13, %v5739_v37  ;;  %vm4182_vm3 = vcmp.eq.s32.totalorder %v10741_v47, %v9137_v57  ;;  %v5867_v28 = vsel %vm4181_vm2, 1.0, %v6308_v41  ;;  %vm3759_vm4 = vcmp.eq.s32.totalorder %v10742_v18, %v9129_v11 }
 0x2ef   :  { %v4590_v29 = vadd.bf16 %v4526_v60, %v4072_v46  ;;  %v5868_v8 = vsel %vm4182_vm3, 1.0, %v6308_v41  ;;  %vm3760_vm5 = vcmp.eq.s32.totalorder %v10743_v49, %v9129_v11  ;;  %v5771_v40 = vsel %vm3759_vm4, 1.0, %v6308_v41  ;;  %v10750_v60 = vld [vmem:[#allocation95_spill] sm:$0xff] }
 0x2f0   :  { %v4519_v4 = vpack.c.bf16 %v5868_v8, %v5867_v28  ;;  %v5772_v52 = vsel %vm3760_vm5, 1.0, %v6308_v41  ;;  %vm4213_vm6 = vcmp.eq.s32.totalorder %v10742_v18, %v9137_v57  ;;  %vm4214_vm7 = vcmp.eq.s32.totalorder %v10743_v49, %v9137_v57 }
 0x2f1   :  { %6248 = vmatpush3.bf16.msra.mxu1 %v4590_v29  ;;  %v4081_v42 = vpack.c.bf16 %v5772_v52, %v5771_v40  ;;  %v5899_v59 = vsel %vm4213_vm6, 1.0, %v6308_v41  ;;  %v5900_v1 = vsel %vm4214_vm7, 1.0, %v6308_v41  ;;  %vm3711_vm8 = vcmp.eq.s32.totalorder %v10744_v62, %v9129_v11 }
 0x2f2   :  { %v4583_v48 = vadd.bf16 %v4519_v4, %v4065_v27  ;;  %v4535_v0 = vpack.c.bf16 %v5900_v1, %v5899_v59  ;;  %vm3712_vm9 = vcmp.eq.s32.totalorder %v10745_v7, %v9129_v11  ;;  %v5723_v45 = vsel %vm3711_vm8, 1.0, %v6308_v41  ;;  %v10751_v27 = vld [vmem:[#allocation96_spill] sm:$0xff]  ;;  %v10752_v4 = vld [vmem:[#allocation97_spill] sm:$0xff]  ;;  %v10753_v59 = vld [vmem:[#allocation98_spill] sm:$0xff] }
 0x2f3   :  { %v5724_v20 = vsel %vm3712_vm9, 1.0, %v6308_v41  ;;  %vm4165_vm10 = vcmp.eq.s32.totalorder %v10744_v62, %v9137_v57  ;;  %vm4166_vm11 = vcmp.eq.s32.totalorder %v10745_v7, %v9137_v57  ;;  %vm3743_vm12 = vcmp.eq.s32.totalorder %v10746_v51, %v9129_v11 }
 0x2f4   :  { %6227 = vmatprep.subr.bf16.mxu0 %v4583_v48  ;;  %v4599_v56 = vadd.bf16 %v4535_v0, %v4081_v42  ;;  %v4057_v32 = vpack.c.bf16 %v5724_v20, %v5723_v45  ;;  %v5851_v31 = vsel %vm4165_vm10, 1.0, %v6308_v41  ;;  %v5852_v15 = vsel %vm4166_vm11, 1.0, %v6308_v41  ;;  %v10754_v48 = vld [vmem:[#allocation99_spill] sm:$0xff] }
 0x2f5   :  { %v4511_v2 = vpack.c.bf16 %v5852_v15, %v5851_v31  ;;  %vm3744_vm13 = vcmp.eq.s32.totalorder %v10747_v24, %v9129_v11  ;;  %v5755_v21 = vsel %vm3743_vm12, 1.0, %v6308_v41  ;;  %vm4197_vm14 = vcmp.eq.s32.totalorder %v10746_v51, %v9137_v57 }
 0x2f6   :  { %6249 = vmatprep.subr.bf16.mxu1 %v4599_v56  ;;  %v5756_v17 = vsel %vm3744_vm13, 1.0, %v6308_v41  ;;  %vm4198_vm15 = vcmp.eq.s32.totalorder %v10747_v24, %v9137_v57  ;;  %v5883_v9 = vsel %vm4197_vm14, 1.0, %v6308_v41  ;;  %vm3729_vm0 = vcmp.eq.s32.totalorder %v10748_v43, %v9129_v11 }
 0x2f7   :  { %v4575_v44 = vadd.bf16 %v4511_v2, %v4057_v32  ;;  %v4073_v35 = vpack.c.bf16 %v5756_v17, %v5755_v21  ;;  %v5884_v6 = vsel %vm4198_vm15, 1.0, %v6308_v41  ;;  %vm3730_vm1 = vcmp.eq.s32.totalorder %v10749_v23, %v9129_v11 }
 0x2f8   :  { %v4527_v36 = vpack.c.bf16 %v5884_v6, %v5883_v9  ;;  %v5741_v53 = vsel %vm3729_vm0, 1.0, %v6308_v41  ;;  %v5742_v46 = vsel %vm3730_vm1, 1.0, %v6308_v41  ;;  %vm4183_vm2 = vcmp.eq.s32.totalorder %v10748_v43, %v9137_v57 }
 0x2f9   :  { %6228 = vmatpush3.bf16.msra.mxu0 %v4575_v44  ;;  %v4066_v26 = vpack.c.bf16 %v5742_v46, %v5741_v53  ;;  %vm4184_vm3 = vcmp.eq.s32.totalorder %v10749_v23, %v9137_v57  ;;  %v5869_v47 = vsel %vm4183_vm2, 1.0, %v6308_v41  ;;  %vm3761_vm4 = vcmp.eq.s32.totalorder %v10750_v60, %v9129_v11 }
 0x2fa   :  { %v4591_v37 = vadd.bf16 %v4527_v36, %v4073_v35  ;;  %v5870_v13 = vsel %vm4184_vm3, 1.0, %v6308_v41  ;;  %vm3762_vm5 = vcmp.eq.s32.totalorder %v10751_v27, %v9129_v11  ;;  %v5773_v28 = vsel %vm3761_vm4, 1.0, %v6308_v41 }
 0x2fb   :  { %v4520_v18 = vpack.c.bf16 %v5870_v13, %v5869_v47  ;;  %v5774_v29 = vsel %vm3762_vm5, 1.0, %v6308_v41  ;;  %vm4215_vm6 = vcmp.eq.s32.totalorder %v10750_v60, %v9137_v57  ;;  %vm4216_vm7 = vcmp.eq.s32.totalorder %v10751_v27, %v9137_v57 }
 0x2fc   :  { %6250 = vmatpush3.bf16.msra.mxu1 %v4591_v37  ;;  %v4082_v8 = vpack.c.bf16 %v5774_v29, %v5773_v28  ;;  %v5901_v49 = vsel %vm4215_vm6, 1.0, %v6308_v41  ;;  %v5902_v40 = vsel %vm4216_vm7, 1.0, %v6308_v41  ;;  %vm3713_vm8 = vcmp.eq.s32.totalorder %v10752_v4, %v9129_v11 }
 0x2fd   :  { %v4584_v52 = vadd.bf16 %v4520_v18, %v4066_v26  ;;  %v4536_v42 = vpack.c.bf16 %v5902_v40, %v5901_v49  ;;  %vm3714_vm9 = vcmp.eq.s32.totalorder %v10753_v59, %v9129_v11  ;;  %v5725_v1 = vsel %vm3713_vm8, 1.0, %v6308_v41 }
 0x2fe   :  { %v5726_v62 = vsel %vm3714_vm9, 1.0, %v6308_v41  ;;  %vm4167_vm10 = vcmp.eq.s32.totalorder %v10752_v4, %v9137_v57  ;;  %vm4168_vm11 = vcmp.eq.s32.totalorder %v10753_v59, %v9137_v57  ;;  %vm3745_vm12 = vcmp.eq.s32.totalorder %v10754_v48, %v9129_v11 }
 0x2ff   :  { %6229 = vmatprep.subr.bf16.mxu0 %v4584_v52  ;;  %v4600_v0 = vadd.bf16 %v4536_v42, %v4082_v8  ;;  %v4058_v7 = vpack.c.bf16 %v5726_v62, %v5725_v1  ;;  %v5853_v45 = vsel %vm4167_vm10, 1.0, %v6308_v41  ;;  %v5854_v20 = vsel %vm4168_vm11, 1.0, %v6308_v41 }
 0x300   :  { %v4512_v51 = vpack.c.bf16 %v5854_v20, %v5853_v45  ;;  %vm3746_vm13 = vcmp.eq.s32.totalorder %v10568_v19, %v9129_v11  ;;  %v5757_v56 = vsel %vm3745_vm12, 1.0, %v6308_v41  ;;  %vm4199_vm14 = vcmp.eq.s32.totalorder %v10754_v48, %v9137_v57 }
 0x301   :  { %6251 = vmatprep.subr.bf16.mxu1 %v4600_v0  ;;  %v5758_v32 = vsel %vm3746_vm13, 1.0, %v6308_v41  ;;  %vm4200_vm15 = vcmp.eq.s32.totalorder %v10568_v19, %v9137_v57  ;;  %v5885_v31 = vsel %vm4199_vm14, 1.0, %v6308_v41  ;;  %v5969_v15 = vadd.f32 %v9404_v22, %v9397_v34 }
 0x302   :  { %v4576_v2 = vadd.bf16 %v4512_v51, %v4058_v7  ;;  %v4074_v24 = vpack.c.bf16 %v5758_v32, %v5757_v56  ;;  %v5886_v11 = vsel %vm4200_vm15, 1.0, %v6308_v41  ;;  %v5991_v21 = vadd.f32 %v9406_v14, %v9399_v5  ;;  %v6283_v32 = vld [vmem:[%s10009_s0] sm:$0xff]  }
 0x303   :  { %v4528_v17 = vpack.c.bf16 %v5886_v11, %v5885_v31  ;;  %v1297_v9 = vadd.f32 %v5969_v15, %v9818_v33  ;;  %v6013_v43 = vadd.f32 %v9430_v38, %v9421_v10  ;;  %v6035_v19 = vadd.f32 %v9432_v12, %v9423_v3 }
 0x304   :  { %6230 = vmatpush3.bf16.msra.mxu0 %v4576_v2  ;;  %v6057_v57 = vadd.f32 %v9454_v55, %v9448_v50  ;;  %v6079_v34 = vadd.f32 %v9456_v61, %v9450_v54  ;;  %v6101_v5 = vadd.f32 %v9704_v16, %v9700_v58  ;;  %v6123_v14 = vadd.f32 %v9722_v30, %v9717_v39 }
 0x305   :  { %v4592_v22 = vadd.bf16 %v4528_v17, %v4074_v24  ;;  %v1337_v44 = vadd.f32 %v5991_v21, %v1297_v9  ;;  %6262 = vmatprep.subr.bf16.mxu0 %v6308_v41  ;;  %vm1343_vm0 = vcmask 125952   ;;  %v2396_v10 = vadd.f32 %v6035_v19, %v6013_v43  ;;  %v5905_v43 = vld [vmem:[%s10012_s3] ss:$0 sm:$0xff] }
 0x306   :  { %v3538_v38 = vadd.f32 %v6123_v14, %v6101_v5  ;;  %vm2485_vm1 = vcmask 130052   ;;  %vm6309_vm2 = vmmov 0   ;;  %vm26_vm3 = vcmask 130048  }
 0x307   :  { %6252 = vmatpush3.bf16.msra.mxu1 %v4592_v22  ;;  %4714 = vmatmul.mubr.bf16.vlgmr.msra.gmra.mrb[28].mxu0 %v7545_v63  ;;  %v1342_v3 = vpack.c.bf16 %v1337_v44, %v1337_v44  ;;  %v2436_v12 = vadd.f32 %v6057_v57, %v2396_v10  ;;  %27 = vst.msk [vmem:[#allocation2] sm:$0xff] %vm26_vm3, %v6308_v41  ;;  %28 = vst.msk [vmem:[#allocation2 + $0x8] sm:$0xff] %vm26_vm3, %v6308_v41  ;;  %vm4777_vm4 = vcmask 261120   ;;  %v5906_v57 = vld [vmem:[%s10013_s4] ss:$0 sm:$0xff] }
 0x308   :  { %6266 = vmatprep.mubr.msk.bf16.mxu0 %vm6309_vm2, %v6308_v41 }
 0x309   :  { %1344 = vst.msk [vmem:[#allocation3] sm:$0xf] %vm1343_vm0, %v1342_v3  ;;  %v2476_v50 = vadd.f32 %v6079_v34, %v2436_v12 }
 0x30a   :  { %4754 = vmatmul.mubr.bf16.vlgmr.msra.gmra.mrb[28].mxu1 %v7548_v25 }
 0x30b   :  { %v2481_v54 = vpack.c.bf16 %v2476_v50, %v2476_v50 }
 0x30d   :  { %v2483_v55 = vrot.slane %v2481_v54, 4 }
 0x30e   :  { %v4766_v31 = vld [vmem:[#allocation2] sm:$0xff]  ;;  %v4767_v2 = vld [vmem:[#allocation2 + $0x8] sm:$0xff] }
 0x30f   :  { %2486 = vst.msk [vmem:[#allocation3] sm:$0xf0] %vm2485_vm1, %v2483_v55 }
 0x316   :  { %v4770_v61 = vld [vmem:[#allocation3] sm:$0xff] }
 0x317   :  { %6263 = vmatpush3.bf16.msra.mxu0 %v4770_v61 }
 0x318   :  { %6264 = vmatprep.subr.bf16.mxu0 %v6308_v41 }
 0x321   :  { %v6143_v58 = vpop.f32.mrb[20].mxu0 }
 0x322   :  { %v6144_v16 = vpop.f32.mrb[21].mxu0 }
 0x323   :  { %v6145_v63 = vadd.f32 %v6144_v16, %v6143_v58  ;;  %v6146_v39 = vpop.f32.mrb[22].mxu0 }
 0x324   :  { %v6165_v30 = vpop.f32.mrb[20].mxu1  ;;  %v6147_v33 = vpop.f32.mrb[23].mxu0 }
 0x325   :  { %v3578_v35 = vadd.f32 %v6145_v63, %v3538_v38  ;;  %v6166_v6 = vpop.f32.mrb[21].mxu1 }
 0x326   :  { %v6167_v23 = vadd.f32 %v6166_v6, %v6165_v30  ;;  %v6168_v25 = vpop.f32.mrb[22].mxu1 }
 0x327   :  { %v6169_v36 = vpop.f32.mrb[23].mxu1 }
 0x328   :  { %v3618_v53 = vadd.f32 %v6167_v23, %v3578_v35 }
 0x32a   :  { %v3623_v46 = vpack.c.bf16 %v3618_v53, %v3618_v53 }
 0x32c   :  { %3624 = vst.msk [vmem:[#allocation3 + $0x8] sm:$0xf] %vm1343_vm0, %v3623_v46 }
 0x381   :  { %v6187_v26 = vpop.f32.mrb[24].mxu0 }
 0x382   :  { %v6188_v47 = vpop.f32.mrb[25].mxu0 }
 0x383   :  { %v6189_v60 = vadd.f32 %v6188_v47, %v6187_v26  ;;  %v6190_v37 = vpop.f32.mrb[26].mxu0 }
 0x384   :  { %v6209_v13 = vpop.f32.mrb[24].mxu1  ;;  %v6191_v27 = vpop.f32.mrb[27].mxu0 }
 0x385   :  { %v6210_v28 = vpop.f32.mrb[25].mxu1 }
 0x386   :  { %v6211_v18 = vadd.f32 %v6210_v28, %v6209_v13  ;;  %v6212_v29 = vpop.f32.mrb[26].mxu1 }
 0x387   :  { %v6213_v8 = vpop.f32.mrb[27].mxu1 }
 0x388   :  { %v4676_v49 = vadd.f32 %v6211_v18, %v6189_v60 }
 0x3da   :  { %v6231_v40 = vpop.f32.mrb[28].mxu0 }
 0x3db   :  { %v6232_v4 = vpop.f32.mrb[29].mxu0 }
 0x3dc   :  { %v6233_v52 = vadd.f32 %v6232_v4, %v6231_v40  ;;  %v6234_v42 = vpop.f32.mrb[30].mxu0 }
 0x3dd   :  { %v6253_v59 = vpop.f32.mrb[28].mxu1  ;;  %v6235_v1 = vpop.f32.mrb[31].mxu0 }
 0x3de   :  { %v4716_v62 = vadd.f32 %v6233_v52, %v4676_v49  ;;  %v6254_v48 = vpop.f32.mrb[29].mxu1 }
 0x3df   :  { %v6255_v41 = vadd.f32 %v6254_v48, %v6253_v59  ;;  %v6256_v0 = vpop.f32.mrb[30].mxu1 }
 0x3e0   :  { %v6257_v7 = vpop.f32.mrb[31].mxu1 }
 0x3e1   :  { %v4756_v45 = vadd.f32 %v6255_v41, %v4716_v62 }
 0x3e3   :  { %v4761_v20 = vpack.c.bf16 %v4756_v45, %v4756_v45 }
 0x3e5   :  { %v4763_v51 = vrot.slane %v4761_v20, 4 }
 0x3e7   :  { %4765 = vst.msk [vmem:[#allocation3 + $0x8] sm:$0xf0] %vm2485_vm1, %v4763_v51 }
 0x3ee   :  { %v4771_v56 = vld [vmem:[#allocation3 + $0x8] sm:$0xff] }
 0x3ef   :  { %6265 = vmatpush3.bf16.msra.mxu0 %v4771_v56 }
 0x3f2   :  { %6267 = vmatmul.mubr.msk.bf16.vlgmr.msra.gmra.mrb[32].mxu0 %vm4777_vm4, %v6283_v32 }
 0x4c5   :  { %v4815_v15 = vpop.f32.mrb[32].mxu0 }
 0x4c6   :  { %v4822_v24 = vadd.f32 %v4815_v15, %v4766_v31  ;;  %v6268_v11 = vpop.f32.mrb[33].mxu0 }
 0x4c7   :  { %v4818_v21 = vpop.f32.mrb[34].mxu0 }
 0x4c8   :  { %4825 = vst.msk [vmem:[#allocation2] sm:$0xff] %vm26_vm3, %v4822_v24  ;;  %v4823_v17 = vadd.f32 %v4818_v21, %v4767_v2  ;;  %v6269_v9 = vpop.f32.mrb[35].mxu0 }
 0x4ca   :  { %4826 = vst.msk [vmem:[#allocation2 + $0x8] sm:$0xff] %vm26_vm3, %v4823_v17 }
 0x4cf   :  { %v4830_v19 = vld [vmem:[#allocation2] sm:$0xff] }
 0x4d0   :  { %v4839_v34 = vmul.f32 %v5905_v43, %v4830_v19 }
 0x4d1   :  { %v4831_v22 = vld [vmem:[#allocation2 + $0x8] sm:$0xff] }
 0x4d2   :  { %v4840_v44 = vmul.f32 %v5905_v43, %v4831_v22  ;;  %v4848_v5 = vadd.f32 %v5906_v57, %v4839_v34 }
 0x4d4   :  { %v4849_v14 = vadd.f32 %v5906_v57, %v4840_v44  ;;  %4850 = vst.msk [vmem:[#allocation4] sm:$0xff] %vm26_vm3, %v4848_v5 }
 0x4d6   :  { %4851 = vst.msk [vmem:[#allocation4 + $0x8] sm:$0xff] %vm26_vm3, %v4849_v14 }
 0x4d7   :  { %6295 = shalt.err (!%p6292_p4)
}
 0x4d8   :  { %s6296_s15 = scalar_lea.hbm %s10014_s5, 256 }
 0x4d9   :  { %p6297_p5 = scmp.ne.s32.totalorder %s10014_s5, %s6296_s15  ;;  %p6300_p6 = scmp.lt.u32.totalorder %s6296_s15, %s10014_s5 }
 0x4db   :  { %p6302_p7 = pnand %p6300_p6, %p6297_p5 }
 0x4dd   :  { %6305 = shalt.err (!%p6302_p7)
}
 0x4de   :  { %s6311_s20 = smov 128   ;;  %s6312_s21 = smov 8  }
 0x4df   :  { %4863 = dma.vmem_to_hbm [thread:$0]  %s4858_s13, 256, %s10014_s5, [#allocation5], %s6311_s20, %s6311_s20, %s6312_s21  }
 0x4e0   :  { %6306 = dma.done.wait [#allocation5], 256  }
 0x4e1   :  { %6307 = vsyncadd [#allocation5], 4294967040 }
 0x4e2   :  { %4867 = vsyncpa [#allocation5], 1 }

</bundles_post_ra>
